<compile_context>
chip_gen: v6e
topology: v6e:2x2x1
jax: 0.10.0
libtpu: 0.0.40
codegen_flags: <defaults>
</compile_context>

<pallas_src>
import functools

import jax
import jax.numpy as jnp
from jax import lax
from jax.experimental import pallas as pl
from jax.experimental.pallas import tpu as pltpu


# ---------------------------------------------------------------------------
# Fused forward kernel
# ---------------------------------------------------------------------------
def _fused_forward_kernel(x_ref, clin_ref,
                          w1_ref, b1_ref, w2_ref, b2_ref,
                          a1_ref, c1_ref, a2_ref, c2_ref, idft_ref,
                          gamma_ref, beta_ref, wcls_ref, bcls_ref,
                          o_ref,
                          h1p_ref,
                          *, B, H, W, C_IN, C1, C2):
    f32 = jnp.float32
    bf16 = jnp.bfloat16
    HW = H * W
    BHW = B * HW

    # ---- conv1: in-kernel im2col (9 shifted window loads -> lane concat)
    cols1 = [x_ref[:, i:i + H, j:j + W, :].reshape(BHW, C_IN)
             for i in range(3) for j in range(3)]
    patches1 = jnp.concatenate(cols1, axis=-1)                       # (BHW, 9*C_IN)
    h1 = jnp.dot(patches1.astype(bf16), w1_ref[...],
                 preferred_element_type=f32) + b1_ref[...]
    h1 = jnp.maximum(h1, 0.0)                                        # (BHW, C1)

    # ---- conv2: zero-padded VMEM scratch, im2col, matmul, ReLU
    h1p_ref[...] = jnp.zeros_like(h1p_ref)
    h1p_ref[:, 1:H + 1, 1:W + 1, :] = h1.reshape(B, H, W, C1)
    cols2 = [h1p_ref[:, i:i + H, j:j + W, :].reshape(BHW, C1)
             for i in range(3) for j in range(3)]
    patches2 = jnp.concatenate(cols2, axis=-1)                       # (BHW, 9*C1)
    h2 = jnp.dot(patches2.astype(bf16), w2_ref[...],
                 preferred_element_type=f32) + b2_ref[...]
    h2 = jnp.maximum(h2, 0.0)                                        # (BHW, C2)

    # ---- global average pool over spatial positions -> (B, C2)
    feats = [jnp.mean(h2[b * HW:(b + 1) * HW, :], axis=0, keepdims=True)
             for b in range(B)]
    feat = jnp.concatenate(feats, axis=0)                            # (B, C2)

    # ---- folded head (linear + clinical + count-sketch + forward DFT):
    #   u = [ar | ai] = (feat @ w_lin + b_lin) @ P1 @ [C | -S] = feat @ A1 + c1
    #   v = [br | bi] = (clin @ w_cli + b_cli) @ P2 @ [C | -S] = clin @ A2 + c2
    u = jnp.dot(feat.astype(bf16), a1_ref[...],
                preferred_element_type=f32) + c1_ref[...]            # (B, 2D)
    v = jnp.dot(clin_ref[...].astype(bf16), a2_ref[...],
                preferred_element_type=f32) + c2_ref[...]            # (B, 2D)
    D = u.shape[1] // 2
    ar, ai = u[:, :D], u[:, D:]
    br, bi = v[:, :D], v[:, D:]
    pr = ar * br - ai * bi
    pi = ar * bi + ai * br
    # circular convolution: inverse real DFT folded into a single (2D, D) matmul
    pcat = jnp.concatenate([pr, pi], axis=1).astype(bf16)            # (B, 2D)
    mcb = jnp.dot(pcat, idft_ref[...], preferred_element_type=f32)   # (B, D)

    # ---- BatchNorm1d(128): training-mode batch stats, biased variance
    mean = jnp.mean(mcb, axis=0, keepdims=True)
    var = jnp.mean((mcb - mean) ** 2, axis=0, keepdims=True)
    bn = (mcb - mean) * lax.rsqrt(var + 1e-5) * gamma_ref[...] + beta_ref[...]

    # ---- ReLU + classifier (128 -> 2)
    act = jnp.maximum(bn, 0.0).astype(bf16)
    o_ref[...] = jnp.dot(act, wcls_ref[...],
                         preferred_element_type=f32) + bcls_ref[...]


# ---------------------------------------------------------------------------
# Parameter initialization (deterministic, synthetic) with head folding
# ---------------------------------------------------------------------------
def init_params(key):
    D = 128        # CBP output dim / linear output dim
    CLIN = 100     # clinical feature dim
    F = 32         # backbone feature dim (conv2 channels after GAP)
    ks = jax.random.split(key, 12)
    bf16 = jnp.bfloat16

    def nrm(k, shape, scale=0.1):
        return scale * jax.random.normal(k, shape, jnp.float32)

    p = {}
    # backbone conv weights stored as (KH*KW*Cin, Cout) for the im2col matmul
    p["conv1_w"] = nrm(ks[0], (3 * 3 * 4, 8)).astype(bf16)
    p["conv1_b"] = nrm(ks[1], (1, 8))
    p["conv2_w"] = nrm(ks[2], (3 * 3 * 8, F)).astype(bf16)
    p["conv2_b"] = nrm(ks[3], (1, F))
    # self.linear / self.clinical / self.classifier
    w_lin = nrm(ks[4], (F, D))
    b_lin = nrm(ks[5], (1, D))
    w_cli = nrm(ks[6], (CLIN, CLIN))
    b_cli = nrm(ks[7], (1, CLIN))
    p["w_cls"] = nrm(ks[8], (D, 2)).astype(bf16)
    p["b_cls"] = nrm(ks[9], (1, 2))
    # BatchNorm1d(128)
    p["bn_gamma"] = jnp.ones((1, D), jnp.float32)
    p["bn_beta"] = jnp.zeros((1, D), jnp.float32)

    # CompactBilinearPooling(128, 100, 128): count-sketch hashes/signs as
    # dense projection matrices P1 (128->128) and P2 (100->128).
    h1 = jax.random.randint(ks[10], (D,), 0, D)
    h2 = jax.random.randint(ks[11], (CLIN,), 0, D)
    s1 = (2 * jax.random.randint(jax.random.fold_in(key, 101), (D,), 0, 2) - 1
          ).astype(jnp.float32)
    s2 = (2 * jax.random.randint(jax.random.fold_in(key, 102), (CLIN,), 0, 2) - 1
          ).astype(jnp.float32)
    P1 = jnp.zeros((D, D), jnp.float32).at[jnp.arange(D), h1].set(s1)
    P2 = jnp.zeros((CLIN, D), jnp.float32).at[jnp.arange(CLIN), h2].set(s2)

    # Real DFT matrices for the circular convolution, folded with the linear
    # layers and the count-sketch projections into 3 matrices total.
    n = jnp.arange(D, dtype=jnp.float32)
    ang = 2.0 * jnp.pi * jnp.outer(n, n) / D
    C = jnp.cos(ang)
    S = jnp.sin(ang)
    CS = jnp.concatenate([C, -S], axis=1)                 # (D, 2D): x@CS = [re|im]
    p["A1"] = (w_lin @ P1 @ CS).astype(bf16)              # (F, 2D)
    p["c1"] = b_lin @ P1 @ CS                             # (1, 2D) f32
    p["A2"] = (w_cli @ P2 @ CS).astype(bf16)              # (CLIN, 2D)
    p["c2"] = b_cli @ P2 @ CS                             # (1, 2D) f32
    p["idft"] = (jnp.concatenate([C, -S], axis=0) / D).astype(bf16)  # (2D, D)
    return p


# ---------------------------------------------------------------------------
# Full forward pass: one fused pallas_call
# ---------------------------------------------------------------------------
def cnn_with_clinical_forward(x_nchw, clinical, params):
    # layout: PyTorch NCHW -> NHWC, plus the conv "same" zero padding (glue only;
    # every matmul / reduction / elementwise hot path is inside the kernel).
    x = jnp.transpose(x_nchw, (0, 2, 3, 1)).astype(jnp.float32)
    B, H, W, C_IN = x.shape
    xp = jnp.pad(x, ((0, 0), (1, 1), (1, 1), (0, 0)))      # (B, H+2, W+2, C_IN)
    C1 = params["conv1_w"].shape[1]
    C2 = params["conv2_w"].shape[1]

    args = (xp, clinical.astype(jnp.float32),
            params["conv1_w"], params["conv1_b"],
            params["conv2_w"], params["conv2_b"],
            params["A1"], params["c1"], params["A2"], params["c2"],
            params["idft"], params["bn_gamma"], params["bn_beta"],
            params["w_cls"], params["b_cls"])
    in_specs = [pl.BlockSpec(a.shape, lambda i, n=a.ndim: (0,) * n) for a in args]

    kernel = functools.partial(_fused_forward_kernel,
                               B=B, H=H, W=W, C_IN=C_IN, C1=C1, C2=C2)
    # TODO(synk): for realistic image sizes, tile the conv path over rows of
    # B*H*W (parallel grid axis, lane-dense output) instead of grid=(1,).
    return pl.pallas_call(
        kernel,
        out_shape=jax.ShapeDtypeStruct((B, 2), jnp.float32),
        grid=(1,),
        in_specs=in_specs,
        out_specs=pl.BlockSpec((B, 2), lambda i: (0, 0)),
        scratch_shapes=[pltpu.VMEM((B, H + 2, W + 2, C1), jnp.float32)],
        compiler_params=pltpu.CompilerParams(
            dimension_semantics=("arbitrary",)),
    )(*args)


if __name__ == "__main__":
    key = jax.random.PRNGKey(0)
    k_p, k_x, k_c = jax.random.split(key, 3)

    params = init_params(k_p)
    x = jax.random.normal(k_x, (2, 4, 16, 16), jnp.float32)     # NCHW, like PyTorch
    clinical = jax.random.normal(k_c, (2, 100), jnp.float32)

    fwd = jax.jit(cnn_with_clinical_forward)
    out = fwd(x, clinical, params)
    jax.block_until_ready(out)
    assert out.shape == (2, 2)
    print("KERNEL_OK")
</pallas_src>

<mosaic_0001>
module attributes {stable_mosaic.version = 11 : i64} {
  func.func @_fused_forward_kernel(%arg0: i32, %arg1: memref<2x18x18x4xf32, #tpu.memory_space<vmem>>, %arg2: memref<2x100xf32, #tpu.memory_space<vmem>>, %arg3: memref<36x8xbf16, #tpu.memory_space<vmem>>, %arg4: memref<1x8xf32, #tpu.memory_space<vmem>>, %arg5: memref<72x32xbf16, #tpu.memory_space<vmem>>, %arg6: memref<1x32xf32, #tpu.memory_space<vmem>>, %arg7: memref<32x256xbf16, #tpu.memory_space<vmem>>, %arg8: memref<1x256xf32, #tpu.memory_space<vmem>>, %arg9: memref<100x256xbf16, #tpu.memory_space<vmem>>, %arg10: memref<1x256xf32, #tpu.memory_space<vmem>>, %arg11: memref<256x128xbf16, #tpu.memory_space<vmem>>, %arg12: memref<1x128xf32, #tpu.memory_space<vmem>>, %arg13: memref<1x128xf32, #tpu.memory_space<vmem>>, %arg14: memref<128x2xbf16, #tpu.memory_space<vmem>>, %arg15: memref<1x2xf32, #tpu.memory_space<vmem>>, %arg16: memref<2x2xf32, #tpu.memory_space<vmem>>, %arg17: memref<2x18x18x8xf32, #tpu.memory_space<vmem>>) attributes {dimension_semantics = [#tpu.dimension_semantics<arbitrary>], iteration_bounds = array<i64: 1>, scalar_prefetch = 0 : i64, scratch_operands = 1 : i64, tpu.core_type = #tpu.core_type<tc>, window_params = [{pipeline_mode = #tpu.pipeline_mode<synchronous>, transform_indices = @transform_0, window_bounds = array<i64: 2, 18, 18, 4>}, {pipeline_mode = #tpu.pipeline_mode<synchronous>, transform_indices = @transform_1, window_bounds = array<i64: 2, 100>}, {pipeline_mode = #tpu.pipeline_mode<synchronous>, transform_indices = @transform_2, window_bounds = array<i64: 36, 8>}, {pipeline_mode = #tpu.pipeline_mode<synchronous>, transform_indices = @transform_3, window_bounds = array<i64: 1, 8>}, {pipeline_mode = #tpu.pipeline_mode<synchronous>, transform_indices = @transform_4, window_bounds = array<i64: 72, 32>}, {pipeline_mode = #tpu.pipeline_mode<synchronous>, transform_indices = @transform_5, window_bounds = array<i64: 1, 32>}, {pipeline_mode = #tpu.pipeline_mode<synchronous>, transform_indices = @transform_6, window_bounds = array<i64: 32, 256>}, {pipeline_mode = #tpu.pipeline_mode<synchronous>, transform_indices = @transform_7, window_bounds = array<i64: 1, 256>}, {pipeline_mode = #tpu.pipeline_mode<synchronous>, transform_indices = @transform_8, window_bounds = array<i64: 100, 256>}, {pipeline_mode = #tpu.pipeline_mode<synchronous>, transform_indices = @transform_9, window_bounds = array<i64: 1, 256>}, {pipeline_mode = #tpu.pipeline_mode<synchronous>, transform_indices = @transform_10, window_bounds = array<i64: 256, 128>}, {pipeline_mode = #tpu.pipeline_mode<synchronous>, transform_indices = @transform_11, window_bounds = array<i64: 1, 128>}, {pipeline_mode = #tpu.pipeline_mode<synchronous>, transform_indices = @transform_12, window_bounds = array<i64: 1, 128>}, {pipeline_mode = #tpu.pipeline_mode<synchronous>, transform_indices = @transform_13, window_bounds = array<i64: 128, 2>}, {pipeline_mode = #tpu.pipeline_mode<synchronous>, transform_indices = @transform_14, window_bounds = array<i64: 1, 2>}, {pipeline_mode = #tpu.pipeline_mode<synchronous>, transform_indices = @transform_15, window_bounds = array<i64: 2, 2>}]} {
    %c0 = arith.constant 0 : index
    %c0_0 = arith.constant 0 : index
    %c0_1 = arith.constant 0 : index
    %c0_2 = arith.constant 0 : index
    %0 = vector.load %arg1[%c0, %c0_0, %c0_1, %c0_2] : memref<2x18x18x4xf32, #tpu.memory_space<vmem>>, vector<2x16x16x4xf32>
    %1 = vector.shape_cast %0 : vector<2x16x16x4xf32> to vector<512x4xf32>
    %c0_3 = arith.constant 0 : index
    %c0_4 = arith.constant 0 : index
    %c1 = arith.constant 1 : index
    %c0_5 = arith.constant 0 : index
    %2 = vector.load %arg1[%c0_3, %c0_4, %c1, %c0_5] : memref<2x18x18x4xf32, #tpu.memory_space<vmem>>, vector<2x16x16x4xf32>
    %3 = vector.shape_cast %2 : vector<2x16x16x4xf32> to vector<512x4xf32>
    %c0_6 = arith.constant 0 : index
    %c0_7 = arith.constant 0 : index
    %c2 = arith.constant 2 : index
    %c0_8 = arith.constant 0 : index
    %4 = vector.load %arg1[%c0_6, %c0_7, %c2, %c0_8] : memref<2x18x18x4xf32, #tpu.memory_space<vmem>>, vector<2x16x16x4xf32>
    %5 = vector.shape_cast %4 : vector<2x16x16x4xf32> to vector<512x4xf32>
    %c0_9 = arith.constant 0 : index
    %c1_10 = arith.constant 1 : index
    %c0_11 = arith.constant 0 : index
    %c0_12 = arith.constant 0 : index
    %6 = vector.load %arg1[%c0_9, %c1_10, %c0_11, %c0_12] : memref<2x18x18x4xf32, #tpu.memory_space<vmem>>, vector<2x16x16x4xf32>
    %7 = vector.shape_cast %6 : vector<2x16x16x4xf32> to vector<512x4xf32>
    %c0_13 = arith.constant 0 : index
    %c1_14 = arith.constant 1 : index
    %c1_15 = arith.constant 1 : index
    %c0_16 = arith.constant 0 : index
    %8 = vector.load %arg1[%c0_13, %c1_14, %c1_15, %c0_16] : memref<2x18x18x4xf32, #tpu.memory_space<vmem>>, vector<2x16x16x4xf32>
    %9 = vector.shape_cast %8 : vector<2x16x16x4xf32> to vector<512x4xf32>
    %c0_17 = arith.constant 0 : index
    %c1_18 = arith.constant 1 : index
    %c2_19 = arith.constant 2 : index
    %c0_20 = arith.constant 0 : index
    %10 = vector.load %arg1[%c0_17, %c1_18, %c2_19, %c0_20] : memref<2x18x18x4xf32, #tpu.memory_space<vmem>>, vector<2x16x16x4xf32>
    %11 = vector.shape_cast %10 : vector<2x16x16x4xf32> to vector<512x4xf32>
    %c0_21 = arith.constant 0 : index
    %c2_22 = arith.constant 2 : index
    %c0_23 = arith.constant 0 : index
    %c0_24 = arith.constant 0 : index
    %12 = vector.load %arg1[%c0_21, %c2_22, %c0_23, %c0_24] : memref<2x18x18x4xf32, #tpu.memory_space<vmem>>, vector<2x16x16x4xf32>
    %13 = vector.shape_cast %12 : vector<2x16x16x4xf32> to vector<512x4xf32>
    %c0_25 = arith.constant 0 : index
    %c2_26 = arith.constant 2 : index
    %c1_27 = arith.constant 1 : index
    %c0_28 = arith.constant 0 : index
    %14 = vector.load %arg1[%c0_25, %c2_26, %c1_27, %c0_28] : memref<2x18x18x4xf32, #tpu.memory_space<vmem>>, vector<2x16x16x4xf32>
    %15 = vector.shape_cast %14 : vector<2x16x16x4xf32> to vector<512x4xf32>
    %c0_29 = arith.constant 0 : index
    %c2_30 = arith.constant 2 : index
    %c2_31 = arith.constant 2 : index
    %c0_32 = arith.constant 0 : index
    %16 = vector.load %arg1[%c0_29, %c2_30, %c2_31, %c0_32] : memref<2x18x18x4xf32, #tpu.memory_space<vmem>>, vector<2x16x16x4xf32>
    %17 = vector.shape_cast %16 : vector<2x16x16x4xf32> to vector<512x4xf32>
    %18 = tpu.concatenate %1, %3, %5, %7, %9, %11, %13, %15, %17 in 1 : vector<512x4xf32>, vector<512x4xf32>, vector<512x4xf32>, vector<512x4xf32>, vector<512x4xf32>, vector<512x4xf32>, vector<512x4xf32>, vector<512x4xf32>, vector<512x4xf32> -> vector<512x36xf32>
    %19 = arith.truncf %18 : vector<512x36xf32> to vector<512x36xbf16>
    %c0_33 = arith.constant 0 : index
    %c0_34 = arith.constant 0 : index
    %20 = vector.load %arg3[%c0_33, %c0_34] : memref<36x8xbf16, #tpu.memory_space<vmem>>, vector<36x8xbf16>
    %cst = arith.constant dense<0.000000e+00> : vector<512x8xf32>
    %21 = tpu.matmul %19, %20, %cst {dimension_numbers = #tpu.dot_dimension_numbers<[1], [0], [0], [1], [0, 0, 1, 1], [], []>} : vector<512x36xbf16>, vector<36x8xbf16>, vector<512x8xf32> -> vector<512x8xf32>
    %c0_35 = arith.constant 0 : index
    %c0_36 = arith.constant 0 : index
    %22 = vector.load %arg4[%c0_35, %c0_36] : memref<1x8xf32, #tpu.memory_space<vmem>>, vector<1x8xf32>
    %23 = vector.broadcast %22 : vector<1x8xf32> to vector<512x8xf32>
    %24 = arith.addf %21, %23 : vector<512x8xf32>
    %cst_37 = arith.constant 0.000000e+00 : f32
    %25 = vector.broadcast %cst_37 : f32 to vector<512x8xf32>
    %26 = arith.maximumf %24, %25 : vector<512x8xf32>
    %cst_38 = arith.constant 0.000000e+00 : f32
    %27 = vector.broadcast %cst_38 : f32 to vector<2x18x18x8xf32>
    %c0_39 = arith.constant 0 : index
    %c0_40 = arith.constant 0 : index
    %c0_41 = arith.constant 0 : index
    %c0_42 = arith.constant 0 : index
    %28 = vector.load %arg17[%c0_39, %c0_40, %c0_41, %c0_42] : memref<2x18x18x8xf32, #tpu.memory_space<vmem>>, vector<2x18x18x8xf32>
    tpu.vector_store %arg17[%c0_39, %c0_40, %c0_41, %c0_42], %27 {strides = array<i32>} : memref<2x18x18x8xf32, #tpu.memory_space<vmem>>, vector<2x18x18x8xf32>,
    %29 = vector.shape_cast %26 : vector<512x8xf32> to vector<2x16x16x8xf32>
    %c0_43 = arith.constant 0 : index
    %c1_44 = arith.constant 1 : index
    %c1_45 = arith.constant 1 : index
    %c0_46 = arith.constant 0 : index
    %30 = vector.load %arg17[%c0_43, %c1_44, %c1_45, %c0_46] : memref<2x18x18x8xf32, #tpu.memory_space<vmem>>, vector<2x16x16x8xf32>
    tpu.vector_store %arg17[%c0_43, %c1_44, %c1_45, %c0_46], %29 {strides = array<i32>} : memref<2x18x18x8xf32, #tpu.memory_space<vmem>>, vector<2x16x16x8xf32>,
    %c0_47 = arith.constant 0 : index
    %c0_48 = arith.constant 0 : index
    %c0_49 = arith.constant 0 : index
    %c0_50 = arith.constant 0 : index
    %31 = vector.load %arg17[%c0_47, %c0_48, %c0_49, %c0_50] : memref<2x18x18x8xf32, #tpu.memory_space<vmem>>, vector<2x16x16x8xf32>
    %32 = vector.shape_cast %31 : vector<2x16x16x8xf32> to vector<512x8xf32>
    %c0_51 = arith.constant 0 : index
    %c0_52 = arith.constant 0 : index
    %c1_53 = arith.constant 1 : index
    %c0_54 = arith.constant 0 : index
    %33 = vector.load %arg17[%c0_51, %c0_52, %c1_53, %c0_54] : memref<2x18x18x8xf32, #tpu.memory_space<vmem>>, vector<2x16x16x8xf32>
    %34 = vector.shape_cast %33 : vector<2x16x16x8xf32> to vector<512x8xf32>
    %c0_55 = arith.constant 0 : index
    %c0_56 = arith.constant 0 : index
    %c2_57 = arith.constant 2 : index
    %c0_58 = arith.constant 0 : index
    %35 = vector.load %arg17[%c0_55, %c0_56, %c2_57, %c0_58] : memref<2x18x18x8xf32, #tpu.memory_space<vmem>>, vector<2x16x16x8xf32>
    %36 = vector.shape_cast %35 : vector<2x16x16x8xf32> to vector<512x8xf32>
    %c0_59 = arith.constant 0 : index
    %c1_60 = arith.constant 1 : index
    %c0_61 = arith.constant 0 : index
    %c0_62 = arith.constant 0 : index
    %37 = vector.load %arg17[%c0_59, %c1_60, %c0_61, %c0_62] : memref<2x18x18x8xf32, #tpu.memory_space<vmem>>, vector<2x16x16x8xf32>
    %38 = vector.shape_cast %37 : vector<2x16x16x8xf32> to vector<512x8xf32>
    %c0_63 = arith.constant 0 : index
    %c1_64 = arith.constant 1 : index
    %c1_65 = arith.constant 1 : index
    %c0_66 = arith.constant 0 : index
    %39 = vector.load %arg17[%c0_63, %c1_64, %c1_65, %c0_66] : memref<2x18x18x8xf32, #tpu.memory_space<vmem>>, vector<2x16x16x8xf32>
    %40 = vector.shape_cast %39 : vector<2x16x16x8xf32> to vector<512x8xf32>
    %c0_67 = arith.constant 0 : index
    %c1_68 = arith.constant 1 : index
    %c2_69 = arith.constant 2 : index
    %c0_70 = arith.constant 0 : index
    %41 = vector.load %arg17[%c0_67, %c1_68, %c2_69, %c0_70] : memref<2x18x18x8xf32, #tpu.memory_space<vmem>>, vector<2x16x16x8xf32>
    %42 = vector.shape_cast %41 : vector<2x16x16x8xf32> to vector<512x8xf32>
    %c0_71 = arith.constant 0 : index
    %c2_72 = arith.constant 2 : index
    %c0_73 = arith.constant 0 : index
    %c0_74 = arith.constant 0 : index
    %43 = vector.load %arg17[%c0_71, %c2_72, %c0_73, %c0_74] : memref<2x18x18x8xf32, #tpu.memory_space<vmem>>, vector<2x16x16x8xf32>
    %44 = vector.shape_cast %43 : vector<2x16x16x8xf32> to vector<512x8xf32>
    %c0_75 = arith.constant 0 : index
    %c2_76 = arith.constant 2 : index
    %c1_77 = arith.constant 1 : index
    %c0_78 = arith.constant 0 : index
    %45 = vector.load %arg17[%c0_75, %c2_76, %c1_77, %c0_78] : memref<2x18x18x8xf32, #tpu.memory_space<vmem>>, vector<2x16x16x8xf32>
    %46 = vector.shape_cast %45 : vector<2x16x16x8xf32> to vector<512x8xf32>
    %c0_79 = arith.constant 0 : index
    %c2_80 = arith.constant 2 : index
    %c2_81 = arith.constant 2 : index
    %c0_82 = arith.constant 0 : index
    %47 = vector.load %arg17[%c0_79, %c2_80, %c2_81, %c0_82] : memref<2x18x18x8xf32, #tpu.memory_space<vmem>>, vector<2x16x16x8xf32>
    %48 = vector.shape_cast %47 : vector<2x16x16x8xf32> to vector<512x8xf32>
    %49 = tpu.concatenate %32, %34, %36, %38, %40, %42, %44, %46, %48 in 1 : vector<512x8xf32>, vector<512x8xf32>, vector<512x8xf32>, vector<512x8xf32>, vector<512x8xf32>, vector<512x8xf32>, vector<512x8xf32>, vector<512x8xf32>, vector<512x8xf32> -> vector<512x72xf32>
    %50 = arith.truncf %49 : vector<512x72xf32> to vector<512x72xbf16>
    %c0_83 = arith.constant 0 : index
    %c0_84 = arith.constant 0 : index
    %51 = vector.load %arg5[%c0_83, %c0_84] : memref<72x32xbf16, #tpu.memory_space<vmem>>, vector<72x32xbf16>
    %cst_85 = arith.constant dense<0.000000e+00> : vector<512x32xf32>
    %52 = tpu.matmul %50, %51, %cst_85 {dimension_numbers = #tpu.dot_dimension_numbers<[1], [0], [0], [1], [0, 0, 1, 1], [], []>} : vector<512x72xbf16>, vector<72x32xbf16>, vector<512x32xf32> -> vector<512x32xf32>
    %c0_86 = arith.constant 0 : index
    %c0_87 = arith.constant 0 : index
    %53 = vector.load %arg6[%c0_86, %c0_87] : memref<1x32xf32, #tpu.memory_space<vmem>>, vector<1x32xf32>
    %54 = vector.broadcast %53 : vector<1x32xf32> to vector<512x32xf32>
    %55 = arith.addf %52, %54 : vector<512x32xf32>
    %cst_88 = arith.constant 0.000000e+00 : f32
    %56 = vector.broadcast %cst_88 : f32 to vector<512x32xf32>
    %57 = arith.maximumf %55, %56 : vector<512x32xf32>
    %58 = vector.extract_strided_slice %57 {offsets = [0, 0], sizes = [256, 32], strides = [1, 1]} : vector<512x32xf32> to vector<256x32xf32>
    %cst_89 = arith.constant dense<0.000000e+00> : vector<32xf32>
    %59 = vector.multi_reduction <add>, %58, %cst_89 [0] : vector<256x32xf32> to vector<32xf32>
    %60 = vector.shape_cast %59 : vector<32xf32> to vector<1x32xf32>
    %cst_90 = arith.constant 2.560000e+02 : f32
    %61 = vector.broadcast %cst_90 : f32 to vector<1x32xf32>
    %62 = arith.divf %60, %61 : vector<1x32xf32>
    %63 = vector.extract_strided_slice %57 {offsets = [256, 0], sizes = [256, 32], strides = [1, 1]} : vector<512x32xf32> to vector<256x32xf32>
    %cst_91 = arith.constant dense<0.000000e+00> : vector<32xf32>
    %64 = vector.multi_reduction <add>, %63, %cst_91 [0] : vector<256x32xf32> to vector<32xf32>
    %65 = vector.shape_cast %64 : vector<32xf32> to vector<1x32xf32>
    %cst_92 = arith.constant 2.560000e+02 : f32
    %66 = vector.broadcast %cst_92 : f32 to vector<1x32xf32>
    %67 = arith.divf %65, %66 : vector<1x32xf32>
    %68 = tpu.concatenate %62, %67 in 0 : vector<1x32xf32>, vector<1x32xf32> -> vector<2x32xf32>
    %69 = arith.truncf %68 : vector<2x32xf32> to vector<2x32xbf16>
    %c0_93 = arith.constant 0 : index
    %c0_94 = arith.constant 0 : index
    %70 = vector.load %arg7[%c0_93, %c0_94] : memref<32x256xbf16, #tpu.memory_space<vmem>>, vector<32x256xbf16>
    %cst_95 = arith.constant dense<0.000000e+00> : vector<2x256xf32>
    %71 = tpu.matmul %69, %70, %cst_95 {dimension_numbers = #tpu.dot_dimension_numbers<[1], [0], [0], [1], [0, 0, 1, 1], [], []>} : vector<2x32xbf16>, vector<32x256xbf16>, vector<2x256xf32> -> vector<2x256xf32>
    %c0_96 = arith.constant 0 : index
    %c0_97 = arith.constant 0 : index
    %72 = vector.load %arg8[%c0_96, %c0_97] : memref<1x256xf32, #tpu.memory_space<vmem>>, vector<1x256xf32>
    %73 = vector.broadcast %72 : vector<1x256xf32> to vector<2x256xf32>
    %74 = arith.addf %71, %73 : vector<2x256xf32>
    %c0_98 = arith.constant 0 : index
    %c0_99 = arith.constant 0 : index
    %75 = vector.load %arg2[%c0_98, %c0_99] : memref<2x100xf32, #tpu.memory_space<vmem>>, vector<2x100xf32>
    %76 = arith.truncf %75 : vector<2x100xf32> to vector<2x100xbf16>
    %c0_100 = arith.constant 0 : index
    %c0_101 = arith.constant 0 : index
    %77 = vector.load %arg9[%c0_100, %c0_101] : memref<100x256xbf16, #tpu.memory_space<vmem>>, vector<100x256xbf16>
    %cst_102 = arith.constant dense<0.000000e+00> : vector<2x256xf32>
    %78 = tpu.matmul %76, %77, %cst_102 {dimension_numbers = #tpu.dot_dimension_numbers<[1], [0], [0], [1], [0, 0, 1, 1], [], []>} : vector<2x100xbf16>, vector<100x256xbf16>, vector<2x256xf32> -> vector<2x256xf32>
    %c0_103 = arith.constant 0 : index
    %c0_104 = arith.constant 0 : index
    %79 = vector.load %arg10[%c0_103, %c0_104] : memref<1x256xf32, #tpu.memory_space<vmem>>, vector<1x256xf32>
    %80 = vector.broadcast %79 : vector<1x256xf32> to vector<2x256xf32>
    %81 = arith.addf %78, %80 : vector<2x256xf32>
    %82 = vector.extract_strided_slice %74 {offsets = [0, 0], sizes = [2, 128], strides = [1, 1]} : vector<2x256xf32> to vector<2x128xf32>
    %83 = vector.extract_strided_slice %74 {offsets = [0, 128], sizes = [2, 128], strides = [1, 1]} : vector<2x256xf32> to vector<2x128xf32>
    %84 = vector.extract_strided_slice %81 {offsets = [0, 0], sizes = [2, 128], strides = [1, 1]} : vector<2x256xf32> to vector<2x128xf32>
    %85 = vector.extract_strided_slice %81 {offsets = [0, 128], sizes = [2, 128], strides = [1, 1]} : vector<2x256xf32> to vector<2x128xf32>
    %86 = arith.mulf %82, %84 : vector<2x128xf32>
    %87 = arith.mulf %83, %85 : vector<2x128xf32>
    %88 = arith.subf %86, %87 : vector<2x128xf32>
    %89 = arith.mulf %82, %85 : vector<2x128xf32>
    %90 = arith.mulf %83, %84 : vector<2x128xf32>
    %91 = arith.addf %89, %90 : vector<2x128xf32>
    %92 = tpu.concatenate %88, %91 in 1 : vector<2x128xf32>, vector<2x128xf32> -> vector<2x256xf32>
    %93 = arith.truncf %92 : vector<2x256xf32> to vector<2x256xbf16>
    %c0_105 = arith.constant 0 : index
    %c0_106 = arith.constant 0 : index
    %94 = vector.load %arg11[%c0_105, %c0_106] : memref<256x128xbf16, #tpu.memory_space<vmem>>, vector<256x128xbf16>
    %cst_107 = arith.constant dense<0.000000e+00> : vector<2x128xf32>
    %95 = tpu.matmul %93, %94, %cst_107 {dimension_numbers = #tpu.dot_dimension_numbers<[1], [0], [0], [1], [0, 0, 1, 1], [], []>} : vector<2x256xbf16>, vector<256x128xbf16>, vector<2x128xf32> -> vector<2x128xf32>
    %cst_108 = arith.constant dense<0.000000e+00> : vector<128xf32>
    %96 = vector.multi_reduction <add>, %95, %cst_108 [0] : vector<2x128xf32> to vector<128xf32>
    %97 = vector.shape_cast %96 : vector<128xf32> to vector<1x128xf32>
    %cst_109 = arith.constant 2.000000e+00 : f32
    %98 = vector.broadcast %cst_109 : f32 to vector<1x128xf32>
    %99 = arith.divf %97, %98 : vector<1x128xf32>
    %100 = vector.broadcast %99 : vector<1x128xf32> to vector<2x128xf32>
    %101 = arith.subf %95, %100 : vector<2x128xf32>
    %102 = arith.mulf %101, %101 : vector<2x128xf32>
    %cst_110 = arith.constant dense<0.000000e+00> : vector<128xf32>
    %103 = vector.multi_reduction <add>, %102, %cst_110 [0] : vector<2x128xf32> to vector<128xf32>
    %104 = vector.shape_cast %103 : vector<128xf32> to vector<1x128xf32>
    %cst_111 = arith.constant 2.000000e+00 : f32
    %105 = vector.broadcast %cst_111 : f32 to vector<1x128xf32>
    %106 = arith.divf %104, %105 : vector<1x128xf32>
    %107 = vector.broadcast %99 : vector<1x128xf32> to vector<2x128xf32>
    %108 = arith.subf %95, %107 : vector<2x128xf32>
    %cst_112 = arith.constant 9.99999974E-6 : f32
    %109 = vector.broadcast %cst_112 : f32 to vector<1x128xf32>
    %110 = arith.addf %106, %109 : vector<1x128xf32>
    %111 = math.rsqrt %110 : vector<1x128xf32>
    %112 = vector.broadcast %111 : vector<1x128xf32> to vector<2x128xf32>
    %113 = arith.mulf %108, %112 : vector<2x128xf32>
    %c0_113 = arith.constant 0 : index
    %c0_114 = arith.constant 0 : index
    %114 = vector.load %arg12[%c0_113, %c0_114] : memref<1x128xf32, #tpu.memory_space<vmem>>, vector<1x128xf32>
    %115 = vector.broadcast %114 : vector<1x128xf32> to vector<2x128xf32>
    %116 = arith.mulf %113, %115 : vector<2x128xf32>
    %c0_115 = arith.constant 0 : index
    %c0_116 = arith.constant 0 : index
    %117 = vector.load %arg13[%c0_115, %c0_116] : memref<1x128xf32, #tpu.memory_space<vmem>>, vector<1x128xf32>
    %118 = vector.broadcast %117 : vector<1x128xf32> to vector<2x128xf32>
    %119 = arith.addf %116, %118 : vector<2x128xf32>
    %cst_117 = arith.constant 0.000000e+00 : f32
    %120 = vector.broadcast %cst_117 : f32 to vector<2x128xf32>
    %121 = arith.maximumf %119, %120 : vector<2x128xf32>
    %122 = arith.truncf %121 : vector<2x128xf32> to vector<2x128xbf16>
    %c0_118 = arith.constant 0 : index
    %c0_119 = arith.constant 0 : index
    %123 = vector.load %arg14[%c0_118, %c0_119] : memref<128x2xbf16, #tpu.memory_space<vmem>>, vector<128x2xbf16>
    %cst_120 = arith.constant dense<0.000000e+00> : vector<2x2xf32>
    %124 = tpu.matmul %122, %123, %cst_120 {dimension_numbers = #tpu.dot_dimension_numbers<[1], [0], [0], [1], [0, 0, 1, 1], [], []>} : vector<2x128xbf16>, vector<128x2xbf16>, vector<2x2xf32> -> vector<2x2xf32>
    %c0_121 = arith.constant 0 : index
    %c0_122 = arith.constant 0 : index
    %125 = vector.load %arg15[%c0_121, %c0_122] : memref<1x2xf32, #tpu.memory_space<vmem>>, vector<1x2xf32>
    %126 = vector.broadcast %125 : vector<1x2xf32> to vector<2x2xf32>
    %127 = arith.addf %124, %126 : vector<2x2xf32>
    %c0_123 = arith.constant 0 : index
    %c0_124 = arith.constant 0 : index
    %128 = vector.load %arg16[%c0_123, %c0_124] : memref<2x2xf32, #tpu.memory_space<vmem>>, vector<2x2xf32>
    tpu.vector_store %arg16[%c0_123, %c0_124], %127 {strides = array<i32>} : memref<2x2xf32, #tpu.memory_space<vmem>>, vector<2x2xf32>,
    return
  }
  func.func @transform_0(%arg0: i32) -> (i32, i32, i32, i32) {
    %c0_i32 = arith.constant 0 : i32
    %c0_i32_0 = arith.constant 0 : i32
    %c0_i32_1 = arith.constant 0 : i32
    %c0_i32_2 = arith.constant 0 : i32
    %c0_i32_3 = arith.constant 0 : i32
    return %c0_i32, %c0_i32_0, %c0_i32_1, %c0_i32_2 : i32, i32, i32, i32
  }
  func.func @transform_1(%arg0: i32) -> (i32, i32) {
    %c0_i32 = arith.constant 0 : i32
    %c0_i32_0 = arith.constant 0 : i32
    %c0_i32_1 = arith.constant 0 : i32
    return %c0_i32, %c0_i32_0 : i32, i32
  }
  func.func @transform_2(%arg0: i32) -> (i32, i32) {
    %c0_i32 = arith.constant 0 : i32
    %c0_i32_0 = arith.constant 0 : i32
    %c0_i32_1 = arith.constant 0 : i32
    return %c0_i32, %c0_i32_0 : i32, i32
  }
  func.func @transform_3(%arg0: i32) -> (i32, i32) {
    %c0_i32 = arith.constant 0 : i32
    %c0_i32_0 = arith.constant 0 : i32
    %c0_i32_1 = arith.constant 0 : i32
    return %c0_i32, %c0_i32_0 : i32, i32
  }
  func.func @transform_4(%arg0: i32) -> (i32, i32) {
    %c0_i32 = arith.constant 0 : i32
    %c0_i32_0 = arith.constant 0 : i32
    %c0_i32_1 = arith.constant 0 : i32
    return %c0_i32, %c0_i32_0 : i32, i32
  }
  func.func @transform_5(%arg0: i32) -> (i32, i32) {
    %c0_i32 = arith.constant 0 : i32
    %c0_i32_0 = arith.constant 0 : i32
    %c0_i32_1 = arith.constant 0 : i32
    return %c0_i32, %c0_i32_0 : i32, i32
  }
  func.func @transform_6(%arg0: i32) -> (i32, i32) {
    %c0_i32 = arith.constant 0 : i32
    %c0_i32_0 = arith.constant 0 : i32
    %c0_i32_1 = arith.constant 0 : i32
    return %c0_i32, %c0_i32_0 : i32, i32
  }
  func.func @transform_7(%arg0: i32) -> (i32, i32) {
    %c0_i32 = arith.constant 0 : i32
    %c0_i32_0 = arith.constant 0 : i32
    %c0_i32_1 = arith.constant 0 : i32
    return %c0_i32, %c0_i32_0 : i32, i32
  }
  func.func @transform_8(%arg0: i32) -> (i32, i32) {
    %c0_i32 = arith.constant 0 : i32
    %c0_i32_0 = arith.constant 0 : i32
    %c0_i32_1 = arith.constant 0 : i32
    return %c0_i32, %c0_i32_0 : i32, i32
  }
  func.func @transform_9(%arg0: i32) -> (i32, i32) {
    %c0_i32 = arith.constant 0 : i32
    %c0_i32_0 = arith.constant 0 : i32
    %c0_i32_1 = arith.constant 0 : i32
    return %c0_i32, %c0_i32_0 : i32, i32
  }
  func.func @transform_10(%arg0: i32) -> (i32, i32) {
    %c0_i32 = arith.constant 0 : i32
    %c0_i32_0 = arith.constant 0 : i32
    %c0_i32_1 = arith.constant 0 : i32
    return %c0_i32, %c0_i32_0 : i32, i32
  }
  func.func @transform_11(%arg0: i32) -> (i32, i32) {
    %c0_i32 = arith.constant 0 : i32
    %c0_i32_0 = arith.constant 0 : i32
    %c0_i32_1 = arith.constant 0 : i32
    return %c0_i32, %c0_i32_0 : i32, i32
  }
  func.func @transform_12(%arg0: i32) -> (i32, i32) {
    %c0_i32 = arith.constant 0 : i32
    %c0_i32_0 = arith.constant 0 : i32
    %c0_i32_1 = arith.constant 0 : i32
    return %c0_i32, %c0_i32_0 : i32, i32
  }
  func.func @transform_13(%arg0: i32) -> (i32, i32) {
    %c0_i32 = arith.constant 0 : i32
    %c0_i32_0 = arith.constant 0 : i32
    %c0_i32_1 = arith.constant 0 : i32
    return %c0_i32, %c0_i32_0 : i32, i32
  }
  func.func @transform_14(%arg0: i32) -> (i32, i32) {
    %c0_i32 = arith.constant 0 : i32
    %c0_i32_0 = arith.constant 0 : i32
    %c0_i32_1 = arith.constant 0 : i32
    return %c0_i32, %c0_i32_0 : i32, i32
  }
  func.func @transform_15(%arg0: i32) -> (i32, i32) {
    %c0_i32 = arith.constant 0 : i32
    %c0_i32_0 = arith.constant 0 : i32
    %c0_i32_1 = arith.constant 0 : i32
    return %c0_i32, %c0_i32_0 : i32, i32
  }
}

</mosaic_0001>

<bundles_post_ra>
// kernel: cnn_with_clinical_forward.1
= control target key start
LH: loop header
LB: loop body
LE: loop exit
PB: predicated region body
PF: predicated region fallthrough
CT: control target
= control target key end

     0   :  { %s11732_s19 = smov 4   ;;  %s11733_s25 = smov 8   ;;  %s18098_s0 = inlined_call_operand.vmem [shape: f32[2,18,18,4], index: 0, kind: input, shape index: {}]   ;;  %s18099_s1 = inlined_call_operand.vmem [shape: f32[2,100], index: 1, kind: input, shape index: {}]   ;;  %s18100_s2 = inlined_call_operand.vmem [shape: bf16[36,8], index: 2, kind: input, shape index: {}]   ;;  %s18101_s3 = inlined_call_operand.vmem [shape: f32[1,8], index: 3, kind: input, shape index: {}]   ;;  %s18102_s4 = inlined_call_operand.vmem [shape: bf16[72,32], index: 4, kind: input, shape index: {}]   ;;  %s18103_s5 = inlined_call_operand.vmem [shape: f32[1,32], index: 5, kind: input, shape index: {}]   ;;  %s18104_s6 = inlined_call_operand.vmem [shape: bf16[32,256], index: 6, kind: input, shape index: {}]   ;;  %s18105_s7 = inlined_call_operand.vmem [shape: f32[1,256], index: 7, kind: input, shape index: {}]   ;;  %s18106_s8 = inlined_call_operand.vmem [shape: bf16[100,256], index: 8, kind: input, shape index: {}]   ;;  %s18107_s9 = inlined_call_operand.vmem [shape: f32[1,256], index: 9, kind: input, shape index: {}]   ;;  %s18108_s10 = inlined_call_operand.vmem [shape: bf16[256,128], index: 10, kind: input, shape index: {}]   ;;  %s18109_s11 = inlined_call_operand.vmem [shape: f32[1,128], index: 11, kind: input, shape index: {}]   ;;  %s18110_s12 = inlined_call_operand.vmem [shape: f32[1,128], index: 12, kind: input, shape index: {}]   ;;  %s18111_s13 = inlined_call_operand.vmem [shape: bf16[128,2], index: 13, kind: input, shape index: {}]   ;;  %s18112_s14 = inlined_call_operand.vmem [shape: f32[1,2], index: 14, kind: input, shape index: {}]   ;;  %s18113_s15 = inlined_call_operand.hbm [shape: f32[2,2], index: 15, kind: output, shape index: {}]  }
   0x1   :  { %v120_v0 = vld [vmem:[%s18098_s0 + $0x31] sm:$0xff]  ;;  %v121_v1 = vld [vmem:[%s18098_s0 + $0x39] sm:$0xff]  ;;  %v116_v2 = vld [vmem:[%s18098_s0 + $0x1] sm:$0xff] }
   0x2   :  { %v9066_v3 = vpack.i.bf16 %v121_v1, %v120_v0  ;;  %v117_v4 = vld [vmem:[%s18098_s0 + $0x9] sm:$0xff]  ;;  %v123_v6 = vld [vmem:[%s18098_s0 + $0x51] sm:$0xff]  ;;  %v118_v8 = vld [vmem:[%s18098_s0 + $0x19] sm:$0xff] }
   0x3   :  { %v122_v5 = vld [vmem:[%s18098_s0 + $0x49] sm:$0xff]  ;;  %v9056_v7 = vpack.i.bf16 %v117_v4, %v116_v2  ;;  %v119_v9 = vld [vmem:[%s18098_s0 + $0x21] sm:$0xff]  ;;  %v126_v12 = vld [vmem:[%s18098_s0 + $0x79] sm:$0xff] }
   0x4   :  { %9067 = vrot.lane.b32.xlu1 %v9066_v3, %s11732_s19  ;;  %v9071_v10 = vpack.i.bf16 %v123_v6, %v122_v5  ;;  %v9061_v11 = vpack.i.bf16 %v119_v9, %v118_v8  ;;  %v127_v13 = vld [vmem:[%s18098_s0 + $0x81] sm:$0xff]  ;;  %v125_v15 = vld [vmem:[%s18098_s0 + $0x69] sm:$0xff]  ;;  %v131_v19 = vld [vmem:[%s18098_s0 + $0xb1] sm:$0xff] }
   0x5   :  { %9057 = vrot.lane.b32.xlu0 %v9056_v7, %s11732_s19  ;;  %v124_v14 = vld [vmem:[%s18098_s0 + $0x61] sm:$0xff]  ;;  %v9081_v16 = vpack.i.bf16 %v127_v13, %v126_v12  ;;  %v130_v18 = vld [vmem:[%s18098_s0 + $0xa9] sm:$0xff]  ;;  %v128_v20 = vld [vmem:[%s18098_s0 + $0x91] sm:$0xff] }
   0x6   :  { %v9076_v17 = vpack.i.bf16 %v125_v15, %v124_v14  ;;  %v129_v21 = vld [vmem:[%s18098_s0 + $0x99] sm:$0xff]  ;;  %v9091_v22 = vpack.i.bf16 %v131_v19, %v130_v18  ;;  %v135_v25 = vld [vmem:[%s18098_s0 + $0xe1] sm:$0xff]  ;;  %v133_v27 = vld [vmem:[%s18098_s0 + $0xc9] sm:$0xff] }
   0x7   :  { %v9086_v23 = vpack.i.bf16 %v129_v21, %v128_v20  ;;  %v134_v24 = vld [vmem:[%s18098_s0 + $0xd9] sm:$0xff]  ;;  %v132_v26 = vld [vmem:[%s18098_s0 + $0xc1] sm:$0xff]  ;;  %v138_v30 = vld [vmem:[%s18098_s0 + $0x109] sm:$0xff] }
   0x8   :  { %9072 = vrot.lane.b32.xlu1 %v9071_v10, %s11732_s19  ;;  %v9101_v28 = vpack.i.bf16 %v135_v25, %v134_v24  ;;  %v9096_v29 = vpack.i.bf16 %v133_v27, %v132_v26  ;;  %v139_v31 = vld [vmem:[%s18098_s0 + $0x111] sm:$0xff]  ;;  %v137_v33 = vld [vmem:[%s18098_s0 + $0xf9] sm:$0xff]  ;;  %v143_v37 = vld [vmem:[%s18098_s0 + $0x141] sm:$0xff] }
   0x9   :  { %9062 = vrot.lane.b32.xlu0 %v9061_v11, %s11732_s19  ;;  %v136_v32 = vld [vmem:[%s18098_s0 + $0xf1] sm:$0xff]  ;;  %v9111_v34 = vpack.i.bf16 %v139_v31, %v138_v30  ;;  %v142_v36 = vld [vmem:[%s18098_s0 + $0x139] sm:$0xff]  ;;  %v140_v38 = vld [vmem:[%s18098_s0 + $0x121] sm:$0xff] }
   0xa   :  { %v9106_v35 = vpack.i.bf16 %v137_v33, %v136_v32  ;;  %v141_v39 = vld [vmem:[%s18098_s0 + $0x129] sm:$0xff]  ;;  %v9121_v40 = vpack.i.bf16 %v143_v37, %v142_v36  ;;  %v147_v43 = vld [vmem:[%s18098_s0 + $0x171] sm:$0xff]  ;;  %v145_v45 = vld [vmem:[%s18098_s0 + $0x159] sm:$0xff] }
   0xb   :  { %v9116_v41 = vpack.i.bf16 %v141_v39, %v140_v38  ;;  %v146_v42 = vld [vmem:[%s18098_s0 + $0x169] sm:$0xff]  ;;  %v144_v44 = vld [vmem:[%s18098_s0 + $0x151] sm:$0xff]  ;;  %v149_v51 = vld [vmem:[%s18098_s0 + $0x1b9] sm:$0xff] }
   0xc   :  { %9082 = vrot.lane.b32.xlu1 %v9081_v16, %s11732_s19  ;;  %v9131_v46 = vpack.i.bf16 %v147_v43, %v146_v42  ;;  %v9126_v47 = vpack.i.bf16 %v145_v45, %v144_v44  ;;  %v150_v48 = vld [vmem:[%s18098_s0 + $0x1c9] sm:$0xff]  ;;  %v151_v49 = vld [vmem:[%s18098_s0 + $0x1d1] sm:$0xff]  ;;  %v154_v54 = vld [vmem:[%s18098_s0 + $0x1f9] sm:$0xff] }
   0xd   :  { %9077 = vrot.lane.b32.xlu0 %v9076_v17, %s11732_s19  ;;  %v148_v50 = vld [vmem:[%s18098_s0 + $0x1b1] sm:$0xff]  ;;  %v9141_v52 = vpack.i.bf16 %v151_v49, %v150_v48  ;;  %v155_v55 = vld [vmem:[%s18098_s0 + $0x201] sm:$0xff]  ;;  %v153_v57 = vld [vmem:[%s18098_s0 + $0x1e9] sm:$0xff] }
   0xe   :  { %v9136_v53 = vpack.i.bf16 %v149_v51, %v148_v50  ;;  %v152_v56 = vld [vmem:[%s18098_s0 + $0x1e1] sm:$0xff]  ;;  %v9151_v58 = vpack.i.bf16 %v155_v55, %v154_v54  ;;  %v158_v60 = vld [vmem:[%s18098_s0 + $0x229] sm:$0xff]  ;;  %v159_v61 = vld [vmem:[%s18098_s0 + $0x231] sm:$0xff] }
   0xf   :  { %v9146_v59 = vpack.i.bf16 %v153_v57, %v152_v56  ;;  %v156_v62 = vld [vmem:[%s18098_s0 + $0x211] sm:$0xff]  ;;  %v157_v63 = vld [vmem:[%s18098_s0 + $0x219] sm:$0xff]  ;;  %v9161_v0 = vpack.i.bf16 %v159_v61, %v158_v60  ;;  %v163_v3 = vld [vmem:[%s18098_s0 + $0x261] sm:$0xff] }
  0x10   :  { %9092 = vrot.lane.b32.xlu1 %v9091_v22, %s11732_s19  ;;  %v9156_v1 = vpack.i.bf16 %v157_v63, %v156_v62  ;;  %v162_v2 = vld [vmem:[%s18098_s0 + $0x259] sm:$0xff]  ;;  %v160_v4 = vld [vmem:[%s18098_s0 + $0x241] sm:$0xff]  ;;  %v161_v5 = vld [vmem:[%s18098_s0 + $0x249] sm:$0xff] }
  0x11   :  { %9087 = vrot.lane.b32.xlu0 %v9086_v23, %s11732_s19  ;;  %v9171_v6 = vpack.i.bf16 %v163_v3, %v162_v2  ;;  %v9166_v7 = vpack.i.bf16 %v161_v5, %v160_v4  ;;  %v166_v8 = vld [vmem:[%s18098_s0 + $0x289] sm:$0xff]  ;;  %v167_v9 = vld [vmem:[%s18098_s0 + $0x291] sm:$0xff]  ;;  %v165_v11 = vld [vmem:[%s18098_s0 + $0x279] sm:$0xff] }
  0x12   :  { %v164_v10 = vld [vmem:[%s18098_s0 + $0x271] sm:$0xff]  ;;  %v9181_v12 = vpack.i.bf16 %v167_v9, %v166_v8  ;;  %v170_v14 = vld [vmem:[%s18098_s0 + $0x2b9] sm:$0xff]  ;;  %v171_v15 = vld [vmem:[%s18098_s0 + $0x2c1] sm:$0xff] }
  0x13   :  { %v9176_v13 = vpack.i.bf16 %v165_v11, %v164_v10  ;;  %v168_v16 = vld [vmem:[%s18098_s0 + $0x2a1] sm:$0xff]  ;;  %v169_v17 = vld [vmem:[%s18098_s0 + $0x2a9] sm:$0xff]  ;;  %v9191_v18 = vpack.i.bf16 %v171_v15, %v170_v14  ;;  %v175_v21 = vld [vmem:[%s18098_s0 + $0x2f1] sm:$0xff] }
  0x14   :  { %9102 = vrot.lane.b32.xlu1 %v9101_v28, %s11732_s19  ;;  %v9186_v19 = vpack.i.bf16 %v169_v17, %v168_v16  ;;  %v174_v20 = vld [vmem:[%s18098_s0 + $0x2e9] sm:$0xff]  ;;  %v172_v22 = vld [vmem:[%s18098_s0 + $0x2d1] sm:$0xff]  ;;  %v173_v23 = vld [vmem:[%s18098_s0 + $0x2d9] sm:$0xff] }
  0x15   :  { %9097 = vrot.lane.b32.xlu0 %v9096_v29, %s11732_s19  ;;  %v9201_v24 = vpack.i.bf16 %v175_v21, %v174_v20  ;;  %v9196_v25 = vpack.i.bf16 %v173_v23, %v172_v22  ;;  %v178_v26 = vld [vmem:[%s18098_s0 + $0x319] sm:$0xff]  ;;  %v179_v27 = vld [vmem:[%s18098_s0 + $0x321] sm:$0xff]  ;;  %v177_v29 = vld [vmem:[%s18098_s0 + $0x309] sm:$0xff] }
  0x16   :  { %v176_v28 = vld [vmem:[%s18098_s0 + $0x301] sm:$0xff]  ;;  %v9211_v30 = vpack.i.bf16 %v179_v27, %v178_v26  ;;  %v186_v38 = vld [vmem:[%s18098_s0 + $0x4a] sm:$0xff]  ;;  %v187_v39 = vld [vmem:[%s18098_s0 + $0x52] sm:$0xff] }
  0x17   :  { %v9206_v31 = vpack.i.bf16 %v177_v29, %v176_v28  ;;  %v182_v32 = vld [vmem:[%s18098_s0 + $0x1a] sm:$0xff]  ;;  %v183_v33 = vld [vmem:[%s18098_s0 + $0x22] sm:$0xff]  ;;  %v9231_v44 = vpack.i.bf16 %v187_v39, %v186_v38  ;;  %v194_v48 = vld [vmem:[%s18098_s0 + $0xaa] sm:$0xff] }
  0x18   :  { %9112 = vrot.lane.b32.xlu1 %v9111_v34, %s11732_s19  ;;  %v180_v34 = vld [vmem:[%s18098_s0 + $0x2] sm:$0xff]  ;;  %v9221_v36 = vpack.i.bf16 %v183_v33, %v182_v32  ;;  %v190_v42 = vld [vmem:[%s18098_s0 + $0x7a] sm:$0xff]  ;;  %v195_v49 = vld [vmem:[%s18098_s0 + $0xb2] sm:$0xff] }
  0x19   :  { %9107 = vrot.lane.b32.xlu0 %v9106_v35, %s11732_s19  ;;  %v181_v35 = vld [vmem:[%s18098_s0 + $0xa] sm:$0xff]  ;;  %v191_v43 = vld [vmem:[%s18098_s0 + $0x82] sm:$0xff]  ;;  %v198_v54 = vld [vmem:[%s18098_s0 + $0xda] sm:$0xff]  ;;  %v9251_v56 = vpack.i.bf16 %v195_v49, %v194_v48 }
  0x1a   :  { %v9216_v37 = vpack.i.bf16 %v181_v35, %v180_v34  ;;  %v9241_v50 = vpack.i.bf16 %v191_v43, %v190_v42  ;;  %v199_v55 = vld [vmem:[%s18098_s0 + $0xe2] sm:$0xff]  ;;  %v202_v60 = vld [vmem:[%s18098_s0 + $0x10a] sm:$0xff]  ;;  %v203_v61 = vld [vmem:[%s18098_s0 + $0x112] sm:$0xff] }
  0x1b   :  { %v9261_v62 = vpack.i.bf16 %v199_v55, %v198_v54  ;;  %v206_v2 = vld [vmem:[%s18098_s0 + $0x13a] sm:$0xff]  ;;  %v207_v3 = vld [vmem:[%s18098_s0 + $0x142] sm:$0xff]  ;;  %v9271_v4 = vpack.i.bf16 %v203_v61, %v202_v60  ;;  %v210_v8 = vld [vmem:[%s18098_s0 + $0x16a] sm:$0xff] }
  0x1c   :  { %9122 = vrot.lane.b32.xlu1 %v9121_v40, %s11732_s19  ;;  %v184_v40 = vld [vmem:[%s18098_s0 + $0x32] sm:$0xff]  ;;  %v9281_v10 = vpack.i.bf16 %v207_v3, %v206_v2  ;;  %v214_v14 = vld [vmem:[%s18098_s0 + $0x1ca] sm:$0xff]  ;;  %v218_v20 = vld [vmem:[%s18098_s0 + $0x1fa] sm:$0xff] }
  0x1d   :  { %9117 = vrot.lane.b32.xlu0 %v9116_v41, %s11732_s19  ;;  %v185_v41 = vld [vmem:[%s18098_s0 + $0x3a] sm:$0xff]  ;;  %v211_v9 = vld [vmem:[%s18098_s0 + $0x172] sm:$0xff]  ;;  %v219_v21 = vld [vmem:[%s18098_s0 + $0x202] sm:$0xff] }
  0x1e   :  { %v9226_v45 = vpack.i.bf16 %v185_v41, %v184_v40  ;;  %v215_v15 = vld [vmem:[%s18098_s0 + $0x1d2] sm:$0xff]  ;;  %v9291_v16 = vpack.i.bf16 %v211_v9, %v210_v8  ;;  %v222_v26 = vld [vmem:[%s18098_s0 + $0x22a] sm:$0xff]  ;;  %v9311_v28 = vpack.i.bf16 %v219_v21, %v218_v20  ;;  %v226_v32 = vld [vmem:[%s18098_s0 + $0x25a] sm:$0xff] }
  0x1f   :  { %v9301_v22 = vpack.i.bf16 %v215_v15, %v214_v14  ;;  %v223_v27 = vld [vmem:[%s18098_s0 + $0x232] sm:$0xff]  ;;  %v227_v33 = vld [vmem:[%s18098_s0 + $0x262] sm:$0xff] }
  0x20   :  { %9132 = vrot.lane.b32.xlu1 %v9131_v46, %s11732_s19  ;;  %v188_v46 = vld [vmem:[%s18098_s0 + $0x62] sm:$0xff]  ;;  %v9321_v34 = vpack.i.bf16 %v223_v27, %v222_v26 }
  0x21   :  { %9127 = vrot.lane.b32.xlu0 %v9126_v47, %s11732_s19  ;;  %v189_v47 = vld [vmem:[%s18098_s0 + $0x6a] sm:$0xff] }
  0x22   :  { %v9236_v51 = vpack.i.bf16 %v189_v47, %v188_v46 }
  0x24   :  { %9142 = vrot.lane.b32.xlu1 %v9141_v52, %s11732_s19  ;;  %v192_v52 = vld [vmem:[%s18098_s0 + $0x92] sm:$0xff] }
  0x25   :  { %9137 = vrot.lane.b32.xlu0 %v9136_v53, %s11732_s19  ;;  %v193_v53 = vld [vmem:[%s18098_s0 + $0x9a] sm:$0xff] }
  0x26   :  { %v9246_v57 = vpack.i.bf16 %v193_v53, %v192_v52 }
  0x28   :  { %9152 = vrot.lane.b32.xlu1 %v9151_v58, %s11732_s19  ;;  %v196_v58 = vld [vmem:[%s18098_s0 + $0xc2] sm:$0xff] }
  0x29   :  { %9147 = vrot.lane.b32.xlu0 %v9146_v59, %s11732_s19  ;;  %v197_v59 = vld [vmem:[%s18098_s0 + $0xca] sm:$0xff] }
  0x2a   :  { %v9256_v63 = vpack.i.bf16 %v197_v59, %v196_v58 }
  0x2c   :  { %9162 = vrot.lane.b32.xlu1 %v9161_v0, %s11732_s19  ;;  %v200_v0 = vld [vmem:[%s18098_s0 + $0xf2] sm:$0xff] }
  0x2d   :  { %9157 = vrot.lane.b32.xlu0 %v9156_v1, %s11732_s19  ;;  %v201_v1 = vld [vmem:[%s18098_s0 + $0xfa] sm:$0xff] }
  0x2e   :  { %v9266_v5 = vpack.i.bf16 %v201_v1, %v200_v0 }
  0x30   :  { %9172 = vrot.lane.b32.xlu1 %v9171_v6, %s11732_s19  ;;  %v204_v6 = vld [vmem:[%s18098_s0 + $0x122] sm:$0xff] }
  0x31   :  { %9167 = vrot.lane.b32.xlu0 %v9166_v7, %s11732_s19  ;;  %v205_v7 = vld [vmem:[%s18098_s0 + $0x12a] sm:$0xff] }
  0x32   :  { %v9276_v11 = vpack.i.bf16 %v205_v7, %v204_v6 }
  0x34   :  { %9182 = vrot.lane.b32.xlu1 %v9181_v12, %s11732_s19  ;;  %v208_v12 = vld [vmem:[%s18098_s0 + $0x152] sm:$0xff] }
  0x35   :  { %9177 = vrot.lane.b32.xlu0 %v9176_v13, %s11732_s19  ;;  %v209_v13 = vld [vmem:[%s18098_s0 + $0x15a] sm:$0xff] }
  0x36   :  { %v9286_v17 = vpack.i.bf16 %v209_v13, %v208_v12 }
  0x38   :  { %9192 = vrot.lane.b32.xlu1 %v9191_v18, %s11732_s19  ;;  %v212_v18 = vld [vmem:[%s18098_s0 + $0x1b2] sm:$0xff] }
  0x39   :  { %9187 = vrot.lane.b32.xlu0 %v9186_v19, %s11732_s19  ;;  %v213_v19 = vld [vmem:[%s18098_s0 + $0x1ba] sm:$0xff] }
  0x3a   :  { %v9296_v23 = vpack.i.bf16 %v213_v19, %v212_v18 }
  0x3c   :  { %9202 = vrot.lane.b32.xlu1 %v9201_v24, %s11732_s19  ;;  %v216_v24 = vld [vmem:[%s18098_s0 + $0x1e2] sm:$0xff] }
  0x3d   :  { %9197 = vrot.lane.b32.xlu0 %v9196_v25, %s11732_s19  ;;  %v217_v25 = vld [vmem:[%s18098_s0 + $0x1ea] sm:$0xff] }
  0x3e   :  { %v9306_v29 = vpack.i.bf16 %v217_v25, %v216_v24 }
  0x40   :  { %9212 = vrot.lane.b32.xlu1 %v9211_v30, %s11732_s19  ;;  %v220_v30 = vld [vmem:[%s18098_s0 + $0x212] sm:$0xff] }
  0x41   :  { %9207 = vrot.lane.b32.xlu0 %v9206_v31, %s11732_s19  ;;  %v221_v31 = vld [vmem:[%s18098_s0 + $0x21a] sm:$0xff] }
  0x42   :  { %v9316_v35 = vpack.i.bf16 %v221_v31, %v220_v30 }
  0x44   :  { %9222 = vrot.lane.b32.xlu1 %v9221_v36, %s11733_s25 }
  0x45   :  { %9217 = vrot.lane.b32.xlu0 %v9216_v37, %s11733_s25 }
  0x48   :  { %9232 = vrot.lane.b32.xlu1 %v9231_v44, %s11733_s25 }
  0x49   :  { %9227 = vrot.lane.b32.xlu0 %v9226_v45, %s11733_s25 }
  0x4c   :  { %9242 = vrot.lane.b32.xlu1 %v9241_v50, %s11733_s25 }
  0x4d   :  { %9237 = vrot.lane.b32.xlu0 %v9236_v51, %s11733_s25 }
  0x50   :  { %9252 = vrot.lane.b32.xlu1 %v9251_v56, %s11733_s25 }
  0x51   :  { %9247 = vrot.lane.b32.xlu0 %v9246_v57, %s11733_s25 }
  0x54   :  { %9262 = vrot.lane.b32.xlu1 %v9261_v62, %s11733_s25 }
  0x55   :  { %9257 = vrot.lane.b32.xlu0 %v9256_v63, %s11733_s25 }
  0x58   :  { %9272 = vrot.lane.b32.xlu1 %v9271_v4, %s11733_s25 }
  0x59   :  { %9267 = vrot.lane.b32.xlu0 %v9266_v5, %s11733_s25 }
  0x5c   :  { %9282 = vrot.lane.b32.xlu1 %v9281_v10, %s11733_s25 }
  0x5d   :  { %9277 = vrot.lane.b32.xlu0 %v9276_v11, %s11733_s25 }
  0x60   :  { %9292 = vrot.lane.b32.xlu1 %v9291_v16, %s11733_s25 }
  0x61   :  { %9287 = vrot.lane.b32.xlu0 %v9286_v17, %s11733_s25 }
  0x64   :  { %9302 = vrot.lane.b32.xlu1 %v9301_v22, %s11733_s25 }
  0x65   :  { %9297 = vrot.lane.b32.xlu0 %v9296_v23, %s11733_s25 }
  0x68   :  { %9312 = vrot.lane.b32.xlu1 %v9311_v28, %s11733_s25 }
  0x69   :  { %9307 = vrot.lane.b32.xlu0 %v9306_v29, %s11733_s25 }
  0x6a   :  { %20 = vsyncpa [#allocation4], 0  ;;  %v224_v36 = vld [vmem:[%s18098_s0 + $0x242] sm:$0xff]  ;;  %v225_v37 = vld [vmem:[%s18098_s0 + $0x24a] sm:$0xff]  ;;  %v9331_v38 = vpack.i.bf16 %v227_v33, %v226_v32  ;;  %s11734_s19 = smov 12   ;;  %vm2678_vm0 = vcmask 31744  }
  0x6b   :  { %v9326_v39 = vpack.i.bf16 %v225_v37, %v224_v36  ;;  %v230_v40 = vld [vmem:[%s18098_s0 + $0x28a] sm:$0xff]  ;;  %v231_v41 = vld [vmem:[%s18098_s0 + $0x292] sm:$0xff]  ;;  %v229_v43 = vld [vmem:[%s18098_s0 + $0x27a] sm:$0xff]  ;;  %s11736_s26 = smov 20   ;;  %vm2743_vm1 = vcmask 64512   ;;  %vm2808_vm2 = vcmask 97280  }
  0x6c   :  { %9322 = vrot.lane.b32.xlu1 %v9321_v34, %s11733_s25  ;;  %v228_v42 = vld [vmem:[%s18098_s0 + $0x272] sm:$0xff]  ;;  %v9341_v44 = vpack.i.bf16 %v231_v41, %v230_v40  ;;  %v234_v46 = vld [vmem:[%s18098_s0 + $0x2ba] sm:$0xff]  ;;  %v235_v47 = vld [vmem:[%s18098_s0 + $0x2c2] sm:$0xff]  ;;  %vm3354_vm3 = vcmask 1041408   ;;  %s11739_s29 = smov 32   ;;  %vm2873_vm4 = vcmask 130048  }
  0x6d   :  { %9317 = vrot.lane.b32.xlu0 %v9316_v35, %s11733_s25  ;;  %v9336_v45 = vpack.i.bf16 %v229_v43, %v228_v42  ;;  %v232_v48 = vld [vmem:[%s18098_s0 + $0x2a2] sm:$0xff]  ;;  %v233_v49 = vld [vmem:[%s18098_s0 + $0x2aa] sm:$0xff]  ;;  %v9351_v50 = vpack.i.bf16 %v235_v47, %v234_v46  ;;  %v239_v53 = vld [vmem:[%s18098_s0 + $0x2f2] sm:$0xff]  ;;  %vm2938_vm5 = vcmask 162816   ;;  %vm3003_vm6 = vcmask 195584   ;;  %s11741_s18 = smov 40  }
  0x6e   :  { %v9346_v51 = vpack.i.bf16 %v233_v49, %v232_v48  ;;  %v238_v52 = vld [vmem:[%s18098_s0 + $0x2ea] sm:$0xff]  ;;  %v236_v55 = vld [vmem:[%s18098_s0 + $0x2d2] sm:$0xff]  ;;  %v237_v56 = vld [vmem:[%s18098_s0 + $0x2da] sm:$0xff]  ;;  %vm3068_vm7 = vcmask 228352   ;;  %vm3133_vm8 = vcmask 261120   ;;  %vm3257_vm9 = vcmask 293888  }
  0x6f   :  { %v9361_v58 = vpack.i.bf16 %v239_v53, %v238_v52  ;;  %v9356_v59 = vpack.i.bf16 %v237_v56, %v236_v55  ;;  %v242_v60 = vld [vmem:[%s18098_s0 + $0x31a] sm:$0xff]  ;;  %v243_v61 = vld [vmem:[%s18098_s0 + $0x322] sm:$0xff]  ;;  %v241_v0 = vld [vmem:[%s18098_s0 + $0x30a] sm:$0xff]  ;;  %vm3713_vm10 = vcmask 58368   ;;  %vm7198_vm11 = vcmask 1043456   ;;  %s11742_s22 = smov 48  }
  0x70   :  { %9332 = vrot.lane.b32.xlu1 %v9331_v38, %s11733_s25  ;;  %v240_v63 = vld [vmem:[%s18098_s0 + $0x302] sm:$0xff]  ;;  %v9371_v2 = vpack.i.bf16 %v243_v61, %v242_v60  ;;  %v56_v5 = vld [vmem:[%s18098_s0 + $0x30] sm:$0xff]  ;;  %v57_v6 = vld [vmem:[%s18098_s0 + $0x38] sm:$0xff]  ;;  %vm6766_vm12 = vcmask 326656   ;;  %vm6831_vm13 = vcmask 392192   ;;  %vm6896_vm14 = vcmask 457728  }
  0x71   :  { %9327 = vrot.lane.b32.xlu0 %v9326_v39, %s11733_s25  ;;  %v9366_v3 = vpack.i.bf16 %v241_v0, %v240_v63  ;;  %v54_v8 = vld [vmem:[%s18098_s0 + $0x18] sm:$0xff]  ;;  %v55_v9 = vld [vmem:[%s18098_s0 + $0x20] sm:$0xff]  ;;  %v9381_v10 = vpack.i.bf16 %v57_v6, %v56_v5  ;;  %v61_v14 = vld [vmem:[%s18098_s0 + $0x68] sm:$0xff]  ;;  %vm6961_vm15 = vcmask 523264   ;;  %s11747_s30 = smov [#allocation3]  }
  0x72   :  { %v9376_v11 = vpack.i.bf16 %v55_v9, %v54_v8  ;;  %v60_v13 = vld [vmem:[%s18098_s0 + $0x60] sm:$0xff]  ;;  %v58_v16 = vld [vmem:[%s18098_s0 + $0x48] sm:$0xff]  ;;  %v59_v17 = vld [vmem:[%s18098_s0 + $0x50] sm:$0xff]  ;;  %s8257_s16 = sshll.u32 %s11747_s30, 4  ;;  %s8258_s16 = int_to_ptr.vmem [resolvable:$true] %s8257_s16 }
  0x73   :  { %v9391_v18 = vpack.i.bf16 %v61_v14, %v60_v13  ;;  %v9386_v19 = vpack.i.bf16 %v59_v17, %v58_v16  ;;  %v64_v21 = vld [vmem:[%s18098_s0 + $0x90] sm:$0xff]  ;;  %v65_v22 = vld [vmem:[%s18098_s0 + $0x98] sm:$0xff]  ;;  %v63_v25 = vld [vmem:[%s18098_s0 + $0x80] sm:$0xff]  ;;  %p11715_p1 = scmp.lt.s32.totalorder %s8258_s16, %s8258_s16 }
  0x74   :  { %9342 = vrot.lane.b32.xlu1 %v9341_v44, %s11733_s25  ;;  %v62_v24 = vld [vmem:[%s18098_s0 + $0x78] sm:$0xff]  ;;  %v9401_v26 = vpack.i.bf16 %v65_v22, %v64_v21  ;;  %v68_v29 = vld [vmem:[%s18098_s0 + $0xc0] sm:$0xff]  ;;  %v69_v30 = vld [vmem:[%s18098_s0 + $0xc8] sm:$0xff] }
  0x75   :  { %9337 = vrot.lane.b32.xlu0 %v9336_v45, %s11733_s25  ;;  %v9396_v27 = vpack.i.bf16 %v63_v25, %v62_v24  ;;  %v66_v32 = vld [vmem:[%s18098_s0 + $0xa8] sm:$0xff]  ;;  %v67_v33 = vld [vmem:[%s18098_s0 + $0xb0] sm:$0xff]  ;;  %v9411_v34 = vpack.i.bf16 %v69_v30, %v68_v29  ;;  %v73_v38 = vld [vmem:[%s18098_s0 + $0xf8] sm:$0xff] }
  0x76   :  { %v12252_v54 = vpop.permute.xlu1 %9067  ;;  %v9406_v35 = vpack.i.bf16 %v67_v33, %v66_v32  ;;  %v72_v37 = vld [vmem:[%s18098_s0 + $0xf0] sm:$0xff]  ;;  %v70_v40 = vld [vmem:[%s18098_s0 + $0xd8] sm:$0xff]  ;;  %v71_v41 = vld [vmem:[%s18098_s0 + $0xe0] sm:$0xff] }
  0x77   :  { %18281 = vst [vmem:[#allocation6_spill] sm:$0xff] %v12252_v54  ;;  %v12260_v57 = vpop.permute.xlu0 %9057  ;;  %v9421_v42 = vpack.i.bf16 %v73_v38, %v72_v37  ;;  %v9416_v43 = vpack.i.bf16 %v71_v41, %v70_v40  ;;  %v76_v45 = vld [vmem:[%s18098_s0 + $0x120] sm:$0xff]  ;;  %v77_v46 = vld [vmem:[%s18098_s0 + $0x128] sm:$0xff]  ;;  %v75_v49 = vld [vmem:[%s18098_s0 + $0x110] sm:$0xff] }
  0x78   :  { %18282 = vst [vmem:[#allocation7_spill] sm:$0xff] %v12260_v57  ;;  %9352 = vrot.lane.b32.xlu1 %v9351_v50, %s11733_s25  ;;  %v74_v48 = vld [vmem:[%s18098_s0 + $0x108] sm:$0xff]  ;;  %v9431_v50 = vpack.i.bf16 %v77_v46, %v76_v45  ;;  %v80_v53 = vld [vmem:[%s18098_s0 + $0x150] sm:$0xff]  ;;  %v81_v55 = vld [vmem:[%s18098_s0 + $0x158] sm:$0xff] }
  0x79   :  { %9347 = vrot.lane.b32.xlu0 %v9346_v51, %s11733_s25  ;;  %v9426_v51 = vpack.i.bf16 %v75_v49, %v74_v48  ;;  %v9441_v60 = vpack.i.bf16 %v81_v55, %v80_v53  ;;  %v8295_v63 = vld [vmem:[%s18098_s0 + $0x180] sm:$0xff]  ;;  %v8296_v0 = vld [vmem:[%s18098_s0 + $0x188] sm:$0xff]  ;;  %v83_v6 = vld [vmem:[%s18098_s0 + $0x170] sm:$0xff] }
  0x7a   :  { %v12270_v62 = vpop.permute.xlu1 %9072  ;;  %v82_v5 = vld [vmem:[%s18098_s0 + $0x168] sm:$0xff]  ;;  %v9451_v8 = vpack.i.bf16 %v8296_v0, %v8295_v63  ;;  %v12448_v17 = vld [vmem:[%s18098_s0 + $0x1d0] sm:$0xff]  ;;  %v12466_v24 = vld [vmem:[%s18098_s0 + $0x218] sm:$0xff] }
  0x7b   :  { %18283 = vst [vmem:[#allocation8_spill] sm:$0xff] %v12270_v62  ;;  %v12278_v1 = vpop.permute.xlu0 %9062  ;;  %v9446_v9 = vpack.i.bf16 %v83_v6, %v82_v5  ;;  %v12436_v13 = vld [vmem:[%s18098_s0 + $0x1e8] sm:$0xff]  ;;  %v12461_v22 = vld [vmem:[%s18098_s0 + $0x210] sm:$0xff]  ;;  %v12491_v33 = vld [vmem:[%s18098_s0 + $0x240] sm:$0xff] }
  0x7c   :  { %18284 = vst [vmem:[#allocation9_spill] sm:$0xff] %v12278_v1  ;;  %9362 = vrot.lane.b32.xlu1 %v9361_v58, %s11733_s25  ;;  %v78_v58 = vld [vmem:[%s18098_s0 + $0x138] sm:$0xff]  ;;  %v12443_v16 = vld [vmem:[%s18098_s0 + $0x1c8] sm:$0xff]  ;;  %v9471_v29 = vpack.i.bf16 %v12466_v24, %v12461_v22  ;;  %v12508_v38 = vld [vmem:[%s18098_s0 + $0x230] sm:$0xff] }
  0x7d   :  { %9357 = vrot.lane.b32.xlu0 %v9356_v59, %s11733_s25  ;;  %v79_v59 = vld [vmem:[%s18098_s0 + $0x140] sm:$0xff]  ;;  %v12503_v37 = vld [vmem:[%s18098_s0 + $0x228] sm:$0xff]  ;;  %v12526_v45 = vld [vmem:[%s18098_s0 + $0x278] sm:$0xff] }
  0x7e   :  { %v12282_v4 = vpop.permute.xlu1 %9082  ;;  %v9436_v61 = vpack.i.bf16 %v79_v59, %v78_v58  ;;  %v9476_v41 = vpack.i.bf16 %v12508_v38, %v12503_v37  ;;  %v12533_v48 = vld [vmem:[%s18098_s0 + $0x258] sm:$0xff]  ;;  %v12538_v49 = vld [vmem:[%s18098_s0 + $0x260] sm:$0xff]  ;;  %v12556_v58 = vld [vmem:[%s18098_s0 + $0x2a8] sm:$0xff] }
  0x7f   :  { %18285 = vst [vmem:[#allocation10_spill] sm:$0xff] %v12282_v4  ;;  %v12290_v7 = vpop.permute.xlu0 %9077  ;;  %v12551_v55 = vld [vmem:[%s18098_s0 + $0x2a0] sm:$0xff]  ;;  %18298 = vst [vmem:[#allocation23_spill] sm:$0xff] %v12556_v58  ;;  %v12581_v6 = vld [vmem:[%s18098_s0 + $0x2d0] sm:$0xff] }
  0x80   :  { %18286 = vst [vmem:[#allocation11_spill] sm:$0xff] %v12290_v7  ;;  %9372 = vrot.lane.b32.xlu1 %v9371_v2, %s11733_s25  ;;  %18297 = vst [vmem:[#allocation22_spill] sm:$0xff] %v12551_v55  ;;  %v9501_v63 = vpack.i.bf16 %v12556_v58, %v12551_v55  ;;  %v8357_v4 = vld [vmem:[%s18098_s0 + $0x169] sm:$0xff]  ;;  %v8365_v54 = vld [vmem:[%s18098_s0 + $0x1f9] sm:$0xff] }
  0x81   :  { %9367 = vrot.lane.b32.xlu0 %v9366_v3, %s11733_s25  ;;  %18300 = vst [vmem:[#allocation25_spill] sm:$0xff] %v12581_v6  ;;  %v8361_v62 = vld [vmem:[%s18098_s0 + $0x1c9] sm:$0xff] }
  0x82   :  { %v12300_v12 = vpop.permute.xlu1 %9092 }
  0x83   :  { %18287 = vst [vmem:[#allocation12_spill] sm:$0xff] %v12300_v12  ;;  %v12308_v15 = vpop.permute.xlu0 %9087 }
  0x84   :  { %18288 = vst [vmem:[#allocation13_spill] sm:$0xff] %v12308_v15  ;;  %9382 = vrot.lane.b32.xlu1 %v9381_v10, %s11734_s19  ;;  %v8336_v15 = vld [vmem:[%s18098_s0 + $0x69] sm:$0xff] }
  0x85   :  { %9377 = vrot.lane.b32.xlu0 %v9376_v11, %s11734_s19  ;;  %v12431_v11 = vld [vmem:[%s18098_s0 + $0x1e0] sm:$0xff] }
  0x86   :  { %v12318_v20 = vpop.permute.xlu1 %9102 }
  0x87   :  { %18289 = vst [vmem:[#allocation14_spill] sm:$0xff] %v12318_v20  ;;  %v12326_v23 = vpop.permute.xlu0 %9097 }
  0x88   :  { %18290 = vst [vmem:[#allocation15_spill] sm:$0xff] %v12326_v23  ;;  %9392 = vrot.lane.b32.xlu1 %v9391_v18, %s11734_s19  ;;  %v9461_v18 = vpack.i.bf16 %v12436_v13, %v12431_v11 }
  0x89   :  { %9387 = vrot.lane.b32.xlu0 %v9386_v19, %s11734_s19  ;;  %v9456_v19 = vpack.i.bf16 %v12448_v17, %v12443_v16 }
  0x8a   :  { %v12336_v28 = vpop.permute.xlu1 %9112 }
  0x8b   :  { %18291 = vst [vmem:[#allocation16_spill] sm:$0xff] %v12336_v28  ;;  %v12344_v31 = vpop.permute.xlu0 %9107  ;;  %v8332_v28 = vld [vmem:[%s18098_s0 + $0x39] sm:$0xff] }
  0x8c   :  { %18292 = vst [vmem:[#allocation17_spill] sm:$0xff] %v12344_v31  ;;  %9402 = vrot.lane.b32.xlu1 %v9401_v26, %s11734_s19  ;;  %v12473_v26 = vld [vmem:[%s18098_s0 + $0x1f8] sm:$0xff] }
  0x8d   :  { %9397 = vrot.lane.b32.xlu0 %v9396_v27, %s11734_s19  ;;  %v12478_v27 = vld [vmem:[%s18098_s0 + $0x200] sm:$0xff] }
  0x8e   :  { %v12354_v36 = vpop.permute.xlu1 %9122  ;;  %v9466_v30 = vpack.i.bf16 %v12478_v27, %v12473_v26 }
  0x8f   :  { %18293 = vst [vmem:[#allocation18_spill] sm:$0xff] %v12354_v36  ;;  %v12362_v39 = vpop.permute.xlu0 %9117 }
  0x90   :  { %18294 = vst [vmem:[#allocation19_spill] sm:$0xff] %v12362_v39  ;;  %9412 = vrot.lane.b32.xlu1 %v9411_v34, %s11734_s19  ;;  %v12496_v34 = vld [vmem:[%s18098_s0 + $0x248] sm:$0xff] }
  0x91   :  { %9407 = vrot.lane.b32.xlu0 %v9406_v35, %s11734_s19  ;;  %v9481_v40 = vpack.i.bf16 %v12496_v34, %v12491_v33 }
  0x92   :  { %v12372_v44 = vpop.permute.xlu1 %9132 }
  0x93   :  { %18295 = vst [vmem:[#allocation20_spill] sm:$0xff] %v12372_v44  ;;  %v12380_v47 = vpop.permute.xlu0 %9127  ;;  %v8328_v44 = vld [vmem:[%s18098_s0 + $0x338] sm:$0xff] }
  0x94   :  { %18296 = vst [vmem:[#allocation21_spill] sm:$0xff] %v12380_v47  ;;  %9422 = vrot.lane.b32.xlu1 %v9421_v42, %s11734_s19  ;;  %v8327_v47 = vld [vmem:[%s18098_s0 + $0x330] sm:$0xff] }
  0x95   :  { %9417 = vrot.lane.b32.xlu0 %v9416_v43, %s11734_s19  ;;  %v12521_v43 = vld [vmem:[%s18098_s0 + $0x270] sm:$0xff]  ;;  %v9531_v31 = vpack.i.bf16 %v8328_v44, %v8327_v47  ;;  %v8330_v44 = vld [vmem:[%s18098_s0 + $0x21] sm:$0xff] }
  0x96   :  { %v12390_v52 = vpop.permute.xlu1 %9142 }
  0x97   :  { %v12398_v56 = vpop.permute.xlu0 %9137 }
  0x98   :  { %9432 = vrot.lane.b32.xlu1 %v9431_v50, %s11734_s19  ;;  %v9491_v50 = vpack.i.bf16 %v12526_v45, %v12521_v43 }
  0x99   :  { %9427 = vrot.lane.b32.xlu0 %v9426_v51, %s11734_s19  ;;  %v9486_v51 = vpack.i.bf16 %v12538_v49, %v12533_v48 }
  0x9a   :  { %v12414_v2 = vpop.permute.xlu1 %9152 }
  0x9b   :  { %v12416_v3 = vpop.permute.xlu0 %9147  ;;  %v9155_v58 = vunpack.i.h.bf16 %v12414_v2  ;;  %v9154_v55 = vunpack.i.l.bf16 %v12414_v2  ;;  %v13090_v2 = vld [vmem:[%s18098_s0 + $0x142] sm:$0xff] }
  0x9c   :  { %9442 = vrot.lane.b32.xlu1 %v9441_v60, %s11734_s19  ;;  %v12563_v60 = vld [vmem:[%s18098_s0 + $0x288] sm:$0xff] }
  0x9d   :  { %9437 = vrot.lane.b32.xlu0 %v9436_v61, %s11734_s19  ;;  %v12568_v61 = vld [vmem:[%s18098_s0 + $0x290] sm:$0xff] }
  0x9e   :  { %v12426_v10 = vpop.permute.xlu1 %9162  ;;  %v9496_v0 = vpack.i.bf16 %v12568_v61, %v12563_v60 }
  0x9f   :  { %v12438_v14 = vpop.permute.xlu0 %9157 }
  0xa0   :  { %9452 = vrot.lane.b32.xlu1 %v9451_v8, %s11734_s19  ;;  %v12586_v8 = vld [vmem:[%s18098_s0 + $0x2d8] sm:$0xff] }
  0xa1   :  { %9447 = vrot.lane.b32.xlu0 %v9446_v9, %s11734_s19  ;;  %18301 = vst [vmem:[#allocation26_spill] sm:$0xff] %v12586_v8 }
  0xa2   :  { %v12456_v21 = vpop.permute.xlu1 %9172 }
  0xa3   :  { %v12468_v25 = vpop.permute.xlu0 %9167 }
  0xa4   :  { %9462 = vrot.lane.b32.xlu1 %v9461_v18, %s11734_s19  ;;  %v12593_v18 = vld [vmem:[%s18098_s0 + $0x2b8] sm:$0xff] }
  0xa5   :  { %9457 = vrot.lane.b32.xlu0 %v9456_v19, %s11734_s19  ;;  %v12598_v19 = vld [vmem:[%s18098_s0 + $0x2c0] sm:$0xff] }
  0xa6   :  { %v12486_v32 = vpop.permute.xlu1 %9182  ;;  %18303 = vst [vmem:[#allocation28_spill] sm:$0xff] %v12598_v19 }
  0xa7   :  { %v12498_v35 = vpop.permute.xlu0 %9177 }
  0xa8   :  { %9472 = vrot.lane.b32.xlu1 %v9471_v29, %s11734_s19  ;;  %v9511_v29 = vpack.i.bf16 %v12586_v8, %v12581_v6  ;;  %v8412_v6 = vld [vmem:[%s18098_s0 + $0xfa] sm:$0xff] }
  0xa9   :  { %9467 = vrot.lane.b32.xlu0 %v9466_v30, %s11734_s19  ;;  %v9506_v30 = vpack.i.bf16 %v12598_v19, %v12593_v18  ;;  %v9150_v19 = vunpack.i.h.bf16 %v12416_v3 }
  0xaa   :  { %v12516_v42 = vpop.permute.xlu1 %9192 }
  0xab   :  { %v12528_v46 = vpop.permute.xlu0 %9187 }
  0xac   :  { %9482 = vrot.lane.b32.xlu1 %v9481_v40, %s11734_s19 }
  0xad   :  { %9477 = vrot.lane.b32.xlu0 %v9476_v41, %s11734_s19  ;;  %v12611_v41 = vld [vmem:[%s18098_s0 + $0x300] sm:$0xff] }
  0xae   :  { %v12546_v53 = vpop.permute.xlu1 %9202  ;;  %18305 = vst [vmem:[#allocation30_spill] sm:$0xff] %v12611_v41 }
  0xaf   :  { %v12558_v59 = vpop.permute.xlu0 %9197 }
  0xb0   :  { %9492 = vrot.lane.b32.xlu1 %v9491_v50, %s11734_s19  ;;  %v12616_v50 = vld [vmem:[%s18098_s0 + $0x308] sm:$0xff] }
  0xb1   :  { %9487 = vrot.lane.b32.xlu0 %v9486_v51, %s11734_s19  ;;  %18306 = vst [vmem:[#allocation31_spill] sm:$0xff] %v12616_v50 }
  0xb2   :  { %v12576_v5 = vpop.permute.xlu1 %9212 }
  0xb3   :  { %18299 = vst [vmem:[#allocation24_spill] sm:$0xff] %v12576_v5  ;;  %v12588_v9 = vpop.permute.xlu0 %9207 }
  0xb4   :  { %18302 = vst [vmem:[#allocation27_spill] sm:$0xff] %v12588_v9  ;;  %9502 = vrot.lane.b32.xlu1 %v9501_v63, %s11734_s19  ;;  %v12623_v63 = vld [vmem:[%s18098_s0 + $0x2e8] sm:$0xff] }
  0xb5   :  { %9497 = vrot.lane.b32.xlu0 %v9496_v0, %s11734_s19  ;;  %18308 = vst [vmem:[#allocation33_spill] sm:$0xff] %v12623_v63  ;;  %v12628_v0 = vld [vmem:[%s18098_s0 + $0x2f0] sm:$0xff] }
  0xb6   :  { %v12606_v40 = vpop.permute.xlu1 %9222  ;;  %18309 = vst [vmem:[#allocation34_spill] sm:$0xff] %v12628_v0  ;;  %v8405_v9 = vld [vmem:[%s18098_s0 + $0xaa] sm:$0xff] }
  0xb7   :  { %18304 = vst [vmem:[#allocation29_spill] sm:$0xff] %v12606_v40  ;;  %v12618_v51 = vpop.permute.xlu0 %9217  ;;  %v9521_v40 = vpack.i.bf16 %v12616_v50, %v12611_v41  ;;  %v8369_v41 = vld [vmem:[%s18098_s0 + $0x229] sm:$0xff] }
  0xb8   :  { %18307 = vst [vmem:[#allocation32_spill] sm:$0xff] %v12618_v51  ;;  %9512 = vrot.lane.b32.xlu1 %v9511_v29, %s11734_s19  ;;  %v9516_v51 = vpack.i.bf16 %v12628_v0, %v12623_v63  ;;  %v12649_v29 = vld [vmem:[%s18098_s0 + $0x318] sm:$0xff]  ;;  %v8410_v63 = vld [vmem:[%s18098_s0 + $0xe2] sm:$0xff] }
  0xb9   :  { %9507 = vrot.lane.b32.xlu0 %v9506_v30, %s11734_s19  ;;  %18312 = vst [vmem:[#allocation37_spill] sm:$0xff] %v12649_v29  ;;  %v12654_v30 = vld [vmem:[%s18098_s0 + $0x320] sm:$0xff] }
  0xba   :  { %v12642_v39 = vpop.permute.xlu1 %9232  ;;  %18313 = vst [vmem:[#allocation38_spill] sm:$0xff] %v12654_v30  ;;  %v8409_v0 = vld [vmem:[%s18098_s0 + $0xda] sm:$0xff] }
  0xbb   :  { %18310 = vst [vmem:[#allocation35_spill] sm:$0xff] %v12642_v39  ;;  %v12644_v36 = vpop.permute.xlu0 %9227  ;;  %v9526_v39 = vpack.i.bf16 %v12654_v30, %v12649_v29 }
  0xbc   :  { %18311 = vst [vmem:[#allocation36_spill] sm:$0xff] %v12644_v36  ;;  %9522 = vrot.lane.b32.xlu1 %v9521_v40, %s11734_s19  ;;  %v8331_v36 = vld [vmem:[%s18098_s0 + $0x31] sm:$0xff]  ;;  %v8329_v40 = vld [vmem:[%s18098_s0 + $0x19] sm:$0xff] }
  0xbd   :  { %9517 = vrot.lane.b32.xlu0 %v9516_v51, %s11734_s19  ;;  %v9541_v51 = vpack.i.bf16 %v8332_v28, %v8331_v36  ;;  %v9536_v20 = vpack.i.bf16 %v8330_v44, %v8329_v40  ;;  %v8334_v28 = vld [vmem:[%s18098_s0 + $0x51] sm:$0xff]  ;;  %v8340_v44 = vld [vmem:[%s18098_s0 + $0x99] sm:$0xff] }
  0xbe   :  { %v12666_v23 = vpop.permute.xlu1 %9242  ;;  %v8339_v40 = vld [vmem:[%s18098_s0 + $0x91] sm:$0xff] }
  0xbf   :  { %18314 = vst [vmem:[#allocation39_spill] sm:$0xff] %v12666_v23  ;;  %v12674_v47 = vpop.permute.xlu0 %9237  ;;  %v8335_v23 = vld [vmem:[%s18098_s0 + $0x61] sm:$0xff] }
  0xc0   :  { %18315 = vst [vmem:[#allocation40_spill] sm:$0xff] %v12674_v47  ;;  %9532 = vrot.lane.b32.xlu1 %v9531_v31, %s11734_s19  ;;  %v8333_v47 = vld [vmem:[%s18098_s0 + $0x49] sm:$0xff]  ;;  %v9551_v36 = vpack.i.bf16 %v8336_v15, %v8335_v23  ;;  %v8338_v15 = vld [vmem:[%s18098_s0 + $0x81] sm:$0xff]  ;;  %v9561_v23 = vpack.i.bf16 %v8340_v44, %v8339_v40  ;;  %v8347_v44 = vld [vmem:[%s18098_s0 + $0xf1] sm:$0xff] }
  0xc1   :  { %9527 = vrot.lane.b32.xlu0 %v9526_v39, %s11734_s19  ;;  %s11735_s19 = smov 16   ;;  %v9546_v39 = vpack.i.bf16 %v8334_v28, %v8333_v47  ;;  %v8344_v28 = vld [vmem:[%s18098_s0 + $0xc9] sm:$0xff] }
  0xc2   :  { %v12684_v12 = vpop.permute.xlu1 %9252 }
  0xc3   :  { %18316 = vst [vmem:[#allocation41_spill] sm:$0xff] %v12684_v12  ;;  %v12692_v31 = vpop.permute.xlu0 %9247 }
  0xc4   :  { %18317 = vst [vmem:[#allocation42_spill] sm:$0xff] %v12692_v31  ;;  %9542 = vrot.lane.b32.xlu1 %v9541_v51, %s11735_s19  ;;  %v8337_v31 = vld [vmem:[%s18098_s0 + $0x79] sm:$0xff]  ;;  %v8343_v51 = vld [vmem:[%s18098_s0 + $0xc1] sm:$0xff] }
  0xc5   :  { %9537 = vrot.lane.b32.xlu0 %v9536_v20, %s11735_s19  ;;  %v9556_v47 = vpack.i.bf16 %v8338_v15, %v8337_v31  ;;  %v9571_v31 = vpack.i.bf16 %v8344_v28, %v8343_v51  ;;  %v8348_v15 = vld [vmem:[%s18098_s0 + $0xf9] sm:$0xff]  ;;  %v8351_v28 = vld [vmem:[%s18098_s0 + $0x121] sm:$0xff] }
  0xc6   :  { %v12702_v12 = vpop.permute.xlu1 %9262 }
  0xc7   :  { %18318 = vst [vmem:[#allocation43_spill] sm:$0xff] %v12702_v12  ;;  %v12710_v20 = vpop.permute.xlu0 %9257 }
  0xc8   :  { %18319 = vst [vmem:[#allocation44_spill] sm:$0xff] %v12710_v20  ;;  %9552 = vrot.lane.b32.xlu1 %v9551_v36, %s11735_s19  ;;  %v8341_v20 = vld [vmem:[%s18098_s0 + $0xa9] sm:$0xff]  ;;  %v8342_v36 = vld [vmem:[%s18098_s0 + $0xb1] sm:$0xff] }
  0xc9   :  { %9547 = vrot.lane.b32.xlu0 %v9546_v39, %s11735_s19  ;;  %v9566_v40 = vpack.i.bf16 %v8342_v36, %v8341_v20  ;;  %v9581_v20 = vpack.i.bf16 %v8348_v15, %v8347_v44  ;;  %v8352_v36 = vld [vmem:[%s18098_s0 + $0x129] sm:$0xff]  ;;  %v8355_v15 = vld [vmem:[%s18098_s0 + $0x151] sm:$0xff] }
  0xca   :  { %v12720_v12 = vpop.permute.xlu1 %9272 }
  0xcb   :  { %18320 = vst [vmem:[#allocation45_spill] sm:$0xff] %v12720_v12  ;;  %v12728_v39 = vpop.permute.xlu0 %9267 }
  0xcc   :  { %18321 = vst [vmem:[#allocation46_spill] sm:$0xff] %v12728_v39  ;;  %9562 = vrot.lane.b32.xlu1 %v9561_v23, %s11735_s19  ;;  %v8345_v39 = vld [vmem:[%s18098_s0 + $0xd9] sm:$0xff]  ;;  %v8346_v23 = vld [vmem:[%s18098_s0 + $0xe1] sm:$0xff] }
  0xcd   :  { %9557 = vrot.lane.b32.xlu0 %v9556_v47, %s11735_s19  ;;  %v9576_v51 = vpack.i.bf16 %v8346_v23, %v8345_v39  ;;  %v9591_v39 = vpack.i.bf16 %v8352_v36, %v8351_v28  ;;  %v8356_v23 = vld [vmem:[%s18098_s0 + $0x159] sm:$0xff]  ;;  %v8359_v36 = vld [vmem:[%s18098_s0 + $0x181] sm:$0xff] }
  0xce   :  { %v12738_v12 = vpop.permute.xlu1 %9282 }
  0xcf   :  { %18322 = vst [vmem:[#allocation47_spill] sm:$0xff] %v12738_v12  ;;  %v12746_v47 = vpop.permute.xlu0 %9277 }
  0xd0   :  { %18323 = vst [vmem:[#allocation48_spill] sm:$0xff] %v12746_v47  ;;  %9572 = vrot.lane.b32.xlu1 %v9571_v31, %s11735_s19  ;;  %v8349_v47 = vld [vmem:[%s18098_s0 + $0x109] sm:$0xff]  ;;  %v8350_v31 = vld [vmem:[%s18098_s0 + $0x111] sm:$0xff] }
  0xd1   :  { %9567 = vrot.lane.b32.xlu0 %v9566_v40, %s11735_s19  ;;  %v9586_v44 = vpack.i.bf16 %v8350_v31, %v8349_v47  ;;  %v9601_v47 = vpack.i.bf16 %v8356_v23, %v8355_v15  ;;  %v8360_v31 = vld [vmem:[%s18098_s0 + $0x189] sm:$0xff]  ;;  %v8363_v23 = vld [vmem:[%s18098_s0 + $0x1e1] sm:$0xff] }
  0xd2   :  { %v12756_v12 = vpop.permute.xlu1 %9292 }
  0xd3   :  { %18324 = vst [vmem:[#allocation49_spill] sm:$0xff] %v12756_v12  ;;  %v12764_v40 = vpop.permute.xlu0 %9287 }
  0xd4   :  { %18325 = vst [vmem:[#allocation50_spill] sm:$0xff] %v12764_v40  ;;  %9582 = vrot.lane.b32.xlu1 %v9581_v20, %s11735_s19  ;;  %v8353_v40 = vld [vmem:[%s18098_s0 + $0x139] sm:$0xff]  ;;  %v8354_v20 = vld [vmem:[%s18098_s0 + $0x141] sm:$0xff] }
  0xd5   :  { %9577 = vrot.lane.b32.xlu0 %v9576_v51, %s11735_s19  ;;  %v9596_v28 = vpack.i.bf16 %v8354_v20, %v8353_v40  ;;  %v9611_v40 = vpack.i.bf16 %v8360_v31, %v8359_v36  ;;  %v8364_v20 = vld [vmem:[%s18098_s0 + $0x1e9] sm:$0xff]  ;;  %v8367_v31 = vld [vmem:[%s18098_s0 + $0x211] sm:$0xff] }
  0xd6   :  { %v12774_v12 = vpop.permute.xlu1 %9302 }
  0xd7   :  { %18326 = vst [vmem:[#allocation51_spill] sm:$0xff] %v12774_v12  ;;  %v12782_v51 = vpop.permute.xlu0 %9297  ;;  %v9139_v12 = vunpack.i.l.bf16 %v12398_v56 }
  0xd8   :  { %18327 = vst [vmem:[#allocation52_spill] sm:$0xff] %v12782_v51  ;;  %9592 = vrot.lane.b32.xlu1 %v9591_v39, %s11735_s19  ;;  %v8358_v39 = vld [vmem:[%s18098_s0 + $0x171] sm:$0xff]  ;;  %v9145_v51 = vunpack.i.h.bf16 %v12390_v52 }
  0xd9   :  { %9587 = vrot.lane.b32.xlu0 %v9586_v44, %s11735_s19  ;;  %v9606_v15 = vpack.i.bf16 %v8358_v39, %v8357_v4  ;;  %v9621_v4 = vpack.i.bf16 %v8364_v20, %v8363_v23  ;;  %v8368_v39 = vld [vmem:[%s18098_s0 + $0x219] sm:$0xff]  ;;  %v8371_v20 = vld [vmem:[%s18098_s0 + $0x241] sm:$0xff] }
  0xda   :  { %v12792_v7 = vpop.permute.xlu1 %9312 }
  0xdb   :  { %18328 = vst [vmem:[#allocation53_spill] sm:$0xff] %v12792_v7  ;;  %v12800_v44 = vpop.permute.xlu0 %9307  ;;  %v8401_v7 = vld [vmem:[%s18098_s0 + $0x7a] sm:$0xff] }
  0xdc   :  { %18329 = vst [vmem:[#allocation54_spill] sm:$0xff] %v12800_v44  ;;  %9602 = vrot.lane.b32.xlu1 %v9601_v47, %s11735_s19  ;;  %v8362_v47 = vld [vmem:[%s18098_s0 + $0x1d1] sm:$0xff]  ;;  %v8404_v44 = vld [vmem:[%s18098_s0 + $0x9a] sm:$0xff] }
  0xdd   :  { %9597 = vrot.lane.b32.xlu0 %v9596_v28, %s11735_s19  ;;  %v9616_v36 = vpack.i.bf16 %v8362_v47, %v8361_v62  ;;  %v9631_v62 = vpack.i.bf16 %v8368_v39, %v8367_v31  ;;  %v8372_v47 = vld [vmem:[%s18098_s0 + $0x249] sm:$0xff]  ;;  %v8375_v39 = vld [vmem:[%s18098_s0 + $0x271] sm:$0xff] }
  0xde   :  { %v12810_v1 = vpop.permute.xlu1 %9322 }
  0xdf   :  { %18330 = vst [vmem:[#allocation55_spill] sm:$0xff] %v12810_v1  ;;  %v12818_v28 = vpop.permute.xlu0 %9317 }
  0xe0   :  { %18331 = vst [vmem:[#allocation56_spill] sm:$0xff] %v12818_v28  ;;  %9612 = vrot.lane.b32.xlu1 %v9611_v40, %s11735_s19  ;;  %v8366_v40 = vld [vmem:[%s18098_s0 + $0x201] sm:$0xff]  ;;  %v8398_v28 = vld [vmem:[%s18098_s0 + $0x52] sm:$0xff] }
  0xe1   :  { %9607 = vrot.lane.b32.xlu0 %v9606_v15, %s11735_s19  ;;  %v9626_v23 = vpack.i.bf16 %v8366_v40, %v8365_v54  ;;  %v9641_v54 = vpack.i.bf16 %v8372_v47, %v8371_v20  ;;  %v8376_v40 = vld [vmem:[%s18098_s0 + $0x279] sm:$0xff]  ;;  %v8379_v47 = vld [vmem:[%s18098_s0 + $0x2a1] sm:$0xff] }
  0xe2   :  { %v12828_v57 = vpop.permute.xlu1 %9332 }
  0xe3   :  { %18332 = vst [vmem:[#allocation57_spill] sm:$0xff] %v12828_v57  ;;  %v12836_v15 = vpop.permute.xlu0 %9327  ;;  %v8397_v57 = vld [vmem:[%s18098_s0 + $0x4a] sm:$0xff] }
  0xe4   :  { %18333 = vst [vmem:[#allocation58_spill] sm:$0xff] %v12836_v15  ;;  %9622 = vrot.lane.b32.xlu1 %v9621_v4, %s11735_s19  ;;  %v8370_v4 = vld [vmem:[%s18098_s0 + $0x231] sm:$0xff] }
  0xe5   :  { %9617 = vrot.lane.b32.xlu0 %v9616_v36, %s11735_s19  ;;  %v9636_v31 = vpack.i.bf16 %v8370_v4, %v8369_v41  ;;  %v9651_v41 = vpack.i.bf16 %v8376_v40, %v8375_v39  ;;  %v8380_v4 = vld [vmem:[%s18098_s0 + $0x2a9] sm:$0xff]  ;;  %v8383_v40 = vld [vmem:[%s18098_s0 + $0x2d1] sm:$0xff] }
  0xe6   :  { %v12846_v50 = vpop.permute.xlu1 %9342  ;;  %v8400_v15 = vld [vmem:[%s18098_s0 + $0x6a] sm:$0xff] }
  0xe7   :  { %18334 = vst [vmem:[#allocation59_spill] sm:$0xff] %v12846_v50  ;;  %v12854_v36 = vpop.permute.xlu0 %9337 }
  0xe8   :  { %18335 = vst [vmem:[#allocation60_spill] sm:$0xff] %v12854_v36  ;;  %9632 = vrot.lane.b32.xlu1 %v9631_v62, %s11735_s19  ;;  %v8373_v36 = vld [vmem:[%s18098_s0 + $0x259] sm:$0xff]  ;;  %v8374_v62 = vld [vmem:[%s18098_s0 + $0x261] sm:$0xff] }
  0xe9   :  { %9627 = vrot.lane.b32.xlu0 %v9626_v23, %s11735_s19  ;;  %v9646_v20 = vpack.i.bf16 %v8374_v62, %v8373_v36  ;;  %v9661_v36 = vpack.i.bf16 %v8380_v4, %v8379_v47  ;;  %v8384_v62 = vld [vmem:[%s18098_s0 + $0x2d9] sm:$0xff]  ;;  %v8387_v4 = vld [vmem:[%s18098_s0 + $0x301] sm:$0xff] }
  0xea   :  { %v12864_v50 = vpop.permute.xlu1 %9352 }
  0xeb   :  { %18336 = vst [vmem:[#allocation61_spill] sm:$0xff] %v12864_v50  ;;  %v12872_v23 = vpop.permute.xlu0 %9347 }
  0xec   :  { %18337 = vst [vmem:[#allocation62_spill] sm:$0xff] %v12872_v23  ;;  %9642 = vrot.lane.b32.xlu1 %v9641_v54, %s11735_s19  ;;  %v8377_v23 = vld [vmem:[%s18098_s0 + $0x289] sm:$0xff]  ;;  %v8378_v54 = vld [vmem:[%s18098_s0 + $0x291] sm:$0xff] }
  0xed   :  { %9637 = vrot.lane.b32.xlu0 %v9636_v31, %s11735_s19  ;;  %v9656_v39 = vpack.i.bf16 %v8378_v54, %v8377_v23  ;;  %v9671_v23 = vpack.i.bf16 %v8384_v62, %v8383_v40  ;;  %v8388_v54 = vld [vmem:[%s18098_s0 + $0x309] sm:$0xff]  ;;  %v8391_v40 = vld [vmem:[%s18098_s0 + $0x331] sm:$0xff] }
  0xee   :  { %v12882_v50 = vpop.permute.xlu1 %9362 }
  0xef   :  { %18338 = vst [vmem:[#allocation63_spill] sm:$0xff] %v12882_v50  ;;  %v12890_v31 = vpop.permute.xlu0 %9357 }
  0xf0   :  { %18339 = vst [vmem:[#allocation64_spill] sm:$0xff] %v12890_v31  ;;  %9652 = vrot.lane.b32.xlu1 %v9651_v41, %s11735_s19  ;;  %v8381_v31 = vld [vmem:[%s18098_s0 + $0x2b9] sm:$0xff]  ;;  %v8382_v41 = vld [vmem:[%s18098_s0 + $0x2c1] sm:$0xff] }
  0xf1   :  { %9647 = vrot.lane.b32.xlu0 %v9646_v20, %s11735_s19  ;;  %v9666_v47 = vpack.i.bf16 %v8382_v41, %v8381_v31  ;;  %v9681_v31 = vpack.i.bf16 %v8388_v54, %v8387_v4  ;;  %v8392_v41 = vld [vmem:[%s18098_s0 + $0x339] sm:$0xff] }
  0xf2   :  { %v12900_v50 = vpop.permute.xlu1 %9372  ;;  %v8395_v54 = vld [vmem:[%s18098_s0 + $0x32] sm:$0xff]  ;;  %v9691_v1 = vpack.i.bf16 %v8392_v41, %v8391_v40  ;;  %v8407_v40 = vld [vmem:[%s18098_s0 + $0xc2] sm:$0xff]  ;;  %v8408_v41 = vld [vmem:[%s18098_s0 + $0xca] sm:$0xff] }
  0xf3   :  { %18340 = vst [vmem:[#allocation65_spill] sm:$0xff] %v12900_v50  ;;  %v12908_v20 = vpop.permute.xlu0 %9367 }
  0xf4   :  { %18341 = vst [vmem:[#allocation66_spill] sm:$0xff] %v12908_v20  ;;  %9662 = vrot.lane.b32.xlu1 %v9661_v36, %s11735_s19  ;;  %v8385_v20 = vld [vmem:[%s18098_s0 + $0x2e9] sm:$0xff]  ;;  %v8386_v36 = vld [vmem:[%s18098_s0 + $0x2f1] sm:$0xff] }
  0xf5   :  { %9657 = vrot.lane.b32.xlu0 %v9656_v39, %s11735_s19  ;;  %v9676_v62 = vpack.i.bf16 %v8386_v36, %v8385_v20  ;;  %v8396_v20 = vld [vmem:[%s18098_s0 + $0x3a] sm:$0xff]  ;;  %v12958_v36 = vld [vmem:[%s18098_s0 + $0x22] sm:$0xff] }
  0xf6   :  { %v12918_v50 = vpop.permute.xlu1 %9382  ;;  %v13007_v8 = vpack.i.bf16 %v8396_v20, %v8395_v54  ;;  %v9144_v54 = vunpack.i.l.bf16 %v12390_v52 }
  0xf7   :  { %18342 = vst [vmem:[#allocation67_spill] sm:$0xff] %v12918_v50  ;;  %v12926_v39 = vpop.permute.xlu0 %9377  ;;  %v8389_v50 = vld [vmem:[%s18098_s0 + $0x319] sm:$0xff] }
  0xf8   :  { %18343 = vst [vmem:[#allocation68_spill] sm:$0xff] %v12926_v39  ;;  %9672 = vrot.lane.b32.xlu1 %v9671_v23, %s11735_s19  ;;  %v8390_v23 = vld [vmem:[%s18098_s0 + $0x321] sm:$0xff]  ;;  %18348 = vst [vmem:[#allocation73_spill] sm:$0xff] %v13007_v8 }
  0xf9   :  { %9667 = vrot.lane.b32.xlu0 %v9666_v47, %s11735_s19  ;;  %v12953_v47 = vld [vmem:[%s18098_s0 + $0x1a] sm:$0xff]  ;;  %v9686_v30 = vpack.i.bf16 %v8390_v23, %v8389_v50  ;;  %v8406_v50 = vld [vmem:[%s18098_s0 + $0xb2] sm:$0xff] }
  0xfa   :  { %v12942_v4 = vpop.permute.xlu1 %9392 }
  0xfb   :  { %18344 = vst [vmem:[#allocation69_spill] sm:$0xff] %v12942_v4  ;;  %v12960_v39 = vpop.permute.xlu0 %9387  ;;  %v8399_v4 = vld [vmem:[%s18098_s0 + $0x62] sm:$0xff] }
  0xfc   :  { %18345 = vst [vmem:[#allocation70_spill] sm:$0xff] %v12960_v39  ;;  %9682 = vrot.lane.b32.xlu1 %v9681_v31, %s11735_s19  ;;  %v8403_v39 = vld [vmem:[%s18098_s0 + $0x92] sm:$0xff]  ;;  %v8402_v31 = vld [vmem:[%s18098_s0 + $0x82] sm:$0xff]  ;;  %v13023_v20 = vpack.i.bf16 %v8400_v15, %v8399_v4  ;;  %v13060_v15 = vpack.i.bf16 %v8406_v50, %v8405_v9  ;;  %v13064_v4 = vpack.i.bf16 %v8410_v63, %v8409_v0  ;;  %v13085_v9 = vld [vmem:[%s18098_s0 + $0x13a] sm:$0xff] }
  0xfd   :  { %9677 = vrot.lane.b32.xlu0 %v9676_v62, %s11735_s19  ;;  %v8411_v62 = vld [vmem:[%s18098_s0 + $0xf2] sm:$0xff]  ;;  %v13035_v5 = vpack.i.bf16 %v8404_v44, %v8403_v39  ;;  %v13037_v52 = vpack.i.bf16 %v8402_v31, %v8401_v7  ;;  %v13058_v44 = vpack.i.bf16 %v8408_v41, %v8407_v40  ;;  %v9149_v40 = vunpack.i.l.bf16 %v12416_v3 }
  0xfe   :  { %v12994_v29 = vpop.permute.xlu1 %9402  ;;  %18349 = vst [vmem:[#allocation74_spill] sm:$0xff] %v13023_v20  ;;  %v85_v7 = vld [vmem:[%s18098_s0 + $0x1b8] sm:$0xff]  ;;  %18355 = vst [vmem:[#allocation80_spill] sm:$0xff] %v13060_v15  ;;  %v13062_v39 = vpack.i.bf16 %v8412_v6, %v8411_v62  ;;  %v13094_v3 = vsel %vm2678_vm0, %v12443_v16, %v9144_v54  ;;  %v13098_v63 = vsel %vm2678_vm0, %v12448_v17, %v9145_v51  ;;  %v9165_v16 = vunpack.i.h.bf16 %v12426_v10  ;;  %v13118_v51 = vld [vmem:[%s18098_s0 + $0x182] sm:$0xff] }
  0xff   :  { %18346 = vst [vmem:[#allocation71_spill] sm:$0xff] %v12994_v29  ;;  %v13005_v23 = vpop.permute.xlu0 %9397  ;;  %v9696_v29 = vpack.i.bf16 %v12958_v36, %v12953_v47  ;;  %v13025_v47 = vpack.i.bf16 %v8398_v28, %v8397_v57  ;;  %v13030_v36 = vld [vmem:[%s18098_s0 + $0x122] sm:$0xff]  ;;  %18351 = vst [vmem:[#allocation76_spill] sm:$0xff] %v13035_v5  ;;  %v13042_v57 = vld [vmem:[%s18098_s0 + $0x12a] sm:$0xff]  ;;  %v9164_v17 = vunpack.i.l.bf16 %v12426_v10  ;;  %v9160_v54 = vunpack.i.h.bf16 %v12438_v14 }
 0x100   :  { %18347 = vst [vmem:[#allocation72_spill] sm:$0xff] %v13005_v23  ;;  %9692 = vrot.lane.b32.xlu1 %v9691_v1, %s11735_s19  ;;  %v9140_v23 = vunpack.i.h.bf16 %v12398_v56  ;;  %18352 = vst [vmem:[#allocation77_spill] sm:$0xff] %v13037_v52  ;;  %v8413_v1 = vld [vmem:[%s18098_s0 + $0x10a] sm:$0xff]  ;;  %v8414_v28 = vld [vmem:[%s18098_s0 + $0x112] sm:$0xff] }
 0x101   :  { %18350 = vst [vmem:[#allocation75_spill] sm:$0xff] %v13025_v47  ;;  %9687 = vrot.lane.b32.xlu0 %v9686_v30, %s11735_s19  ;;  %v84_v56 = vld [vmem:[%s18098_s0 + $0x1b0] sm:$0xff]  ;;  %18354 = vst [vmem:[#allocation79_spill] sm:$0xff] %v13058_v44  ;;  %v13080_v6 = vld [vmem:[%s18098_s0 + $0x15a] sm:$0xff]  ;;  %v13104_v50 = vpack.i.bf16 %v8414_v28, %v8413_v1  ;;  %v9159_v1 = vunpack.i.l.bf16 %v12438_v14  ;;  %v13153_v28 = vsel %vm2678_vm0, %v12431_v11, %v9149_v40  ;;  %v9169_v11 = vunpack.i.l.bf16 %v12468_v25 }
 0x102   :  { %v13056_v30 = vpop.permute.xlu1 %9412  ;;  %18356 = vst [vmem:[#allocation81_spill] sm:$0xff] %v13062_v39  ;;  %18357 = vst [vmem:[#allocation82_spill] sm:$0xff] %v13064_v4  ;;  %v13069_v31 = vld [vmem:[%s18098_s0 + $0x152] sm:$0xff]  ;;  %v13107_v62 = vsel %vm2678_vm0, %v84_v56, %v9139_v12  ;;  %v13131_v10 = vld [vmem:[%s18098_s0 + $0x18a] sm:$0xff]  ;;  %v13145_v56 = vsel %vm2678_vm0, %v12473_v26, %v9154_v55  ;;  %v9175_v26 = vunpack.i.h.bf16 %v12456_v21  ;;  %v9170_v55 = vunpack.i.h.bf16 %v12468_v25 }
 0x103   :  { %18353 = vst [vmem:[#allocation78_spill] sm:$0xff] %v13056_v30  ;;  %v13075_v41 = vpop.permute.xlu0 %9407  ;;  %v13141_v14 = vld [vmem:[%s18098_s0 + $0x172] sm:$0xff]  ;;  %v13189_v25 = vsel %vm2678_vm0, %v12503_v37, %v9164_v17  ;;  %v13203_v30 = vsel %vm2678_vm0, %v12461_v22, %v9159_v1  ;;  %v13207_v37 = vsel %vm2678_vm0, %v12466_v24, %v9160_v54  ;;  %v13221_v22 = vld [vmem:[%s18098_s0 + $0x21a] sm:$0xff]  ;;  %v9180_v1 = vunpack.i.h.bf16 %v12498_v35 }
 0x104   :  { %18358 = vst [vmem:[#allocation83_spill] sm:$0xff] %v13075_v41  ;;  %9702 = vrot.lane.b32.xlu1 %v13007_v8, %s11736_s26  ;;  %v13110_v41 = vsel %vm2678_vm0, %v85_v7, %v9140_v23  ;;  %v13149_v7 = vsel %vm2678_vm0, %v12478_v27, %v9155_v58  ;;  %v13157_v23 = vsel %vm2678_vm0, %v12436_v13, %v9150_v19  ;;  %v9174_v27 = vunpack.i.l.bf16 %v12456_v21  ;;  %v13175_v13 = vld [vmem:[%s18098_s0 + $0x1ea] sm:$0xff]  ;;  %v13185_v21 = vld [vmem:[%s18098_s0 + $0x1d2] sm:$0xff] }
 0x105   :  { %9697 = vrot.lane.b32.xlu0 %v9696_v29, %s11736_s26  ;;  %v13136_v29 = vld [vmem:[%s18098_s0 + $0x16a] sm:$0xff]  ;;  %v13193_v19 = vsel %vm2678_vm0, %v12508_v38, %v9165_v16  ;;  %v9185_v38 = vunpack.i.h.bf16 %v12486_v32  ;;  %v9184_v16 = vunpack.i.l.bf16 %v12486_v32  ;;  %v13216_v40 = vld [vmem:[%s18098_s0 + $0x212] sm:$0xff]  ;;  %18364 = vst [vmem:[#allocation89_spill] sm:$0xff] %v13221_v22  ;;  %v9179_v24 = vunpack.i.l.bf16 %v12498_v35  ;;  %v13244_v35 = vld [vmem:[%s18098_s0 + $0x242] sm:$0xff] }
 0x106   :  { %v13122_v12 = vpop.permute.xlu1 %9422  ;;  %v13180_v58 = vld [vmem:[%s18098_s0 + $0x1ca] sm:$0xff]  ;;  %18363 = vst [vmem:[#allocation88_spill] sm:$0xff] %v13216_v40  ;;  %18368 = vst [vmem:[#allocation93_spill] sm:$0xff] %v13244_v35  ;;  %v13248_v32 = vsel %vm2678_vm0, %v12533_v48, %v9174_v27  ;;  %v9190_v27 = vunpack.i.h.bf16 %v12528_v46  ;;  %v18390_v40 = vld [vmem:[#allocation25_spill] sm:$0xff] }
 0x107   :  { %18359 = vst [vmem:[#allocation84_spill] sm:$0xff] %v13122_v12  ;;  %v13159_v0 = vpop.permute.xlu0 %9417  ;;  %v13164_v12 = vld [vmem:[%s18098_s0 + $0x1e2] sm:$0xff]  ;;  %18361 = vst [vmem:[#allocation86_spill] sm:$0xff] %v13180_v58  ;;  %v13267_v48 = vld [vmem:[%s18098_s0 + $0x24a] sm:$0xff]  ;;  %v13301_v58 = vsel %vm2678_vm0, %v12521_v43, %v9179_v24  ;;  %v9205_v43 = vunpack.i.h.bf16 %v12546_v53  ;;  %v9204_v24 = vunpack.i.l.bf16 %v12546_v53 }
 0x108   :  { %18360 = vst [vmem:[#allocation85_spill] sm:$0xff] %v13159_v0  ;;  %9712 = vrot.lane.b32.xlu1 %v13023_v20, %s11736_s26  ;;  %v13239_v20 = vld [vmem:[%s18098_s0 + $0x202] sm:$0xff]  ;;  %v13252_v0 = vsel %vm2678_vm0, %v12538_v49, %v9175_v26  ;;  %18369 = vst [vmem:[#allocation94_spill] sm:$0xff] %v13267_v48  ;;  %v13272_v49 = vld [vmem:[%s18098_s0 + $0x22a] sm:$0xff]  ;;  %v9194_v26 = vunpack.i.l.bf16 %v12516_v42 }
 0x109   :  { %9707 = vrot.lane.b32.xlu0 %v13025_v47, %s11736_s26  ;;  %18367 = vst [vmem:[#allocation92_spill] sm:$0xff] %v13239_v20  ;;  %v13260_v47 = vsel %vm2678_vm0, %v12496_v34, %v9170_v55  ;;  %18370 = vst [vmem:[#allocation95_spill] sm:$0xff] %v13272_v49  ;;  %v9195_v34 = vunpack.i.h.bf16 %v12516_v42  ;;  %v9189_v55 = vunpack.i.l.bf16 %v12528_v46  ;;  %v13316_v46 = vld [vmem:[%s18098_s0 + $0x272] sm:$0xff]  ;;  %v13337_v53 = vld [vmem:[%s18098_s0 + $0x262] sm:$0xff] }
 0x10a   :  { %v13211_v17 = vpop.permute.xlu1 %9432  ;;  %v18375_v42 = vld [vmem:[#allocation28_spill] sm:$0xff]  ;;  %v18392_v48 = vld [vmem:[#allocation27_spill] sm:$0xff] }
 0x10b   :  { %18362 = vst [vmem:[#allocation87_spill] sm:$0xff] %v13211_v17  ;;  %v13225_v54 = vpop.permute.xlu0 %9427  ;;  %v13234_v17 = vld [vmem:[%s18098_s0 + $0x1fa] sm:$0xff] }
 0x10c   :  { %18365 = vst [vmem:[#allocation90_spill] sm:$0xff] %v13225_v54  ;;  %18366 = vst [vmem:[#allocation91_spill] sm:$0xff] %v13234_v17  ;;  %v13256_v54 = vsel %vm2678_vm0, %v12491_v33, %v9169_v11  ;;  %9722 = vrot.lane.b32.xlu1 %v13035_v5, %s11736_s26  ;;  %v13277_v33 = vld [vmem:[%s18098_s0 + $0x232] sm:$0xff]  ;;  %v13287_v11 = vsel %vm2678_vm0, %v12563_v60, %v9184_v16  ;;  %v13291_v5 = vsel %vm2678_vm0, %v12568_v61, %v9185_v38  ;;  %v13327_v38 = vld [vmem:[%s18098_s0 + $0x27a] sm:$0xff] }
 0x10d   :  { %18371 = vst [vmem:[#allocation96_spill] sm:$0xff] %v13277_v33  ;;  %9717 = vrot.lane.b32.xlu0 %v13037_v52, %s11736_s26  ;;  %v13305_v60 = vsel %vm2678_vm0, %v12526_v45, %v9180_v1  ;;  %v9200_v45 = vunpack.i.h.bf16 %v12558_v59  ;;  %v9199_v1 = vunpack.i.l.bf16 %v12558_v59  ;;  %v13332_v61 = vld [vmem:[%s18098_s0 + $0x25a] sm:$0xff]  ;;  %v13341_v59 = vsel %vm2678_vm0, %v12593_v18, %v9194_v26  ;;  %v18379_v52 = vld [vmem:[#allocation23_spill] sm:$0xff]  ;;  %v13360_v18 = vld [vmem:[%s18098_s0 + $0x2a2] sm:$0xff] }
 0x10e   :  { %v13293_v8 = vpop.permute.xlu1 %9442  ;;  %18374 = vst [vmem:[#allocation99_spill] sm:$0xff] %v13341_v59  ;;  %v13353_v49 = vsel %vm2678_vm0, %v18379_v52, %v9190_v27  ;;  %v18381_v26 = vld [vmem:[#allocation24_spill] sm:$0xff]  ;;  %v13371_v52 = vld [vmem:[%s18098_s0 + $0x2aa] sm:$0xff]  ;;  %v18389_v17 = vld [vmem:[#allocation34_spill] sm:$0xff] }
 0x10f   :  { %18372 = vst [vmem:[#allocation97_spill] sm:$0xff] %v13293_v8  ;;  %v13307_v16 = vpop.permute.xlu0 %9437  ;;  %v18377_v8 = vld [vmem:[#allocation22_spill] sm:$0xff]  ;;  %18380 = vst [vmem:[#allocation23_spill] sm:$0xff] %v13353_v49  ;;  %v9215_v33 = vunpack.i.h.bf16 %v18381_v26  ;;  %v13376_v27 = vld [vmem:[%s18098_s0 + $0x28a] sm:$0xff]  ;;  %v13397_v20 = vsel %vm2678_vm0, %v18389_v17, %v9205_v43  ;;  %v13401_v22 = vsel %vm2678_vm0, %v18390_v40, %v9199_v1 }
 0x110   :  { %18373 = vst [vmem:[#allocation98_spill] sm:$0xff] %v13307_v16  ;;  %9732 = vrot.lane.b32.xlu1 %v13058_v44, %s11736_s26  ;;  %v13345_v16 = vsel %vm2678_vm0, %v18375_v42, %v9195_v34  ;;  %v13349_v44 = vsel %vm2678_vm0, %v18377_v8, %v9189_v55  ;;  %v9214_v34 = vunpack.i.l.bf16 %v18381_v26  ;;  %v18382_v42 = vld [vmem:[#allocation51_spill] sm:$0xff]  ;;  %v13381_v26 = vld [vmem:[%s18098_s0 + $0x292] sm:$0xff]  ;;  %v18393_v43 = vld [vmem:[#allocation37_spill] sm:$0xff] }
 0x111   :  { %18376 = vst [vmem:[#allocation28_spill] sm:$0xff] %v13345_v16  ;;  %18378 = vst [vmem:[#allocation22_spill] sm:$0xff] %v13349_v44  ;;  %9727 = vrot.lane.b32.xlu0 %v13060_v15, %s11736_s26  ;;  %v9305_v35 = vunpack.i.h.bf16 %v18382_v42  ;;  %v9304_v8 = vunpack.i.l.bf16 %v18382_v42  ;;  %v18386_v15 = vld [vmem:[#allocation52_spill] sm:$0xff]  ;;  %v18388_v16 = vld [vmem:[#allocation33_spill] sm:$0xff] }
 0x112   :  { %v13366_v55 = vpop.permute.xlu1 %9452  ;;  %18384 = vst [vmem:[#allocation51_spill] sm:$0xff] %v13376_v27  ;;  %18385 = vst [vmem:[#allocation100_spill] sm:$0xff] %v13381_v26  ;;  %v9300_v49 = vunpack.i.h.bf16 %v18386_v15  ;;  %v9299_v42 = vunpack.i.l.bf16 %v18386_v15  ;;  %v13393_v59 = vsel %vm2678_vm0, %v18388_v16, %v9204_v24  ;;  %v18391_v15 = vld [vmem:[#allocation26_spill] sm:$0xff]  ;;  %v13419_v24 = vsel %vm2678_vm0, %v18393_v43, %v9214_v34 }
 0x113   :  { %18383 = vst [vmem:[#allocation24_spill] sm:$0xff] %v13366_v55  ;;  %v13385_v55 = vpop.permute.xlu0 %9447  ;;  %v2779_v44 = vsel %vm2743_vm1, %v13098_v63, %v9305_v35  ;;  %v18397_v63 = vld [vmem:[#allocation54_spill] sm:$0xff] }
 0x114   :  { %18387 = vst [vmem:[#allocation52_spill] sm:$0xff] %v13385_v55  ;;  %v13405_v55 = vsel %vm2678_vm0, %v18391_v15, %v9200_v45  ;;  %9742 = vrot.lane.b32.xlu1 %v13062_v39, %s11736_s26  ;;  %v18394_v45 = vld [vmem:[#allocation38_spill] sm:$0xff]  ;;  %v2778_v15 = vsel %vm2743_vm1, %v13094_v3, %v9304_v8  ;;  %v2776_v17 = vsel %vm2743_vm1, %v13107_v62, %v9299_v42  ;;  %v9310_v35 = vunpack.i.h.bf16 %v18397_v63 }
 0x115   :  { %9737 = vrot.lane.b32.xlu0 %v13064_v4, %s11736_s26  ;;  %v13423_v1 = vsel %vm2678_vm0, %v18394_v45, %v9215_v33  ;;  %v2777_v40 = vsel %vm2743_vm1, %v13110_v41, %v9300_v49  ;;  %v18395_v4 = vld [vmem:[#allocation53_spill] sm:$0xff]  ;;  %v18396_v3 = vpack.i.bf16 %v13042_v57, %v13030_v36  ;;  %v9309_v62 = vunpack.i.l.bf16 %v18397_v63 }
 0x116   :  { %v9463_v16 = vpop.permute.xlu1 %9462  ;;  %v9315_v27 = vunpack.i.h.bf16 %v18395_v4  ;;  %v9314_v33 = vunpack.i.l.bf16 %v18395_v4  ;;  %v18399_v4 = vld [vmem:[#allocation55_spill] sm:$0xff] }
 0x117   :  { %v9465_v39 = vunpack.i.h.bf16 %v9463_v16  ;;  %v9464_v34 = vunpack.i.l.bf16 %v9463_v16  ;;  %v9458_v43 = vpop.permute.xlu0 %9457  ;;  %v9325_v8 = vunpack.i.h.bf16 %v18399_v4  ;;  %v9324_v42 = vunpack.i.l.bf16 %v18399_v4 }
 0x118   :  { %v9460_v45 = vunpack.i.h.bf16 %v9458_v43  ;;  %v9459_v26 = vunpack.i.l.bf16 %v9458_v43  ;;  %9752 = vrot.lane.b32.xlu1 %v18396_v3, %s11736_s26  ;;  %v18400_v43 = vld [vmem:[#allocation56_spill] sm:$0xff]  ;;  %v2782_v63 = vsel %vm2743_vm1, %v13145_v56, %v9314_v33  ;;  %v2783_v4 = vsel %vm2743_vm1, %v13149_v7, %v9315_v27 }
 0x119   :  { %v13442_v41 = vsel %vm2808_vm2, %v2778_v15, %v9464_v34  ;;  %v13445_v49 = vsel %vm2808_vm2, %v2779_v44, %v9465_v39  ;;  %9747 = vrot.lane.b32.xlu0 %v13104_v50, %s11736_s26  ;;  %v9320_v15 = vunpack.i.h.bf16 %v18400_v43  ;;  %v9319_v34 = vunpack.i.l.bf16 %v18400_v43 }
 0x11a   :  { %18398 = vst [vmem:[#allocation33_spill] sm:$0xff] %v13445_v49  ;;  %v13452_v36 = vsel %vm2808_vm2, %v2776_v17, %v9459_v26  ;;  %v13455_v57 = vsel %vm2808_vm2, %v2777_v40, %v9460_v45  ;;  %v9473_v16 = vpop.permute.xlu1 %9472  ;;  %v18401_v17 = vpack.i.bf16 %v13080_v6, %v13069_v31  ;;  %v2780_v40 = vsel %vm2743_vm1, %v13153_v28, %v9309_v62 }
 0x11b   :  { %v9475_v44 = vunpack.i.h.bf16 %v9473_v16  ;;  %v9474_v39 = vunpack.i.l.bf16 %v9473_v16  ;;  %v9468_v3 = vpop.permute.xlu0 %9467  ;;  %v2781_v45 = vsel %vm2743_vm1, %v13157_v23, %v9310_v35  ;;  %v18404_v7 = vpack.i.bf16 %v13090_v2, %v13085_v9 }
 0x11c   :  { %v9470_v49 = vunpack.i.h.bf16 %v9468_v3  ;;  %v9469_v26 = vunpack.i.l.bf16 %v9468_v3  ;;  %9762 = vrot.lane.b32.xlu1 %v18401_v17, %s11736_s26  ;;  %v2786_v31 = vsel %vm2743_vm1, %v13189_v25, %v9324_v42  ;;  %v2787_v6 = vsel %vm2743_vm1, %v13193_v19, %v9325_v8  ;;  %v18407_v25 = vld [vmem:[#allocation57_spill] sm:$0xff]  ;;  %v18413_v3 = vld [vmem:[#allocation59_spill] sm:$0xff]  ;;  %v18416_v17 = vld [vmem:[#allocation60_spill] sm:$0xff] }
 0x11d   :  { %v13472_v16 = vsel %vm2808_vm2, %v2782_v63, %v9474_v39  ;;  %v13475_v56 = vsel %vm2808_vm2, %v2783_v4, %v9475_v44  ;;  %9757 = vrot.lane.b32.xlu0 %v18404_v7, %s11736_s26  ;;  %v2784_v33 = vsel %vm2743_vm1, %v13203_v30, %v9319_v34  ;;  %v2785_v9 = vsel %vm2743_vm1, %v13207_v37, %v9320_v15  ;;  %v18409_v44 = vld [vmem:[#allocation58_spill] sm:$0xff] }
 0x11e   :  { %18402 = vst [vmem:[#allocation34_spill] sm:$0xff] %v13472_v16  ;;  %18403 = vst [vmem:[#allocation25_spill] sm:$0xff] %v13475_v56  ;;  %v13486_v28 = vsel %vm2808_vm2, %v2780_v40, %v9469_v26  ;;  %v13489_v23 = vsel %vm2808_vm2, %v2781_v45, %v9470_v49  ;;  %v9483_v27 = vpop.permute.xlu1 %9482  ;;  %v9335_v42 = vunpack.i.h.bf16 %v18407_v25  ;;  %v9334_v19 = vunpack.i.l.bf16 %v18407_v25 }
 0x11f   :  { %18405 = vst [vmem:[#allocation26_spill] sm:$0xff] %v13486_v28  ;;  %18406 = vst [vmem:[#allocation27_spill] sm:$0xff] %v13489_v23  ;;  %v9485_v2 = vunpack.i.h.bf16 %v9483_v27  ;;  %v9484_v35 = vunpack.i.l.bf16 %v9483_v27  ;;  %v9478_v62 = vpop.permute.xlu0 %9477  ;;  %v18408_v49 = vpack.i.bf16 %v13131_v10, %v13118_v51  ;;  %v9330_v39 = vunpack.i.h.bf16 %v18409_v44 }
 0x120   :  { %v9480_v8 = vunpack.i.h.bf16 %v9478_v62  ;;  %v9479_v43 = vunpack.i.l.bf16 %v9478_v62  ;;  %v9329_v30 = vunpack.i.l.bf16 %v18409_v44  ;;  %v18412_v34 = vpack.i.bf16 %v13141_v14, %v13136_v29 }
 0x121   :  { %9772 = vrot.lane.b32.xlu1 %v18408_v49, %s11736_s26  ;;  %v13504_v37 = vsel %vm2808_vm2, %v2786_v31, %v9484_v35  ;;  %v13507_v15 = vsel %vm2808_vm2, %v2787_v6, %v9485_v2  ;;  %v9345_v63 = vunpack.i.h.bf16 %v18413_v3  ;;  %v9344_v51 = vunpack.i.l.bf16 %v18413_v3  ;;  %v18426_v3 = vld [vmem:[#allocation88_spill] sm:$0xff] }
 0x122   :  { %18410 = vst [vmem:[#allocation37_spill] sm:$0xff] %v13504_v37  ;;  %18411 = vst [vmem:[#allocation38_spill] sm:$0xff] %v13507_v15  ;;  %9767 = vrot.lane.b32.xlu0 %v18412_v34, %s11736_s26  ;;  %v13516_v10 = vsel %vm2808_vm2, %v2784_v33, %v9479_v43  ;;  %v13519_v4 = vsel %vm2808_vm2, %v2785_v9, %v9480_v8  ;;  %v9493_v26 = vpop.permute.xlu1 %9492  ;;  %v9340_v40 = vunpack.i.h.bf16 %v18416_v17  ;;  %v9339_v45 = vunpack.i.l.bf16 %v18416_v17  ;;  %v18425_v34 = vld [vmem:[#allocation89_spill] sm:$0xff] }
 0x123   :  { %18414 = vst [vmem:[#allocation53_spill] sm:$0xff] %v13516_v10  ;;  %18415 = vst [vmem:[#allocation54_spill] sm:$0xff] %v13519_v4  ;;  %v9495_v7 = vunpack.i.h.bf16 %v9493_v26  ;;  %v9494_v31 = vunpack.i.l.bf16 %v9493_v26  ;;  %v9488_v6 = vpop.permute.xlu0 %9487  ;;  %v2790_v29 = vsel %vm2743_vm1, %v13248_v32, %v9334_v19  ;;  %v2791_v14 = vsel %vm2743_vm1, %v13252_v0, %v9335_v42  ;;  %v18420_v0 = vld [vmem:[#allocation86_spill] sm:$0xff] }
 0x124   :  { %v9490_v27 = vunpack.i.h.bf16 %v9488_v6  ;;  %v9489_v33 = vunpack.i.l.bf16 %v9488_v6  ;;  %v18417_v9 = vpack.i.bf16 %v13175_v13, %v13164_v12  ;;  %v2788_v2 = vsel %vm2743_vm1, %v13256_v54, %v9329_v30  ;;  %v11701_v10 = vld [vmem:[%s18098_s0 + $0x128] sm:$0xff] }
 0x125   :  { %v2789_v35 = vsel %vm2743_vm1, %v13260_v47, %v9330_v39  ;;  %v13536_v62 = vsel %vm2808_vm2, %v2790_v29, %v9494_v31  ;;  %v13539_v32 = vsel %vm2808_vm2, %v2791_v14, %v9495_v7  ;;  %v18421_v25 = vpack.i.bf16 %v13185_v21, %v18420_v0  ;;  %v18434_v31 = vld [vmem:[#allocation63_spill] sm:$0xff] }
 0x126   :  { %9782 = vrot.lane.b32.xlu1 %v18417_v9, %s11736_s26  ;;  %18418 = vst [vmem:[#allocation55_spill] sm:$0xff] %v13536_v62  ;;  %18419 = vst [vmem:[#allocation56_spill] sm:$0xff] %v13539_v32  ;;  %v2794_v12 = vsel %vm2743_vm1, %v13287_v11, %v9344_v51  ;;  %v2795_v13 = vsel %vm2743_vm1, %v13291_v5, %v9345_v63  ;;  %v13550_v54 = vsel %vm2808_vm2, %v2788_v2, %v9489_v33  ;;  %v9503_v42 = vpop.permute.xlu1 %9502  ;;  %v18424_v11 = vld [vmem:[#allocation61_spill] sm:$0xff]  ;;  %v18428_v51 = vld [vmem:[#allocation62_spill] sm:$0xff] }
 0x127   :  { %9777 = vrot.lane.b32.xlu0 %v18421_v25, %s11736_s26  ;;  %18422 = vst [vmem:[#allocation57_spill] sm:$0xff] %v13550_v54  ;;  %v13553_v47 = vsel %vm2808_vm2, %v2789_v35, %v9490_v27  ;;  %v2792_v19 = vsel %vm2743_vm1, %v13301_v58, %v9339_v45  ;;  %v2793_v21 = vsel %vm2743_vm1, %v13305_v60, %v9340_v40  ;;  %v9505_v8 = vunpack.i.h.bf16 %v9503_v42  ;;  %v9498_v49 = vpop.permute.xlu0 %9497  ;;  %v18431_v40 = vld [vmem:[#allocation92_spill] sm:$0xff]  ;;  %v18432_v45 = vld [vmem:[#allocation91_spill] sm:$0xff]  ;;  %v18516_v32 = vld [vmem:[#allocation21_spill] sm:$0xff] }
 0x128   :  { %18423 = vst [vmem:[#allocation58_spill] sm:$0xff] %v13553_v47  ;;  %v9504_v43 = vunpack.i.l.bf16 %v9503_v42  ;;  %v9355_v44 = vunpack.i.h.bf16 %v18424_v11  ;;  %v9354_v5 = vunpack.i.l.bf16 %v18424_v11  ;;  %v9500_v39 = vunpack.i.h.bf16 %v9498_v49  ;;  %v18437_v9 = vld [vmem:[#allocation64_spill] sm:$0xff]  ;;  %v18440_v11 = vld [vmem:[#allocation94_spill] sm:$0xff] }
 0x129   :  { %v9499_v30 = vunpack.i.l.bf16 %v9498_v49  ;;  %v18427_v63 = vpack.i.bf16 %v18425_v34, %v18426_v3  ;;  %v9350_v26 = vunpack.i.h.bf16 %v18428_v51  ;;  %v9349_v58 = vunpack.i.l.bf16 %v18428_v51  ;;  %v18444_v3 = vld [vmem:[#allocation23_spill] sm:$0xff] }
 0x12a   :  { %v13568_v60 = vsel %vm2808_vm2, %v2794_v12, %v9504_v43  ;;  %v13571_v17 = vsel %vm2808_vm2, %v2795_v13, %v9505_v8  ;;  %v18433_v7 = vpack.i.bf16 %v18431_v40, %v18432_v45  ;;  %v9365_v6 = vunpack.i.h.bf16 %v18434_v31  ;;  %v9513_v33 = vpop.permute.xlu1 %9512  ;;  %v18438_v13 = vld [vmem:[#allocation99_spill] sm:$0xff]  ;;  %v18439_v8 = vld [vmem:[#allocation28_spill] sm:$0xff] }
 0x12b   :  { %9792 = vrot.lane.b32.xlu1 %v18427_v63, %s11736_s26  ;;  %18429 = vst [vmem:[#allocation59_spill] sm:$0xff] %v13568_v60  ;;  %18430 = vst [vmem:[#allocation60_spill] sm:$0xff] %v13571_v17  ;;  %v9364_v29 = vunpack.i.l.bf16 %v18434_v31  ;;  %v13580_v14 = vsel %vm2808_vm2, %v2792_v19, %v9499_v30  ;;  %v13583_v27 = vsel %vm2808_vm2, %v2793_v21, %v9500_v39  ;;  %v9360_v2 = vunpack.i.h.bf16 %v18437_v9  ;;  %v9508_v12 = vpop.permute.xlu0 %9507  ;;  %v18441_v21 = vld [vmem:[#allocation93_spill] sm:$0xff]  ;;  %v18443_v30 = vld [vmem:[#allocation22_spill] sm:$0xff] }
 0x12c   :  { %9787 = vrot.lane.b32.xlu0 %v18433_v7, %s11736_s26  ;;  %18435 = vst [vmem:[#allocation86_spill] sm:$0xff] %v13580_v14  ;;  %18436 = vst [vmem:[#allocation61_spill] sm:$0xff] %v13583_v27  ;;  %v9359_v35 = vunpack.i.l.bf16 %v18437_v9  ;;  %v9515_v0 = vunpack.i.h.bf16 %v9513_v33  ;;  %v9514_v25 = vunpack.i.l.bf16 %v9513_v33  ;;  %v2798_v42 = vsel %vm2743_vm1, %v18438_v13, %v9354_v5  ;;  %v18448_v40 = vld [vmem:[#allocation95_spill] sm:$0xff] }
 0x12d   :  { %v2799_v43 = vsel %vm2743_vm1, %v18439_v8, %v9355_v44  ;;  %v9510_v49 = vunpack.i.h.bf16 %v9508_v12  ;;  %v9509_v19 = vunpack.i.l.bf16 %v9508_v12  ;;  %v18442_v39 = vpack.i.bf16 %v18440_v11, %v18441_v21  ;;  %v18447_v44 = vld [vmem:[#allocation96_spill] sm:$0xff] }
 0x12e   :  { %v2796_v34 = vsel %vm2743_vm1, %v18443_v30, %v9349_v58  ;;  %v2797_v63 = vsel %vm2743_vm1, %v18444_v3, %v9350_v26  ;;  %v13600_v51 = vsel %vm2808_vm2, %v2798_v42, %v9514_v25  ;;  %v13603_v5 = vsel %vm2808_vm2, %v2799_v43, %v9515_v0  ;;  %v9523_v33 = vpop.permute.xlu1 %9522  ;;  %v18454_v43 = vld [vmem:[#allocation66_spill] sm:$0xff]  ;;  %v18461_v3 = vld [vmem:[#allocation31_spill] sm:$0xff] }
 0x12f   :  { %9802 = vrot.lane.b32.xlu1 %v18442_v39, %s11736_s26  ;;  %18445 = vst [vmem:[#allocation89_spill] sm:$0xff] %v13600_v51  ;;  %18446 = vst [vmem:[#allocation88_spill] sm:$0xff] %v13603_v5  ;;  %v18449_v45 = vpack.i.bf16 %v18447_v44, %v18448_v40  ;;  %v2802_v7 = vsel %vm2743_vm1, %v13393_v59, %v9364_v29  ;;  %v2803_v58 = vsel %vm2743_vm1, %v13397_v20, %v9365_v6  ;;  %v9518_v13 = vpop.permute.xlu0 %9517  ;;  %v8447_v20 = vld [vmem:[%s18098_s0 + $0x2d2] sm:$0xff]  ;;  %v18452_v59 = vld [vmem:[#allocation65_spill] sm:$0xff] }
 0x130   :  { %v13614_v31 = vsel %vm2808_vm2, %v2796_v34, %v9509_v19  ;;  %v13617_v26 = vsel %vm2808_vm2, %v2797_v63, %v9510_v49  ;;  %v2800_v9 = vsel %vm2743_vm1, %v13401_v22, %v9359_v35  ;;  %v2801_v0 = vsel %vm2743_vm1, %v13405_v55, %v9360_v2  ;;  %v8448_v55 = vld [vmem:[%s18098_s0 + $0x2da] sm:$0xff]  ;;  %v8446_v35 = vld [vmem:[%s18098_s0 + $0x2c2] sm:$0xff] }
 0x131   :  { %9797 = vrot.lane.b32.xlu0 %v18449_v45, %s11736_s26  ;;  %18450 = vst [vmem:[#allocation62_spill] sm:$0xff] %v13614_v31  ;;  %18451 = vst [vmem:[#allocation92_spill] sm:$0xff] %v13617_v26  ;;  %v9525_v25 = vunpack.i.h.bf16 %v9523_v33  ;;  %v9524_v12 = vunpack.i.l.bf16 %v9523_v33  ;;  %v9375_v6 = vunpack.i.h.bf16 %v18452_v59  ;;  %v9374_v29 = vunpack.i.l.bf16 %v18452_v59  ;;  %v8445_v2 = vld [vmem:[%s18098_s0 + $0x2ba] sm:$0xff]  ;;  %v18459_v39 = vld [vmem:[#allocation30_spill] sm:$0xff] }
 0x132   :  { %v9520_v42 = vunpack.i.h.bf16 %v9518_v13  ;;  %v9519_v8 = vunpack.i.l.bf16 %v9518_v13  ;;  %v18453_v22 = vpack.i.bf16 %v13327_v38, %v13316_v46  ;;  %v9370_v49 = vunpack.i.h.bf16 %v18454_v43  ;;  %v9533_v45 = vpop.permute.xlu1 %9532  ;;  %v18507_v26 = vld [vmem:[#allocation17_spill] sm:$0xff]  ;;  %v11686_v51 = vld [vmem:[%s18098_s0 + $0xa8] sm:$0xff] }
 0x133   :  { %v9369_v19 = vunpack.i.l.bf16 %v18454_v43  ;;  %v13644_v11 = vsel %vm2808_vm2, %v2802_v7, %v9524_v12  ;;  %v13647_v46 = vsel %vm2808_vm2, %v2803_v58, %v9525_v25  ;;  %v18457_v38 = vpack.i.bf16 %v13337_v53, %v13332_v61  ;;  %v9528_v53 = vpop.permute.xlu0 %9527 }
 0x134   :  { %9812 = vrot.lane.b32.xlu1 %v18453_v22, %s11736_s26  ;;  %18455 = vst [vmem:[#allocation91_spill] sm:$0xff] %v13644_v11  ;;  %18456 = vst [vmem:[#allocation63_spill] sm:$0xff] %v13647_v46  ;;  %v18458_v21 = vunpack.i.l.bf16 %v18392_v48  ;;  %v18460_v34 = vunpack.i.h.bf16 %v18392_v48  ;;  %v13662_v44 = vsel %vm2808_vm2, %v2800_v9, %v9519_v8  ;;  %v13665_v40 = vsel %vm2808_vm2, %v2801_v0, %v9520_v42 }
 0x135   :  { %9807 = vrot.lane.b32.xlu0 %v18457_v38, %s11736_s26  ;;  %18462 = vst [vmem:[#allocation64_spill] sm:$0xff] %v13662_v44  ;;  %18463 = vst [vmem:[#allocation99_spill] sm:$0xff] %v13665_v40  ;;  %v9535_v7 = vunpack.i.h.bf16 %v9533_v45  ;;  %v9534_v61 = vunpack.i.l.bf16 %v9533_v45  ;;  %v9831_v58 = vpack.i.bf16 %v8448_v55, %v8447_v20  ;;  %v9826_v33 = vpack.i.bf16 %v8446_v35, %v8445_v2  ;;  %v8449_v55 = vld [vmem:[%s18098_s0 + $0x2ea] sm:$0xff]  ;;  %v8450_v2 = vld [vmem:[%s18098_s0 + $0x2f2] sm:$0xff] }
 0x136   :  { %v2739_v30 = vsel %vm2678_vm0, %v18459_v39, %v18458_v21  ;;  %v2740_v63 = vsel %vm2678_vm0, %v18461_v3, %v18460_v34  ;;  %v2806_v25 = vsel %vm2743_vm1, %v13419_v24, %v9374_v29  ;;  %v2807_v48 = vsel %vm2743_vm1, %v13423_v1, %v9375_v6  ;;  %v18467_v24 = vld [vmem:[#allocation100_spill] sm:$0xff]  ;;  %v18468_v1 = vld [vmem:[#allocation51_spill] sm:$0xff]  ;;  %v13699_v22 = vpop.permute.xlu1 %9542  ;;  %v8456_v38 = vld [vmem:[%s18098_s0 + $0x33a] sm:$0xff] }
 0x137   :  { %v9530_v12 = vunpack.i.h.bf16 %v9528_v53  ;;  %v9529_v13 = vunpack.i.l.bf16 %v9528_v53  ;;  %v18464_v9 = vpack.i.bf16 %v13371_v52, %v13360_v18  ;;  %v2804_v0 = vsel %vm2743_vm1, %v2739_v30, %v9369_v19  ;;  %v8451_v18 = vld [vmem:[%s18098_s0 + $0x302] sm:$0xff]  ;;  %v8452_v52 = vld [vmem:[%s18098_s0 + $0x30a] sm:$0xff]  ;;  %18472 = vst [vmem:[#allocation23_spill] sm:$0xff] %v13699_v22  ;;  %v13707_v35 = vpop.permute.xlu0 %9537  ;;  %v8455_v19 = vld [vmem:[%s18098_s0 + $0x332] sm:$0xff] }
 0x138   :  { %v2805_v59 = vsel %vm2743_vm1, %v2740_v63, %v9370_v49  ;;  %v13678_v20 = vsel %vm2808_vm2, %v2806_v25, %v9534_v61  ;;  %v13681_v42 = vsel %vm2808_vm2, %v2807_v48, %v9535_v7  ;;  %v18469_v6 = vpack.i.bf16 %v18467_v24, %v18468_v1  ;;  %18473 = vst [vmem:[#allocation96_spill] sm:$0xff] %v13707_v35  ;;  %v8453_v39 = vld [vmem:[%s18098_s0 + $0x31a] sm:$0xff]  ;;  %v8454_v30 = vld [vmem:[%s18098_s0 + $0x322] sm:$0xff]  ;;  %v8460_v7 = vld [vmem:[%s18098_s0 + $0x50] sm:$0xff] }
 0x139   :  { %9822 = vrot.lane.b32.xlu1 %v18464_v9, %s11736_s26  ;;  %18465 = vst [vmem:[#allocation28_spill] sm:$0xff] %v13678_v20  ;;  %18466 = vst [vmem:[#allocation94_spill] sm:$0xff] %v13681_v42  ;;  %v13694_v29 = vsel %vm2808_vm2, %v2804_v0, %v9529_v13  ;;  %v13697_v8 = vsel %vm2808_vm2, %v2805_v59, %v9530_v12  ;;  %v9841_v43 = vpack.i.bf16 %v8452_v52, %v8451_v18  ;;  %v8459_v45 = vld [vmem:[%s18098_s0 + $0x48] sm:$0xff]  ;;  %v8457_v53 = vld [vmem:[%s18098_s0 + $0x30] sm:$0xff] }
 0x13a   :  { %9817 = vrot.lane.b32.xlu0 %v18469_v6, %s11736_s26  ;;  %18470 = vst [vmem:[#allocation93_spill] sm:$0xff] %v13694_v29  ;;  %18471 = vst [vmem:[#allocation22_spill] sm:$0xff] %v13697_v8  ;;  %v9836_v49 = vpack.i.bf16 %v8450_v2, %v8449_v55  ;;  %v13717_v21 = vpop.permute.xlu1 %9552  ;;  %v9851_v3 = vpack.i.bf16 %v8456_v38, %v8455_v19  ;;  %v9846_v63 = vpack.i.bf16 %v8454_v30, %v8453_v39  ;;  %v8463_v12 = vld [vmem:[%s18098_s0 + $0x78] sm:$0xff]  ;;  %v8464_v13 = vld [vmem:[%s18098_s0 + $0x80] sm:$0xff] }
 0x13b   :  { %18474 = vst [vmem:[#allocation95_spill] sm:$0xff] %v13717_v21  ;;  %v13725_v34 = vpop.permute.xlu0 %9547  ;;  %v9861_v25 = vpack.i.bf16 %v8460_v7, %v8459_v45  ;;  %v8461_v0 = vld [vmem:[%s18098_s0 + $0x60] sm:$0xff]  ;;  %v8462_v59 = vld [vmem:[%s18098_s0 + $0x68] sm:$0xff]  ;;  %v9871_v1 = vpack.i.bf16 %v8464_v13, %v8463_v12  ;;  %v8468_v52 = vld [vmem:[%s18098_s0 + $0xb0] sm:$0xff]  ;;  %v9109_v31 = vunpack.i.l.bf16 %v18507_v26  ;;  %v9130_v62 = vunpack.i.h.bf16 %v18516_v32 }
 0x13c   :  { %18475 = vst [vmem:[#allocation65_spill] sm:$0xff] %v13725_v34  ;;  %v9866_v6 = vpack.i.bf16 %v8462_v59, %v8461_v0  ;;  %v8467_v18 = vld [vmem:[%s18098_s0 + $0xa8] sm:$0xff]  ;;  %v8465_v2 = vld [vmem:[%s18098_s0 + $0x90] sm:$0xff]  ;;  %v8471_v39 = vld [vmem:[%s18098_s0 + $0xd8] sm:$0xff] }
 0x13d   :  { %9832 = vrot.lane.b32.xlu1 %v9831_v58, %s11736_s26  ;;  %v8458_v58 = vld [vmem:[%s18098_s0 + $0x38] sm:$0xff]  ;;  %v9881_v19 = vpack.i.bf16 %v8468_v52, %v8467_v18  ;;  %v8472_v30 = vld [vmem:[%s18098_s0 + $0xe0] sm:$0xff]  ;;  %v8470_v45 = vld [vmem:[%s18098_s0 + $0xc8] sm:$0xff] }
 0x13e   :  { %9827 = vrot.lane.b32.xlu0 %v9826_v33, %s11736_s26  ;;  %v13735_v61 = vpop.permute.xlu1 %9562  ;;  %v9856_v48 = vpack.i.bf16 %v8458_v58, %v8457_v53  ;;  %v9891_v53 = vpack.i.bf16 %v8472_v30, %v8471_v39  ;;  %v8473_v13 = vld [vmem:[%s18098_s0 + $0xf0] sm:$0xff]  ;;  %v8474_v0 = vld [vmem:[%s18098_s0 + $0xf8] sm:$0xff]  ;;  %v8480_v52 = vld [vmem:[%s18098_s0 + $0x140] sm:$0xff] }
 0x13f   :  { %18476 = vst [vmem:[#allocation66_spill] sm:$0xff] %v13735_v61  ;;  %v13743_v33 = vpop.permute.xlu0 %9557  ;;  %v8479_v18 = vld [vmem:[%s18098_s0 + $0x138] sm:$0xff]  ;;  %v11616_v39 = vld [vmem:[%s18100_s2 + $0x10] ss:$0 sps:$4 sm:$0x33]   ;;  %v18503_v20 = vld [vmem:[#allocation14_spill] sm:$0xff] }
 0x140   :  { %18477 = vst [vmem:[#allocation30_spill] sm:$0xff] %v13743_v33  ;;  %v9911_v30 = vpack.i.bf16 %v8480_v52, %v8479_v18  ;;  %9038 = vmatprep.subr.msk.bf16.mxu0 %vm3354_vm3, %v11616_v39  ;;  %v8521_v52 = vld [vmem:[%s18098_s0 + $0x31] sm:$0xff]  ;;  %v18497_v34 = vld [vmem:[#allocation73_spill] sm:$0xff] }
 0x141   :  { %9842 = vrot.lane.b32.xlu1 %v9841_v43, %s11736_s26  ;;  %v8466_v43 = vld [vmem:[%s18098_s0 + $0x98] sm:$0xff]  ;;  %v18504_v40 = vld [vmem:[#allocation15_spill] sm:$0xff] }
 0x142   :  { %9837 = vrot.lane.b32.xlu0 %v9836_v49, %s11736_s26  ;;  %v13753_v9 = vpop.permute.xlu1 %9572  ;;  %v9876_v38 = vpack.i.bf16 %v8466_v43, %v8465_v2  ;;  %v8477_v43 = vld [vmem:[%s18098_s0 + $0x120] sm:$0xff]  ;;  %v11677_v61 = vld [vmem:[%s18098_s0 + $0x38] sm:$0xff]  ;;  %v9100_v44 = vunpack.i.h.bf16 %v18504_v40 }
 0x143   :  { %18478 = vst [vmem:[#allocation31_spill] sm:$0xff] %v13753_v9  ;;  %v13761_v24 = vpop.permute.xlu0 %9567  ;;  %v11676_v9 = vld [vmem:[%s18098_s0 + $0x30] sm:$0xff]  ;;  %v18502_v8 = vld [vmem:[#allocation13_spill] sm:$0xff] }
 0x144   :  { %18479 = vst [vmem:[#allocation100_spill] sm:$0xff] %v13761_v24  ;;  %v9090_v29 = vunpack.i.h.bf16 %v18502_v8  ;;  %v9089_v42 = vunpack.i.l.bf16 %v18502_v8  ;;  %v8529_v8 = vld [vmem:[%s18098_s0 + $0x91] sm:$0xff] }
 0x145   :  { %9852 = vrot.lane.b32.xlu1 %v9851_v3, %s11736_s26 }
 0x146   :  { %9847 = vrot.lane.b32.xlu0 %v9846_v63, %s11736_s26  ;;  %s11737_s26 = smov 24   ;;  %v13771_v55 = vpop.permute.xlu1 %9582  ;;  %v8469_v63 = vld [vmem:[%s18098_s0 + $0xc0] sm:$0xff] }
 0x147   :  { %18480 = vst [vmem:[#allocation51_spill] sm:$0xff] %v13771_v55  ;;  %v13779_v49 = vpop.permute.xlu0 %9577  ;;  %v9886_v58 = vpack.i.bf16 %v8470_v45, %v8469_v63  ;;  %v8483_v45 = vld [vmem:[%s18098_s0 + $0x168] sm:$0xff] }
 0x148   :  { %18481 = vst [vmem:[#allocation101_spill] sm:$0xff] %v13779_v49 }
 0x149   :  { %9862 = vrot.lane.b32.xlu1 %v9861_v25, %s11737_s26  ;;  %v8475_v25 = vld [vmem:[%s18098_s0 + $0x108] sm:$0xff] }
 0x14a   :  { %9857 = vrot.lane.b32.xlu0 %v9856_v48, %s11737_s26  ;;  %v13789_v3 = vpop.permute.xlu1 %9592  ;;  %v8476_v48 = vld [vmem:[%s18098_s0 + $0x110] sm:$0xff] }
 0x14b   :  { %18482 = vst [vmem:[#allocation102_spill] sm:$0xff] %v13789_v3  ;;  %v13797_v7 = vpop.permute.xlu0 %9587 }
 0x14c   :  { %18483 = vst [vmem:[#allocation103_spill] sm:$0xff] %v13797_v7  ;;  %v8525_v7 = vld [vmem:[%s18098_s0 + $0x61] sm:$0xff] }
 0x14d   :  { %9872 = vrot.lane.b32.xlu1 %v9871_v1, %s11737_s26  ;;  %v9901_v1 = vpack.i.bf16 %v8476_v48, %v8475_v25  ;;  %v8481_v48 = vld [vmem:[%s18098_s0 + $0x150] sm:$0xff] }
 0x14e   :  { %9867 = vrot.lane.b32.xlu0 %v9866_v6, %s11737_s26  ;;  %v13807_v12 = vpop.permute.xlu1 %9602  ;;  %v9896_v6 = vpack.i.bf16 %v8474_v0, %v8473_v13  ;;  %v8482_v13 = vld [vmem:[%s18098_s0 + $0x158] sm:$0xff] }
 0x14f   :  { %18484 = vst [vmem:[#allocation104_spill] sm:$0xff] %v13807_v12  ;;  %v13815_v59 = vpop.permute.xlu0 %9597  ;;  %v9916_v18 = vpack.i.bf16 %v8482_v13, %v8481_v48  ;;  %v8523_v13 = vld [vmem:[%s18098_s0 + $0x49] sm:$0xff] }
 0x150   :  { %18485 = vst [vmem:[#allocation105_spill] sm:$0xff] %v13815_v59 }
 0x151   :  { %9882 = vrot.lane.b32.xlu1 %v9881_v19, %s11737_s26  ;;  %v8478_v19 = vld [vmem:[%s18098_s0 + $0x128] sm:$0xff] }
 0x152   :  { %9877 = vrot.lane.b32.xlu0 %v9876_v38, %s11737_s26  ;;  %v13825_v2 = vpop.permute.xlu1 %9612  ;;  %v9906_v63 = vpack.i.bf16 %v8478_v19, %v8477_v43  ;;  %v8522_v43 = vld [vmem:[%s18098_s0 + $0x39] sm:$0xff] }
 0x153   :  { %18486 = vst [vmem:[#allocation106_spill] sm:$0xff] %v13825_v2  ;;  %v13833_v38 = vpop.permute.xlu0 %9607  ;;  %v18490_v2 = vld [vmem:[#allocation6_spill] sm:$0xff] }
 0x154   :  { %18487 = vst [vmem:[#allocation107_spill] sm:$0xff] %v13833_v38 }
 0x155   :  { %9892 = vrot.lane.b32.xlu1 %v9891_v53, %s11737_s26  ;;  %v8484_v53 = vld [vmem:[%s18098_s0 + $0x170] sm:$0xff] }
 0x156   :  { %9887 = vrot.lane.b32.xlu0 %v9886_v58, %s11737_s26  ;;  %v3356_v58 = vsel %vm3354_vm3, %v11616_v39, 0  ;;  %v13848_v25 = vpop.permute.xlu1 %9622  ;;  %v8485_v39 = vld [vmem:[%s18098_s0 + $0x180] sm:$0xff] }
 0x157   :  { %8875 = vmatpush3.bf16.msra.mxu0 %v3356_v58  ;;  %v13856_v0 = vpop.permute.xlu0 %9617 }
 0x159   :  { %9902 = vrot.lane.b32.xlu1 %v9901_v1, %s11737_s26  ;;  %v11617_v1 = vld [vmem:[%s18100_s2 + $0x8] sm:$0xff]  }
 0x15a   :  { %9897 = vrot.lane.b32.xlu0 %v9896_v6, %s11737_s26  ;;  %v9921_v6 = vpack.i.bf16 %v8484_v53, %v8483_v45  ;;  %8876 = vmatprep.subr.bf16.mxu0 %v11617_v1  ;;  %v13869_v19 = vpop.permute.xlu1 %9632  ;;  %v11618_v45 = vld [vmem:[%s18100_s2] sm:$0xff]   ;;  %v9931_v53 = vpack.i.bf16 %v8522_v43, %v8521_v52  ;;  %v9069_v52 = vunpack.i.l.bf16 %v18490_v2  ;;  %s11738_s2 = smov 28  }
 0x15b   :  { %8877 = vmatpush3.bf16.msra.mxu0 %v11617_v1  ;;  %v8524_v1 = vld [vmem:[%s18098_s0 + $0x51] sm:$0xff] }
 0x15c   :  { %8878 = vmatprep.subr.bf16.mxu0 %v11618_v45  ;;  %v13926_v33 = vsel %vm2678_vm0, %v11676_v9, %v9069_v52  ;;  %v11678_v9 = vld [vmem:[%s18098_s0 + $0x48] sm:$0xff] }
 0x15d   :  { %9912 = vrot.lane.b32.xlu1 %v9911_v30, %s11737_s26  ;;  %v8486_v30 = vld [vmem:[%s18098_s0 + $0x188] sm:$0xff] }
 0x15e   :  { %9907 = vrot.lane.b32.xlu0 %v9906_v63, %s11737_s26  ;;  %v13877_v63 = vpop.permute.xlu0 %9627  ;;  %v9926_v58 = vpack.i.bf16 %v8486_v30, %v8485_v39  ;;  %v13884_v48 = vpop.permute.xlu1 %9642  ;;  %v18492_v30 = vld [vmem:[#allocation8_spill] sm:$0xff] }
 0x15f   :  { %18488 = vst [vmem:[#allocation108_spill] sm:$0xff] %v13884_v48  ;;  %8879 = vmatpush3.bf16.msra.mxu0 %v11618_v45  ;;  %v9075_v59 = vunpack.i.h.bf16 %v18492_v30  ;;  %v9074_v12 = vunpack.i.l.bf16 %v18492_v30  ;;  %v9936_v45 = vpack.i.bf16 %v8524_v1, %v8523_v13  ;;  %v18493_v30 = vld [vmem:[#allocation9_spill] sm:$0xff]  ;;  %v18495_v1 = vld [vmem:[#allocation10_spill] sm:$0xff] }
 0x160   :  { %v9065_v3 = vunpack.i.h.bf16 %v18493_v30  ;;  %v9085_v49 = vunpack.i.h.bf16 %v18495_v1  ;;  %v9084_v55 = vunpack.i.l.bf16 %v18495_v1 }
 0x161   :  { %9922 = vrot.lane.b32.xlu1 %v9921_v6, %s11737_s26  ;;  %v9070_v6 = vunpack.i.h.bf16 %v18490_v2  ;;  %v8526_v2 = vld [vmem:[%s18098_s0 + $0x69] sm:$0xff]  ;;  %v13946_v52 = vsel %vm2678_vm0, %v11678_v9, %v9074_v12  ;;  %v11681_v12 = vld [vmem:[%s18098_s0 + $0x20] sm:$0xff] }
 0x162   :  { %9917 = vrot.lane.b32.xlu0 %v9916_v18, %s11737_s26  ;;  %v13892_v38 = vpop.permute.xlu0 %9637  ;;  %v18491_v18 = vld [vmem:[#allocation7_spill] sm:$0xff]  ;;  %v13916_v13 = vpop.permute.xlu1 %9652  ;;  %v9951_v1 = vpack.i.bf16 %v8526_v2, %v8525_v7  ;;  %v11680_v7 = vld [vmem:[%s18098_s0 + $0x18] sm:$0xff]  ;;  %v11683_v9 = vld [vmem:[%s18098_s0 + $0x80] sm:$0xff] }
 0x163   :  { %18489 = vst [vmem:[#allocation109_spill] sm:$0xff] %v13892_v38  ;;  %v9060_v43 = vunpack.i.h.bf16 %v18491_v18  ;;  %v9059_v39 = vunpack.i.l.bf16 %v18491_v18  ;;  %v53_v18 = vld [vmem:[%s18098_s0 + $0x8] sm:$0xff]  ;;  %18494 = vst [vmem:[#allocation6_spill] sm:$0xff] %v13916_v13 }
 0x165   :  { %9932 = vrot.lane.b32.xlu1 %v9931_v53, %s11738_s2  ;;  %v52_v53 = vld [vmem:[%s18098_s0] sm:$0xff]  ;;  %v13940_v35 = vsel %vm2678_vm0, %v53_v18, %v9060_v43  ;;  %v13965_v43 = vsel %vm2678_vm0, %v11681_v12, %v9065_v3 }
 0x166   :  { %9927 = vrot.lane.b32.xlu0 %v9926_v58, %s11737_s26  ;;  %v9064_v58 = vunpack.i.l.bf16 %v18493_v30  ;;  %v13920_v24 = vpop.permute.xlu0 %9647  ;;  %v13932_v30 = vsel %vm2678_vm0, %v11677_v61, %v9070_v6  ;;  %v13937_v21 = vsel %vm2678_vm0, %v52_v53, %v9059_v39  ;;  %v11679_v61 = vld [vmem:[%s18098_s0 + $0x50] sm:$0xff]  ;;  %v13969_v53 = vpop.permute.xlu1 %9662  ;;  %v8528_v18 = vld [vmem:[%s18098_s0 + $0x81] sm:$0xff] }
 0x167   :  { %18496 = vst [vmem:[#allocation7_spill] sm:$0xff] %v13920_v24  ;;  %v18498_v39 = vld [vmem:[#allocation11_spill] sm:$0xff]  ;;  %18499 = vst [vmem:[#allocation8_spill] sm:$0xff] %v13969_v53  ;;  %v18519_v24 = vld [vmem:[#allocation77_spill] sm:$0xff] }
 0x168   :  { %v13959_v6 = vsel %vm2678_vm0, %v11680_v7, %v9064_v58  ;;  %v9080_v2 = vunpack.i.h.bf16 %v18498_v39  ;;  %v11682_v58 = vld [vmem:[%s18098_s0 + $0x78] sm:$0xff] }
 0x169   :  { %9942 = vrot.lane.b32.xlu1 %v18497_v34, %s11739_s29  ;;  %v13952_v34 = vsel %vm2678_vm0, %v11679_v61, %v9075_v59  ;;  %v9079_v59 = vunpack.i.l.bf16 %v18498_v39  ;;  %v13981_v3 = vsel %vm2678_vm0, %v11682_v58, %v9084_v55  ;;  %v13987_v61 = vsel %vm2678_vm0, %v11683_v9, %v9085_v49  ;;  %v18500_v7 = vld [vmem:[#allocation12_spill] sm:$0xff] }
 0x16a   :  { %9937 = vrot.lane.b32.xlu0 %v9936_v45, %s11738_s2  ;;  %v8527_v45 = vld [vmem:[%s18098_s0 + $0x79] sm:$0xff]  ;;  %v9095_v12 = vunpack.i.h.bf16 %v18500_v7  ;;  %v9094_v39 = vunpack.i.l.bf16 %v18500_v7  ;;  %v13991_v22 = vpop.permute.xlu0 %9657  ;;  %v9105_v55 = vunpack.i.h.bf16 %v18503_v20  ;;  %v9104_v58 = vunpack.i.l.bf16 %v18503_v20  ;;  %v18506_v7 = vld [vmem:[#allocation75_spill] sm:$0xff]  ;;  %v14023_v5 = vpop.permute.xlu1 %9672 }
 0x16b   :  { %18501 = vst [vmem:[#allocation9_spill] sm:$0xff] %v13991_v22  ;;  %v9099_v49 = vunpack.i.l.bf16 %v18504_v40  ;;  %v18505_v9 = vld [vmem:[#allocation16_spill] sm:$0xff]  ;;  %v9956_v11 = vpack.i.bf16 %v8528_v18, %v8527_v45  ;;  %18508 = vst [vmem:[#allocation10_spill] sm:$0xff] %v14023_v5 }
 0x16c   :  { %v9114_v46 = vunpack.i.l.bf16 %v18505_v9  ;;  %v8530_v20 = vld [vmem:[%s18098_s0 + $0x99] sm:$0xff]  ;;  %v9115_v18 = vunpack.i.h.bf16 %v18505_v9  ;;  %v9110_v9 = vunpack.i.h.bf16 %v18507_v26  ;;  %v11688_v5 = vld [vmem:[%s18098_s0 + $0x90] sm:$0xff] }
 0x16d   :  { %9952 = vrot.lane.b32.xlu1 %v9951_v1, %s11738_s2  ;;  %v11684_v1 = vld [vmem:[%s18098_s0 + $0x60] sm:$0xff]  ;;  %v11690_v26 = vld [vmem:[%s18098_s0 + $0xd8] sm:$0xff]  ;;  %v9971_v17 = vpack.i.bf16 %v8530_v20, %v8529_v8  ;;  %v11694_v8 = vld [vmem:[%s18098_s0 + $0x108] sm:$0xff] }
 0x16e   :  { %9947 = vrot.lane.b32.xlu0 %v18506_v7, %s11739_s29  ;;  %v14013_v40 = vsel %vm2678_vm0, %v11684_v1, %v9079_v59  ;;  %v11685_v7 = vld [vmem:[%s18098_s0 + $0x68] sm:$0xff]  ;;  %v14029_v59 = vsel %vm2678_vm0, %v11686_v51, %v9094_v39  ;;  %v11687_v1 = vld [vmem:[%s18098_s0 + $0xb0] sm:$0xff]  ;;  %v14039_v14 = vpop.permute.xlu0 %9667  ;;  %v14045_v51 = vsel %vm2678_vm0, %v11688_v5, %v9089_v42  ;;  %v11689_v39 = vld [vmem:[%s18098_s0 + $0x98] sm:$0xff] }
 0x16f   :  { %v14019_v45 = vsel %vm2678_vm0, %v11685_v7, %v9080_v2  ;;  %v14035_v2 = vsel %vm2678_vm0, %v11687_v1, %v9095_v12  ;;  %v18509_v7 = vld [vmem:[#allocation18_spill] sm:$0xff]  ;;  %18510 = vst [vmem:[#allocation73_spill] sm:$0xff] %v14039_v14  ;;  %v14051_v12 = vsel %vm2678_vm0, %v11689_v39, %v9090_v29  ;;  %v14057_v1 = vsel %vm2678_vm0, %v11690_v26, %v9104_v58 }
 0x170   :  { %v9124_v27 = vunpack.i.l.bf16 %v18509_v7  ;;  %v18511_v14 = vld [vmem:[#allocation74_spill] sm:$0xff] }
 0x171   :  { %9962 = vrot.lane.b32.xlu1 %v18511_v14, %s11739_s29  ;;  %v11691_v5 = vld [vmem:[%s18098_s0 + $0xe0] sm:$0xff]  ;;  %v11693_v58 = vld [vmem:[%s18098_s0 + $0xc8] sm:$0xff] }
 0x172   :  { %v14065_v42 = vsel %vm2678_vm0, %v11691_v5, %v9105_v55  ;;  %v11692_v29 = vld [vmem:[%s18098_s0 + $0xc0] sm:$0xff]  ;;  %v14077_v14 = vsel %vm2678_vm0, %v11693_v58, %v9100_v44  ;;  %v14083_v55 = vsel %vm2678_vm0, %v11694_v8, %v9114_v46  ;;  %9957 = vrot.lane.b32.xlu0 %v9956_v11, %s11738_s2  ;;  %v11696_v44 = vld [vmem:[%s18098_s0 + $0xf0] sm:$0xff]  ;;  %v9125_v5 = vunpack.i.h.bf16 %v18509_v7  ;;  %v14100_v58 = vpop.permute.xlu1 %9682  ;;  %v11697_v8 = vld [vmem:[%s18098_s0 + $0xf8] sm:$0xff]  ;;  %v14122_v47 = vpop.permute.xlu0 %9677 }
 0x173   :  { %v14071_v39 = vsel %vm2678_vm0, %v11692_v29, %v9099_v49  ;;  %v11695_v49 = vld [vmem:[%s18098_s0 + $0x110] sm:$0xff]  ;;  %v14096_v26 = vsel %vm2678_vm0, %v11696_v44, %v9109_v31  ;;  %18513 = vst [vmem:[#allocation11_spill] sm:$0xff] %v14100_v58  ;;  %v14112_v31 = vsel %vm2678_vm0, %v11697_v8, %v9110_v9  ;;  %v11698_v7 = vld [vmem:[%s18098_s0 + $0x138] sm:$0xff]  ;;  %18515 = vst [vmem:[#allocation12_spill] sm:$0xff] %v14122_v47  ;;  %v9129_v9 = vunpack.i.l.bf16 %v18516_v32 }
 0x174   :  { %v14090_v20 = vsel %vm2678_vm0, %v11695_v49, %v9115_v18  ;;  %v18512_v46 = vld [vmem:[#allocation19_spill] sm:$0xff]  ;;  %v14118_v49 = vsel %vm2678_vm0, %v11698_v7, %v9124_v27  ;;  %v18514_v58 = vld [vmem:[#allocation20_spill] sm:$0xff]  ;;  %v18517_v8 = vld [vmem:[#allocation29_spill] sm:$0xff] }
 0x175   :  { %v9119_v29 = vunpack.i.l.bf16 %v18512_v46  ;;  %v8531_v11 = vld [vmem:[%s18098_s0 + $0xa9] sm:$0xff]  ;;  %v8532_v18 = vld [vmem:[%s18098_s0 + $0xb1] sm:$0xff]  ;;  %v9120_v44 = vunpack.i.h.bf16 %v18512_v46  ;;  %v9134_v60 = vunpack.i.l.bf16 %v18514_v58  ;;  %v9135_v54 = vunpack.i.h.bf16 %v18514_v58  ;;  %9972 = vrot.lane.b32.xlu1 %v9971_v17, %s11738_s2  ;;  %v8533_v58 = vld [vmem:[%s18098_s0 + $0xc1] sm:$0xff] }
 0x176   :  { %v9225_v22 = vunpack.i.h.bf16 %v18517_v8  ;;  %v9224_v53 = vunpack.i.l.bf16 %v18517_v8  ;;  %v18518_v27 = vld [vmem:[#allocation32_spill] sm:$0xff]  ;;  %9967 = vrot.lane.b32.xlu0 %v18519_v24, %s11739_s29  ;;  %v9976_v47 = vpack.i.bf16 %v8532_v18, %v8531_v11  ;;  %v8534_v32 = vld [vmem:[%s18098_s0 + $0xc9] sm:$0xff]  ;;  %v11699_v17 = vld [vmem:[%s18098_s0 + $0x140] sm:$0xff]  ;;  %v14154_v4 = vpop.permute.xlu1 %9692  ;;  %v14170_v37 = vpop.permute.xlu0 %9687 }
 0x177   :  { %v9220_v7 = vunpack.i.h.bf16 %v18518_v27  ;;  %v9219_v46 = vunpack.i.l.bf16 %v18518_v27  ;;  %v14144_v8 = vsel %vm2678_vm0, %v11699_v17, %v9125_v5  ;;  %v11700_v24 = vld [vmem:[%s18098_s0 + $0x120] sm:$0xff]  ;;  %v18520_v18 = vld [vmem:[#allocation35_spill] sm:$0xff]  ;;  %18521 = vst [vmem:[#allocation13_spill] sm:$0xff] %v14154_v4  ;;  %v14160_v5 = vsel %vm2678_vm0, %v11701_v10, %v9120_v44  ;;  %18523 = vst [vmem:[#allocation14_spill] sm:$0xff] %v14170_v37 }
 0x178   :  { %v14150_v11 = vsel %vm2678_vm0, %v11700_v24, %v9119_v29  ;;  %v9235_v27 = vunpack.i.h.bf16 %v18520_v18  ;;  %v9234_v13 = vunpack.i.l.bf16 %v18520_v18  ;;  %v11702_v17 = vld [vmem:[%s18098_s0 + $0x168] sm:$0xff]  ;;  %v18522_v24 = vld [vmem:[#allocation36_spill] sm:$0xff]  ;;  %v9991_v23 = vpack.i.bf16 %v8534_v32, %v8533_v58  ;;  %v18529_v32 = vld [vmem:[#allocation41_spill] sm:$0xff] }
 0x179   :  { %v14166_v29 = vsel %vm2678_vm0, %v11702_v17, %v9134_v60  ;;  %v9230_v15 = vunpack.i.h.bf16 %v18522_v24  ;;  %v9229_v18 = vunpack.i.l.bf16 %v18522_v24  ;;  %v11703_v4 = vld [vmem:[%s18098_s0 + $0x170] sm:$0xff]  ;;  %v11705_v17 = vld [vmem:[%s18098_s0 + $0x158] sm:$0xff] }
 0x17a   :  { %v14176_v10 = vsel %vm2678_vm0, %v11703_v4, %v9135_v54  ;;  %v11704_v44 = vld [vmem:[%s18098_s0 + $0x150] sm:$0xff]  ;;  %v14188_v24 = vsel %vm2678_vm0, %v11705_v17, %v9130_v62  ;;  %v14194_v4 = vsel %vm2743_vm1, %v13959_v6, %v9224_v53  ;;  %v14198_v54 = vsel %vm2743_vm1, %v13965_v43, %v9225_v22  ;;  %9977 = vrot.lane.b32.xlu0 %v9976_v47, %s11738_s2  ;;  %v8536_v47 = vld [vmem:[%s18098_s0 + $0xe1] sm:$0xff]  ;;  %v14237_v58 = vpop.permute.xlu0 %9697 }
 0x17b   :  { %v14182_v60 = vsel %vm2678_vm0, %v11704_v44, %v9129_v9  ;;  %v18524_v37 = vld [vmem:[#allocation76_spill] sm:$0xff]  ;;  %v14202_v9 = vsel %vm2743_vm1, %v13937_v21, %v9219_v46  ;;  %v14206_v62 = vsel %vm2743_vm1, %v13940_v35, %v9220_v7  ;;  %v14215_v6 = vsel %vm2743_vm1, %v13952_v34, %v9235_v27  ;;  %v18525_v22 = vld [vmem:[#allocation39_spill] sm:$0xff]  ;;  %v14219_v21 = vpop.permute.xlu1 %9702  ;;  %18528 = vst [vmem:[#allocation16_spill] sm:$0xff] %v14237_v58  ;;  %v18530_v17 = vld [vmem:[#allocation42_spill] sm:$0xff] }
 0x17c   :  { %9982 = vrot.lane.b32.xlu1 %v18524_v37, %s11739_s29  ;;  %v14211_v37 = vsel %vm2743_vm1, %v13946_v52, %v9234_v13  ;;  %v9245_v43 = vunpack.i.h.bf16 %v18525_v22  ;;  %v9244_v53 = vunpack.i.l.bf16 %v18525_v22  ;;  %18526 = vst [vmem:[#allocation15_spill] sm:$0xff] %v14219_v21  ;;  %v8535_v35 = vld [vmem:[%s18098_s0 + $0xd9] sm:$0xff]  ;;  %v14229_v13 = vsel %vm2743_vm1, %v13926_v33, %v9229_v18  ;;  %v18531_v33 = vld [vmem:[#allocation43_spill] sm:$0xff] }
 0x17d   :  { %v14233_v52 = vsel %vm2743_vm1, %v13932_v30, %v9230_v15  ;;  %v18527_v34 = vld [vmem:[#allocation40_spill] sm:$0xff]  ;;  %v9255_v27 = vunpack.i.h.bf16 %v18529_v32  ;;  %v9254_v44 = vunpack.i.l.bf16 %v18529_v32  ;;  %v9250_v22 = vunpack.i.h.bf16 %v18530_v17 }
 0x17e   :  { %v9240_v7 = vunpack.i.h.bf16 %v18527_v34  ;;  %v9239_v46 = vunpack.i.l.bf16 %v18527_v34  ;;  %v9249_v21 = vunpack.i.l.bf16 %v18530_v17  ;;  %v9265_v18 = vunpack.i.h.bf16 %v18531_v33  ;;  %v18532_v30 = vld [vmem:[#allocation44_spill] sm:$0xff] }
 0x17f   :  { %v9264_v15 = vunpack.i.l.bf16 %v18531_v33  ;;  %v9259_v28 = vunpack.i.l.bf16 %v18532_v30  ;;  %v18533_v34 = vld [vmem:[#allocation80_spill] sm:$0xff]  ;;  %v9996_v58 = vpack.i.bf16 %v8536_v47, %v8535_v35  ;;  %v14261_v33 = vsel %vm2743_vm1, %v13987_v61, %v9245_v43  ;;  %v14265_v47 = vpop.permute.xlu1 %9712  ;;  %v14277_v61 = vpop.permute.xlu0 %9707 }
 0x180   :  { %9992 = vrot.lane.b32.xlu1 %v9991_v23, %s11738_s2  ;;  %9987 = vrot.lane.b32.xlu0 %v18533_v34, %s11739_s29  ;;  %v8537_v32 = vld [vmem:[%s18098_s0 + $0xf1] sm:$0xff]  ;;  %v8538_v17 = vld [vmem:[%s18098_s0 + $0xf9] sm:$0xff]  ;;  %v14257_v23 = vsel %vm2743_vm1, %v13981_v3, %v9244_v53  ;;  %v9260_v56 = vunpack.i.h.bf16 %v18532_v30  ;;  %18535 = vst [vmem:[#allocation75_spill] sm:$0xff] %v14265_v47  ;;  %v14269_v16 = vsel %vm2743_vm1, %v14013_v40, %v9239_v46  ;;  %v18536_v53 = vld [vmem:[#allocation46_spill] sm:$0xff]  ;;  %vm7101_vm0 = vcmask 588800  }
 0x181   :  { %v18534_v34 = vld [vmem:[#allocation45_spill] sm:$0xff]  ;;  %v14273_v38 = vsel %vm2743_vm1, %v14019_v45, %v9240_v7  ;;  %v9269_v48 = vunpack.i.l.bf16 %v18536_v53  ;;  %18537 = vst [vmem:[#allocation17_spill] sm:$0xff] %v14277_v61  ;;  %v14281_v43 = vsel %vm2743_vm1, %v14029_v59, %v9254_v44  ;;  %v14285_v30 = vsel %vm2743_vm1, %v14035_v2, %v9255_v27  ;;  %v18538_v45 = vld [vmem:[#allocation79_spill] sm:$0xff] }
 0x182   :  { %v9274_v35 = vunpack.i.l.bf16 %v18534_v34  ;;  %v9275_v3 = vunpack.i.h.bf16 %v18534_v34  ;;  %v14289_v40 = vsel %vm2743_vm1, %v14045_v51, %v9249_v21  ;;  %v10011_v7 = vpack.i.bf16 %v8538_v17, %v8537_v32  ;;  %v18539_v27 = vld [vmem:[#allocation47_spill] sm:$0xff]  ;;  %v18543_v32 = vld [vmem:[#allocation49_spill] sm:$0xff] }
 0x183   :  { %v14295_v46 = vsel %vm2743_vm1, %v14051_v12, %v9250_v22  ;;  %v14299_v59 = vsel %vm2743_vm1, %v14057_v1, %v9264_v15  ;;  %v14303_v2 = vsel %vm2743_vm1, %v14065_v42, %v9265_v18  ;;  %v14307_v51 = vsel %vm2743_vm1, %v14071_v39, %v9259_v28  ;;  %v14320_v42 = vpop.permute.xlu1 %9722  ;;  %v8539_v28 = vld [vmem:[%s18098_s0 + $0x109] sm:$0xff]  ;;  %v8540_v39 = vld [vmem:[%s18098_s0 + $0x111] sm:$0xff]  ;;  %v14338_v18 = vpop.permute.xlu0 %9717 }
 0x184   :  { %10002 = vrot.lane.b32.xlu1 %v18538_v45, %s11739_s29  ;;  %9997 = vrot.lane.b32.xlu0 %v9996_v58, %s11738_s2  ;;  %v14312_v21 = vsel %vm2743_vm1, %v14077_v14, %v9260_v56  ;;  %v14316_v12 = vsel %vm2743_vm1, %v14083_v55, %v9274_v35  ;;  %v9270_v1 = vunpack.i.h.bf16 %v18536_v53  ;;  %v9284_v44 = vunpack.i.l.bf16 %v18539_v27  ;;  %18540 = vst [vmem:[#allocation18_spill] sm:$0xff] %v14320_v42  ;;  %v18541_v58 = vld [vmem:[#allocation48_spill] sm:$0xff]  ;;  %v18544_v35 = vld [vmem:[#allocation50_spill] sm:$0xff] }
 0x185   :  { %v14330_v56 = vsel %vm2743_vm1, %v14090_v20, %v9275_v3  ;;  %v14334_v14 = vsel %vm2743_vm1, %v14096_v26, %v9269_v48  ;;  %v9285_v55 = vunpack.i.h.bf16 %v18539_v27  ;;  %v9279_v22 = vunpack.i.l.bf16 %v18541_v58  ;;  %18542 = vst [vmem:[#allocation74_spill] sm:$0xff] %v14338_v18  ;;  %v18545_v48 = vld [vmem:[#allocation67_spill] sm:$0xff]  ;;  %v18546_v45 = vld [vmem:[#allocation82_spill] sm:$0xff] }
 0x186   :  { %v9280_v15 = vunpack.i.h.bf16 %v18541_v58  ;;  %v9295_v17 = vunpack.i.h.bf16 %v18543_v32  ;;  %v9294_v34 = vunpack.i.l.bf16 %v18543_v32  ;;  %v9290_v53 = vunpack.i.h.bf16 %v18544_v35  ;;  %v8541_v58 = vld [vmem:[%s18098_s0 + $0x121] sm:$0xff]  ;;  %v8542_v32 = vld [vmem:[%s18098_s0 + $0x129] sm:$0xff] }
 0x187   :  { %v9289_v20 = vunpack.i.l.bf16 %v18544_v35  ;;  %v9385_v26 = vunpack.i.h.bf16 %v18545_v48  ;;  %v9384_v3 = vunpack.i.l.bf16 %v18545_v48  ;;  %v10016_v27 = vpack.i.bf16 %v8540_v39, %v8539_v28  ;;  %v18547_v48 = vld [vmem:[#allocation68_spill] sm:$0xff]  ;;  %v14366_v39 = vpop.permute.xlu1 %9732 }
 0x188   :  { %10012 = vrot.lane.b32.xlu1 %v10011_v7, %s11738_s2  ;;  %10007 = vrot.lane.b32.xlu0 %v18546_v45, %s11739_s29  ;;  %v14358_v7 = vsel %vm2743_vm1, %v14112_v31, %v9270_v1  ;;  %v14362_v35 = vsel %vm2743_vm1, %v14118_v49, %v9284_v44  ;;  %v9380_v18 = vunpack.i.h.bf16 %v18547_v48  ;;  %v9379_v28 = vunpack.i.l.bf16 %v18547_v48  ;;  %18548 = vst [vmem:[#allocation19_spill] sm:$0xff] %v14366_v39  ;;  %v18549_v31 = vld [vmem:[#allocation69_spill] sm:$0xff]  ;;  %v14378_v49 = vpop.permute.xlu0 %9727 }
 0x189   :  { %v14370_v45 = vsel %vm2743_vm1, %v14144_v8, %v9285_v55  ;;  %v14374_v42 = vsel %vm2743_vm1, %v14150_v11, %v9279_v22  ;;  %v9395_v1 = vunpack.i.h.bf16 %v18549_v31  ;;  %v9394_v61 = vunpack.i.l.bf16 %v18549_v31  ;;  %18550 = vst [vmem:[#allocation20_spill] sm:$0xff] %v14378_v49  ;;  %v18551_v11 = vld [vmem:[#allocation81_spill] sm:$0xff] }
 0x18a   :  { %v14382_v44 = vsel %vm2743_vm1, %v14160_v5, %v9280_v15  ;;  %v14386_v48 = vsel %vm2743_vm1, %v14166_v29, %v9294_v34  ;;  %v14390_v8 = vsel %vm2743_vm1, %v14176_v10, %v9295_v17  ;;  %v10031_v55 = vpack.i.bf16 %v8542_v32, %v8541_v58  ;;  %v8605_v15 = vld [vmem:[%s18098_s0 + $0x122] sm:$0xff]  ;;  %v18564_v32 = vld [vmem:[#allocation72_spill] sm:$0xff] }
 0x18b   :  { %v14396_v22 = vsel %vm2743_vm1, %v14182_v60, %v9289_v20  ;;  %v14400_v5 = vsel %vm2743_vm1, %v14188_v24, %v9290_v53  ;;  %v14404_v29 = vsel %vm2808_vm2, %v14194_v4, %v9384_v3  ;;  %v14408_v10 = vsel %vm2808_vm2, %v14198_v54, %v9385_v26  ;;  %v8606_v60 = vld [vmem:[%s18098_s0 + $0x12a] sm:$0xff]  ;;  %v18558_v54 = vld [vmem:[#allocation70_spill] sm:$0xff]  ;;  %v14427_v53 = vpop.permute.xlu1 %9742  ;;  %v8543_v20 = vld [vmem:[%s18098_s0 + $0x139] sm:$0xff] }
 0x18c   :  { %10022 = vrot.lane.b32.xlu1 %v18551_v11, %s11739_s29  ;;  %18552 = vst [vmem:[#allocation21_spill] sm:$0xff] %v14396_v22  ;;  %18553 = vst [vmem:[#allocation29_spill] sm:$0xff] %v14400_v5  ;;  %10017 = vrot.lane.b32.xlu0 %v10016_v27, %s11738_s2  ;;  %v14419_v24 = vsel %vm2808_vm2, %v14202_v9, %v9379_v28  ;;  %v14423_v4 = vsel %vm2808_vm2, %v14206_v62, %v9380_v18  ;;  %v9390_v17 = vunpack.i.h.bf16 %v18558_v54  ;;  %v8544_v26 = vld [vmem:[%s18098_s0 + $0x141] sm:$0xff]  ;;  %v18562_v18 = vld [vmem:[#allocation71_spill] sm:$0xff]  ;;  %v14445_v58 = vpop.permute.xlu0 %9737 }
 0x18d   :  { %18554 = vst [vmem:[#allocation32_spill] sm:$0xff] %v14404_v29  ;;  %18555 = vst [vmem:[#allocation77_spill] sm:$0xff] %v14408_v10  ;;  %v9389_v34 = vunpack.i.l.bf16 %v18558_v54  ;;  %v14437_v9 = vsel %vm2808_vm2, %v14211_v37, %v9394_v61  ;;  %v14441_v62 = vsel %vm2808_vm2, %v14215_v6, %v9395_v1  ;;  %v9405_v3 = vunpack.i.h.bf16 %v18562_v18  ;;  %v18565_v11 = vld [vmem:[#allocation78_spill] sm:$0xff] }
 0x18e   :  { %18556 = vst [vmem:[#allocation35_spill] sm:$0xff] %v14419_v24  ;;  %18557 = vst [vmem:[#allocation36_spill] sm:$0xff] %v14423_v4  ;;  %v9404_v27 = vunpack.i.l.bf16 %v18562_v18  ;;  %v9400_v28 = vunpack.i.h.bf16 %v18564_v32  ;;  %v9399_v31 = vunpack.i.l.bf16 %v18564_v32  ;;  %v9414_v54 = vunpack.i.l.bf16 %v18565_v11  ;;  %v18593_v4 = vld [vmem:[#allocation33_spill] sm:$0xff] }
 0x18f   :  { %18559 = vst [vmem:[#allocation76_spill] sm:$0xff] %v14427_v53  ;;  %18560 = vst [vmem:[#allocation39_spill] sm:$0xff] %v14437_v9  ;;  %v10041_v37 = vpack.i.bf16 %v8606_v60, %v8605_v15  ;;  %v9415_v61 = vunpack.i.h.bf16 %v18565_v11  ;;  %v18566_v53 = vld [vmem:[#allocation83_spill] sm:$0xff]  ;;  %v10036_v18 = vpack.i.bf16 %v8544_v26, %v8543_v20  ;;  %v18567_v15 = vld [vmem:[#allocation84_spill] sm:$0xff]  ;;  %v14468_v39 = vpop.permute.xlu1 %9752  ;;  %v14478_v26 = vsel %vm2808_vm2, %v14229_v13, %v9389_v34 }
 0x190   :  { %18561 = vst [vmem:[#allocation40_spill] sm:$0xff] %v14441_v62  ;;  %18563 = vst [vmem:[#allocation41_spill] sm:$0xff] %v14445_v58  ;;  %10032 = vrot.lane.b32.xlu1 %v10031_v55, %s11738_s2  ;;  %v9410_v6 = vunpack.i.h.bf16 %v18566_v53  ;;  %v9409_v1 = vunpack.i.l.bf16 %v18566_v53  ;;  %10027 = vrot.lane.b32.xlu0 %v13104_v50, %s11739_s29  ;;  %v14459_v58 = vld [vmem:[%s18098_s0 + $0x151] sm:$0xff]  ;;  %v8546_v55 = vld [vmem:[%s18098_s0 + $0x159] sm:$0xff]  ;;  %v9425_v60 = vunpack.i.h.bf16 %v18567_v15  ;;  %v9424_v32 = vunpack.i.l.bf16 %v18567_v15  ;;  %v14492_v47 = vpop.permute.xlu0 %9747 }
 0x191   :  { %v18568_v11 = vld [vmem:[#allocation85_spill] sm:$0xff]  ;;  %18569 = vst [vmem:[#allocation42_spill] sm:$0xff] %v14468_v39  ;;  %v8608_v20 = vld [vmem:[%s18098_s0 + $0x142] sm:$0xff]  ;;  %18570 = vst [vmem:[#allocation43_spill] sm:$0xff] %v14478_v26  ;;  %v14482_v15 = vsel %vm2808_vm2, %v14233_v52, %v9390_v17  ;;  %v14490_v39 = vsel %vm2808_vm2, %v14261_v33, %v9405_v3  ;;  %v14506_v52 = vsel %vm2808_vm2, %v14269_v16, %v9399_v31  ;;  %v9629_v9 = vunpack.i.l.bf16 %v13877_v63 }
 0x192   :  { %v9420_v49 = vunpack.i.h.bf16 %v18568_v11  ;;  %v9419_v53 = vunpack.i.l.bf16 %v18568_v11  ;;  %v8607_v50 = vld [vmem:[%s18098_s0 + $0x13a] sm:$0xff]  ;;  %18571 = vst [vmem:[#allocation44_spill] sm:$0xff] %v14482_v15  ;;  %v14486_v11 = vsel %vm2808_vm2, %v14257_v23, %v9404_v27  ;;  %18573 = vst [vmem:[#allocation45_spill] sm:$0xff] %v14490_v39  ;;  %v14497_v62 = vld [vmem:[%s18098_s0 + $0x152] sm:$0xff]  ;;  %v14510_v23 = vsel %vm2808_vm2, %v14273_v38, %v9400_v28 }
 0x193   :  { %18572 = vst [vmem:[#allocation80_spill] sm:$0xff] %v14486_v11  ;;  %18574 = vst [vmem:[#allocation46_spill] sm:$0xff] %v14492_v47  ;;  %v14502_v13 = vld [vmem:[%s18098_s0 + $0x15a] sm:$0xff]  ;;  %v14514_v33 = vsel %vm2808_vm2, %v14281_v43, %v9414_v54  ;;  %v10051_v17 = vpack.i.bf16 %v8546_v55, %v14459_v58  ;;  %v14521_v34 = vld [vmem:[%s18098_s0 + $0x169] sm:$0xff]  ;;  %v14550_v58 = vsel %vm2808_vm2, %v14285_v30, %v9415_v61  ;;  %v14597_v55 = vpop.permute.xlu1 %9762 }
 0x194   :  { %18575 = vst [vmem:[#allocation79_spill] sm:$0xff] %v14506_v52  ;;  %18576 = vst [vmem:[#allocation47_spill] sm:$0xff] %v14510_v23  ;;  %10042 = vrot.lane.b32.xlu1 %v10041_v37, %s11739_s29  ;;  %v14526_v16 = vld [vmem:[%s18098_s0 + $0x171] sm:$0xff]  ;;  %v14536_v43 = vld [vmem:[%s18098_s0 + $0x1a0] sm:$0xff]  ;;  %v14554_v28 = vsel %vm2808_vm2, %v14289_v40, %v9409_v1  ;;  %v14558_v31 = vsel %vm2808_vm2, %v14295_v46, %v9410_v6  ;;  %10037 = vrot.lane.b32.xlu0 %v10036_v18, %s11738_s2 }
 0x195   :  { %18577 = vst [vmem:[#allocation48_spill] sm:$0xff] %v14514_v33  ;;  %v14531_v38 = vld [vmem:[%s18098_s0 + $0x198] sm:$0xff]  ;;  %v14541_v3 = vld [vmem:[%s18098_s0 + $0x16a] sm:$0xff]  ;;  %18578 = vst [vmem:[#allocation49_spill] sm:$0xff] %v14550_v58  ;;  %v10046_v54 = vpack.i.bf16 %v8608_v20, %v8607_v50  ;;  %v14583_v61 = vsel %vm2808_vm2, %v14299_v59, %v9424_v32  ;;  %v14587_v6 = vsel %vm2808_vm2, %v14303_v2, %v9425_v60 }
 0x196   :  { %v14546_v27 = vld [vmem:[%s18098_s0 + $0x172] sm:$0xff]  ;;  %18579 = vst [vmem:[#allocation50_spill] sm:$0xff] %v14554_v28  ;;  %18580 = vst [vmem:[#allocation67_spill] sm:$0xff] %v14558_v31  ;;  %v14569_v30 = vld [vmem:[%s18098_s0 + $0x1a1] sm:$0xff]  ;;  %v14591_v1 = vsel %vm2808_vm2, %v14307_v51, %v9419_v53  ;;  %v14595_v18 = vsel %vm2808_vm2, %v14312_v21, %v9420_v49  ;;  %v10061_v33 = vpack.i.bf16 %v14502_v13, %v14497_v62 }
 0x197   :  { %v14564_v37 = vld [vmem:[%s18098_s0 + $0x199] sm:$0xff]  ;;  %v14574_v40 = vld [vmem:[%s18098_s0 + $0x181] sm:$0xff]  ;;  %v14579_v46 = vld [vmem:[%s18098_s0 + $0x189] sm:$0xff]  ;;  %18581 = vst [vmem:[#allocation82_spill] sm:$0xff] %v14583_v61  ;;  %v10056_v62 = vpack.i.bf16 %v14526_v16, %v14521_v34  ;;  %v10071_v13 = vpack.i.bf16 %v14536_v43, %v14531_v38  ;;  %v10066_v61 = vpack.i.bf16 %v14546_v27, %v14541_v3  ;;  %v9625_v16 = vunpack.i.h.bf16 %v13848_v25  ;;  %v14711_v43 = vpop.permute.xlu1 %9772 }
 0x198   :  { %18582 = vst [vmem:[#allocation68_spill] sm:$0xff] %v14587_v6  ;;  %18583 = vst [vmem:[#allocation69_spill] sm:$0xff] %v14591_v1  ;;  %v14602_v50 = vld [vmem:[%s18098_s0 + $0x19a] sm:$0xff]  ;;  %v14607_v59 = vld [vmem:[%s18098_s0 + $0x1a2] sm:$0xff]  ;;  %10052 = vrot.lane.b32.xlu1 %v10051_v17, %s11738_s2  ;;  %10047 = vrot.lane.b32.xlu0 %v10046_v54, %s11739_s29  ;;  %v9624_v38 = vunpack.i.l.bf16 %v13848_v25  ;;  %v10081_v3 = vpack.i.bf16 %v14569_v30, %v14564_v37  ;;  %v10076_v27 = vpack.i.bf16 %v14579_v46, %v14574_v40 }
 0x199   :  { %18584 = vst [vmem:[#allocation81_spill] sm:$0xff] %v14595_v18  ;;  %18585 = vst [vmem:[#allocation70_spill] sm:$0xff] %v14597_v55  ;;  %v14612_v2 = vld [vmem:[%s18098_s0 + $0x182] sm:$0xff]  ;;  %v14617_v51 = vld [vmem:[%s18098_s0 + $0x18a] sm:$0xff]  ;;  %v14623_v55 = vpop.permute.xlu0 %9757  ;;  %v9620_v37 = vunpack.i.h.bf16 %v13856_v0  ;;  %v9619_v30 = vunpack.i.l.bf16 %v13856_v0  ;;  %v2909_v26 = vsel %vm2873_vm4, %v18593_v4, %v9625_v16  ;;  %v9634_v4 = vunpack.i.l.bf16 %v13869_v19 }
 0x19a   :  { %v18586_v21 = vld [vmem:[#allocation87_spill] sm:$0xff]  ;;  %v18587_v32 = vld [vmem:[#allocation90_spill] sm:$0xff]  ;;  %18588 = vst [vmem:[#allocation71_spill] sm:$0xff] %v14623_v55  ;;  %v14628_v47 = vld [vmem:[%s18098_s0 + $0x1f8] sm:$0xff] }
 0x19b   :  { %v14633_v18 = vld [vmem:[%s18098_s0 + $0x200] sm:$0xff]  ;;  %v14643_v53 = vld [vmem:[%s18098_s0 + $0x1e8] sm:$0xff]  ;;  %v14707_v34 = vld [vmem:[%s18098_s0 + $0x230] sm:$0xff]  ;;  %18591 = vst [vmem:[#allocation72_spill] sm:$0xff] %v14711_v43  ;;  %v9783_v24 = vpop.permute.xlu1 %9782  ;;  %v2907_v43 = vsel %vm2873_vm4, %v13455_v57, %v9620_v37 }
 0x19c   :  { %v14638_v49 = vld [vmem:[%s18098_s0 + $0x1e0] sm:$0xff]  ;;  %v14663_v1 = vld [vmem:[%s18098_s0 + $0x1e9] sm:$0xff]  ;;  %v14725_v39 = vld [vmem:[%s18098_s0 + $0x218] sm:$0xff]  ;;  %10062 = vrot.lane.b32.xlu1 %v10061_v33, %s11739_s29  ;;  %v2906_v33 = vsel %vm2873_vm4, %v13452_v36, %v9619_v30  ;;  %v9785_v46 = vunpack.i.h.bf16 %v9783_v24  ;;  %v9784_v10 = vunpack.i.l.bf16 %v9783_v24 }
 0x19d   :  { %v14648_v20 = vld [vmem:[%s18098_s0 + $0x1f9] sm:$0xff]  ;;  %v14653_v60 = vld [vmem:[%s18098_s0 + $0x201] sm:$0xff]  ;;  %v14697_v31 = vld [vmem:[%s18098_s0 + $0x1ea] sm:$0xff]  ;;  %v14734_v40 = vpop.permute.xlu0 %9767  ;;  %10057 = vrot.lane.b32.xlu0 %v10056_v62, %s11738_s2  ;;  %v9630_v62 = vunpack.i.h.bf16 %v13877_v63 }
 0x19e   :  { %v14658_v55 = vld [vmem:[%s18098_s0 + $0x1e1] sm:$0xff]  ;;  %v14720_v54 = vld [vmem:[%s18098_s0 + $0x210] sm:$0xff]  ;;  %18592 = vst [vmem:[#allocation78_spill] sm:$0xff] %v14734_v40  ;;  %v14753_v0 = vld [vmem:[%s18098_s0 + $0x219] sm:$0xff]  ;;  %v2908_v40 = vsel %vm2873_vm4, %v13442_v41, %v9624_v38  ;;  %v9635_v41 = vunpack.i.h.bf16 %v13869_v19  ;;  %v14794_v57 = vsel %vm2938_vm5, %v2909_v26, %v9785_v46 }
 0x19f   :  { %v18589_v6 = vld [vmem:[#allocation97_spill] sm:$0xff]  ;;  %v18590_v28 = vld [vmem:[#allocation98_spill] sm:$0xff]  ;;  %v14743_v11 = vld [vmem:[%s18098_s0 + $0x231] sm:$0xff]  ;;  %v14791_v36 = vsel %vm2938_vm5, %v2908_v40, %v9784_v10  ;;  %18595 = vst [vmem:[#allocation84_spill] sm:$0xff] %v14794_v57  ;;  %v9793_v30 = vpop.permute.xlu1 %9792 }
 0x1a0   :  { %v14674_v23 = vld [vmem:[%s18098_s0 + $0x1fa] sm:$0xff]  ;;  %v14679_v52 = vld [vmem:[%s18098_s0 + $0x202] sm:$0xff]  ;;  %v14748_v15 = vld [vmem:[%s18098_s0 + $0x211] sm:$0xff]  ;;  %10072 = vrot.lane.b32.xlu1 %v10071_v13, %s11737_s26  ;;  %18594 = vst [vmem:[#allocation83_spill] sm:$0xff] %v14791_v36  ;;  %v9795_v40 = vunpack.i.h.bf16 %v9793_v30  ;;  %v9794_v26 = vunpack.i.l.bf16 %v9793_v30 }
 0x1a1   :  { %v14684_v58 = vld [vmem:[%s18098_s0 + $0x1e2] sm:$0xff]  ;;  %v9778_v29 = vpop.permute.xlu0 %9777  ;;  %10067 = vrot.lane.b32.xlu0 %v10066_v61, %s11739_s29  ;;  %v18596_v24 = vld [vmem:[#allocation108_spill] sm:$0xff]  ;;  %v18599_v63 = vld [vmem:[#allocation109_spill] sm:$0xff] }
 0x1a2   :  { %v14702_v17 = vld [vmem:[%s18098_s0 + $0x228] sm:$0xff]  ;;  %v9780_v16 = vunpack.i.h.bf16 %v9778_v29  ;;  %v9779_v38 = vunpack.i.l.bf16 %v9778_v29  ;;  %v9645_v37 = vunpack.i.h.bf16 %v18596_v24  ;;  %v9644_v19 = vunpack.i.l.bf16 %v18596_v24  ;;  %v18601_v36 = vld [vmem:[#allocation25_spill] sm:$0xff] }
 0x1a3   :  { %v14730_v25 = vld [vmem:[%s18098_s0 + $0x229] sm:$0xff]  ;;  %v9640_v5 = vunpack.i.h.bf16 %v18599_v63  ;;  %v9639_v10 = vunpack.i.l.bf16 %v18599_v63  ;;  %v2913_v24 = vsel %vm2873_vm4, %v18601_v36, %v9635_v41 }
 0x1a4   :  { %v14800_v29 = vsel %vm2938_vm5, %v2906_v33, %v9779_v38  ;;  %v14803_v13 = vsel %vm2938_vm5, %v2907_v43, %v9780_v16  ;;  %v18600_v57 = vld [vmem:[#allocation34_spill] sm:$0xff]  ;;  %10082 = vrot.lane.b32.xlu1 %v10081_v3, %s11738_s2  ;;  %v18603_v38 = vld [vmem:[#allocation27_spill] sm:$0xff]  ;;  %v14820_v30 = vsel %vm2938_vm5, %v2913_v24, %v9795_v40 }
 0x1a5   :  { %18597 = vst [vmem:[#allocation85_spill] sm:$0xff] %v14800_v29  ;;  %18598 = vst [vmem:[#allocation87_spill] sm:$0xff] %v14803_v13  ;;  %v9788_v46 = vpop.permute.xlu0 %9787  ;;  %v2912_v61 = vsel %vm2873_vm4, %v18600_v57, %v9634_v4  ;;  %v18602_v43 = vld [vmem:[#allocation26_spill] sm:$0xff]  ;;  %v2911_v13 = vsel %vm2873_vm4, %v18603_v38, %v9630_v62  ;;  %10077 = vrot.lane.b32.xlu0 %v10076_v27, %s11738_s2  ;;  %v18606_v4 = vld [vmem:[#allocation37_spill] sm:$0xff]  ;;  %v9803_v62 = vpop.permute.xlu1 %9802 }
 0x1a6   :  { %v9790_v22 = vunpack.i.h.bf16 %v9788_v46  ;;  %v9789_v33 = vunpack.i.l.bf16 %v9788_v46  ;;  %v2910_v16 = vsel %vm2873_vm4, %v18602_v43, %v9629_v9  ;;  %v14817_v63 = vsel %vm2938_vm5, %v2912_v61, %v9794_v26  ;;  %18605 = vst [vmem:[#allocation97_spill] sm:$0xff] %v14820_v30  ;;  %v18607_v36 = vld [vmem:[#allocation38_spill] sm:$0xff]  ;;  %v18610_v26 = vld [vmem:[#allocation53_spill] sm:$0xff] }
 0x1a7   :  { %18604 = vst [vmem:[#allocation90_spill] sm:$0xff] %v14817_v63  ;;  %v2916_v41 = vsel %vm2873_vm4, %v18606_v4, %v9644_v19  ;;  %v2917_v3 = vsel %vm2873_vm4, %v18607_v36, %v9645_v37  ;;  %v2914_v46 = vsel %vm2873_vm4, %v18610_v26, %v9639_v10  ;;  %v18611_v40 = vld [vmem:[#allocation54_spill] sm:$0xff]  ;;  %v9805_v27 = vunpack.i.h.bf16 %v9803_v62  ;;  %v18618_v26 = vld [vmem:[#allocation8_spill] sm:$0xff] }
 0x1a8   :  { %v14828_v57 = vsel %vm2938_vm5, %v2910_v16, %v9789_v33  ;;  %v14831_v9 = vsel %vm2938_vm5, %v2911_v13, %v9790_v22  ;;  %v2915_v61 = vsel %vm2873_vm4, %v18611_v40, %v9640_v5  ;;  %v9804_v24 = vunpack.i.l.bf16 %v9803_v62  ;;  %v18612_v19 = vld [vmem:[#allocation6_spill] sm:$0xff]  ;;  %v18614_v13 = vld [vmem:[#allocation7_spill] sm:$0xff]  ;;  %v15309_v30 = vld [vmem:[%s18098_s0 + $0x2b8] sm:$0xff] }
 0x1a9   :  { %18608 = vst [vmem:[#allocation98_spill] sm:$0xff] %v14828_v57  ;;  %18609 = vst [vmem:[#allocation33_spill] sm:$0xff] %v14831_v9  ;;  %v9798_v43 = vpop.permute.xlu0 %9797  ;;  %v9655_v38 = vunpack.i.h.bf16 %v18612_v19  ;;  %v9654_v37 = vunpack.i.l.bf16 %v18612_v19  ;;  %v18613_v22 = vpack.i.bf16 %v14607_v59, %v14602_v50  ;;  %v9650_v16 = vunpack.i.h.bf16 %v18614_v13  ;;  %v15314_v63 = vld [vmem:[%s18098_s0 + $0x2c0] sm:$0xff] }
 0x1aa   :  { %v9800_v4 = vunpack.i.h.bf16 %v9798_v43  ;;  %v9799_v33 = vunpack.i.l.bf16 %v9798_v43  ;;  %v9649_v10 = vunpack.i.l.bf16 %v18614_v13  ;;  %v14846_v5 = vsel %vm2938_vm5, %v2916_v41, %v9804_v24  ;;  %v9813_v41 = vpop.permute.xlu1 %9812  ;;  %v18621_v24 = vld [vmem:[#allocation9_spill] sm:$0xff]  ;;  %v18732_v29 = vld [vmem:[#allocation82_spill] sm:$0xff] }
 0x1ab   :  { %10092 = vrot.lane.b32.xlu1 %v18613_v22, %s11739_s29  ;;  %18615 = vst [vmem:[#allocation108_spill] sm:$0xff] %v14846_v5  ;;  %v14849_v36 = vsel %vm2938_vm5, %v2917_v3, %v9805_v27  ;;  %v18617_v62 = vpack.i.bf16 %v14617_v51, %v14612_v2  ;;  %v9665_v40 = vunpack.i.h.bf16 %v18618_v26  ;;  %v9664_v50 = vunpack.i.l.bf16 %v18618_v26  ;;  %v18622_v2 = vld [vmem:[#allocation55_spill] sm:$0xff]  ;;  %v15293_v5 = vld [vmem:[%s18098_s0 + $0x272] sm:$0xff] }
 0x1ac   :  { %18616 = vst [vmem:[#allocation109_spill] sm:$0xff] %v14849_v36  ;;  %v14858_v59 = vsel %vm2938_vm5, %v2914_v46, %v9799_v33  ;;  %v14861_v43 = vsel %vm2938_vm5, %v2915_v61, %v9800_v4  ;;  %v9660_v19 = vunpack.i.h.bf16 %v18621_v24  ;;  %v9659_v3 = vunpack.i.l.bf16 %v18621_v24  ;;  %v18625_v4 = vld [vmem:[#allocation57_spill] sm:$0xff]  ;;  %v18626_v24 = vld [vmem:[#allocation58_spill] sm:$0xff] }
 0x1ad   :  { %10087 = vrot.lane.b32.xlu0 %v18617_v62, %s11739_s29  ;;  %18619 = vst [vmem:[#allocation34_spill] sm:$0xff] %v14858_v59  ;;  %18620 = vst [vmem:[#allocation25_spill] sm:$0xff] %v14861_v43  ;;  %v9815_v27 = vunpack.i.h.bf16 %v9813_v41  ;;  %v9814_v22 = vunpack.i.l.bf16 %v9813_v41  ;;  %v9808_v13 = vpop.permute.xlu0 %9807  ;;  %v2920_v51 = vsel %vm2873_vm4, %v18622_v2, %v9654_v37  ;;  %v18623_v62 = vld [vmem:[#allocation56_spill] sm:$0xff]  ;;  %v18624_v61 = vpack.i.bf16 %v14633_v18, %v14628_v47 }
 0x1ae   :  { %v2921_v26 = vsel %vm2873_vm4, %v18623_v62, %v9655_v38  ;;  %v9810_v36 = vunpack.i.h.bf16 %v9808_v13  ;;  %v9809_v46 = vunpack.i.l.bf16 %v9808_v13  ;;  %v2918_v33 = vsel %vm2873_vm4, %v18625_v4, %v9649_v10  ;;  %v18630_v13 = vld [vmem:[#allocation59_spill] sm:$0xff]  ;;  %v18631_v18 = vld [vmem:[#allocation60_spill] sm:$0xff]  ;;  %v18635_v62 = vld [vmem:[#allocation61_spill] sm:$0xff] }
 0x1af   :  { %10102 = vrot.lane.b32.xlu1 %v18624_v61, %s11737_s26  ;;  %v2919_v41 = vsel %vm2873_vm4, %v18626_v24, %v9650_v16  ;;  %v14878_v43 = vsel %vm2938_vm5, %v2920_v51, %v9814_v22  ;;  %v14881_v37 = vsel %vm2938_vm5, %v2921_v26, %v9815_v27  ;;  %v18629_v38 = vpack.i.bf16 %v14643_v53, %v14638_v49  ;;  %v9823_v22 = vpop.permute.xlu1 %9822  ;;  %v18634_v27 = vld [vmem:[#allocation86_spill] sm:$0xff]  ;;  %v15288_v59 = vld [vmem:[%s18098_s0 + $0x292] sm:$0xff] }
 0x1b0   :  { %18627 = vst [vmem:[#allocation26_spill] sm:$0xff] %v14878_v43  ;;  %18628 = vst [vmem:[#allocation27_spill] sm:$0xff] %v14881_v37  ;;  %v2924_v47 = vsel %vm2873_vm4, %v18630_v13, %v9664_v50  ;;  %v2925_v10 = vsel %vm2873_vm4, %v18631_v18, %v9665_v40  ;;  %v14892_v2 = vsel %vm2938_vm5, %v2918_v33, %v9809_v46  ;;  %v9825_v53 = vunpack.i.h.bf16 %v9823_v22  ;;  %v18636_v50 = vld [vmem:[#allocation10_spill] sm:$0xff]  ;;  %v18638_v33 = vld [vmem:[#allocation73_spill] sm:$0xff] }
 0x1b1   :  { %10097 = vrot.lane.b32.xlu0 %v18629_v38, %s11737_s26  ;;  %18632 = vst [vmem:[#allocation37_spill] sm:$0xff] %v14892_v2  ;;  %v14895_v16 = vsel %vm2938_vm5, %v2919_v41, %v9810_v36  ;;  %v2922_v51 = vsel %vm2873_vm4, %v18634_v27, %v9659_v3  ;;  %v2923_v49 = vsel %vm2873_vm4, %v18635_v62, %v9660_v19  ;;  %v9824_v26 = vunpack.i.l.bf16 %v9823_v22  ;;  %v9818_v61 = vpop.permute.xlu0 %9817  ;;  %v18642_v18 = vld [vmem:[#allocation11_spill] sm:$0xff]  ;;  %v18645_v62 = vld [vmem:[#allocation12_spill] sm:$0xff] }
 0x1b2   :  { %18633 = vst [vmem:[#allocation38_spill] sm:$0xff] %v14895_v16  ;;  %v9675_v4 = vunpack.i.h.bf16 %v18636_v50  ;;  %v9674_v40 = vunpack.i.l.bf16 %v18636_v50  ;;  %v9820_v24 = vunpack.i.h.bf16 %v9818_v61  ;;  %v9819_v46 = vunpack.i.l.bf16 %v9818_v61  ;;  %v15265_v2 = vld [vmem:[%s18098_s0 + $0x271] sm:$0xff]  ;;  %v15270_v37 = vld [vmem:[%s18098_s0 + $0x279] sm:$0xff] }
 0x1b3   :  { %v18637_v36 = vpack.i.bf16 %v14653_v60, %v14648_v20  ;;  %v9670_v41 = vunpack.i.h.bf16 %v18638_v33  ;;  %v9669_v3 = vunpack.i.l.bf16 %v18638_v33  ;;  %v14910_v19 = vsel %vm2938_vm5, %v2924_v47, %v9824_v26  ;;  %v9833_v47 = vpop.permute.xlu1 %9832 }
 0x1b4   :  { %18639 = vst [vmem:[#allocation53_spill] sm:$0xff] %v14910_v19  ;;  %v14913_v38 = vsel %vm2938_vm5, %v2925_v10, %v9825_v53  ;;  %v18641_v13 = vpack.i.bf16 %v14663_v1, %v14658_v55  ;;  %v9685_v22 = vunpack.i.h.bf16 %v18642_v18  ;;  %v9684_v60 = vunpack.i.l.bf16 %v18642_v18  ;;  %v18646_v1 = vld [vmem:[#allocation89_spill] sm:$0xff]  ;;  %v18650_v18 = vld [vmem:[#allocation92_spill] sm:$0xff] }
 0x1b5   :  { %10112 = vrot.lane.b32.xlu1 %v18637_v36, %s11738_s2  ;;  %18640 = vst [vmem:[#allocation54_spill] sm:$0xff] %v14913_v38  ;;  %v14922_v20 = vsel %vm2938_vm5, %v2922_v51, %v9819_v46  ;;  %v14925_v27 = vsel %vm2938_vm5, %v2923_v49, %v9820_v24  ;;  %v9680_v26 = vunpack.i.h.bf16 %v18645_v62  ;;  %v9679_v10 = vunpack.i.l.bf16 %v18645_v62  ;;  %v9828_v50 = vpop.permute.xlu0 %9827  ;;  %v18647_v36 = vld [vmem:[#allocation88_spill] sm:$0xff]  ;;  %v18649_v24 = vld [vmem:[#allocation62_spill] sm:$0xff] }
 0x1b6   :  { %10107 = vrot.lane.b32.xlu0 %v18641_v13, %s11738_s2  ;;  %18643 = vst [vmem:[#allocation6_spill] sm:$0xff] %v14922_v20  ;;  %18644 = vst [vmem:[#allocation7_spill] sm:$0xff] %v14925_v27  ;;  %v9835_v53 = vunpack.i.h.bf16 %v9833_v47  ;;  %v9834_v61 = vunpack.i.l.bf16 %v9833_v47  ;;  %v2928_v55 = vsel %vm2873_vm4, %v18646_v1, %v9674_v40  ;;  %v2929_v33 = vsel %vm2873_vm4, %v18647_v36, %v9675_v4  ;;  %v18659_v36 = vld [vmem:[#allocation99_spill] sm:$0xff]  ;;  %v18723_v20 = vld [vmem:[#allocation50_spill] sm:$0xff] }
 0x1b7   :  { %v9830_v13 = vunpack.i.h.bf16 %v9828_v50  ;;  %v9829_v51 = vunpack.i.l.bf16 %v9828_v50  ;;  %v18648_v49 = vpack.i.bf16 %v14679_v52, %v14674_v23  ;;  %v2926_v46 = vsel %vm2873_vm4, %v18649_v24, %v9669_v3  ;;  %v18654_v50 = vld [vmem:[#allocation91_spill] sm:$0xff] }
 0x1b8   :  { %v2927_v47 = vsel %vm2873_vm4, %v18650_v18, %v9670_v41  ;;  %v14942_v62 = vsel %vm2938_vm5, %v2928_v55, %v9834_v61  ;;  %v14945_v40 = vsel %vm2938_vm5, %v2929_v33, %v9835_v53  ;;  %v18653_v4 = vpack.i.bf16 %v14697_v31, %v14684_v58  ;;  %v18655_v23 = vld [vmem:[#allocation63_spill] sm:$0xff]  ;;  %v9843_v61 = vpop.permute.xlu1 %9842  ;;  %v18658_v53 = vld [vmem:[#allocation64_spill] sm:$0xff] }
 0x1b9   :  { %10122 = vrot.lane.b32.xlu1 %v18648_v49, %s11739_s29  ;;  %18651 = vst [vmem:[#allocation8_spill] sm:$0xff] %v14942_v62  ;;  %18652 = vst [vmem:[#allocation9_spill] sm:$0xff] %v14945_v40  ;;  %v2932_v52 = vsel %vm2873_vm4, %v18654_v50, %v9684_v60  ;;  %v2933_v3 = vsel %vm2873_vm4, %v18655_v23, %v9685_v22  ;;  %v14956_v1 = vsel %vm2938_vm5, %v2926_v46, %v9829_v51  ;;  %v9838_v49 = vpop.permute.xlu0 %9837  ;;  %v8623_v22 = vld [vmem:[%s18098_s0 + $0x22a] sm:$0xff]  ;;  %v18660_v60 = vld [vmem:[#allocation13_spill] sm:$0xff] }
 0x1ba   :  { %10117 = vrot.lane.b32.xlu0 %v18653_v4, %s11739_s29  ;;  %18656 = vst [vmem:[#allocation55_spill] sm:$0xff] %v14956_v1  ;;  %v14959_v41 = vsel %vm2938_vm5, %v2927_v47, %v9830_v13  ;;  %v2930_v55 = vsel %vm2873_vm4, %v18658_v53, %v9679_v10  ;;  %v2931_v58 = vsel %vm2873_vm4, %v18659_v36, %v9680_v26  ;;  %v9845_v31 = vunpack.i.h.bf16 %v9843_v61  ;;  %v8624_v26 = vld [vmem:[%s18098_s0 + $0x232] sm:$0xff]  ;;  %v8622_v47 = vld [vmem:[%s18098_s0 + $0x21a] sm:$0xff]  ;;  %v18662_v4 = vld [vmem:[#allocation14_spill] sm:$0xff] }
 0x1bb   :  { %18657 = vst [vmem:[#allocation56_spill] sm:$0xff] %v14959_v41  ;;  %v9844_v33 = vunpack.i.l.bf16 %v9843_v61  ;;  %v9695_v51 = vunpack.i.h.bf16 %v18660_v60  ;;  %v9694_v24 = vunpack.i.l.bf16 %v18660_v60  ;;  %v9840_v13 = vunpack.i.h.bf16 %v9838_v49  ;;  %v8621_v18 = vld [vmem:[%s18098_s0 + $0x212] sm:$0xff]  ;;  %v18708_v1 = vld [vmem:[#allocation43_spill] sm:$0xff] }
 0x1bc   :  { %v9839_v46 = vunpack.i.l.bf16 %v9838_v49  ;;  %v18661_v10 = vpack.i.bf16 %v14707_v34, %v14702_v17  ;;  %v9690_v50 = vunpack.i.h.bf16 %v18662_v4  ;;  %v9689_v23 = vunpack.i.l.bf16 %v18662_v4  ;;  %v18666_v53 = vld [vmem:[#allocation24_spill] sm:$0xff] }
 0x1bd   :  { %v14986_v61 = vsel %vm2938_vm5, %v2932_v52, %v9844_v33  ;;  %v14989_v17 = vsel %vm2938_vm5, %v2933_v3, %v9845_v31  ;;  %v18665_v34 = vpack.i.bf16 %v14725_v39, %v14720_v54  ;;  %v9455_v36 = vunpack.i.h.bf16 %v18666_v53  ;;  %v9853_v52 = vpop.permute.xlu1 %9852  ;;  %v9848_v3 = vpop.permute.xlu0 %9847  ;;  %v18670_v54 = vld [vmem:[#allocation94_spill] sm:$0xff]  ;;  %v15253_v27 = vld [vmem:[%s18098_s0 + $0x291] sm:$0xff] }
 0x1be   :  { %10132 = vrot.lane.b32.xlu1 %v18661_v10, %s11737_s26  ;;  %18663 = vst [vmem:[#allocation57_spill] sm:$0xff] %v14986_v61  ;;  %18664 = vst [vmem:[#allocation58_spill] sm:$0xff] %v14989_v17  ;;  %v9454_v49 = vunpack.i.l.bf16 %v18666_v53  ;;  %v14998_v60 = vsel %vm2938_vm5, %v2930_v55, %v9839_v46  ;;  %v15001_v10 = vsel %vm2938_vm5, %v2931_v58, %v9840_v13  ;;  %v9855_v33 = vunpack.i.h.bf16 %v9853_v52  ;;  %v18669_v61 = vld [vmem:[#allocation28_spill] sm:$0xff]  ;;  %v18672_v58 = vld [vmem:[#allocation93_spill] sm:$0xff] }
 0x1bf   :  { %10127 = vrot.lane.b32.xlu0 %v18665_v34, %s11737_s26  ;;  %18667 = vst [vmem:[#allocation59_spill] sm:$0xff] %v14998_v60  ;;  %18668 = vst [vmem:[#allocation60_spill] sm:$0xff] %v15001_v10  ;;  %v9854_v4 = vunpack.i.l.bf16 %v9853_v52  ;;  %v10151_v31 = vpack.i.bf16 %v8624_v26, %v8623_v22  ;;  %v10146_v17 = vpack.i.bf16 %v8622_v47, %v8621_v18  ;;  %v9850_v41 = vunpack.i.h.bf16 %v9848_v3  ;;  %v18673_v46 = vld [vmem:[#allocation22_spill] sm:$0xff]  ;;  %v18677_v18 = vld [vmem:[#allocation52_spill] sm:$0xff] }
 0x1c0   :  { %v2936_v39 = vsel %vm2873_vm4, %v18669_v61, %v9694_v24  ;;  %v2937_v34 = vsel %vm2873_vm4, %v18670_v54, %v9695_v51  ;;  %v9849_v53 = vunpack.i.l.bf16 %v9848_v3  ;;  %v18671_v55 = vpack.i.bf16 %v14743_v11, %v14730_v25  ;;  %v8499_v11 = vld [vmem:[%s18098_s0 + $0x258] sm:$0xff]  ;;  %v8500_v25 = vld [vmem:[%s18098_s0 + $0x260] sm:$0xff]  ;;  %v8498_v52 = vld [vmem:[%s18098_s0 + $0x248] sm:$0xff] }
 0x1c1   :  { %v2934_v13 = vsel %vm2873_vm4, %v18672_v58, %v9689_v23  ;;  %v2935_v22 = vsel %vm2873_vm4, %v18673_v46, %v9690_v50  ;;  %v15016_v26 = vsel %vm2938_vm5, %v2936_v39, %v9854_v4  ;;  %v15019_v24 = vsel %vm2938_vm5, %v2937_v34, %v9855_v33  ;;  %v18686_v58 = vld [vmem:[#allocation23_spill] sm:$0xff] }
 0x1c2   :  { %10142 = vrot.lane.b32.xlu1 %v18671_v55, %s11738_s2  ;;  %18674 = vst [vmem:[#allocation86_spill] sm:$0xff] %v15016_v26  ;;  %18675 = vst [vmem:[#allocation61_spill] sm:$0xff] %v15019_v24  ;;  %v18676_v51 = vpack.i.bf16 %v14753_v0, %v14748_v15  ;;  %v9450_v47 = vunpack.i.h.bf16 %v18677_v18  ;;  %v9449_v50 = vunpack.i.l.bf16 %v18677_v18  ;;  %v15034_v23 = vsel %vm2938_vm5, %v2934_v13, %v9849_v53  ;;  %v15039_v15 = vpop.permute.xlu1 %9862  ;;  %v8497_v0 = vld [vmem:[%s18098_s0 + $0x240] sm:$0xff]  ;;  %v18706_v24 = vld [vmem:[#allocation39_spill] sm:$0xff] }
 0x1c3   :  { %18678 = vst [vmem:[#allocation10_spill] sm:$0xff] %v15034_v23  ;;  %v15037_v61 = vsel %vm2938_vm5, %v2935_v22, %v9850_v41  ;;  %v18680_v33 = vunpack.i.l.bf16 %v18586_v21  ;;  %v18681_v3 = vunpack.i.h.bf16 %v18586_v21  ;;  %v18682_v39 = vunpack.i.l.bf16 %v18587_v32  ;;  %v18705_v23 = vld [vmem:[#allocation36_spill] sm:$0xff] }
 0x1c4   :  { %10137 = vrot.lane.b32.xlu0 %v18676_v51, %s11738_s2  ;;  %18679 = vst [vmem:[#allocation73_spill] sm:$0xff] %v15037_v61  ;;  %v18683_v34 = vunpack.i.h.bf16 %v18587_v32  ;;  %v18684_v21 = vunpack.i.l.bf16 %v18589_v6  ;;  %v18685_v55 = vunpack.i.h.bf16 %v18589_v6  ;;  %v9544_v32 = vunpack.i.l.bf16 %v18686_v58  ;;  %v18691_v51 = vld [vmem:[#allocation21_spill] sm:$0xff]  ;;  %v18707_v26 = vld [vmem:[#allocation40_spill] sm:$0xff] }
 0x1c5   :  { %v15051_v4 = vsel %vm2808_vm2, %v14316_v12, %v18680_v33  ;;  %v15057_v41 = vsel %vm2808_vm2, %v14330_v56, %v18681_v3  ;;  %v15063_v54 = vsel %vm2808_vm2, %v14334_v14, %v18682_v39  ;;  %v15071_v12 = vpop.permute.xlu0 %9857  ;;  %v18687_v13 = vunpack.i.l.bf16 %v18590_v28  ;;  %v18697_v3 = vld [vmem:[#allocation32_spill] sm:$0xff] }
 0x1c6   :  { %v15069_v53 = vsel %vm2808_vm2, %v14358_v7, %v18683_v34  ;;  %v15077_v56 = vsel %vm2808_vm2, %v14362_v35, %v18684_v21  ;;  %v15083_v14 = vsel %vm2808_vm2, %v14370_v45, %v18685_v55  ;;  %10152 = vrot.lane.b32.xlu1 %v10151_v31, %s11739_s29  ;;  %v10161_v7 = vpack.i.bf16 %v8500_v25, %v8499_v11  ;;  %v8563_v31 = vld [vmem:[%s18098_s0 + $0x259] sm:$0xff]  ;;  %v15123_v18 = vpop.permute.xlu1 %9872 }
 0x1c7   :  { %v15091_v46 = vsel %vm2808_vm2, %v14374_v42, %v18687_v13  ;;  %v18688_v35 = vunpack.i.h.bf16 %v18590_v28  ;;  %v9545_v45 = vunpack.i.h.bf16 %v18686_v58  ;;  %v10156_v22 = vpack.i.bf16 %v8498_v52, %v8497_v0  ;;  %v8564_v42 = vld [vmem:[%s18098_s0 + $0x261] sm:$0xff] }
 0x1c8   :  { %10147 = vrot.lane.b32.xlu0 %v10146_v17, %s11739_s29  ;;  %v15109_v28 = vsel %vm2808_vm2, %v14386_v48, %v9454_v49  ;;  %v15117_v17 = vsel %vm2808_vm2, %v18691_v51, %v9449_v50  ;;  %v18693_v11 = vld [vmem:[#allocation29_spill] sm:$0xff]  ;;  %v8562_v48 = vld [vmem:[%s18098_s0 + $0x249] sm:$0xff]  ;;  %v15139_v39 = vsel %vm2873_vm4, %v18697_v3, %v9544_v32  ;;  %v10171_v58 = vpack.i.bf16 %v8564_v42, %v8563_v31 }
 0x1c9   :  { %v15097_v6 = vsel %vm2808_vm2, %v14382_v44, %v18688_v35  ;;  %18689 = vst [vmem:[#allocation11_spill] sm:$0xff] %v15109_v28  ;;  %v15113_v44 = vsel %vm2808_vm2, %v14390_v8, %v9455_v36  ;;  %18692 = vst [vmem:[#allocation89_spill] sm:$0xff] %v15117_v17  ;;  %v15121_v25 = vsel %vm2808_vm2, %v18693_v11, %v9450_v47  ;;  %v8561_v0 = vld [vmem:[%s18098_s0 + $0x241] sm:$0xff]  ;;  %v18695_v8 = vld [vmem:[#allocation96_spill] sm:$0xff]  ;;  %v15135_v47 = vpop.permute.xlu0 %9867  ;;  %vm7696_vm2 = vcmask 1040384  }
 0x1ca   :  { %18690 = vst [vmem:[#allocation12_spill] sm:$0xff] %v15113_v44  ;;  %18694 = vst [vmem:[#allocation88_spill] sm:$0xff] %v15121_v25  ;;  %v9540_v36 = vunpack.i.h.bf16 %v18695_v8  ;;  %v9539_v49 = vunpack.i.l.bf16 %v18695_v8  ;;  %v18696_v50 = vld [vmem:[#allocation95_spill] sm:$0xff]  ;;  %v18698_v34 = vld [vmem:[#allocation65_spill] sm:$0xff]  ;;  %10162 = vrot.lane.b32.xlu1 %v10161_v7, %s11737_s26 }
 0x1cb   :  { %v9555_v52 = vunpack.i.h.bf16 %v18696_v50  ;;  %v9554_v33 = vunpack.i.l.bf16 %v18696_v50  ;;  %v9550_v21 = vunpack.i.h.bf16 %v18698_v34  ;;  %v9549_v55 = vunpack.i.l.bf16 %v18698_v34  ;;  %v18699_v13 = vld [vmem:[#allocation77_spill] sm:$0xff]  ;;  %v18700_v51 = vld [vmem:[#allocation66_spill] sm:$0xff]  ;;  %v18702_v3 = vld [vmem:[#allocation31_spill] sm:$0xff] }
 0x1cc   :  { %v15146_v35 = vsel %vm2873_vm4, %v18699_v13, %v9545_v45  ;;  %v9565_v11 = vunpack.i.h.bf16 %v18700_v51  ;;  %v9564_v8 = vunpack.i.l.bf16 %v18700_v51  ;;  %10157 = vrot.lane.b32.xlu0 %v10156_v22, %s11737_s26  ;;  %v10166_v50 = vpack.i.bf16 %v8562_v48, %v8561_v0  ;;  %v8627_v32 = vld [vmem:[%s18098_s0 + $0x25a] sm:$0xff]  ;;  %v8628_v7 = vld [vmem:[%s18098_s0 + $0x262] sm:$0xff]  ;;  %v15161_v51 = vpop.permute.xlu1 %9882  ;;  %v8626_v0 = vld [vmem:[%s18098_s0 + $0x24a] sm:$0xff] }
 0x1cd   :  { %v18701_v31 = vld [vmem:[#allocation30_spill] sm:$0xff]  ;;  %v9575_v34 = vunpack.i.h.bf16 %v18702_v3  ;;  %v9574_v13 = vunpack.i.l.bf16 %v18702_v3  ;;  %18703 = vst [vmem:[#allocation62_spill] sm:$0xff] %v15161_v51  ;;  %v18704_v48 = vld [vmem:[#allocation35_spill] sm:$0xff]  ;;  %v15179_v3 = vsel %vm2873_vm4, %v18706_v24, %v9554_v33  ;;  %v15183_v10 = vsel %vm2873_vm4, %v18707_v26, %v9555_v52  ;;  %v15185_v60 = vpop.permute.xlu0 %9877  ;;  %v18711_v33 = vld [vmem:[#allocation80_spill] sm:$0xff] }
 0x1ce   :  { %v9560_v42 = vunpack.i.h.bf16 %v18701_v31  ;;  %v9559_v45 = vunpack.i.l.bf16 %v18701_v31  ;;  %v8625_v22 = vld [vmem:[%s18098_s0 + $0x242] sm:$0xff]  ;;  %v15171_v61 = vsel %vm2873_vm4, %v18704_v48, %v9539_v49  ;;  %v15175_v31 = vsel %vm2873_vm4, %v18705_v23, %v9540_v36  ;;  %v18709_v49 = vld [vmem:[#allocation44_spill] sm:$0xff]  ;;  %10172 = vrot.lane.b32.xlu1 %v10171_v58, %s11738_s2  ;;  %v18712_v26 = vld [vmem:[#allocation45_spill] sm:$0xff] }
 0x1cf   :  { %v15189_v40 = vsel %vm2873_vm4, %v18708_v1, %v9549_v55  ;;  %v15193_v48 = vsel %vm2873_vm4, %v18709_v49, %v9550_v21  ;;  %v18710_v23 = vld [vmem:[#allocation100_spill] sm:$0xff]  ;;  %v10181_v24 = vpack.i.bf16 %v8628_v7, %v8627_v32  ;;  %v15199_v62 = vsel %vm2873_vm4, %v18711_v33, %v9564_v8  ;;  %v8503_v21 = vld [vmem:[%s18098_s0 + $0x288] sm:$0xff]  ;;  %v18736_v28 = vld [vmem:[#allocation69_spill] sm:$0xff] }
 0x1d0   :  { %v9569_v36 = vunpack.i.l.bf16 %v18710_v23  ;;  %v15203_v52 = vsel %vm2873_vm4, %v18712_v26, %v9565_v11  ;;  %v9570_v1 = vunpack.i.h.bf16 %v18710_v23  ;;  %10167 = vrot.lane.b32.xlu0 %v10166_v50, %s11738_s2  ;;  %v10176_v55 = vpack.i.bf16 %v8626_v0, %v8625_v22  ;;  %v8504_v58 = vld [vmem:[%s18098_s0 + $0x290] sm:$0xff]  ;;  %v18717_v22 = vld [vmem:[#allocation49_spill] sm:$0xff]  ;;  %v15229_v23 = vpop.permute.xlu1 %9892 }
 0x1d1   :  { %v18713_v32 = vld [vmem:[#allocation79_spill] sm:$0xff]  ;;  %v18715_v49 = vld [vmem:[#allocation48_spill] sm:$0xff]  ;;  %v15227_v0 = vsel %vm2873_vm4, %v18717_v22, %v9575_v34  ;;  %18719 = vst [vmem:[#allocation63_spill] sm:$0xff] %v15229_v23  ;;  %v10191_v16 = vpack.i.bf16 %v8504_v58, %v8503_v21 }
 0x1d2   :  { %v15215_v8 = vsel %vm2873_vm4, %v18713_v32, %v9559_v45  ;;  %v18714_v7 = vld [vmem:[#allocation47_spill] sm:$0xff]  ;;  %v15223_v50 = vsel %vm2873_vm4, %v18715_v49, %v9574_v13  ;;  %18718 = vst [vmem:[#allocation91_spill] sm:$0xff] %v15227_v0  ;;  %v18721_v32 = vld [vmem:[#allocation101_spill] sm:$0xff]  ;;  %v15243_v49 = vpop.permute.xlu0 %9887  ;;  %v15257_v38 = vsel %vm2873_vm4, %v18723_v20, %v9569_v36  ;;  %10182 = vrot.lane.b32.xlu1 %v10181_v24, %s11739_s29  ;;  %v18734_v17 = vld [vmem:[#allocation68_spill] sm:$0xff] }
 0x1d3   :  { %v15219_v11 = vsel %vm2873_vm4, %v18714_v7, %v9560_v42  ;;  %18716 = vst [vmem:[#allocation92_spill] sm:$0xff] %v15223_v50  ;;  %v15234_v33 = vld [vmem:[%s18098_s0 + $0x270] sm:$0xff]  ;;  %v8502_v42 = vld [vmem:[%s18098_s0 + $0x278] sm:$0xff]  ;;  %v9580_v7 = vunpack.i.h.bf16 %v18721_v32  ;;  %v9579_v34 = vunpack.i.l.bf16 %v18721_v32  ;;  %18722 = vst [vmem:[#allocation64_spill] sm:$0xff] %v15243_v49 }
 0x1d4   :  { %v18720_v45 = vld [vmem:[#allocation51_spill] sm:$0xff]  ;;  %18724 = vst [vmem:[#allocation99_spill] sm:$0xff] %v15257_v38  ;;  %10177 = vrot.lane.b32.xlu0 %v10176_v55, %s11739_s29  ;;  %v10186_v43 = vpack.i.bf16 %v8502_v42, %v15234_v33  ;;  %v18730_v33 = vld [vmem:[#allocation105_spill] sm:$0xff]  ;;  %v15304_v57 = vpop.permute.xlu1 %9902 }
 0x1d5   :  { %v9585_v26 = vunpack.i.h.bf16 %v18720_v45  ;;  %v9584_v13 = vunpack.i.l.bf16 %v18720_v45  ;;  %v15248_v22 = vld [vmem:[%s18098_s0 + $0x289] sm:$0xff]  ;;  %v9600_v42 = vunpack.i.h.bf16 %v18730_v33  ;;  %v9599_v9 = vunpack.i.l.bf16 %v18730_v33  ;;  %18731 = vst [vmem:[#allocation14_spill] sm:$0xff] %v15304_v57  ;;  %v18738_v0 = vld [vmem:[#allocation81_spill] sm:$0xff] }
 0x1d6   :  { %v18725_v45 = vld [vmem:[#allocation102_spill] sm:$0xff]  ;;  %v15275_v20 = vld [vmem:[%s18098_s0 + $0x28a] sm:$0xff]  ;;  %v15336_v57 = vsel %vm2873_vm4, %v18736_v28, %v9579_v34  ;;  %v15340_v23 = vsel %vm2873_vm4, %v18738_v0, %v9580_v7  ;;  %v15342_v49 = vpop.permute.xlu0 %9897  ;;  %v15367_v0 = vld [vmem:[%s18098_s0 + $0x2ba] sm:$0xff]  ;;  %10192 = vrot.lane.b32.xlu1 %v10191_v16, %s11737_s26 }
 0x1d7   :  { %v9595_v19 = vunpack.i.h.bf16 %v18725_v45  ;;  %v9594_v32 = vunpack.i.l.bf16 %v18725_v45  ;;  %v18726_v36 = vld [vmem:[#allocation67_spill] sm:$0xff]  ;;  %v15328_v25 = vsel %vm2873_vm4, %v18732_v29, %v9584_v13  ;;  %v15332_v44 = vsel %vm2873_vm4, %v18734_v17, %v9585_v26  ;;  %18737 = vst [vmem:[#allocation94_spill] sm:$0xff] %v15336_v57  ;;  %18739 = vst [vmem:[#allocation93_spill] sm:$0xff] %v15340_v23  ;;  %v15352_v29 = vld [vmem:[%s18098_s0 + $0x2c1] sm:$0xff] }
 0x1d8   :  { %v15279_v45 = vsel %vm2873_vm4, %v18726_v36, %v9570_v1  ;;  %v18728_v24 = vld [vmem:[#allocation103_spill] sm:$0xff]  ;;  %v15298_v1 = vld [vmem:[%s18098_s0 + $0x27a] sm:$0xff]  ;;  %v18729_v36 = vld [vmem:[#allocation104_spill] sm:$0xff]  ;;  %18733 = vst [vmem:[#allocation24_spill] sm:$0xff] %v15328_v25  ;;  %v10201_v23 = vpack.i.bf16 %v15253_v27, %v15248_v22  ;;  %10187 = vrot.lane.b32.xlu0 %v10186_v43, %s11737_s26 }
 0x1d9   :  { %18727 = vst [vmem:[#allocation13_spill] sm:$0xff] %v15279_v45  ;;  %v9590_v21 = vunpack.i.h.bf16 %v18728_v24  ;;  %v9589_v58 = vunpack.i.l.bf16 %v18728_v24  ;;  %v9605_v24 = vunpack.i.h.bf16 %v18729_v36  ;;  %v9604_v55 = vunpack.i.l.bf16 %v18729_v36  ;;  %v15319_v36 = vld [vmem:[%s18098_s0 + $0x2a0] sm:$0xff]  ;;  %v15324_v33 = vld [vmem:[%s18098_s0 + $0x2a8] sm:$0xff]  ;;  %18735 = vst [vmem:[#allocation28_spill] sm:$0xff] %v15332_v44 }
 0x1da   :  { %18740 = vst [vmem:[#allocation22_spill] sm:$0xff] %v15342_v49  ;;  %v15347_v45 = vld [vmem:[%s18098_s0 + $0x2b9] sm:$0xff]  ;;  %v15357_v28 = vld [vmem:[%s18098_s0 + $0x2a1] sm:$0xff]  ;;  %v15362_v17 = vld [vmem:[%s18098_s0 + $0x2a9] sm:$0xff]  ;;  %v15386_v34 = vsel %vm2873_vm4, %v15051_v4, %v9594_v32  ;;  %v15390_v44 = vsel %vm2873_vm4, %v15057_v41, %v9595_v19  ;;  %v10196_v49 = vpack.i.bf16 %v15270_v37, %v15265_v2  ;;  %10202 = vrot.lane.b32.xlu1 %v10201_v23, %s11738_s2 }
 0x1db   :  { %v15372_v26 = vld [vmem:[%s18098_s0 + $0x2c2] sm:$0xff]  ;;  %v15382_v7 = vld [vmem:[%s18098_s0 + $0x2aa] sm:$0xff]  ;;  %18741 = vst [vmem:[#allocation52_spill] sm:$0xff] %v15386_v34  ;;  %18742 = vst [vmem:[#allocation23_spill] sm:$0xff] %v15390_v44  ;;  %v15439_v22 = vsel %vm2873_vm4, %v15063_v54, %v9589_v58  ;;  %v15443_v32 = vsel %vm2873_vm4, %v15069_v53, %v9590_v21  ;;  %v10211_v44 = vpack.i.bf16 %v15288_v59, %v15275_v20  ;;  %v15486_v34 = vpop.permute.xlu1 %9912 }
 0x1dc   :  { %v15377_v13 = vld [vmem:[%s18098_s0 + $0x2a2] sm:$0xff]  ;;  %v15405_v4 = vld [vmem:[%s18098_s0 + $0x2f0] sm:$0xff]  ;;  %v15415_v19 = vld [vmem:[%s18098_s0 + $0x2d8] sm:$0xff]  ;;  %18746 = vst [vmem:[#allocation95_spill] sm:$0xff] %v15439_v22  ;;  %v15472_v53 = vsel %vm2873_vm4, %v15077_v56, %v9604_v55  ;;  %v15476_v20 = vsel %vm2873_vm4, %v15083_v14, %v9605_v24  ;;  %v15480_v21 = vsel %vm2873_vm4, %v15091_v46, %v9599_v9  ;;  %v15484_v58 = vsel %vm2873_vm4, %v15097_v6, %v9600_v42  ;;  %v15505_v24 = vpop.permute.xlu0 %9907 }
 0x1dd   :  { %v15400_v57 = vld [vmem:[%s18098_s0 + $0x2e8] sm:$0xff]  ;;  %v15410_v16 = vld [vmem:[%s18098_s0 + $0x2d0] sm:$0xff]  ;;  %v15435_v41 = vld [vmem:[%s18098_s0 + $0x2d9] sm:$0xff]  ;;  %18747 = vst [vmem:[#allocation32_spill] sm:$0xff] %v15443_v32  ;;  %10197 = vrot.lane.b32.xlu0 %v10196_v49, %s11738_s2 }
 0x1de   :  { %v15420_v37 = vld [vmem:[%s18098_s0 + $0x2e9] sm:$0xff]  ;;  %v15425_v2 = vld [vmem:[%s18098_s0 + $0x2f1] sm:$0xff]  ;;  %18745 = vst [vmem:[#allocation96_spill] sm:$0xff] %v15435_v41  ;;  %v15468_v59 = vld [vmem:[%s18098_s0 + $0x2da] sm:$0xff]  ;;  %10212 = vrot.lane.b32.xlu1 %v10211_v44, %s11739_s29 }
 0x1df   :  { %18743 = vst [vmem:[#allocation21_spill] sm:$0xff] %v15420_v37  ;;  %v15430_v27 = vld [vmem:[%s18098_s0 + $0x2d1] sm:$0xff]  ;;  %18749 = vst [vmem:[#allocation77_spill] sm:$0xff] %v15472_v53  ;;  %v15496_v56 = vld [vmem:[%s18098_s0 + $0x320] sm:$0xff] }
 0x1e0   :  { %18744 = vst [vmem:[#allocation29_spill] sm:$0xff] %v15430_v27  ;;  %v15453_v25 = vld [vmem:[%s18098_s0 + $0x2ea] sm:$0xff]  ;;  %v15458_v54 = vld [vmem:[%s18098_s0 + $0x2f2] sm:$0xff]  ;;  %18750 = vst [vmem:[#allocation66_spill] sm:$0xff] %v15476_v20  ;;  %v15589_v37 = vpop.permute.xlu0 %9917 }
 0x1e1   :  { %v15463_v43 = vld [vmem:[%s18098_s0 + $0x2d2] sm:$0xff]  ;;  %18751 = vst [vmem:[#allocation30_spill] sm:$0xff] %v15480_v21  ;;  %18752 = vst [vmem:[#allocation31_spill] sm:$0xff] %v15484_v58  ;;  %v15501_v9 = vld [vmem:[%s18098_s0 + $0x300] sm:$0xff]  ;;  %v15576_v21 = vpop.permute.xlu1 %9922 }
 0x1e2   :  { %18748 = vst [vmem:[#allocation65_spill] sm:$0xff] %v15463_v43  ;;  %18753 = vst [vmem:[#allocation35_spill] sm:$0xff] %v15486_v34  ;;  %v15491_v32 = vld [vmem:[%s18098_s0 + $0x318] sm:$0xff]  ;;  %v15514_v20 = vld [vmem:[%s18098_s0 + $0x308] sm:$0xff] }
 0x1e3   :  { %18754 = vst [vmem:[#allocation36_spill] sm:$0xff] %v15491_v32  ;;  %18755 = vst [vmem:[#allocation39_spill] sm:$0xff] %v15496_v56  ;;  %v15519_v53 = vld [vmem:[%s18098_s0 + $0x319] sm:$0xff]  ;;  %v15524_v46 = vld [vmem:[%s18098_s0 + $0x321] sm:$0xff] }
 0x1e4   :  { %18756 = vst [vmem:[#allocation40_spill] sm:$0xff] %v15501_v9  ;;  %18758 = vst [vmem:[#allocation43_spill] sm:$0xff] %v15505_v24  ;;  %v15538_v58 = vld [vmem:[%s18098_s0 + $0x301] sm:$0xff]  ;;  %v15543_v23 = vld [vmem:[%s18098_s0 + $0x309] sm:$0xff] }
 0x1e5   :  { %18759 = vst [vmem:[#allocation44_spill] sm:$0xff] %v15514_v20  ;;  %18760 = vst [vmem:[#allocation100_spill] sm:$0xff] %v15519_v53  ;;  %v15548_v42 = vld [vmem:[%s18098_s0 + $0x31a] sm:$0xff]  ;;  %v15562_v34 = vld [vmem:[%s18098_s0 + $0x322] sm:$0xff] }
 0x1e6   :  { %18761 = vst [vmem:[#allocation80_spill] sm:$0xff] %v15548_v42  ;;  %18762 = vst [vmem:[#allocation45_spill] sm:$0xff] %v15562_v34  ;;  %v15567_v49 = vld [vmem:[%s18098_s0 + $0x302] sm:$0xff]  ;;  %v15572_v55 = vld [vmem:[%s18098_s0 + $0x30a] sm:$0xff]  ;;  %v9860_v34 = vunpack.i.h.bf16 %v15071_v12 }
 0x1e7   :  { %18763 = vst [vmem:[#allocation79_spill] sm:$0xff] %v15567_v49  ;;  %18764 = vst [vmem:[#allocation47_spill] sm:$0xff] %v15572_v55  ;;  %v18765_v14 = vld [vmem:[#allocation15_spill] sm:$0xff]  ;;  %v18767_v27 = vld [vmem:[#allocation16_spill] sm:$0xff] }
 0x1e8   :  { %v9705_v6 = vunpack.i.h.bf16 %v18765_v14  ;;  %v9704_v22 = vunpack.i.l.bf16 %v18765_v14  ;;  %18766 = vst [vmem:[#allocation48_spill] sm:$0xff] %v15576_v21  ;;  %v15585_v50 = vld [vmem:[%s18098_s0 + $0x348] sm:$0xff]  ;;  %v9700_v41 = vunpack.i.h.bf16 %v18767_v27  ;;  %v9699_v51 = vunpack.i.l.bf16 %v18767_v27  ;;  %18768 = vst [vmem:[#allocation49_spill] sm:$0xff] %v15589_v37  ;;  %v15598_v38 = vld [vmem:[%s18098_s0 + $0x350] sm:$0xff] }
 0x1e9   :  { %v15603_v21 = vld [vmem:[%s18098_s0 + $0x330] sm:$0xff]  ;;  %v15608_v27 = vld [vmem:[%s18098_s0 + $0x338] sm:$0xff]  ;;  %v18771_v37 = vpack.i.bf16 %v15298_v1, %v15293_v5 }
 0x1ea   :  { %v15622_v20 = vld [vmem:[%s18098_s0 + $0x349] sm:$0xff]  ;;  %v18770_v43 = vld [vmem:[#allocation17_spill] sm:$0xff]  ;;  %v15635_v9 = vld [vmem:[%s18098_s0 + $0x351] sm:$0xff]  ;;  %v2941_v5 = vsel %vm2938_vm5, %v15139_v39, %v9704_v22  ;;  %v2942_v1 = vsel %vm2938_vm5, %v15146_v35, %v9705_v6  ;;  %v2939_v55 = vsel %vm2938_vm5, %v15171_v61, %v9699_v51  ;;  %v2940_v42 = vsel %vm2938_vm5, %v15175_v31, %v9700_v41  ;;  %v15661_v22 = vpop.permute.xlu0 %9927 }
 0x1eb   :  { %v18769_v32 = vld [vmem:[#allocation75_spill] sm:$0xff]  ;;  %v9710_v24 = vunpack.i.h.bf16 %v18770_v43  ;;  %v9709_v53 = vunpack.i.l.bf16 %v18770_v43  ;;  %10207 = vrot.lane.b32.xlu0 %v18771_v37, %s11739_s29  ;;  %v9933_v37 = vpop.permute.xlu1 %9932  ;;  %v9859_v39 = vunpack.i.l.bf16 %v15071_v12  ;;  %18774 = vst [vmem:[#allocation50_spill] sm:$0xff] %v15661_v22  ;;  %v18775_v43 = vpack.i.bf16 %v15314_v63, %v15309_v30  ;;  %v18777_v41 = vld [vmem:[#allocation18_spill] sm:$0xff] }
 0x1ec   :  { %v9715_v56 = vunpack.i.h.bf16 %v18769_v32  ;;  %v9714_v44 = vunpack.i.l.bf16 %v18769_v32  ;;  %v15640_v14 = vld [vmem:[%s18098_s0 + $0x331] sm:$0xff]  ;;  %v15645_v32 = vld [vmem:[%s18098_s0 + $0x339] sm:$0xff]  ;;  %v9935_v35 = vunpack.i.h.bf16 %v9933_v37  ;;  %v9934_v6 = vunpack.i.l.bf16 %v9933_v37  ;;  %v18778_v61 = vld [vmem:[#allocation74_spill] sm:$0xff] }
 0x1ed   :  { %18772 = vst [vmem:[#allocation51_spill] sm:$0xff] %v15640_v14  ;;  %18773 = vst [vmem:[#allocation101_spill] sm:$0xff] %v15645_v32  ;;  %10222 = vrot.lane.b32.xlu1 %v18775_v43, %s11737_s26  ;;  %v2943_v31 = vsel %vm2938_vm5, %v15189_v40, %v9709_v53  ;;  %v2944_v63 = vsel %vm2938_vm5, %v15193_v48, %v9710_v24  ;;  %v18776_v30 = vpack.i.bf16 %v15324_v33, %v15319_v36 }
 0x1ee   :  { %v15673_v51 = vsel %vm2938_vm5, %v15179_v3, %v9714_v44  ;;  %v15677_v12 = vsel %vm2938_vm5, %v15183_v10, %v9715_v56  ;;  %v15690_v3 = vld [vmem:[%s18098_s0 + $0x34a] sm:$0xff]  ;;  %v15695_v10 = vld [vmem:[%s18098_s0 + $0x352] sm:$0xff]  ;;  %v9725_v40 = vunpack.i.h.bf16 %v18777_v41  ;;  %v9724_v53 = vunpack.i.l.bf16 %v18777_v41  ;;  %v9938_v44 = vpop.permute.xlu0 %9937  ;;  %v15711_v41 = vld [vmem:[%s18098_s0 + $0x33a] sm:$0xff] }
 0x1ef   :  { %10217 = vrot.lane.b32.xlu0 %v18776_v30, %s11737_s26  ;;  %v9865_v48 = vunpack.i.h.bf16 %v15039_v15  ;;  %v9864_v56 = vunpack.i.l.bf16 %v15039_v15  ;;  %v9943_v36 = vpop.permute.xlu1 %9942  ;;  %v3004_v37 = vsel %vm3003_vm6, %v2939_v55, %v9859_v39  ;;  %v3005_v43 = vsel %vm3003_vm6, %v2940_v42, %v9860_v34  ;;  %v15706_v30 = vld [vmem:[%s18098_s0 + $0x332] sm:$0xff]  ;;  %s11743_s0 = smov 56  }
 0x1f0   :  { %v9945_v33 = vunpack.i.h.bf16 %v9943_v36  ;;  %v9944_v24 = vunpack.i.l.bf16 %v9943_v36  ;;  %v9720_v15 = vunpack.i.h.bf16 %v18778_v61  ;;  %v18779_v36 = vpack.i.bf16 %v15352_v29, %v15347_v45 }
 0x1f1   :  { %v3069_v55 = vsel %vm3068_vm7, %v3004_v37, %v9934_v6  ;;  %v3070_v34 = vsel %vm3068_vm7, %v3005_v43, %v9935_v35  ;;  %v10331_v42 = vpack.i.bf16 %v15695_v10, %v15690_v3  ;;  %v9940_v39 = vunpack.i.h.bf16 %v9938_v44  ;;  %v18840_v3 = vld [vmem:[#allocation49_spill] sm:$0xff] }
 0x1f2   :  { %10232 = vrot.lane.b32.xlu1 %v18779_v36, %s11738_s2  ;;  %v9939_v49 = vunpack.i.l.bf16 %v9938_v44  ;;  %v18780_v22 = vpack.i.bf16 %v15362_v17, %v15357_v28  ;;  %v3134_v14 = vsel %vm3133_vm8, %v3069_v55, %v9944_v24  ;;  %v3135_v32 = vsel %vm3133_vm8, %v3070_v34, %v9945_v33  ;;  %v9948_v33 = vpop.permute.xlu0 %9947 }
 0x1f3   :  { %v9719_v45 = vunpack.i.l.bf16 %v18778_v61  ;;  %v9869_v29 = vunpack.i.l.bf16 %v15135_v47  ;;  %v9953_v6 = vpop.permute.xlu1 %9952  ;;  %v3198_v35 = vpack.c.bf16 %v3135_v32, %v3134_v14  ;;  %v10326_v37 = vpack.i.bf16 %v15711_v41, %v15706_v30 }
 0x1f4   :  { %10227 = vrot.lane.b32.xlu0 %v18780_v22, %s11738_s2  ;;  %v15734_v44 = vsel %vm2938_vm5, %v15199_v62, %v9724_v53  ;;  %v3006_v28 = vsel %vm3003_vm6, %v2941_v5, %v9864_v56  ;;  %v3007_v17 = vsel %vm3003_vm6, %v2942_v1, %v9865_v48  ;;  %v9870_v22 = vunpack.i.h.bf16 %v15135_v47 }
 0x1f5   :  { %v9955_v24 = vunpack.i.h.bf16 %v9953_v6  ;;  %v9954_v61 = vunpack.i.l.bf16 %v9953_v6  ;;  %v9950_v43 = vunpack.i.h.bf16 %v9948_v33  ;;  %v9949_v36 = vunpack.i.l.bf16 %v9948_v33  ;;  %8880 = vmatprep.mubr.msk.bf16.mxu0 %vm3257_vm9, %v3198_v35 }
 0x1f6   :  { %v18781_v14 = vpack.i.bf16 %v15372_v26, %v15367_v0  ;;  %v15746_v62 = vsel %vm2938_vm5, %v15203_v52, %v9725_v40  ;;  %v9875_v32 = vunpack.i.h.bf16 %v15123_v18  ;;  %v3071_v47 = vsel %vm3068_vm7, %v3006_v28, %v9939_v49  ;;  %v9958_v55 = vpop.permute.xlu0 %9957 }
 0x1f7   :  { %v3072_v5 = vsel %vm3068_vm7, %v3007_v17, %v9940_v39  ;;  %v18782_v1 = vpack.i.bf16 %v15382_v7, %v15377_v13  ;;  %v9874_v0 = vunpack.i.l.bf16 %v15123_v18  ;;  %v3008_v26 = vsel %vm3003_vm6, %v2943_v31, %v9869_v29  ;;  %v9963_v40 = vpop.permute.xlu1 %9962  ;;  %v18786_v17 = vld [vmem:[#allocation20_spill] sm:$0xff] }
 0x1f8   :  { %10242 = vrot.lane.b32.xlu1 %v18781_v14, %s11739_s29  ;;  %v3136_v53 = vsel %vm3133_vm8, %v3071_v47, %v9949_v36  ;;  %v3137_v52 = vsel %vm3133_vm8, %v3072_v5, %v9950_v43  ;;  %v3009_v48 = vsel %vm3003_vm6, %v2944_v63, %v9870_v22  ;;  %v9965_v56 = vunpack.i.h.bf16 %v9963_v40  ;;  %v18787_v47 = vld [vmem:[#allocation21_spill] sm:$0xff] }
 0x1f9   :  { %10237 = vrot.lane.b32.xlu0 %v18782_v1, %s11739_s29  ;;  %v9964_v49 = vunpack.i.l.bf16 %v9963_v40  ;;  %v3199_v34 = vpack.c.bf16 %v3137_v52, %v3136_v53  ;;  %v2947_v39 = vsel %vm2938_vm5, %v15215_v8, %v9719_v45  ;;  %v2948_v13 = vsel %vm2938_vm5, %v15219_v11, %v9720_v15  ;;  %v18785_v11 = vld [vmem:[#allocation19_spill] sm:$0xff] }
 0x1fa   :  { %v3073_v18 = vsel %vm3068_vm7, %v3008_v26, %v9954_v61  ;;  %v3074_v7 = vsel %vm3068_vm7, %v3009_v48, %v9955_v24  ;;  %v18783_v31 = vpack.i.bf16 %v15405_v4, %v15400_v57  ;;  %v9960_v6 = vunpack.i.h.bf16 %v9958_v55  ;;  %v18791_v26 = vld [vmem:[#allocation29_spill] sm:$0xff] }
 0x1fb   :  { %v3138_v63 = vsel %vm3133_vm8, %v3073_v18, %v9964_v49  ;;  %v3139_v29 = vsel %vm3133_vm8, %v3074_v7, %v9965_v56  ;;  %v9959_v35 = vunpack.i.l.bf16 %v9958_v55  ;;  %v18784_v8 = vpack.i.bf16 %v15415_v19, %v15410_v16  ;;  %8881 = vmatmul.mubr.msk.bf16.vlgmr.msra.gmra.mxu0 %vm3257_vm9, %v3199_v34  ;;  %v9973_v4 = vpop.permute.xlu1 %9972  ;;  %v9968_v19 = vpop.permute.xlu0 %9967 }
 0x1fc   :  { %10252 = vrot.lane.b32.xlu1 %v18783_v31, %s11737_s26  ;;  %v9735_v15 = vunpack.i.h.bf16 %v18785_v11  ;;  %v9734_v45 = vunpack.i.l.bf16 %v18785_v11  ;;  %v9879_v57 = vunpack.i.l.bf16 %v15185_v60  ;;  %v3200_v28 = vpack.c.bf16 %v3139_v29, %v3138_v63  ;;  %v18793_v31 = vld [vmem:[#allocation92_spill] sm:$0xff]  ;;  %v18794_v29 = vld [vmem:[#allocation99_spill] sm:$0xff] }
 0x1fd   :  { %10247 = vrot.lane.b32.xlu0 %v18784_v8, %s11737_s26  ;;  %v9729_v22 = vunpack.i.l.bf16 %v18786_v17  ;;  %v3010_v33 = vsel %vm3003_vm6, %v15673_v51, %v9874_v0  ;;  %v3011_v24 = vsel %vm3003_vm6, %v15677_v12, %v9875_v32  ;;  %v9880_v16 = vunpack.i.h.bf16 %v15185_v60  ;;  %v18789_v51 = vld [vmem:[#allocation62_spill] sm:$0xff]  ;;  %v18790_v32 = vld [vmem:[#allocation96_spill] sm:$0xff] }
 0x1fe   :  { %v9975_v61 = vunpack.i.h.bf16 %v9973_v4  ;;  %v9974_v43 = vunpack.i.l.bf16 %v9973_v4  ;;  %v9970_v36 = vunpack.i.h.bf16 %v9968_v19  ;;  %v9969_v14 = vunpack.i.l.bf16 %v9968_v19  ;;  %8884 = vmatprep.mubr.msk.bf16.mxu0 %vm3257_vm9, %v3200_v28 }
 0x1ff   :  { %v18788_v5 = vpack.i.bf16 %v15425_v2, %v18787_v47  ;;  %v9730_v1 = vunpack.i.h.bf16 %v18786_v17  ;;  %v9885_v0 = vunpack.i.h.bf16 %v18789_v51  ;;  %v3075_v12 = vsel %vm3068_vm7, %v3010_v33, %v9959_v35  ;;  %v9983_v56 = vpop.permute.xlu1 %9982  ;;  %v9978_v18 = vpop.permute.xlu0 %9977 }
 0x200   :  { %v3076_v60 = vsel %vm3068_vm7, %v3011_v24, %v9960_v6  ;;  %v18792_v53 = vpack.i.bf16 %v18790_v32, %v18791_v26  ;;  %v9884_v52 = vunpack.i.l.bf16 %v18789_v51  ;;  %v3012_v2 = vsel %vm3003_vm6, %v2947_v39, %v9879_v57  ;;  %v18799_v24 = vld [vmem:[#allocation76_spill] sm:$0xff]  ;;  %v18802_v32 = vld [vmem:[#allocation39_spill] sm:$0xff] }
 0x201   :  { %10262 = vrot.lane.b32.xlu1 %v18788_v5, %s11738_s2  ;;  %v3140_v40 = vsel %vm3133_vm8, %v3075_v12, %v9969_v14  ;;  %v3141_v48 = vsel %vm3133_vm8, %v3076_v60, %v9970_v36  ;;  %v3013_v49 = vsel %vm3003_vm6, %v2948_v13, %v9880_v16  ;;  %v9985_v55 = vunpack.i.h.bf16 %v9983_v56  ;;  %v18803_v26 = vld [vmem:[#allocation36_spill] sm:$0xff] }
 0x202   :  { %10257 = vrot.lane.b32.xlu0 %v18792_v53, %s11738_s2  ;;  %v9984_v34 = vunpack.i.l.bf16 %v9983_v56  ;;  %v3201_v7 = vpack.c.bf16 %v3141_v48, %v3140_v40  ;;  %v2953_v63 = vsel %vm2938_vm5, %v18793_v31, %v9734_v45  ;;  %v2951_v6 = vsel %vm2938_vm5, %v18794_v29, %v9729_v22  ;;  %v18796_v45 = vld [vmem:[#allocation65_spill] sm:$0xff]  ;;  %v18806_v40 = vld [vmem:[#allocation44_spill] sm:$0xff] }
 0x203   :  { %v3077_v35 = vsel %vm3068_vm7, %v3012_v2, %v9974_v43  ;;  %v3078_v39 = vsel %vm3068_vm7, %v3013_v49, %v9975_v61  ;;  %v18795_v8 = vpack.i.bf16 %v15458_v54, %v15453_v25  ;;  %v9980_v4 = vunpack.i.h.bf16 %v9978_v18  ;;  %v18798_v22 = vld [vmem:[#allocation13_spill] sm:$0xff]  ;;  %v18800_v25 = vld [vmem:[#allocation64_spill] sm:$0xff]  ;;  %v9993_v19 = vpop.permute.xlu1 %9992  ;;  %v9988_v5 = vpop.permute.xlu0 %9987 }
 0x204   :  { %v3142_v13 = vsel %vm3133_vm8, %v3077_v35, %v9984_v34  ;;  %v3143_v57 = vsel %vm3133_vm8, %v3078_v39, %v9985_v55  ;;  %v9979_v28 = vunpack.i.l.bf16 %v9978_v18  ;;  %v18797_v17 = vpack.i.bf16 %v15468_v59, %v18796_v45  ;;  %8885 = vmatmul.mubr.msk.bf16.gmra.mxu0 %vm3257_vm9, %v3201_v7  ;;  %v18801_v43 = vld [vmem:[#allocation41_spill] sm:$0xff]  ;;  %v18807_v48 = vld [vmem:[#allocation40_spill] sm:$0xff] }
 0x205   :  { %10272 = vrot.lane.b32.xlu1 %v18795_v8, %s11739_s29  ;;  %v2952_v33 = vsel %vm2938_vm5, %v18798_v22, %v9730_v1  ;;  %v9744_v16 = vunpack.i.l.bf16 %v18799_v24  ;;  %v9889_v54 = vunpack.i.l.bf16 %v18800_v25  ;;  %v3202_v61 = vpack.c.bf16 %v3143_v57, %v3142_v13  ;;  %v18809_v13 = vld [vmem:[#allocation91_spill] sm:$0xff]  ;;  %v18810_v45 = vld [vmem:[#allocation100_spill] sm:$0xff] }
 0x206   :  { %10267 = vrot.lane.b32.xlu0 %v18797_v17, %s11739_s29  ;;  %v9740_v36 = vunpack.i.h.bf16 %v18801_v43  ;;  %v3014_v14 = vsel %vm3003_vm6, %v15734_v44, %v9884_v52  ;;  %v3015_v59 = vsel %vm3003_vm6, %v15746_v62, %v9885_v0  ;;  %v9890_v47 = vunpack.i.h.bf16 %v18800_v25  ;;  %v18805_v44 = vld [vmem:[#allocation63_spill] sm:$0xff] }
 0x207   :  { %v9995_v51 = vunpack.i.h.bf16 %v9993_v19  ;;  %v9994_v12 = vunpack.i.l.bf16 %v9993_v19  ;;  %v9990_v1 = vunpack.i.h.bf16 %v9988_v5  ;;  %v9989_v60 = vunpack.i.l.bf16 %v9988_v5  ;;  %8888 = vmatprep.mubr.msk.bf16.mxu0 %vm3257_vm9, %v3202_v61  ;;  %v10003_v7 = vpop.permute.xlu1 %10002  ;;  %v9998_v39 = vpop.permute.xlu0 %9997  ;;  %v18814_v19 = vld [vmem:[#allocation94_spill] sm:$0xff] }
 0x208   :  { %v18804_v53 = vpack.i.bf16 %v18802_v32, %v18803_v26  ;;  %v9739_v2 = vunpack.i.l.bf16 %v18801_v43  ;;  %v9895_v52 = vunpack.i.h.bf16 %v18805_v44  ;;  %v3079_v62 = vsel %vm3068_vm7, %v3014_v14, %v9979_v28  ;;  %v18815_v61 = vld [vmem:[#allocation22_spill] sm:$0xff]  ;;  %v18817_v26 = vld [vmem:[#allocation45_spill] sm:$0xff] }
 0x209   :  { %v3080_v0 = vsel %vm3068_vm7, %v3015_v59, %v9980_v4  ;;  %v18808_v56 = vpack.i.bf16 %v18806_v40, %v18807_v48  ;;  %v9894_v49 = vunpack.i.l.bf16 %v18805_v44  ;;  %v3016_v55 = vsel %vm3003_vm6, %v2951_v6, %v9889_v54  ;;  %v18820_v44 = vld [vmem:[#allocation46_spill] sm:$0xff]  ;;  %v18822_v40 = vld [vmem:[#allocation47_spill] sm:$0xff] }
 0x20a   :  { %10282 = vrot.lane.b32.xlu1 %v18804_v53, %s11737_s26  ;;  %v3144_v34 = vsel %vm3133_vm8, %v3079_v62, %v9989_v60  ;;  %v3145_v18 = vsel %vm3133_vm8, %v3080_v0, %v9990_v1  ;;  %v3017_v31 = vsel %vm3003_vm6, %v2952_v33, %v9890_v47  ;;  %v10005_v29 = vunpack.i.h.bf16 %v10003_v7  ;;  %v18816_v47 = vld [vmem:[#allocation93_spill] sm:$0xff]  ;;  %v18818_v53 = vld [vmem:[#allocation80_spill] sm:$0xff]  ;;  %v18821_v62 = vld [vmem:[#allocation14_spill] sm:$0xff] }
 0x20b   :  { %10277 = vrot.lane.b32.xlu0 %v18808_v56, %s11737_s26  ;;  %v10004_v35 = vunpack.i.l.bf16 %v10003_v7  ;;  %v3203_v8 = vpack.c.bf16 %v3145_v18, %v3144_v34  ;;  %v2954_v57 = vsel %vm2938_vm5, %v18809_v13, %v9735_v15  ;;  %v9745_v4 = vunpack.i.h.bf16 %v18799_v24  ;;  %v18813_v24 = vld [vmem:[#allocation24_spill] sm:$0xff]  ;;  %v10013_v14 = vpop.permute.xlu1 %10012  ;;  %v18823_v48 = vld [vmem:[#allocation79_spill] sm:$0xff] }
 0x20c   :  { %v3081_v6 = vsel %vm3068_vm7, %v3016_v55, %v9994_v12  ;;  %v3082_v28 = vsel %vm3068_vm7, %v3017_v31, %v9995_v51  ;;  %v18811_v17 = vpack.i.bf16 %v15524_v46, %v18810_v45  ;;  %v10000_v25 = vunpack.i.h.bf16 %v9998_v39  ;;  %v10008_v12 = vpop.permute.xlu0 %10007  ;;  %v18825_v13 = vld [vmem:[#allocation28_spill] sm:$0xff] }
 0x20d   :  { %v3146_v22 = vsel %vm3133_vm8, %v3081_v6, %v10004_v35  ;;  %v3147_v33 = vsel %vm3133_vm8, %v3082_v28, %v10005_v29  ;;  %v9999_v11 = vunpack.i.l.bf16 %v9998_v39  ;;  %v18812_v15 = vpack.i.bf16 %v15543_v23, %v15538_v58  ;;  %8889 = vmatmul.mubr.msk.bf16.gmra.mxu0 %vm3257_vm9, %v3203_v8 }
 0x20e   :  { %10292 = vrot.lane.b32.xlu1 %v18811_v17, %s11738_s2  ;;  %v2957_v54 = vsel %vm2938_vm5, %v18813_v24, %v9744_v16  ;;  %v2955_v46 = vsel %vm2938_vm5, %v18814_v19, %v9739_v2  ;;  %v9899_v43 = vunpack.i.l.bf16 %v18815_v61  ;;  %v3204_v59 = vpack.c.bf16 %v3147_v33, %v3146_v22 }
 0x20f   :  { %10287 = vrot.lane.b32.xlu0 %v18812_v15, %s11738_s2  ;;  %v2956_v5 = vsel %vm2938_vm5, %v18816_v47, %v9740_v36  ;;  %v3018_v51 = vsel %vm3003_vm6, %v2953_v63, %v9894_v49  ;;  %v3019_v58 = vsel %vm3003_vm6, %v2954_v57, %v9895_v52  ;;  %v9900_v23 = vunpack.i.h.bf16 %v18815_v61  ;;  %v10023_v7 = vpop.permute.xlu1 %10022  ;;  %v18828_v15 = vld [vmem:[#allocation42_spill] sm:$0xff] }
 0x210   :  { %v10015_v1 = vunpack.i.h.bf16 %v10013_v14  ;;  %v10014_v60 = vunpack.i.l.bf16 %v10013_v14  ;;  %v10010_v16 = vunpack.i.h.bf16 %v10008_v12  ;;  %v10009_v32 = vunpack.i.l.bf16 %v10008_v12  ;;  %8892 = vmatprep.mubr.msk.bf16.mxu0 %vm3257_vm9, %v3204_v59  ;;  %v10018_v39 = vpop.permute.xlu0 %10017 }
 0x211   :  { %v18819_v2 = vpack.i.bf16 %v18817_v26, %v18818_v53  ;;  %v9749_v36 = vunpack.i.l.bf16 %v18820_v44  ;;  %v9905_v63 = vunpack.i.h.bf16 %v18821_v62  ;;  %v3083_v52 = vsel %vm3068_vm7, %v3018_v51, %v9999_v11  ;;  %v18834_v53 = vld [vmem:[#allocation101_spill] sm:$0xff] }
 0x212   :  { %v3084_v0 = vsel %vm3068_vm7, %v3019_v58, %v10000_v25  ;;  %v18824_v56 = vpack.i.bf16 %v18822_v40, %v18823_v48  ;;  %v9904_v49 = vunpack.i.l.bf16 %v18821_v62  ;;  %v3020_v55 = vsel %vm3003_vm6, %v2955_v46, %v9899_v43  ;;  %v18829_v46 = vld [vmem:[#allocation43_spill] sm:$0xff] }
 0x213   :  { %10302 = vrot.lane.b32.xlu1 %v18819_v2, %s11739_s29  ;;  %v3148_v34 = vsel %vm3133_vm8, %v3083_v52, %v10009_v32  ;;  %v3149_v18 = vsel %vm3133_vm8, %v3084_v0, %v10010_v16  ;;  %v3021_v31 = vsel %vm3003_vm6, %v2956_v5, %v9900_v23  ;;  %v10025_v29 = vunpack.i.h.bf16 %v10023_v7  ;;  %v18830_v43 = vld [vmem:[#allocation95_spill] sm:$0xff] }
 0x214   :  { %10297 = vrot.lane.b32.xlu0 %v18824_v56, %s11739_s29  ;;  %v10024_v35 = vunpack.i.l.bf16 %v10023_v7  ;;  %v3205_v8 = vpack.c.bf16 %v3149_v18, %v3148_v34  ;;  %v2958_v57 = vsel %vm2938_vm5, %v18825_v13, %v9745_v4  ;;  %v9750_v6 = vunpack.i.h.bf16 %v18820_v44  ;;  %v18835_v2 = vld [vmem:[#allocation51_spill] sm:$0xff] }
 0x215   :  { %v3085_v28 = vsel %vm3068_vm7, %v3020_v55, %v10014_v60  ;;  %v3086_v45 = vsel %vm3068_vm7, %v3021_v31, %v10015_v1  ;;  %v18826_v17 = vpack.i.bf16 %v15598_v38, %v15585_v50  ;;  %v10020_v25 = vunpack.i.h.bf16 %v10018_v39  ;;  %v10033_v50 = vpop.permute.xlu1 %10032  ;;  %v18832_v1 = vld [vmem:[#allocation32_spill] sm:$0xff]  ;;  %v18838_v34 = vld [vmem:[#allocation71_spill] sm:$0xff] }
 0x216   :  { %v3150_v22 = vsel %vm3133_vm8, %v3085_v28, %v10024_v35  ;;  %v3151_v33 = vsel %vm3133_vm8, %v3086_v45, %v10025_v29  ;;  %v10019_v11 = vunpack.i.l.bf16 %v10018_v39  ;;  %v18827_v4 = vpack.i.bf16 %v15608_v27, %v15603_v21  ;;  %8893 = vmatmul.mubr.msk.bf16.gmra.mxu0 %vm3257_vm9, %v3205_v8  ;;  %v10028_v27 = vpop.permute.xlu0 %10027  ;;  %v18839_v13 = vld [vmem:[#allocation23_spill] sm:$0xff]  ;;  %v18841_v45 = vld [vmem:[#allocation70_spill] sm:$0xff] }
 0x217   :  { %10312 = vrot.lane.b32.xlu1 %v18826_v17, %s11737_s26  ;;  %v9755_v24 = vunpack.i.h.bf16 %v18828_v15  ;;  %v9754_v19 = vunpack.i.l.bf16 %v18828_v15  ;;  %v9909_v38 = vunpack.i.l.bf16 %v18829_v46  ;;  %v3206_v61 = vpack.c.bf16 %v3151_v33, %v3150_v22 }
 0x218   :  { %10307 = vrot.lane.b32.xlu0 %v18827_v4, %s11737_s26  ;;  %v2959_v14 = vsel %vm2938_vm5, %v18830_v43, %v9749_v36  ;;  %v3022_v59 = vsel %vm3003_vm6, %v2957_v54, %v9904_v49  ;;  %v3023_v47 = vsel %vm3003_vm6, %v2958_v57, %v9905_v63  ;;  %v9910_v21 = vunpack.i.h.bf16 %v18829_v46  ;;  %v18833_v54 = vld [vmem:[#allocation35_spill] sm:$0xff]  ;;  %v18837_v49 = vld [vmem:[#allocation52_spill] sm:$0xff] }
 0x219   :  { %v10035_v5 = vunpack.i.h.bf16 %v10033_v50  ;;  %v10034_v51 = vunpack.i.l.bf16 %v10033_v50  ;;  %v10030_v58 = vunpack.i.h.bf16 %v10028_v27  ;;  %v10029_v23 = vunpack.i.l.bf16 %v10028_v27  ;;  %8896 = vmatprep.mubr.msk.bf16.mxu0 %vm3257_vm9, %v3206_v61  ;;  %v10043_v63 = vpop.permute.xlu1 %10042  ;;  %v18843_v50 = vld [vmem:[#allocation31_spill] sm:$0xff] }
 0x21a   :  { %v18831_v12 = vpack.i.bf16 %v15635_v9, %v15622_v20  ;;  %v2960_v60 = vsel %vm2938_vm5, %v18832_v1, %v9750_v6  ;;  %v9915_v16 = vunpack.i.h.bf16 %v18833_v54  ;;  %v3087_v32 = vsel %vm3068_vm7, %v3022_v59, %v10019_v11  ;;  %v10038_v48 = vpop.permute.xlu0 %10037 }
 0x21b   :  { %v3088_v26 = vsel %vm3068_vm7, %v3023_v47, %v10020_v25  ;;  %v18836_v44 = vpack.i.bf16 %v18834_v53, %v18835_v2  ;;  %v9914_v36 = vunpack.i.l.bf16 %v18833_v54  ;;  %v3024_v20 = vsel %vm3003_vm6, %v2959_v14, %v9909_v38  ;;  %v18845_v2 = vld [vmem:[#allocation106_spill] sm:$0xff] }
 0x21c   :  { %10322 = vrot.lane.b32.xlu1 %v18831_v12, %s11738_s2  ;;  %v3152_v9 = vsel %vm3133_vm8, %v3087_v32, %v10029_v23  ;;  %v3153_v62 = vsel %vm3133_vm8, %v3088_v26, %v10030_v58  ;;  %v3025_v52 = vsel %vm3003_vm6, %v2960_v60, %v9910_v21  ;;  %v10045_v0 = vunpack.i.h.bf16 %v10043_v63  ;;  %v18844_v23 = vld [vmem:[#allocation48_spill] sm:$0xff] }
 0x21d   :  { %10317 = vrot.lane.b32.xlu0 %v18836_v44, %s11738_s2  ;;  %v10044_v40 = vunpack.i.l.bf16 %v10043_v63  ;;  %v3207_v56 = vpack.c.bf16 %v3153_v62, %v3152_v9  ;;  %v2961_v55 = vsel %vm2938_vm5, %v18837_v49, %v9754_v19  ;;  %v9759_v18 = vunpack.i.l.bf16 %v18838_v34  ;;  %v18848_v9 = vld [vmem:[#allocation107_spill] sm:$0xff] }
 0x21e   :  { %v3089_v7 = vsel %vm3068_vm7, %v3024_v20, %v10034_v51  ;;  %v3090_v31 = vsel %vm3068_vm7, %v3025_v52, %v10035_v5  ;;  %v10040_v39 = vunpack.i.h.bf16 %v10038_v48  ;;  %v10039_v8 = vunpack.i.l.bf16 %v10038_v48  ;;  %v10048_v41 = vpop.permute.xlu0 %10047 }
 0x21f   :  { %v3154_v29 = vsel %vm3133_vm8, %v3089_v7, %v10044_v40  ;;  %v3155_v35 = vsel %vm3133_vm8, %v3090_v31, %v10045_v0  ;;  %8897 = vmatmul.mubr.msk.bf16.gmra.mxu0 %vm3257_vm9, %v3207_v56  ;;  %v2962_v57 = vsel %vm2938_vm5, %v18839_v13, %v9755_v24  ;;  %v9760_v6 = vunpack.i.h.bf16 %v18838_v34  ;;  %v18842_v24 = vld [vmem:[#allocation30_spill] sm:$0xff]  ;;  %v18849_v40 = vld [vmem:[#allocation77_spill] sm:$0xff] }
 0x220   :  { %10332 = vrot.lane.b32.xlu1 %v10331_v42, %s11739_s29  ;;  %v9919_v10 = vunpack.i.l.bf16 %v18840_v3  ;;  %v10053_v42 = vpop.permute.xlu1 %10052  ;;  %v3208_v28 = vpack.c.bf16 %v3155_v35, %v3154_v29  ;;  %v9765_v17 = vunpack.i.h.bf16 %v18841_v45  ;;  %v3026_v22 = vsel %vm3003_vm6, %v2961_v55, %v9914_v36  ;;  %v18847_v36 = vld [vmem:[#allocation11_spill] sm:$0xff]  ;;  %v18850_v56 = vld [vmem:[#allocation66_spill] sm:$0xff]  ;;  %v18851_v55 = vld [vmem:[#allocation72_spill] sm:$0xff] }
 0x221   :  { %10327 = vrot.lane.b32.xlu0 %v10326_v37, %s11739_s29  ;;  %v3027_v33 = vsel %vm3003_vm6, %v2962_v57, %v9915_v16  ;;  %v9920_v30 = vunpack.i.h.bf16 %v18840_v3  ;;  %v10055_v37 = vunpack.i.h.bf16 %v10053_v42  ;;  %v10054_v25 = vunpack.i.l.bf16 %v10053_v42 }
 0x222   :  { %v10050_v11 = vunpack.i.h.bf16 %v10048_v41  ;;  %v10049_v4 = vunpack.i.l.bf16 %v10048_v41  ;;  %8900 = vmatprep.mubr.msk.bf16.mxu0 %vm3257_vm9, %v3208_v28  ;;  %v9764_v15 = vunpack.i.l.bf16 %v18841_v45  ;;  %v2963_v19 = vsel %vm2938_vm5, %v18842_v24, %v9759_v18  ;;  %v10058_v51 = vpop.permute.xlu0 %10057 }
 0x223   :  { %v3091_v46 = vsel %vm3068_vm7, %v3026_v22, %v10039_v8  ;;  %v3092_v38 = vsel %vm3068_vm7, %v3027_v33, %v10040_v39  ;;  %v2964_v61 = vsel %vm2938_vm5, %v18843_v50, %v9760_v6  ;;  %v3028_v43 = vsel %vm3003_vm6, %v2963_v19, %v9919_v10  ;;  %v18852_v8 = vld [vmem:[#allocation78_spill] sm:$0xff]  ;;  %v18857_v19 = vld [vmem:[#allocation88_spill] sm:$0xff] }
 0x224   :  { %v3156_v14 = vsel %vm3133_vm8, %v3091_v46, %v10049_v4  ;;  %v3157_v59 = vsel %vm3133_vm8, %v3092_v38, %v10050_v11  ;;  %v10063_v47 = vpop.permute.xlu1 %10062  ;;  %v3029_v21 = vsel %vm3003_vm6, %v2964_v61, %v9920_v30  ;;  %v9925_v12 = vunpack.i.h.bf16 %v18844_v23  ;;  %v18853_v10 = vld [vmem:[#allocation50_spill] sm:$0xff]  ;;  %v18855_v30 = vld [vmem:[#allocation12_spill] sm:$0xff] }
 0x225   :  { %v10065_v27 = vunpack.i.h.bf16 %v10063_v47  ;;  %v10064_v5 = vunpack.i.l.bf16 %v10063_v47  ;;  %v3209_v58 = vpack.c.bf16 %v3157_v59, %v3156_v14  ;;  %v9924_v1 = vunpack.i.l.bf16 %v18844_v23 }
 0x226   :  { %v3093_v60 = vsel %vm3068_vm7, %v3028_v43, %v10054_v25  ;;  %v3094_v54 = vsel %vm3068_vm7, %v3029_v21, %v10055_v37  ;;  %v10060_v26 = vunpack.i.h.bf16 %v10058_v51  ;;  %v10059_v53 = vunpack.i.l.bf16 %v10058_v51  ;;  %v10068_v7 = vpop.permute.xlu0 %10067 }
 0x227   :  { %v3158_v16 = vsel %vm3133_vm8, %v3093_v60, %v10064_v5  ;;  %v3159_v32 = vsel %vm3133_vm8, %v3094_v54, %v10065_v27  ;;  %8901 = vmatmul.mubr.msk.bf16.gmra.mxu0 %vm3257_vm9, %v3209_v58  ;;  %v18846_v44 = vunpack.i.l.bf16 %v18845_v2  ;;  %v9610_v62 = vunpack.i.h.bf16 %v18848_v9 }
 0x228   :  { %v9609_v63 = vunpack.i.l.bf16 %v18848_v9  ;;  %v10073_v52 = vpop.permute.xlu1 %10072  ;;  %v3210_v0 = vpack.c.bf16 %v3159_v32, %v3158_v16  ;;  %v2965_v48 = vsel %vm2938_vm5, %v18849_v40, %v9764_v15  ;;  %v2966_v49 = vsel %vm2938_vm5, %v18850_v56, %v9765_v17  ;;  %v18856_v15 = vld [vmem:[#allocation89_spill] sm:$0xff] }
 0x229   :  { %v2904_v20 = vsel %vm2873_vm4, %v18847_v36, %v18846_v44  ;;  %v9775_v34 = vunpack.i.h.bf16 %v18851_v55  ;;  %v9774_v18 = vunpack.i.l.bf16 %v18851_v55  ;;  %v3030_v31 = vsel %vm3003_vm6, %v2965_v48, %v9924_v1 }
 0x22a   :  { %v3031_v29 = vsel %vm3003_vm6, %v2966_v49, %v9925_v12  ;;  %v10070_v35 = vunpack.i.h.bf16 %v10068_v7  ;;  %v10069_v39 = vunpack.i.l.bf16 %v10068_v7  ;;  %8904 = vmatprep.mubr.msk.bf16.mxu0 %vm3257_vm9, %v3210_v0  ;;  %v9770_v13 = vunpack.i.h.bf16 %v18852_v8  ;;  %v10078_v11 = vpop.permute.xlu0 %10077 }
 0x22b   :  { %v9769_v57 = vunpack.i.l.bf16 %v18852_v8  ;;  %v3095_v6 = vsel %vm3068_vm7, %v3030_v31, %v10059_v53  ;;  %v3096_v3 = vsel %vm3068_vm7, %v3031_v29, %v10060_v26  ;;  %v9930_v42 = vunpack.i.h.bf16 %v18853_v10  ;;  %v18859_v8 = vld [vmem:[#allocation84_spill] sm:$0xff] }
 0x22c   :  { %v9929_v28 = vunpack.i.l.bf16 %v18853_v10  ;;  %v3160_v45 = vsel %vm3133_vm8, %v3095_v6, %v10069_v39  ;;  %v3161_v17 = vsel %vm3133_vm8, %v3096_v3, %v10070_v35  ;;  %v10083_v22 = vpop.permute.xlu1 %10082  ;;  %v18854_v33 = vunpack.i.h.bf16 %v18845_v2  ;;  %v18858_v35 = vld [vmem:[#allocation83_spill] sm:$0xff]  ;;  %v18860_v6 = vld [vmem:[#allocation85_spill] sm:$0xff] }
 0x22d   :  { %v10075_v37 = vunpack.i.h.bf16 %v10073_v52  ;;  %v10074_v25 = vunpack.i.l.bf16 %v10073_v52  ;;  %v3211_v4 = vpack.c.bf16 %v3161_v17, %v3160_v45  ;;  %v2902_v24 = vsel %vm2873_vm4, %v18856_v15, %v9609_v63  ;;  %v18861_v10 = vld [vmem:[#allocation87_spill] sm:$0xff] }
 0x22e   :  { %v2905_v41 = vsel %vm2873_vm4, %v18855_v30, %v18854_v33  ;;  %v2903_v46 = vsel %vm2873_vm4, %v18857_v19, %v9610_v62  ;;  %v10085_v38 = vunpack.i.h.bf16 %v10083_v22  ;;  %v10084_v50 = vunpack.i.l.bf16 %v10083_v22  ;;  %v10088_v60 = vpop.permute.xlu0 %10087 }
 0x22f   :  { %v2967_v61 = vsel %vm2938_vm5, %v2902_v24, %v9769_v57  ;;  %v2968_v43 = vsel %vm2938_vm5, %v2903_v46, %v9770_v13  ;;  %v10080_v14 = vunpack.i.h.bf16 %v10078_v11  ;;  %v10079_v59 = vunpack.i.l.bf16 %v10078_v11  ;;  %8905 = vmatmul.mubr.msk.bf16.gmra.mxu0 %vm3257_vm9, %v3211_v4 }
 0x230   :  { %v2969_v47 = vsel %vm2938_vm5, %v2904_v20, %v9774_v18  ;;  %v2970_v21 = vsel %vm2938_vm5, %v2905_v41, %v9775_v34  ;;  %v3032_v27 = vsel %vm3003_vm6, %v2967_v61, %v9929_v28  ;;  %v3033_v5 = vsel %vm3003_vm6, %v2968_v43, %v9930_v42  ;;  %v10093_v51 = vpop.permute.xlu1 %10092 }
 0x231   :  { %v3034_v58 = vsel %vm3003_vm6, %v2969_v47, %v10074_v25  ;;  %v3035_v23 = vsel %vm3003_vm6, %v2970_v21, %v10075_v37  ;;  %v10095_v12 = vunpack.i.h.bf16 %v10093_v51  ;;  %v10094_v1 = vunpack.i.l.bf16 %v10093_v51 }
 0x232   :  { %v3099_v54 = vsel %vm3068_vm7, %v3034_v58, %v10084_v50  ;;  %v3100_v16 = vsel %vm3068_vm7, %v3035_v23, %v10085_v38  ;;  %v10090_v32 = vunpack.i.h.bf16 %v10088_v60  ;;  %v10089_v26 = vunpack.i.l.bf16 %v10088_v60  ;;  %v10098_v52 = vpop.permute.xlu0 %10097  ;;  %v18863_v60 = vld [vmem:[#allocation97_spill] sm:$0xff] }
 0x233   :  { %v3097_v53 = vsel %vm3068_vm7, %v3032_v27, %v10079_v59  ;;  %v3098_v2 = vsel %vm3068_vm7, %v3033_v5, %v10080_v14  ;;  %v3164_v44 = vsel %vm3133_vm8, %v3099_v54, %v10094_v1  ;;  %v3165_v36 = vsel %vm3133_vm8, %v3100_v16, %v10095_v12  ;;  %v18862_v12 = vld [vmem:[#allocation90_spill] sm:$0xff] }
 0x234   :  { %v3162_v20 = vsel %vm3133_vm8, %v3097_v53, %v10089_v26  ;;  %v3163_v9 = vsel %vm3133_vm8, %v3098_v2, %v10090_v32  ;;  %v10103_v62 = vpop.permute.xlu1 %10102  ;;  %v3213_v63 = vpack.c.bf16 %v3165_v36, %v3164_v44  ;;  %v10100_v49 = vunpack.i.h.bf16 %v10098_v52  ;;  %v18864_v16 = vld [vmem:[#allocation98_spill] sm:$0xff]  ;;  %v18865_v53 = vld [vmem:[#allocation33_spill] sm:$0xff] }
 0x235   :  { %v3212_v0 = vpack.c.bf16 %v3163_v9, %v3162_v20  ;;  %v10105_v40 = vunpack.i.h.bf16 %v10103_v62  ;;  %v10104_v48 = vunpack.i.l.bf16 %v10103_v62  ;;  %v10099_v55 = vunpack.i.l.bf16 %v10098_v52 }
 0x236   :  { %v10108_v34 = vpop.permute.xlu0 %10107  ;;  %v3037_v42 = vsel %vm3003_vm6, %v18861_v10, %v10100_v49  ;;  %v11740_v61 = vmov 0.0  }
 0x237   :  { %8908 = vmatprep.mubr.msk.bf16.mxu0 %vm3257_vm9, %v3212_v0  ;;  %v10110_v31 = vunpack.i.h.bf16 %v10108_v34  ;;  %v10109_v29 = vunpack.i.l.bf16 %v10108_v34  ;;  %v3038_v39 = vsel %vm3003_vm6, %v18858_v35, %v10104_v48  ;;  %v3039_v13 = vsel %vm3003_vm6, %v18859_v8, %v10105_v40  ;;  %3718 = vst.msk [vmem:[#allocation2 + $0x30] sm:$0xff] %vm2743_vm1, %v11740_v61  ;;  %3719 = vst.msk [vmem:[#allocation2 + $0x38] sm:$0xff] %vm2743_vm1, %v11740_v61 }
 0x238   :  { %8909 = vmatmul.mubr.msk.bf16.gmra.mxu0 %vm3257_vm9, %v3213_v63  ;;  %v10113_v56 = vpop.permute.xlu1 %10112  ;;  %v3036_v3 = vsel %vm3003_vm6, %v18860_v6, %v10099_v55  ;;  %3711 = vst.msk [vmem:[#allocation2] sm:$0xff] %vm2743_vm1, %v11740_v61  ;;  %3712 = vst.msk [vmem:[#allocation2 + $0x8] sm:$0xff] %vm2743_vm1, %v11740_v61 }
 0x239   :  { %v10115_v18 = vunpack.i.h.bf16 %v10113_v56  ;;  %v10114_v7 = vunpack.i.l.bf16 %v10113_v56  ;;  %v3101_v37 = vsel %vm3068_vm7, %v3036_v3, %v10109_v29  ;;  %v3102_v25 = vsel %vm3068_vm7, %v3037_v42, %v10110_v31  ;;  %3715 = vst.msk [vmem:[#allocation2 + $0x18] sm:$0xff] %vm2743_vm1, %v11740_v61  ;;  %3716 = vst.msk [vmem:[#allocation2 + $0x20] sm:$0xff] %vm2743_vm1, %v11740_v61 }
 0x23a   :  { %v10118_v17 = vpop.permute.xlu0 %10117  ;;  %3721 = vst.msk [vmem:[#allocation2 + $0x48] sm:$0xff] %vm2743_vm1, %v11740_v61  ;;  %3722 = vst.msk [vmem:[#allocation2 + $0x50] sm:$0xff] %vm2743_vm1, %v11740_v61 }
 0x23b   :  { %v3103_v22 = vsel %vm3068_vm7, %v3038_v39, %v10114_v7  ;;  %v3104_v33 = vsel %vm3068_vm7, %v3039_v13, %v10115_v18  ;;  %v10120_v30 = vunpack.i.h.bf16 %v10118_v17  ;;  %v10119_v41 = vunpack.i.l.bf16 %v10118_v17  ;;  %3724 = vst.msk [vmem:[#allocation2 + $0x60] sm:$0xff] %vm2743_vm1, %v11740_v61  ;;  %3725 = vst.msk [vmem:[#allocation2 + $0x68] sm:$0xff] %vm2743_vm1, %v11740_v61 }
 0x23c   :  { %v10123_v57 = vpop.permute.xlu1 %10122  ;;  %3727 = vst.msk [vmem:[#allocation2 + $0x78] sm:$0xff] %vm2743_vm1, %v11740_v61  ;;  %3728 = vst.msk [vmem:[#allocation2 + $0x80] sm:$0xff] %vm2743_vm1, %v11740_v61 }
 0x23d   :  { %v10125_v28 = vunpack.i.h.bf16 %v10123_v57  ;;  %v10124_v45 = vunpack.i.l.bf16 %v10123_v57  ;;  %v16050_v15 = vsel %vm3133_vm8, %v3101_v37, %v10119_v41  ;;  %v16053_v24 = vsel %vm3133_vm8, %v3102_v25, %v10120_v30  ;;  %3730 = vst.msk [vmem:[#allocation2 + $0x90] sm:$0xff] %vm2743_vm1, %v11740_v61  ;;  %3731 = vst.msk [vmem:[#allocation2 + $0x98] sm:$0xff] %vm2743_vm1, %v11740_v61  ;;  %v18866_v41 = vld [vmem:[#allocation108_spill] sm:$0xff]  ;;  %v18867_v25 = vld [vmem:[#allocation109_spill] sm:$0xff] }
 0x23e   :  { %v16059_v38 = vpop.permute.xlu0 %10127  ;;  %v3214_v50 = vpack.c.bf16 %v16053_v24, %v16050_v15  ;;  %3733 = vst.msk [vmem:[#allocation2 + $0xa8] sm:$0xff] %vm2743_vm1, %v11740_v61  ;;  %3734 = vst.msk [vmem:[#allocation2 + $0xb0] sm:$0xff] %vm2743_vm1, %v11740_v61  ;;  %v18868_v15 = vld [vmem:[#allocation34_spill] sm:$0xff] }
 0x23f   :  { %v16044_v11 = vsel %vm3133_vm8, %v3103_v22, %v10124_v45  ;;  %v16047_v4 = vsel %vm3133_vm8, %v3104_v33, %v10125_v28  ;;  %3736 = vst.msk [vmem:[#allocation2 + $0xc0] sm:$0xff] %vm2743_vm1, %v11740_v61  ;;  %3737 = vst.msk [vmem:[#allocation2 + $0xc8] sm:$0xff] %vm2743_vm1, %v11740_v61  ;;  %v10129_v59 = vunpack.i.l.bf16 %v16059_v38  ;;  %v10130_v21 = vunpack.i.h.bf16 %v16059_v38  ;;  %v3949_v62 = vld [vmem:[#allocation2 + $0x1] sm:$0xff] }
 0x240   :  { %v16055_v19 = vpop.permute.xlu1 %10132  ;;  %v3215_v46 = vpack.c.bf16 %v16047_v4, %v16044_v11  ;;  %3739 = vst.msk [vmem:[#allocation2 + $0xd8] sm:$0xff] %vm2743_vm1, %v11740_v61  ;;  %3740 = vst.msk [vmem:[#allocation2 + $0xe0] sm:$0xff] %vm2743_vm1, %v11740_v61  ;;  %8912 = vmatprep.mubr.msk.bf16.mxu0 %vm3257_vm9, %v3214_v50  ;;  %v4013_v8 = vld [vmem:[#allocation2 + $0x2] sm:$0xff] }
 0x241   :  { %3742 = vst.msk [vmem:[#allocation2 + $0xf0] sm:$0xff] %vm2743_vm1, %v11740_v61  ;;  %3743 = vst.msk [vmem:[#allocation2 + $0xf8] sm:$0xff] %vm2743_vm1, %v11740_v61  ;;  %v10135_v43 = vunpack.i.h.bf16 %v16055_v19  ;;  %v10134_v14 = vunpack.i.l.bf16 %v16055_v19  ;;  %v3040_v32 = vsel %vm3003_vm6, %v18864_v16, %v10129_v59  ;;  %v3041_v2 = vsel %vm3003_vm6, %v18865_v53, %v10130_v21  ;;  %v18869_v19 = vld [vmem:[#allocation25_spill] sm:$0xff] }
 0x242   :  { %3745 = vst.msk [vmem:[#allocation2 + $0x108] sm:$0xff] %vm2743_vm1, %v11740_v61  ;;  %3746 = vst.msk [vmem:[#allocation2 + $0x110] sm:$0xff] %vm2743_vm1, %v11740_v61  ;;  %8913 = vmatmul.mubr.msk.bf16.gmra.mxu0 %vm3257_vm9, %v3215_v46  ;;  %v10138_v5 = vpop.permute.xlu0 %10137 }
 0x243   :  { %3748 = vst.msk [vmem:[#allocation2 + $0x120] sm:$0xff] %vm2743_vm1, %v11740_v61  ;;  %3749 = vst.msk [vmem:[#allocation2 + $0x128] sm:$0xff] %vm2743_vm1, %v11740_v61  ;;  %v10139_v58 = vunpack.i.l.bf16 %v10138_v5  ;;  %v10140_v23 = vunpack.i.h.bf16 %v10138_v5  ;;  %v3042_v1 = vsel %vm3003_vm6, %v18862_v12, %v10134_v14  ;;  %v3043_v54 = vsel %vm3003_vm6, %v18863_v60, %v10135_v43 }
 0x244   :  { %3751 = vst.msk [vmem:[#allocation2 + $0x138] sm:$0xff] %vm2743_vm1, %v11740_v61  ;;  %3752 = vst.msk [vmem:[#allocation2 + $0x140] sm:$0xff] %vm2743_vm1, %v11740_v61  ;;  %v10143_v47 = vpop.permute.xlu1 %10142 }
 0x245   :  { %3754 = vst.msk [vmem:[#allocation2 + $0x150] sm:$0xff] %vm2743_vm1, %v11740_v61  ;;  %3755 = vst.msk [vmem:[#allocation2 + $0x158] sm:$0xff] %vm2743_vm1, %v11740_v61  ;;  %v10144_v27 = vunpack.i.l.bf16 %v10143_v47  ;;  %v10145_v51 = vunpack.i.h.bf16 %v10143_v47  ;;  %v3105_v52 = vsel %vm3068_vm7, %v3040_v32, %v10139_v58  ;;  %v3106_v56 = vsel %vm3068_vm7, %v3041_v2, %v10140_v23 }
 0x246   :  { %3757 = vst.msk [vmem:[#allocation2 + $0x168] sm:$0xff] %vm2743_vm1, %v11740_v61  ;;  %3758 = vst.msk [vmem:[#allocation2 + $0x170] sm:$0xff] %vm2743_vm1, %v11740_v61  ;;  %v10148_v9 = vpop.permute.xlu0 %10147 }
 0x247   :  { %3760 = vst.msk [vmem:[#allocation2 + $0x180] sm:$0xff] %vm2743_vm1, %v11740_v61  ;;  %3761 = vst.msk [vmem:[#allocation2 + $0x188] sm:$0xff] %vm2743_vm1, %v11740_v61  ;;  %v3107_v44 = vsel %vm3068_vm7, %v3042_v1, %v10144_v27  ;;  %v3108_v63 = vsel %vm3068_vm7, %v3043_v54, %v10145_v51  ;;  %v10150_v0 = vunpack.i.h.bf16 %v10148_v9  ;;  %v10149_v40 = vunpack.i.l.bf16 %v10148_v9 }
 0x248   :  { %3763 = vst.msk [vmem:[#allocation2 + $0x198] sm:$0xff] %vm2743_vm1, %v11740_v61  ;;  %3764 = vst.msk [vmem:[#allocation2 + $0x1a0] sm:$0xff] %vm2743_vm1, %v11740_v61  ;;  %v10153_v26 = vpop.permute.xlu1 %10152 }
 0x249   :  { %3766 = vst.msk [vmem:[#allocation2 + $0x1b0] sm:$0xff] %vm2743_vm1, %v11740_v61  ;;  %3767 = vst.msk [vmem:[#allocation2 + $0x1b8] sm:$0xff] %vm2743_vm1, %v11740_v61  ;;  %v10155_v36 = vunpack.i.h.bf16 %v10153_v26  ;;  %v10154_v20 = vunpack.i.l.bf16 %v10153_v26  ;;  %v3170_v18 = vsel %vm3133_vm8, %v3105_v52, %v10149_v40  ;;  %v3171_v7 = vsel %vm3133_vm8, %v3106_v56, %v10150_v0  ;;  %v18870_v52 = vld [vmem:[#allocation26_spill] sm:$0xff]  ;;  %v18871_v40 = vld [vmem:[#allocation27_spill] sm:$0xff] }
 0x24a   :  { %3769 = vst.msk [vmem:[#allocation2 + $0x1c8] sm:$0xff] %vm2743_vm1, %v11740_v61  ;;  %3770 = vst.msk [vmem:[#allocation2 + $0x1d0] sm:$0xff] %vm2743_vm1, %v11740_v61  ;;  %v10158_v35 = vpop.permute.xlu0 %10157  ;;  %v3216_v39 = vpack.c.bf16 %v3171_v7, %v3170_v18 }
 0x24b   :  { %3772 = vst.msk [vmem:[#allocation2 + $0x1e0] sm:$0xff] %vm2743_vm1, %v11740_v61  ;;  %3773 = vst.msk [vmem:[#allocation2 + $0x1e8] sm:$0xff] %vm2743_vm1, %v11740_v61  ;;  %v3172_v49 = vsel %vm3133_vm8, %v3107_v44, %v10154_v20  ;;  %v3173_v55 = vsel %vm3133_vm8, %v3108_v63, %v10155_v36  ;;  %v10160_v42 = vunpack.i.h.bf16 %v10158_v35  ;;  %v10159_v28 = vunpack.i.l.bf16 %v10158_v35 }
 0x24c   :  { %3775 = vst.msk [vmem:[#allocation2 + $0x1f8] sm:$0xff] %vm2743_vm1, %v11740_v61  ;;  %3776 = vst.msk [vmem:[#allocation2 + $0x200] sm:$0xff] %vm2743_vm1, %v11740_v61  ;;  %v10163_v31 = vpop.permute.xlu1 %10162  ;;  %v3217_v29 = vpack.c.bf16 %v3173_v55, %v3172_v49  ;;  %8916 = vmatprep.mubr.msk.bf16.mxu0 %vm3257_vm9, %v3216_v39  ;;  %v18872_v49 = vld [vmem:[#allocation37_spill] sm:$0xff] }
 0x24d   :  { %3778 = vst.msk [vmem:[#allocation2 + $0x210] sm:$0xff] %vm2743_vm1, %v11740_v61  ;;  %3779 = vst.msk [vmem:[#allocation2 + $0x218] sm:$0xff] %vm2743_vm1, %v11740_v61  ;;  %v10165_v6 = vunpack.i.h.bf16 %v10163_v31  ;;  %v10164_v3 = vunpack.i.l.bf16 %v10163_v31  ;;  %v3044_v24 = vsel %vm3003_vm6, %v18868_v15, %v10159_v28  ;;  %v3045_v46 = vsel %vm3003_vm6, %v18869_v19, %v10160_v42 }
 0x24e   :  { %3781 = vst.msk [vmem:[#allocation2 + $0x228] sm:$0xff] %vm2743_vm1, %v11740_v61  ;;  %3782 = vst.msk [vmem:[#allocation2 + $0x230] sm:$0xff] %vm2743_vm1, %v11740_v61  ;;  %8917 = vmatmul.mubr.msk.bf16.gmra.mxu0 %vm3257_vm9, %v3217_v29  ;;  %v10168_v45 = vpop.permute.xlu0 %10167 }
 0x24f   :  { %3784 = vst.msk [vmem:[#allocation2 + $0x240] sm:$0xff] %vm2743_vm1, %v11740_v61  ;;  %3785 = vst.msk [vmem:[#allocation2 + $0x248] sm:$0xff] %vm2743_vm1, %v11740_v61  ;;  %v10170_v33 = vunpack.i.h.bf16 %v10168_v45  ;;  %v10169_v30 = vunpack.i.l.bf16 %v10168_v45  ;;  %v3046_v37 = vsel %vm3003_vm6, %v18866_v41, %v10164_v3  ;;  %v3047_v11 = vsel %vm3003_vm6, %v18867_v25, %v10165_v6 }
 0x250   :  { %3787 = vst.msk [vmem:[#allocation2 + $0x258] sm:$0xff] %vm2743_vm1, %v11740_v61  ;;  %3788 = vst.msk [vmem:[#allocation2 + $0x260] sm:$0xff] %vm2743_vm1, %v11740_v61  ;;  %v10173_v10 = vpop.permute.xlu1 %10172 }
 0x251   :  { %3790 = vst.msk [vmem:[#allocation2 + $0x270] sm:$0xff] %vm2743_vm1, %v11740_v61  ;;  %3791 = vst.msk [vmem:[#allocation2 + $0x278] sm:$0xff] %vm2743_vm1, %v11740_v61  ;;  %v10175_v17 = vunpack.i.h.bf16 %v10173_v10  ;;  %v10174_v22 = vunpack.i.l.bf16 %v10173_v10  ;;  %v3109_v27 = vsel %vm3068_vm7, %v3044_v24, %v10169_v30  ;;  %v3110_v5 = vsel %vm3068_vm7, %v3045_v46, %v10170_v33 }
 0x252   :  { %3793 = vst.msk [vmem:[#allocation2 + $0x288] sm:$0xff] %vm2743_vm1, %v11740_v61  ;;  %3794 = vst.msk [vmem:[#allocation2 + $0x290] sm:$0xff] %vm2743_vm1, %v11740_v61  ;;  %v10178_v43 = vpop.permute.xlu0 %10177 }
 0x253   :  { %3796 = vst.msk [vmem:[#allocation2 + $0x2a0] sm:$0xff] %vm2743_vm1, %v11740_v61  ;;  %3797 = vst.msk [vmem:[#allocation2 + $0x2a8] sm:$0xff] %vm2743_vm1, %v11740_v61  ;;  %v3111_v14 = vsel %vm3068_vm7, %v3046_v37, %v10174_v22  ;;  %v3112_v59 = vsel %vm3068_vm7, %v3047_v11, %v10175_v17  ;;  %v10180_v47 = vunpack.i.h.bf16 %v10178_v43  ;;  %v10179_v21 = vunpack.i.l.bf16 %v10178_v43  ;;  %v18875_v43 = vld [vmem:[#allocation54_spill] sm:$0xff] }
 0x254   :  { %3799 = vst.msk [vmem:[#allocation2 + $0x2b8] sm:$0xff] %vm2743_vm1, %v11740_v61  ;;  %3800 = vst.msk [vmem:[#allocation2 + $0x2c0] sm:$0xff] %vm2743_vm1, %v11740_v61  ;;  %v10183_v4 = vpop.permute.xlu1 %10182 }
 0x255   :  { %3802 = vst.msk [vmem:[#allocation2 + $0x2d0] sm:$0xff] %vm2743_vm1, %v11740_v61  ;;  %3803 = vst.msk [vmem:[#allocation2 + $0x2d8] sm:$0xff] %vm2743_vm1, %v11740_v61  ;;  %v10185_v38 = vunpack.i.h.bf16 %v10183_v4  ;;  %v10184_v50 = vunpack.i.l.bf16 %v10183_v4  ;;  %v3174_v23 = vsel %vm3133_vm8, %v3109_v27, %v10179_v21  ;;  %v3175_v12 = vsel %vm3133_vm8, %v3110_v5, %v10180_v47  ;;  %v18876_v47 = vld [vmem:[#allocation6_spill] sm:$0xff]  ;;  %v18877_v27 = vld [vmem:[#allocation7_spill] sm:$0xff] }
 0x256   :  { %3805 = vst.msk [vmem:[#allocation2 + $0x2e8] sm:$0xff] %vm2743_vm1, %v11740_v61  ;;  %3806 = vst.msk [vmem:[#allocation2 + $0x2f0] sm:$0xff] %vm2743_vm1, %v11740_v61  ;;  %v10188_v54 = vpop.permute.xlu0 %10187  ;;  %v3218_v16 = vpack.c.bf16 %v3175_v12, %v3174_v23 }
 0x257   :  { %3808 = vst.msk [vmem:[#allocation2 + $0x300] sm:$0xff] %vm2743_vm1, %v11740_v61  ;;  %3809 = vst.msk [vmem:[#allocation2 + $0x308] sm:$0xff] %vm2743_vm1, %v11740_v61  ;;  %v3176_v51 = vsel %vm3133_vm8, %v3111_v14, %v10184_v50  ;;  %v3177_v58 = vsel %vm3133_vm8, %v3112_v59, %v10185_v38  ;;  %v10190_v2 = vunpack.i.h.bf16 %v10188_v54  ;;  %v10189_v44 = vunpack.i.l.bf16 %v10188_v54  ;;  %v18874_v38 = vld [vmem:[#allocation53_spill] sm:$0xff] }
 0x258   :  { %3811 = vst.msk [vmem:[#allocation2 + $0x318] sm:$0xff] %vm2743_vm1, %v11740_v61  ;;  %3812 = vst.msk [vmem:[#allocation2 + $0x320] sm:$0xff] %vm2743_vm1, %v11740_v61  ;;  %v10193_v1 = vpop.permute.xlu1 %10192  ;;  %v3219_v60 = vpack.c.bf16 %v3177_v58, %v3176_v51  ;;  %8920 = vmatprep.mubr.msk.bf16.mxu0 %vm3257_vm9, %v3218_v16 }
 0x259   :  { %3814 = vst.msk [vmem:[#allocation2 + $0x330] sm:$0xff] %vm2743_vm1, %v11740_v61  ;;  %3815 = vst.msk [vmem:[#allocation2 + $0x338] sm:$0xff] %vm2743_vm1, %v11740_v61  ;;  %v10195_v32 = vunpack.i.h.bf16 %v10193_v1  ;;  %v10194_v26 = vunpack.i.l.bf16 %v10193_v1  ;;  %v3048_v55 = vsel %vm3003_vm6, %v18872_v49, %v10189_v44 }
 0x25a   :  { %3817 = vst.msk [vmem:[#allocation2 + $0x348] sm:$0xff] %vm2743_vm1, %v11740_v61  ;;  %3818 = vst.msk [vmem:[#allocation2 + $0x350] sm:$0xff] %vm2743_vm1, %v11740_v61  ;;  %8921 = vmatmul.mubr.msk.bf16.gmra.mxu0 %vm3257_vm9, %v3219_v60  ;;  %v10198_v36 = vpop.permute.xlu0 %10197 }
 0x25b   :  { %3720 = vst.msk [vmem:[#allocation2 + $0x40] sm:$0x3] %vm3713_vm10, %v11740_v61  ;;  %3714 = vst.msk [vmem:[#allocation2 + $0x10] sm:$0x3] %vm3713_vm10, %v11740_v61  ;;  %v10199_v63 = vunpack.i.l.bf16 %v10198_v36  ;;  %v3050_v0 = vsel %vm3003_vm6, %v18870_v52, %v10194_v26 }
 0x25c   :  { %3717 = vst.msk [vmem:[#allocation2 + $0x28] sm:$0x3] %vm3713_vm10, %v11740_v61  ;;  %3723 = vst.msk [vmem:[#allocation2 + $0x58] sm:$0x3] %vm3713_vm10, %v11740_v61  ;;  %v10203_v53 = vpop.permute.xlu1 %10202 }
 0x25d   :  { %3726 = vst.msk [vmem:[#allocation2 + $0x70] sm:$0x3] %vm3713_vm10, %v11740_v61  ;;  %3729 = vst.msk [vmem:[#allocation2 + $0x88] sm:$0x3] %vm3713_vm10, %v11740_v61  ;;  %v10205_v20 = vunpack.i.h.bf16 %v10203_v53  ;;  %v10204_v9 = vunpack.i.l.bf16 %v10203_v53 }
 0x25e   :  { %3732 = vst.msk [vmem:[#allocation2 + $0xa0] sm:$0x3] %vm3713_vm10, %v11740_v61  ;;  %3735 = vst.msk [vmem:[#allocation2 + $0xb8] sm:$0x3] %vm3713_vm10, %v11740_v61  ;;  %v10208_v29 = vpop.permute.xlu0 %10207 }
 0x25f   :  { %3738 = vst.msk [vmem:[#allocation2 + $0xd0] sm:$0x3] %vm3713_vm10, %v11740_v61  ;;  %3741 = vst.msk [vmem:[#allocation2 + $0xe8] sm:$0x3] %vm3713_vm10, %v11740_v61  ;;  %v3115_v35 = vsel %vm3068_vm7, %v3050_v0, %v10204_v9 }
 0x260   :  { %3744 = vst.msk [vmem:[#allocation2 + $0x100] sm:$0x3] %vm3713_vm10, %v11740_v61  ;;  %3747 = vst.msk [vmem:[#allocation2 + $0x118] sm:$0x3] %vm3713_vm10, %v11740_v61  ;;  %v10213_v56 = vpop.permute.xlu1 %10212 }
 0x261   :  { %3750 = vst.msk [vmem:[#allocation2 + $0x130] sm:$0x3] %vm3713_vm10, %v11740_v61  ;;  %3753 = vst.msk [vmem:[#allocation2 + $0x148] sm:$0x3] %vm3713_vm10, %v11740_v61  ;;  %v10215_v7 = vunpack.i.h.bf16 %v10213_v56  ;;  %v10214_v31 = vunpack.i.l.bf16 %v10213_v56 }
 0x262   :  { %3756 = vst.msk [vmem:[#allocation2 + $0x160] sm:$0x3] %vm3713_vm10, %v11740_v61  ;;  %3759 = vst.msk [vmem:[#allocation2 + $0x178] sm:$0x3] %vm3713_vm10, %v11740_v61  ;;  %v3950_v48 = vld [vmem:[#allocation2 + $0x9] sm:$0xff]  ;;  %v10218_v22 = vpop.permute.xlu0 %10217 }
 0x263   :  { %3762 = vst.msk [vmem:[#allocation2 + $0x190] sm:$0x3] %vm3713_vm10, %v11740_v61  ;;  %3765 = vst.msk [vmem:[#allocation2 + $0x1a8] sm:$0x3] %vm3713_vm10, %v11740_v61  ;;  %v10336_v34 = vpack.i.bf16 %v3950_v48, %v3949_v62  ;;  %v4014_v13 = vld [vmem:[#allocation2 + $0xa] sm:$0xff]  ;;  %v10200_v62 = vunpack.i.h.bf16 %v10198_v36  ;;  %v3051_v48 = vsel %vm3003_vm6, %v18871_v40, %v10195_v32  ;;  %v3180_v3 = vsel %vm3133_vm8, %v3115_v35, %v10214_v31 }
 0x264   :  { %3768 = vst.msk [vmem:[#allocation2 + $0x1c0] sm:$0x3] %vm3713_vm10, %v11740_v61  ;;  %3771 = vst.msk [vmem:[#allocation2 + $0x1d8] sm:$0x3] %vm3713_vm10, %v11740_v61  ;;  %v10346_v57 = vpack.i.bf16 %v4014_v13, %v4013_v8  ;;  %v3116_v39 = vsel %vm3068_vm7, %v3051_v48, %v10205_v20  ;;  %v10210_v8 = vunpack.i.h.bf16 %v10208_v29  ;;  %v10209_v13 = vunpack.i.l.bf16 %v10208_v29  ;;  %v10223_v45 = vpop.permute.xlu1 %10222  ;;  %v18879_v29 = vld [vmem:[#allocation9_spill] sm:$0xff] }
 0x265   :  { %3774 = vst.msk [vmem:[#allocation2 + $0x1f0] sm:$0x3] %vm3713_vm10, %v11740_v61  ;;  %3777 = vst.msk [vmem:[#allocation2 + $0x208] sm:$0x3] %vm3713_vm10, %v11740_v61  ;;  %10337 = vrot.lane.b32.xlu0 %v10336_v34, %s11733_s25  ;;  %v18873_v34 = vld [vmem:[#allocation38_spill] sm:$0xff]  ;;  %v3181_v10 = vsel %vm3133_vm8, %v3116_v39, %v10215_v7  ;;  %v10225_v30 = vunpack.i.h.bf16 %v10223_v45  ;;  %v10224_v41 = vunpack.i.l.bf16 %v10223_v45  ;;  %v10220_v25 = vunpack.i.h.bf16 %v10218_v22  ;;  %v18878_v7 = vld [vmem:[#allocation8_spill] sm:$0xff] }
 0x266   :  { %3780 = vst.msk [vmem:[#allocation2 + $0x220] sm:$0x3] %vm3713_vm10, %v11740_v61  ;;  %3783 = vst.msk [vmem:[#allocation2 + $0x238] sm:$0x3] %vm3713_vm10, %v11740_v61  ;;  %v3049_v18 = vsel %vm3003_vm6, %v18873_v34, %v10190_v2  ;;  %v3221_v17 = vpack.c.bf16 %v3181_v10, %v3180_v3  ;;  %v10219_v11 = vunpack.i.l.bf16 %v10218_v22  ;;  %v10228_v4 = vpop.permute.xlu0 %10227 }
 0x267   :  { %3786 = vst.msk [vmem:[#allocation2 + $0x250] sm:$0x3] %vm3713_vm10, %v11740_v61  ;;  %3789 = vst.msk [vmem:[#allocation2 + $0x268] sm:$0x3] %vm3713_vm10, %v11740_v61  ;;  %v3114_v6 = vsel %vm3068_vm7, %v3049_v18, %v10200_v62  ;;  %v10230_v19 = vunpack.i.h.bf16 %v10228_v4  ;;  %v10229_v46 = vunpack.i.l.bf16 %v10228_v4  ;;  %v3054_v50 = vsel %vm3003_vm6, %v18874_v38, %v10224_v41 }
 0x268   :  { %3792 = vst.msk [vmem:[#allocation2 + $0x280] sm:$0x3] %vm3713_vm10, %v11740_v61  ;;  %3795 = vst.msk [vmem:[#allocation2 + $0x298] sm:$0x3] %vm3713_vm10, %v11740_v61  ;;  %v3179_v28 = vsel %vm3133_vm8, %v3114_v6, %v10210_v8  ;;  %v10233_v37 = vpop.permute.xlu1 %10232  ;;  %v3055_v14 = vsel %vm3003_vm6, %v18875_v43, %v10225_v30  ;;  %v3052_v21 = vsel %vm3003_vm6, %v18876_v47, %v10219_v11  ;;  %v18880_v8 = vld [vmem:[#allocation55_spill] sm:$0xff] }
 0x269   :  { %3798 = vst.msk [vmem:[#allocation2 + $0x2b0] sm:$0x3] %vm3713_vm10, %v11740_v61  ;;  %3801 = vst.msk [vmem:[#allocation2 + $0x2c8] sm:$0x3] %vm3713_vm10, %v11740_v61  ;;  %10347 = vrot.lane.b32.xlu0 %v10346_v57, %s11735_s19  ;;  %v3113_v57 = vsel %vm3068_vm7, %v3048_v55, %v10199_v63  ;;  %v10235_v15 = vunpack.i.h.bf16 %v10233_v37  ;;  %v10234_v24 = vunpack.i.l.bf16 %v10233_v37  ;;  %v3053_v5 = vsel %vm3003_vm6, %v18877_v27, %v10220_v25 }
 0x26a   :  { %3804 = vst.msk [vmem:[#allocation2 + $0x2e0] sm:$0x3] %vm3713_vm10, %v11740_v61  ;;  %3807 = vst.msk [vmem:[#allocation2 + $0x2f8] sm:$0x3] %vm3713_vm10, %v11740_v61  ;;  %v3178_v42 = vsel %vm3133_vm8, %v3113_v57, %v10209_v13  ;;  %v3117_v16 = vsel %vm3068_vm7, %v3052_v21, %v10229_v46  ;;  %v3118_v32 = vsel %vm3068_vm7, %v3053_v5, %v10230_v19  ;;  %v18881_v57 = vld [vmem:[#allocation56_spill] sm:$0xff] }
 0x26b   :  { %3810 = vst.msk [vmem:[#allocation2 + $0x310] sm:$0x3] %vm3713_vm10, %v11740_v61  ;;  %3813 = vst.msk [vmem:[#allocation2 + $0x328] sm:$0x3] %vm3713_vm10, %v11740_v61  ;;  %v3220_v33 = vpack.c.bf16 %v3179_v28, %v3178_v42  ;;  %v10238_v23 = vpop.permute.xlu0 %10237  ;;  %v3119_v12 = vsel %vm3068_vm7, %v3054_v50, %v10234_v24  ;;  %v3120_v1 = vsel %vm3068_vm7, %v3055_v14, %v10235_v15 }
 0x26c   :  { %3816 = vst.msk [vmem:[#allocation2 + $0x340] sm:$0x3] %vm3713_vm10, %v11740_v61  ;;  %3819 = vst.msk [vmem:[#allocation2 + $0x358] sm:$0x3] %vm3713_vm10, %v11740_v61  ;;  %v10243_v59 = vpop.permute.xlu1 %10242  ;;  %v10240_v60 = vunpack.i.h.bf16 %v10238_v23  ;;  %v10239_v54 = vunpack.i.l.bf16 %v10238_v23  ;;  %v18883_v23 = vld [vmem:[#allocation58_spill] sm:$0xff] }
 0x26d   :  { %8924 = vmatprep.mubr.msk.bf16.mxu0 %vm3257_vm9, %v3220_v33  ;;  %v10245_v51 = vunpack.i.h.bf16 %v10243_v59  ;;  %v10244_v58 = vunpack.i.l.bf16 %v10243_v59 }
 0x26e   :  { %8925 = vmatmul.mubr.msk.bf16.gmra.mxu0 %vm3257_vm9, %v3221_v17  ;;  %v3182_v2 = vsel %vm3133_vm8, %v3117_v16, %v10239_v54  ;;  %v3183_v44 = vsel %vm3133_vm8, %v3118_v32, %v10240_v60  ;;  %v18884_v60 = vld [vmem:[#allocation59_spill] sm:$0xff]  ;;  %v18885_v16 = vld [vmem:[#allocation60_spill] sm:$0xff] }
 0x26f   :  { %v3184_v26 = vsel %vm3133_vm8, %v3119_v12, %v10244_v58  ;;  %v3185_v53 = vsel %vm3133_vm8, %v3120_v1, %v10245_v51  ;;  %v10248_v9 = vpop.permute.xlu0 %10247  ;;  %v3222_v62 = vpack.c.bf16 %v3183_v44, %v3182_v2  ;;  %v18882_v51 = vld [vmem:[#allocation57_spill] sm:$0xff] }
 0x270   :  { %v10253_v36 = vpop.permute.xlu1 %10252  ;;  %v3223_v20 = vpack.c.bf16 %v3185_v53, %v3184_v26  ;;  %v10250_v40 = vunpack.i.h.bf16 %v10248_v9  ;;  %v10249_v48 = vunpack.i.l.bf16 %v10248_v9 }
 0x271   :  { %8928 = vmatprep.mubr.msk.bf16.mxu0 %vm3257_vm9, %v3222_v62  ;;  %v10255_v63 = vunpack.i.h.bf16 %v10253_v36  ;;  %v10254_v52 = vunpack.i.l.bf16 %v10253_v36 }
 0x272   :  { %v3056_v13 = vsel %vm3003_vm6, %v18880_v8, %v10249_v48  ;;  %v3057_v6 = vsel %vm3003_vm6, %v18881_v57, %v10250_v40 }
 0x273   :  { %v3058_v31 = vsel %vm3003_vm6, %v18878_v7, %v10254_v52  ;;  %v3059_v35 = vsel %vm3003_vm6, %v18879_v29, %v10255_v63 }
 0x274   :  { %v10263_v0 = vpop.permute.xlu1 %10262  ;;  %v10258_v56 = vpop.permute.xlu0 %10257 }
 0x275   :  { %v10265_v49 = vunpack.i.h.bf16 %v10263_v0  ;;  %v10264_v55 = vunpack.i.l.bf16 %v10263_v0  ;;  %v10260_v34 = vunpack.i.h.bf16 %v10258_v56  ;;  %v10259_v18 = vunpack.i.l.bf16 %v10258_v56 }
 0x276   :  { %8929 = vmatmul.mubr.msk.bf16.gmra.mxu0 %vm3257_vm9, %v3223_v20 }
 0x277   :  { %v3123_v28 = vsel %vm3068_vm7, %v3058_v31, %v10264_v55  ;;  %v3124_v45 = vsel %vm3068_vm7, %v3059_v35, %v10265_v49  ;;  %v3121_v33 = vsel %vm3068_vm7, %v3056_v13, %v10259_v18  ;;  %v3122_v30 = vsel %vm3068_vm7, %v3057_v6, %v10260_v34 }
 0x278   :  { %v10273_v39 = vpop.permute.xlu1 %10272  ;;  %v10268_v42 = vpop.permute.xlu0 %10267 }
 0x279   :  { %v10275_v3 = vunpack.i.h.bf16 %v10273_v39  ;;  %v10274_v10 = vunpack.i.l.bf16 %v10273_v39  ;;  %v10270_v17 = vunpack.i.h.bf16 %v10268_v42  ;;  %v10269_v22 = vunpack.i.l.bf16 %v10268_v42  ;;  %v18887_v42 = vld [vmem:[#allocation61_spill] sm:$0xff] }
 0x27b   :  { %v3188_v41 = vsel %vm3133_vm8, %v3123_v28, %v10274_v10  ;;  %v3189_v37 = vsel %vm3133_vm8, %v3124_v45, %v10275_v3  ;;  %v3186_v25 = vsel %vm3133_vm8, %v3121_v33, %v10269_v22  ;;  %v3187_v11 = vsel %vm3133_vm8, %v3122_v30, %v10270_v17  ;;  %v18886_v3 = vld [vmem:[#allocation86_spill] sm:$0xff]  ;;  %v18889_v33 = vld [vmem:[#allocation73_spill] sm:$0xff] }
 0x27c   :  { %v10283_v4 = vpop.permute.xlu1 %10282  ;;  %v3225_v15 = vpack.c.bf16 %v3189_v37, %v3188_v41  ;;  %v3224_v19 = vpack.c.bf16 %v3187_v11, %v3186_v25  ;;  %v18888_v17 = vld [vmem:[#allocation10_spill] sm:$0xff] }
 0x27d   :  { %v10278_v24 = vpop.permute.xlu0 %10277  ;;  %v10285_v46 = vunpack.i.h.bf16 %v10283_v4  ;;  %v10284_v38 = vunpack.i.l.bf16 %v10283_v4 }
 0x27e   :  { %8932 = vmatprep.mubr.msk.bf16.mxu0 %vm3257_vm9, %v3224_v19  ;;  %v10280_v43 = vunpack.i.h.bf16 %v10278_v24  ;;  %v10279_v14 = vunpack.i.l.bf16 %v10278_v24 }
 0x27f   :  { %8933 = vmatmul.mubr.msk.bf16.gmra.mxu0 %vm3257_vm9, %v3225_v15  ;;  %v3062_v58 = vsel %vm3003_vm6, %v18882_v51, %v10284_v38  ;;  %v3063_v12 = vsel %vm3003_vm6, %v18883_v23, %v10285_v46 }
 0x280   :  { %v10293_v50 = vpop.permute.xlu1 %10292  ;;  %v3060_v54 = vsel %vm3003_vm6, %v18884_v60, %v10279_v14  ;;  %v3061_v32 = vsel %vm3003_vm6, %v18885_v16, %v10280_v43 }
 0x281   :  { %v10288_v59 = vpop.permute.xlu0 %10287  ;;  %v10295_v47 = vunpack.i.h.bf16 %v10293_v50  ;;  %v10294_v21 = vunpack.i.l.bf16 %v10293_v50 }
 0x282   :  { %v10290_v27 = vunpack.i.h.bf16 %v10288_v59  ;;  %v10289_v5 = vunpack.i.l.bf16 %v10288_v59 }
 0x283   :  { %v3127_v44 = vsel %vm3068_vm7, %v3062_v58, %v10294_v21  ;;  %v3128_v36 = vsel %vm3068_vm7, %v3063_v12, %v10295_v47  ;;  %v16422_v21 = vld [vmem:[%s18101_s3] ss:$0 sm:$0xff] }
 0x284   :  { %v3125_v62 = vsel %vm3068_vm7, %v3060_v54, %v10289_v5  ;;  %v3126_v63 = vsel %vm3068_vm7, %v3061_v32, %v10290_v27 }
 0x285   :  { %v10303_v1 = vpop.permute.xlu1 %10302 }
 0x286   :  { %v10305_v26 = vunpack.i.h.bf16 %v10303_v1  ;;  %v10304_v53 = vunpack.i.l.bf16 %v10303_v1  ;;  %v10298_v2 = vpop.permute.xlu0 %10297 }
 0x287   :  { %v10300_v20 = vunpack.i.h.bf16 %v10298_v2  ;;  %v10299_v9 = vunpack.i.l.bf16 %v10298_v2 }
 0x288   :  { %v3192_v52 = vsel %vm3133_vm8, %v3127_v44, %v10304_v53  ;;  %v3193_v0 = vsel %vm3133_vm8, %v3128_v36, %v10305_v26 }
 0x289   :  { %v3190_v40 = vsel %vm3133_vm8, %v3125_v62, %v10299_v9  ;;  %v3191_v48 = vsel %vm3133_vm8, %v3126_v63, %v10300_v20  ;;  %v10313_v56 = vpop.permute.xlu1 %10312  ;;  %v3227_v49 = vpack.c.bf16 %v3193_v0, %v3192_v52 }
 0x28a   :  { %v10308_v55 = vpop.permute.xlu0 %10307  ;;  %v3226_v34 = vpack.c.bf16 %v3191_v48, %v3190_v40  ;;  %v10315_v18 = vunpack.i.h.bf16 %v10313_v56  ;;  %v10314_v7 = vunpack.i.l.bf16 %v10313_v56 }
 0x28b   :  { %v10310_v29 = vunpack.i.h.bf16 %v10308_v55  ;;  %v10309_v35 = vunpack.i.l.bf16 %v10308_v55 }
 0x28c   :  { %8936 = vmatprep.mubr.msk.bf16.mxu0 %vm3257_vm9, %v3226_v34  ;;  %v3066_v10 = vsel %vm3003_vm6, %v18886_v3, %v10314_v7  ;;  %v3067_v28 = vsel %vm3003_vm6, %v18887_v42, %v10315_v18  ;;  %v11619_v34 = vld [vmem:[%s18102_s4 + $0x20] ss:$0 sps:$4 sm:$0xff]  }
 0x28d   :  { %8937 = vmatmul.mubr.msk.bf16.gmra.mxu0 %vm3257_vm9, %v3227_v49  ;;  %v3064_v22 = vsel %vm3003_vm6, %v18888_v17, %v10309_v35  ;;  %v3065_v30 = vsel %vm3003_vm6, %v18889_v33, %v10310_v29  ;;  %9039 = vmatprep.subr.msk.bf16.mxu1 %vm7198_vm11, %v11619_v34 }
 0x28e   :  { %v10323_v31 = vpop.permute.xlu1 %10322 }
 0x28f   :  { %v10318_v39 = vpop.permute.xlu0 %10317  ;;  %v10325_v8 = vunpack.i.h.bf16 %v10323_v31  ;;  %v10324_v13 = vunpack.i.l.bf16 %v10323_v31 }
 0x290   :  { %v10320_v57 = vunpack.i.h.bf16 %v10318_v39  ;;  %v10319_v6 = vunpack.i.l.bf16 %v10318_v39 }
 0x291   :  { %v3131_v11 = vsel %vm3068_vm7, %v3066_v10, %v10324_v13  ;;  %v3132_v4 = vsel %vm3068_vm7, %v3067_v28, %v10325_v8  ;;  %v7200_v10 = vsel %vm7198_vm11, %v11619_v34, 0 }
 0x292   :  { %v10333_v45 = vpop.permute.xlu1 %10332  ;;  %v3129_v19 = vsel %vm3068_vm7, %v3064_v22, %v10319_v6  ;;  %v3130_v46 = vsel %vm3068_vm7, %v3065_v30, %v10320_v57  ;;  %8945 = vmatpush3.bf16.msra.mxu1 %v7200_v10 }
 0x293   :  { %v10335_v41 = vunpack.i.h.bf16 %v10333_v45  ;;  %v10334_v37 = vunpack.i.l.bf16 %v10333_v45  ;;  %v10328_v25 = vpop.permute.xlu0 %10327  ;;  %v11620_v45 = vld [vmem:[%s18102_s4 + $0x18] sm:$0xff]  }
 0x294   :  { %v10330_v15 = vunpack.i.h.bf16 %v10328_v25  ;;  %v10329_v24 = vunpack.i.l.bf16 %v10328_v25  ;;  %8946 = vmatprep.subr.bf16.mxu1 %v11620_v45 }
 0x295   :  { %v3196_v38 = vsel %vm3133_vm8, %v3131_v11, %v10334_v37  ;;  %v3197_v50 = vsel %vm3133_vm8, %v3132_v4, %v10335_v41  ;;  %v11621_v4 = vld [vmem:[%s18102_s4 + $0x10] sm:$0xff]  }
 0x296   :  { %v3194_v43 = vsel %vm3133_vm8, %v3129_v19, %v10329_v24  ;;  %v3195_v14 = vsel %vm3133_vm8, %v3130_v46, %v10330_v15  ;;  %v3229_v59 = vpack.c.bf16 %v3197_v50, %v3196_v38  ;;  %8947 = vmatpush3.bf16.msra.mxu1 %v11620_v45 }
 0x297   :  { %v3228_v47 = vpack.c.bf16 %v3195_v14, %v3194_v43  ;;  %8948 = vmatprep.subr.bf16.mxu1 %v11621_v4 }
 0x299   :  { %8940 = vmatprep.mubr.msk.bf16.mxu0 %vm3257_vm9, %v3228_v47  ;;  %v11622_v47 = vld [vmem:[%s18102_s4 + $0x8] sm:$0xff]  }
 0x29a   :  { %8941 = vmatmul.mubr.msk.bf16.gmra.mxu0 %vm3257_vm9, %v3229_v59  ;;  %8949 = vmatpush3.bf16.msra.mxu1 %v11621_v4 }
 0x29b   :  { %8950 = vmatprep.subr.bf16.mxu1 %v11622_v47 }
 0x29e   :  { %8951 = vmatpush3.bf16.msra.mxu1 %v11622_v47 }
 0x2bb   :  { %v8882_v27 = vpop.f32.mrf.mxu0 }
 0x2bc   :  { %v3401_v5 = vadd.f32 %v8882_v27, %v16422_v21 }
 0x2bd   :  { %v3392_v51 = vpop.f32.mrf.mxu0 }
 0x2be   :  { %v3649_v58 = vmax.f32 %v3401_v5, 0.0  ;;  %v3393_v23 = vadd.f32 %v16422_v21, %v3392_v51 }
 0x2bf   :  { %v8883_v12 = vpop.f32.mrf.mxu0 }
 0x2c0   :  { %3823 = vst.msk [vmem:[#allocation2 + $0x31] sm:$0xff] %vm2743_vm1, %v3649_v58  ;;  %v3647_v1 = vmax.f32 %v3393_v23, 0.0  ;;  %v3404_v60 = vadd.f32 %v8883_v12, %v16422_v21 }
 0x2c1   :  { %v3395_v54 = vpop.f32.mrf.mxu0 }
 0x2c2   :  { %3821 = vst.msk [vmem:[#allocation2 + $0x19] sm:$0xff] %vm2743_vm1, %v3647_v1  ;;  %v3650_v16 = vmax.f32 %v3404_v60, 0.0  ;;  %v3396_v32 = vadd.f32 %v16422_v21, %v3395_v54 }
 0x2c4   :  { %v8886_v26 = vpop.f32.mrf.mxu0  ;;  %3824 = vst.msk [vmem:[#allocation2 + $0x39] sm:$0xff] %vm2743_vm1, %v3650_v16  ;;  %v3648_v53 = vmax.f32 %v3396_v32, 0.0  ;;  %v11623_v32 = vld [vmem:[%s18102_s4] sm:$0xff]   ;;  %s11744_s4 = smov 64  }
 0x2c5   :  { %v3417_v2 = vadd.f32 %v8886_v26, %v16422_v21  ;;  %8952 = vmatprep.subr.bf16.mxu1 %v11623_v32 }
 0x2c6   :  { %v3408_v44 = vpop.f32.mrf.mxu0  ;;  %3822 = vst.msk [vmem:[#allocation2 + $0x21] sm:$0xff] %vm2743_vm1, %v3648_v53  ;;  %8953 = vmatpush3.bf16.msra.mxu1 %v11623_v32 }
 0x2c7   :  { %v3653_v36 = vmax.f32 %v3417_v2, 0.0  ;;  %v3409_v20 = vadd.f32 %v16422_v21, %v3408_v44  ;;  %v4079_v24 = vld [vmem:[#allocation2 + $0x30] sm:$0xff] }
 0x2c8   :  { %v8887_v9 = vpop.f32.mrf.mxu0  ;;  %v4143_v5 = vld [vmem:[#allocation2 + $0x31] sm:$0xff] }
 0x2c9   :  { %3827 = vst.msk [vmem:[#allocation2 + $0x61] sm:$0xff] %vm2743_vm1, %v3653_v36  ;;  %v3651_v62 = vmax.f32 %v3409_v20, 0.0  ;;  %v3420_v63 = vadd.f32 %v8887_v9, %v16422_v21  ;;  %v16440_v55 = vld [vmem:[#allocation2 + $0x18] sm:$0xff] }
 0x2ca   :  { %v3411_v52 = vpop.f32.mrf.mxu0  ;;  %v3951_v31 = vld [vmem:[#allocation2 + $0x19] sm:$0xff] }
 0x2cb   :  { %3825 = vst.msk [vmem:[#allocation2 + $0x49] sm:$0xff] %vm2743_vm1, %v3651_v62  ;;  %v3654_v0 = vmax.f32 %v3420_v63, 0.0  ;;  %v3412_v40 = vadd.f32 %v16422_v21, %v3411_v52  ;;  %v4080_v37 = vld [vmem:[#allocation2 + $0x38] sm:$0xff] }
 0x2cc   :  { %v10361_v38 = vpack.i.bf16 %v4080_v37, %v4079_v24  ;;  %v4144_v43 = vld [vmem:[#allocation2 + $0x39] sm:$0xff] }
 0x2cd   :  { %v8890_v48 = vpop.f32.mrf.mxu0  ;;  %3828 = vst.msk [vmem:[#allocation2 + $0x69] sm:$0xff] %vm2743_vm1, %v3654_v0  ;;  %v3652_v56 = vmax.f32 %v3412_v40, 0.0  ;;  %v16445_v7 = vld [vmem:[#allocation2 + $0x20] sm:$0xff]  ;;  %v16478_v23 = vpack.i.bf16 %v4144_v43, %v4143_v5  ;;  %v4207_v1 = vld [vmem:[#allocation2 + $0x32] sm:$0xff] }
 0x2ce   :  { %v3433_v49 = vadd.f32 %v8890_v48, %v16422_v21  ;;  %v3952_v29 = vld [vmem:[#allocation2 + $0x21] sm:$0xff]  ;;  %v10356_v8 = vpack.i.bf16 %v16445_v7, %v16440_v55 }
 0x2cf   :  { %v3424_v18 = vpop.f32.mrf.mxu0  ;;  %3826 = vst.msk [vmem:[#allocation2 + $0x51] sm:$0xff] %vm2743_vm1, %v3652_v56  ;;  %v10341_v13 = vpack.i.bf16 %v3952_v29, %v3951_v31  ;;  %v4015_v6 = vld [vmem:[#allocation2 + $0x1a] sm:$0xff]  ;;  %v4016_v3 = vld [vmem:[#allocation2 + $0x22] sm:$0xff] }
 0x2d0   :  { %v3657_v35 = vmax.f32 %v3433_v49, 0.0  ;;  %v3425_v39 = vadd.f32 %v16422_v21, %v3424_v18  ;;  %10357 = vrot.lane.b32.xlu0 %v10356_v8, %s11737_s26  ;;  %v10351_v30 = vpack.i.bf16 %v4016_v3, %v4015_v6  ;;  %v4208_v60 = vld [vmem:[#allocation2 + $0x3a] sm:$0xff] }
 0x2d1   :  { %v8891_v57 = vpop.f32.mrf.mxu0  ;;  %10342 = vrot.lane.b32.xlu1 %v10341_v13, %s11733_s25  ;;  %v10381_v44 = vpack.i.bf16 %v4208_v60, %v4207_v1  ;;  %v4147_v60 = vld [vmem:[#allocation2 + $0x61] sm:$0xff] }
 0x2d2   :  { %3831 = vst.msk [vmem:[#allocation2 + $0x91] sm:$0xff] %vm2743_vm1, %v3657_v35  ;;  %v3655_v42 = vmax.f32 %v3425_v39, 0.0  ;;  %v3436_v28 = vadd.f32 %v8891_v57, %v16422_v21  ;;  %v4272_v52 = vld [vmem:[#allocation2 + $0x48] sm:$0xff] }
 0x2d3   :  { %v3427_v17 = vpop.f32.mrf.mxu0  ;;  %v4336_v39 = vld [vmem:[#allocation2 + $0x49] sm:$0xff] }
 0x2d4   :  { %3829 = vst.msk [vmem:[#allocation2 + $0x79] sm:$0xff] %vm2743_vm1, %v3655_v42  ;;  %v3658_v22 = vmax.f32 %v3436_v28, 0.0  ;;  %v3428_v33 = vadd.f32 %v16422_v21, %v3427_v17  ;;  %10367 = vrot.lane.b32.xlu0 %v10341_v13, %s11739_s29 }
 0x2d5   :  { %10352 = vrot.lane.b32.xlu1 %v10351_v30, %s11735_s19 }
 0x2d6   :  { %v8894_v41 = vpop.f32.mrf.mxu0  ;;  %3832 = vst.msk [vmem:[#allocation2 + $0x99] sm:$0xff] %vm2743_vm1, %v3658_v22  ;;  %v3656_v25 = vmax.f32 %v3428_v33, 0.0  ;;  %v4273_v20 = vld [vmem:[#allocation2 + $0x50] sm:$0xff] }
 0x2d7   :  { %v3449_v11 = vadd.f32 %v8894_v41, %v16422_v21  ;;  %v10391_v48 = vpack.i.bf16 %v4273_v20, %v4272_v52  ;;  %v4400_v49 = vld [vmem:[#allocation2 + $0x4a] sm:$0xff]  ;;  %v4401_v34 = vld [vmem:[#allocation2 + $0x52] sm:$0xff] }
 0x2d8   :  { %v3440_v15 = vpop.f32.mrf.mxu0  ;;  %3830 = vst.msk [vmem:[#allocation2 + $0x81] sm:$0xff] %vm2743_vm1, %v3656_v25  ;;  %10377 = vrot.lane.b32.xlu0 %v10351_v30, %s11741_s18  ;;  %v4337_v18 = vld [vmem:[#allocation2 + $0x51] sm:$0xff]  ;;  %v10416_v57 = vpack.i.bf16 %v4401_v34, %v4400_v49 }
 0x2d9   :  { %v3661_v19 = vmax.f32 %v3449_v11, 0.0  ;;  %v3441_v46 = vadd.f32 %v16422_v21, %v3440_v15  ;;  %10362 = vrot.lane.b32.xlu1 %v10361_v38, %s11737_s26  ;;  %v10401_v6 = vpack.i.bf16 %v4337_v18, %v4336_v39 }
 0x2da   :  { %v8895_v50 = vpop.f32.mrf.mxu0 }
 0x2db   :  { %3835 = vst.msk [vmem:[#allocation2 + $0xc1] sm:$0xff] %vm2743_vm1, %v3661_v19  ;;  %v3659_v14 = vmax.f32 %v3441_v46, 0.0  ;;  %v3452_v59 = vadd.f32 %v8895_v50, %v16422_v21 }
 0x2dc   :  { %v3443_v27 = vpop.f32.mrf.mxu0  ;;  %10387 = vrot.lane.b32.xlu0 %v10361_v38, %s11742_s22  ;;  %v4084_v38 = vld [vmem:[#allocation2 + $0x68] sm:$0xff] }
 0x2dd   :  { %3833 = vst.msk [vmem:[#allocation2 + $0xa9] sm:$0xff] %vm2743_vm1, %v3659_v14  ;;  %v3662_v51 = vmax.f32 %v3452_v59, 0.0  ;;  %v3444_v58 = vadd.f32 %v16422_v21, %v3443_v27  ;;  %10372 = vrot.lane.b32.xlu1 %v16478_v23, %s11739_s29  ;;  %v4083_v59 = vld [vmem:[#allocation2 + $0x60] sm:$0xff] }
 0x2de   :  { %v10441_v27 = vpack.i.bf16 %v4084_v38, %v4083_v59 }
 0x2df   :  { %v8898_v12 = vpop.f32.mrf.mxu0  ;;  %3836 = vst.msk [vmem:[#allocation2 + $0xc9] sm:$0xff] %vm2743_vm1, %v3662_v51  ;;  %v3660_v54 = vmax.f32 %v3444_v58, 0.0  ;;  %v4148_v58 = vld [vmem:[#allocation2 + $0x69] sm:$0xff]  ;;  %v4277_v20 = vld [vmem:[#allocation2 + $0x80] sm:$0xff] }
 0x2e0   :  { %v3465_v16 = vadd.f32 %v8898_v12, %v16422_v21  ;;  %10397 = vrot.lane.b32.xlu0 %v16478_v23, %s11743_s0  ;;  %v4405_v49 = vld [vmem:[#allocation2 + $0x82] sm:$0xff] }
 0x2e1   :  { %v3456_v26 = vpop.f32.mrf.mxu0  ;;  %3834 = vst.msk [vmem:[#allocation2 + $0xb1] sm:$0xff] %vm2743_vm1, %v3660_v54  ;;  %10382 = vrot.lane.b32.xlu1 %v10381_v44, %s11741_s18  ;;  %v4341_v34 = vld [vmem:[#allocation2 + $0x81] sm:$0xff] }
 0x2e2   :  { %v3665_v53 = vmax.f32 %v3465_v16, 0.0  ;;  %v3457_v2 = vadd.f32 %v16422_v21, %v3456_v26  ;;  %v10451_v16 = vpack.i.bf16 %v4148_v58, %v4147_v60 }
 0x2e3   :  { %v8899_v36 = vpop.f32.mrf.mxu0 }
 0x2e4   :  { %3839 = vst.msk [vmem:[#allocation2 + $0xf1] sm:$0xff] %vm2743_vm1, %v3665_v53  ;;  %v3663_v9 = vmax.f32 %v3457_v2, 0.0  ;;  %v3468_v62 = vadd.f32 %v8899_v36, %v16422_v21  ;;  %10407 = vrot.lane.b32.xlu0 %v10381_v44, %s11744_s4  ;;  %v4211_v53 = vld [vmem:[#allocation2 + $0x62] sm:$0xff]  ;;  %v4212_v2 = vld [vmem:[#allocation2 + $0x6a] sm:$0xff] }
 0x2e5   :  { %v3459_v63 = vpop.f32.mrf.mxu0  ;;  %10392 = vrot.lane.b32.xlu1 %v10391_v48, %s11742_s22  ;;  %v10461_v36 = vpack.i.bf16 %v4212_v2, %v4211_v53 }
 0x2e6   :  { %3837 = vst.msk [vmem:[#allocation2 + $0xd9] sm:$0xff] %vm2743_vm1, %v3663_v9  ;;  %v3666_v0 = vmax.f32 %v3468_v62, 0.0  ;;  %v3460_v40 = vadd.f32 %v16422_v21, %v3459_v63  ;;  %v4276_v63 = vld [vmem:[#allocation2 + $0x78] sm:$0xff] }
 0x2e7   :  { %v8902_v56 = vpop.f32.mrf.mxu0 }
 0x2e8   :  { %3840 = vst.msk [vmem:[#allocation2 + $0xf9] sm:$0xff] %vm2743_vm1, %v3666_v0  ;;  %v3664_v31 = vmax.f32 %v3460_v40, 0.0  ;;  %v3481_v29 = vadd.f32 %v8902_v56, %v16422_v21  ;;  %10417 = vrot.lane.b32.xlu0 %v10416_v57, %s11744_s4  ;;  %v10471_v0 = vpack.i.bf16 %v4277_v20, %v4276_v63  ;;  %v4404_v56 = vld [vmem:[#allocation2 + $0x7a] sm:$0xff]  ;;  %v4408_v2 = vld [vmem:[#allocation2 + $0xaa] sm:$0xff] }
 0x2e9   :  { %v3472_v35 = vpop.f32.mrf.mxu0  ;;  %10402 = vrot.lane.b32.xlu1 %v10401_v6, %s11743_s0 }
 0x2ea   :  { %3838 = vst.msk [vmem:[#allocation2 + $0xe1] sm:$0xff] %vm2743_vm1, %v3664_v31  ;;  %v3669_v8 = vmax.f32 %v3481_v29, 0.0  ;;  %v3473_v13 = vadd.f32 %v16422_v21, %v3472_v35  ;;  %v4340_v35 = vld [vmem:[#allocation2 + $0x79] sm:$0xff] }
 0x2eb   :  { %v8903_v3 = vpop.f32.mrf.mxu0 }
 0x2ec   :  { %3843 = vst.msk [vmem:[#allocation2 + $0x121] sm:$0xff] %vm2743_vm1, %v3669_v8  ;;  %v3667_v10 = vmax.f32 %v3473_v13, 0.0  ;;  %v3484_v42 = vadd.f32 %v8903_v3, %v16422_v21  ;;  %10427 = vrot.lane.b32.xlu0 %v10381_v44, %s11735_s19  ;;  %v10496_v8 = vpack.i.bf16 %v4405_v49, %v4404_v56  ;;  %v10481_v13 = vpack.i.bf16 %v4341_v34, %v4340_v35 }
 0x2ed   :  { %v3475_v28 = vpop.f32.mrf.mxu0  ;;  %10412 = vrot.lane.b32.xlu1 %v16478_v23, %s11733_s25 }
 0x2ee   :  { %3841 = vst.msk [vmem:[#allocation2 + $0x109] sm:$0xff] %vm2743_vm1, %v3667_v10  ;;  %v3670_v45 = vmax.f32 %v3484_v42, 0.0  ;;  %v3476_v17 = vadd.f32 %v16422_v21, %v3475_v28 }
 0x2ef   :  { %v8906_v22 = vpop.f32.mrf.mxu0 }
 0x2f0   :  { %3844 = vst.msk [vmem:[#allocation2 + $0x129] sm:$0xff] %vm2743_vm1, %v3670_v45  ;;  %v3668_v33 = vmax.f32 %v3476_v17, 0.0  ;;  %v3497_v30 = vadd.f32 %v8906_v22, %v16422_v21  ;;  %10437 = vrot.lane.b32.xlu0 %v10391_v48, %s11737_s26 }
 0x2f1   :  { %v3488_v41 = vpop.f32.mrf.mxu0  ;;  %10422 = vrot.lane.b32.xlu1 %v10401_v6, %s11733_s25 }
 0x2f2   :  { %3842 = vst.msk [vmem:[#allocation2 + $0x111] sm:$0xff] %vm2743_vm1, %v3668_v33  ;;  %v3673_v37 = vmax.f32 %v3497_v30, 0.0  ;;  %v3489_v25 = vadd.f32 %v16422_v21, %v3488_v41 }
 0x2f3   :  { %v8907_v11 = vpop.f32.mrf.mxu0 }
 0x2f4   :  { %3847 = vst.msk [vmem:[#allocation2 + $0x151] sm:$0xff] %vm2743_vm1, %v3673_v37  ;;  %v3671_v4 = vmax.f32 %v3489_v25, 0.0  ;;  %v3500_v15 = vadd.f32 %v8907_v11, %v16422_v21  ;;  %10447 = vrot.lane.b32.xlu0 %v10401_v6, %s11739_s29  ;;  %v4088_v11 = vld [vmem:[#allocation2 + $0x98] sm:$0xff] }
 0x2f5   :  { %v3491_v24 = vpop.f32.mrf.mxu0  ;;  %10432 = vrot.lane.b32.xlu1 %v10416_v57, %s11735_s19 }
 0x2f6   :  { %3845 = vst.msk [vmem:[#allocation2 + $0x139] sm:$0xff] %vm2743_vm1, %v3671_v4  ;;  %v3674_v19 = vmax.f32 %v3500_v15, 0.0  ;;  %v3492_v46 = vadd.f32 %v16422_v21, %v3491_v24  ;;  %v4087_v15 = vld [vmem:[#allocation2 + $0x90] sm:$0xff] }
 0x2f7   :  { %v10521_v24 = vpack.i.bf16 %v4088_v11, %v4087_v15  ;;  %v4155_v11 = vld [vmem:[#allocation2 + $0xc1] sm:$0xff] }
 0x2f8   :  { %3848 = vst.msk [vmem:[#allocation2 + $0x159] sm:$0xff] %vm2743_vm1, %v3674_v19  ;;  %v3672_v50 = vmax.f32 %v3492_v46, 0.0  ;;  %v8910_v43 = vpop.f32.mrf.mxu0  ;;  %10457 = vrot.lane.b32.xlu0 %v10416_v57, %s11741_s18  ;;  %v4152_v19 = vld [vmem:[#allocation2 + $0x99] sm:$0xff]  ;;  %v4219_v15 = vld [vmem:[#allocation2 + $0xc2] sm:$0xff] }
 0x2f9   :  { %v3513_v14 = vadd.f32 %v8910_v43, %v16422_v21  ;;  %10442 = vrot.lane.b32.xlu1 %v10441_v27, %s11737_s26 }
 0x2fa   :  { %3846 = vst.msk [vmem:[#allocation2 + $0x141] sm:$0xff] %vm2743_vm1, %v3672_v50  ;;  %v3504_v47 = vpop.f32.mrf.mxu0  ;;  %v4151_v50 = vld [vmem:[#allocation2 + $0x91] sm:$0xff] }
 0x2fb   :  { %v3677_v5 = vmax.f32 %v3513_v14, 0.0  ;;  %v3505_v51 = vadd.f32 %v16422_v21, %v3504_v47  ;;  %v10531_v14 = vpack.i.bf16 %v4152_v19, %v4151_v50 }
 0x2fc   :  { %v8911_v23 = vpop.f32.mrf.mxu0  ;;  %10467 = vrot.lane.b32.xlu0 %v10441_v27, %s11742_s22  ;;  %v4215_v27 = vld [vmem:[#allocation2 + $0x92] sm:$0xff] }
 0x2fd   :  { %3851 = vst.msk [vmem:[#allocation2 + $0x181] sm:$0xff] %vm2743_vm1, %v3677_v5  ;;  %v3675_v12 = vmax.f32 %v3505_v51, 0.0  ;;  %v3516_v1 = vadd.f32 %v8911_v23, %v16422_v21  ;;  %10452 = vrot.lane.b32.xlu1 %v10451_v16, %s11739_s29  ;;  %v4216_v5 = vld [vmem:[#allocation2 + $0x9a] sm:$0xff] }
 0x2fe   :  { %v3507_v54 = vpop.f32.mrf.mxu0 }
 0x2ff   :  { %3849 = vst.msk [vmem:[#allocation2 + $0x169] sm:$0xff] %vm2743_vm1, %v3675_v12  ;;  %v3678_v32 = vmax.f32 %v3516_v1, 0.0  ;;  %v3508_v26 = vadd.f32 %v16422_v21, %v3507_v54  ;;  %v10541_v1 = vpack.i.bf16 %v4216_v5, %v4215_v27 }
 0x300   :  { %10477 = vrot.lane.b32.xlu0 %v10451_v16, %s11743_s0 }
 0x301   :  { %3852 = vst.msk [vmem:[#allocation2 + $0x189] sm:$0xff] %vm2743_vm1, %v3678_v32  ;;  %v3676_v44 = vmax.f32 %v3508_v26, 0.0  ;;  %10462 = vrot.lane.b32.xlu1 %v10461_v36, %s11741_s18  ;;  %v4280_v26 = vld [vmem:[#allocation2 + $0xa8] sm:$0xff] }
 0x302   :  { %v8914_v9 = vpop.f32.mrf.mxu0 }
 0x303   :  { %3850 = vst.msk [vmem:[#allocation2 + $0x171] sm:$0xff] %vm2743_vm1, %v3676_v44  ;;  %v3529_v62 = vadd.f32 %v8914_v9, %v16422_v21  ;;  %v4409_v44 = vld [vmem:[#allocation2 + $0xb2] sm:$0xff] }
 0x304   :  { %v3520_v52 = vpop.f32.mrf.mxu0  ;;  %10487 = vrot.lane.b32.xlu0 %v10461_v36, %s11744_s4 }
 0x305   :  { %v3681_v40 = vmax.f32 %v3529_v62, 0.0  ;;  %v3521_v48 = vadd.f32 %v16422_v21, %v3520_v52  ;;  %10472 = vrot.lane.b32.xlu1 %v10471_v0, %s11742_s22  ;;  %v4344_v62 = vld [vmem:[#allocation2 + $0xa9] sm:$0xff]  ;;  %v10576_v52 = vpack.i.bf16 %v4409_v44, %v4408_v2  ;;  %v3885_v44 = vld [vmem:[#allocation2] sm:$0xff] }
 0x306   :  { %v8915_v18 = vpop.f32.mrf.mxu0 }
 0x307   :  { %3855 = vst.msk [vmem:[#allocation2 + $0x1e1] sm:$0xff] %vm2743_vm1, %v3681_v40  ;;  %v3679_v31 = vmax.f32 %v3521_v48, 0.0  ;;  %v3532_v29 = vadd.f32 %v8915_v18, %v16422_v21 }
 0x308   :  { %v3523_v39 = vpop.f32.mrf.mxu0  ;;  %10497 = vrot.lane.b32.xlu0 %v10496_v8, %s11744_s4 }
 0x309   :  { %3853 = vst.msk [vmem:[#allocation2 + $0x1c9] sm:$0xff] %vm2743_vm1, %v3679_v31  ;;  %v3682_v57 = vmax.f32 %v3532_v29, 0.0  ;;  %v3524_v6 = vadd.f32 %v16422_v21, %v3523_v39  ;;  %10482 = vrot.lane.b32.xlu1 %v10481_v13, %s11743_s0 }
 0x30b   :  { %3856 = vst.msk [vmem:[#allocation2 + $0x1e9] sm:$0xff] %vm2743_vm1, %v3682_v57  ;;  %v3680_v3 = vmax.f32 %v3524_v6, 0.0 }
 0x30c   :  { %10507 = vrot.lane.b32.xlu0 %v10461_v36, %s11735_s19  ;;  %v4345_v36 = vld [vmem:[#allocation2 + $0xb1] sm:$0xff] }
 0x30d   :  { %3854 = vst.msk [vmem:[#allocation2 + $0x1d1] sm:$0xff] %vm2743_vm1, %v3680_v3  ;;  %10492 = vrot.lane.b32.xlu1 %v10451_v16, %s11733_s25  ;;  %v4281_v16 = vld [vmem:[#allocation2 + $0xb0] sm:$0xff]  ;;  %v4092_v3 = vld [vmem:[#allocation2 + $0xc8] sm:$0xff] }
 0x30e   :  { %v8918_v10 = vpop.f32.mrf.mxu0  ;;  %v10551_v53 = vpack.i.bf16 %v4281_v16, %v4280_v26  ;;  %v4413_v26 = vld [vmem:[#allocation2 + $0xe2] sm:$0xff] }
 0x30f   :  { %v3545_v42 = vadd.f32 %v8918_v10, %v16422_v21 }
 0x310   :  { %v3536_v28 = vpop.f32.mrf.mxu0  ;;  %10517 = vrot.lane.b32.xlu0 %v10471_v0, %s11737_s26  ;;  %v10561_v0 = vpack.i.bf16 %v4345_v36, %v4344_v62  ;;  %v3886_v62 = vld [vmem:[#allocation2 + $0x8] sm:$0xff] }
 0x311   :  { %v3685_v45 = vmax.f32 %v3545_v42, 0.0  ;;  %v3537_v17 = vadd.f32 %v16422_v21, %v3536_v28  ;;  %10502 = vrot.lane.b32.xlu1 %v10481_v13, %s11733_s25 }
 0x312   :  { %v8919_v22 = vpop.f32.mrf.mxu0 }
 0x313   :  { %3859 = vst.msk [vmem:[#allocation2 + $0x211] sm:$0xff] %vm2743_vm1, %v3685_v45  ;;  %v3683_v33 = vmax.f32 %v3537_v17, 0.0  ;;  %v3548_v30 = vadd.f32 %v8919_v22, %v16422_v21  ;;  %v4091_v45 = vld [vmem:[#allocation2 + $0xc0] sm:$0xff] }
 0x314   :  { %v3539_v41 = vpop.f32.mrf.mxu0  ;;  %10527 = vrot.lane.b32.xlu0 %v10481_v13, %s11739_s29  ;;  %v10601_v22 = vpack.i.bf16 %v4092_v3, %v4091_v45 }
 0x315   :  { %3857 = vst.msk [vmem:[#allocation2 + $0x1f9] sm:$0xff] %vm2743_vm1, %v3683_v33  ;;  %v3686_v37 = vmax.f32 %v3548_v30, 0.0  ;;  %v3540_v25 = vadd.f32 %v16422_v21, %v3539_v41  ;;  %10512 = vrot.lane.b32.xlu1 %v10496_v8, %s11735_s19  ;;  %v16602_v33 = vpop.permute.xlu0 %10337 }
 0x316   :  { %v10339_v2 = vunpack.i.l.bf16 %v16602_v33  ;;  %v10340_v36 = vunpack.i.h.bf16 %v16602_v33 }
 0x317   :  { %3860 = vst.msk [vmem:[#allocation2 + $0x219] sm:$0xff] %vm2743_vm1, %v3686_v37  ;;  %v3684_v4 = vmax.f32 %v3540_v25, 0.0  ;;  %v4156_v37 = vld [vmem:[#allocation2 + $0xc9] sm:$0xff] }
 0x318   :  { %10537 = vrot.lane.b32.xlu0 %v10496_v8, %s11741_s18 }
 0x319   :  { %3858 = vst.msk [vmem:[#allocation2 + $0x201] sm:$0xff] %vm2743_vm1, %v3684_v4  ;;  %10522 = vrot.lane.b32.xlu1 %v10521_v24, %s11737_s26  ;;  %v16609_v4 = vpack.i.bf16 %v4156_v37, %v4155_v11 }
 0x31a   :  { %v8922_v46 = vpop.f32.mrf.mxu0 }
 0x31b   :  { %v3561_v38 = vadd.f32 %v8922_v46, %v16422_v21  ;;  %v10348_v46 = vpop.permute.xlu0 %10347 }
 0x31c   :  { %v3552_v43 = vpop.f32.mrf.mxu0  ;;  %10547 = vrot.lane.b32.xlu0 %v10521_v24, %s11742_s22  ;;  %v4220_v24 = vld [vmem:[#allocation2 + $0xca] sm:$0xff] }
 0x31d   :  { %v3689_v59 = vmax.f32 %v3561_v38, 0.0  ;;  %v3553_v47 = vadd.f32 %v16422_v21, %v3552_v43  ;;  %10532 = vrot.lane.b32.xlu1 %v10531_v14, %s11739_s29  ;;  %v10621_v43 = vpack.i.bf16 %v4220_v24, %v4219_v15 }
 0x31e   :  { %v8923_v51 = vpop.f32.mrf.mxu0 }
 0x31f   :  { %3863 = vst.msk [vmem:[#allocation2 + $0x241] sm:$0xff] %vm2743_vm1, %v3689_v59  ;;  %v3687_v58 = vmax.f32 %v3553_v47, 0.0  ;;  %v3564_v23 = vadd.f32 %v8923_v51, %v16422_v21  ;;  %v4285_v47 = vld [vmem:[#allocation2 + $0xe0] sm:$0xff] }
 0x320   :  { %v3555_v12 = vpop.f32.mrf.mxu0  ;;  %10557 = vrot.lane.b32.xlu0 %v10531_v14, %s11743_s0 }
 0x321   :  { %3861 = vst.msk [vmem:[#allocation2 + $0x229] sm:$0xff] %vm2743_vm1, %v3687_v58  ;;  %v3690_v60 = vmax.f32 %v3564_v23, 0.0  ;;  %v3556_v54 = vadd.f32 %v16422_v21, %v3555_v12  ;;  %10542 = vrot.lane.b32.xlu1 %v10541_v1, %s11741_s18  ;;  %v4284_v58 = vld [vmem:[#allocation2 + $0xd8] sm:$0xff] }
 0x323   :  { %3864 = vst.msk [vmem:[#allocation2 + $0x249] sm:$0xff] %vm2743_vm1, %v3690_v60  ;;  %v3688_v32 = vmax.f32 %v3556_v54, 0.0 }
 0x324   :  { %10567 = vrot.lane.b32.xlu0 %v10541_v1, %s11744_s4 }
 0x325   :  { %3862 = vst.msk [vmem:[#allocation2 + $0x231] sm:$0xff] %vm2743_vm1, %v3688_v32  ;;  %10552 = vrot.lane.b32.xlu1 %v10551_v53, %s11742_s22  ;;  %v4412_v32 = vld [vmem:[#allocation2 + $0xda] sm:$0xff] }
 0x328   :  { %10577 = vrot.lane.b32.xlu0 %v10576_v52, %s11744_s4 }
 0x329   :  { %10562 = vrot.lane.b32.xlu1 %v10561_v0, %s11743_s0 }
 0x32c   :  { %10587 = vrot.lane.b32.xlu0 %v10541_v1, %s11735_s19  ;;  %v16624_v1 = vpack.i.bf16 %v4285_v47, %v4284_v58 }
 0x32d   :  { %10572 = vrot.lane.b32.xlu1 %v10531_v14, %s11733_s25 }
 0x32e   :  { %v8926_v20 = vpop.f32.mrf.mxu0 }
 0x32f   :  { %v3577_v9 = vadd.f32 %v8926_v20, %v16422_v21 }
 0x330   :  { %v3568_v63 = vpop.f32.mrf.mxu0  ;;  %10597 = vrot.lane.b32.xlu0 %v10551_v53, %s11737_s26  ;;  %v4349_v53 = vld [vmem:[#allocation2 + $0xe1] sm:$0xff] }
 0x331   :  { %v3693_v40 = vmax.f32 %v3577_v9, 0.0  ;;  %v3569_v48 = vadd.f32 %v16422_v21, %v3568_v63  ;;  %10582 = vrot.lane.b32.xlu1 %v10561_v0, %s11733_s25  ;;  %v4348_v9 = vld [vmem:[#allocation2 + $0xd9] sm:$0xff] }
 0x332   :  { %v8927_v56 = vpop.f32.mrf.mxu0 }
 0x333   :  { %3867 = vst.msk [vmem:[#allocation2 + $0x271] sm:$0xff] %vm2743_vm1, %v3693_v40  ;;  %v3691_v49 = vmax.f32 %v3569_v48, 0.0  ;;  %v3580_v34 = vadd.f32 %v8927_v56, %v16422_v21  ;;  %v10349_v40 = vunpack.i.l.bf16 %v10348_v46  ;;  %v6510_v56 = vsel %vm2743_vm1, %v3885_v44, %v10339_v2 }
 0x334   :  { %v3571_v18 = vpop.f32.mrf.mxu0  ;;  %10607 = vrot.lane.b32.xlu0 %v10561_v0, %s11739_s29  ;;  %v16640_v0 = vpack.i.bf16 %v4349_v53, %v4348_v9 }
 0x335   :  { %3865 = vst.msk [vmem:[#allocation2 + $0x259] sm:$0xff] %vm2743_vm1, %v3691_v49  ;;  %v3694_v31 = vmax.f32 %v3580_v34, 0.0  ;;  %v3572_v29 = vadd.f32 %v16422_v21, %v3571_v18  ;;  %10592 = vrot.lane.b32.xlu1 %v10576_v52, %s11735_s19  ;;  %v10350_v49 = vunpack.i.h.bf16 %v10348_v46  ;;  %v6511_v18 = vsel %vm2743_vm1, %v3886_v62, %v10340_v36 }
 0x336   :  { %v8930_v39 = vpop.f32.mrf.mxu0 }
 0x337   :  { %3868 = vst.msk [vmem:[#allocation2 + $0x279] sm:$0xff] %vm2743_vm1, %v3694_v31  ;;  %v3692_v35 = vmax.f32 %v3572_v29, 0.0  ;;  %v3593_v8 = vadd.f32 %v8930_v39, %v16422_v21  ;;  %v6574_v39 = vsel %vm2873_vm4, %v6510_v56, %v10349_v40 }
 0x338   :  { %v3584_v13 = vpop.f32.mrf.mxu0  ;;  %10617 = vrot.lane.b32.xlu0 %v10576_v52, %s11741_s18  ;;  %v16638_v52 = vpack.i.bf16 %v4413_v26, %v4412_v32 }
 0x339   :  { %3866 = vst.msk [vmem:[#allocation2 + $0x261] sm:$0xff] %vm2743_vm1, %v3692_v35  ;;  %v3697_v57 = vmax.f32 %v3593_v8, 0.0  ;;  %v3585_v6 = vadd.f32 %v16422_v21, %v3584_v13  ;;  %10602 = vrot.lane.b32.xlu1 %v10601_v22, %s11737_s26 }
 0x33a   :  { %v8931_v10 = vpop.f32.mrf.mxu0 }
 0x33b   :  { %3871 = vst.msk [vmem:[#allocation2 + $0x2a1] sm:$0xff] %vm2743_vm1, %v3697_v57  ;;  %v3695_v42 = vmax.f32 %v3585_v6, 0.0  ;;  %v3596_v28 = vadd.f32 %v8931_v10, %v16422_v21  ;;  %v6575_v6 = vsel %vm2873_vm4, %v6511_v18, %v10350_v49 }
 0x33c   :  { %v3587_v17 = vpop.f32.mrf.mxu0  ;;  %10627 = vrot.lane.b32.xlu0 %v10601_v22, %s11742_s22  ;;  %v4096_v22 = vld [vmem:[#allocation2 + $0xf8] sm:$0xff] }
 0x33d   :  { %3869 = vst.msk [vmem:[#allocation2 + $0x289] sm:$0xff] %vm2743_vm1, %v3695_v42  ;;  %v3698_v30 = vmax.f32 %v3596_v28, 0.0  ;;  %v3588_v41 = vadd.f32 %v16422_v21, %v3587_v17  ;;  %10612 = vrot.lane.b32.xlu1 %v16609_v4, %s11739_s29 }
 0x33f   :  { %3872 = vst.msk [vmem:[#allocation2 + $0x2a9] sm:$0xff] %vm2743_vm1, %v3698_v30  ;;  %v3696_v25 = vmax.f32 %v3588_v41, 0.0  ;;  %v8934_v19 = vpop.f32.mrf.mxu0 }
 0x340   :  { %v3609_v38 = vadd.f32 %v8934_v19, %v16422_v21  ;;  %10637 = vrot.lane.b32.xlu0 %v16609_v4, %s11743_s0 }
 0x341   :  { %3870 = vst.msk [vmem:[#allocation2 + $0x291] sm:$0xff] %vm2743_vm1, %v3696_v25  ;;  %v3600_v50 = vpop.f32.mrf.mxu0  ;;  %10622 = vrot.lane.b32.xlu1 %v10621_v43, %s11741_s18 }
 0x342   :  { %v3701_v14 = vmax.f32 %v3609_v38, 0.0  ;;  %v3601_v59 = vadd.f32 %v16422_v21, %v3600_v50  ;;  %v16622_v12 = vpop.permute.xlu0 %10357  ;;  %v4095_v38 = vld [vmem:[#allocation2 + $0xf0] sm:$0xff] }
 0x343   :  { %v8935_v27 = vpop.f32.mrf.mxu0  ;;  %v16628_v16 = vpop.permute.xlu1 %10342  ;;  %v10360_v3 = vunpack.i.h.bf16 %v16622_v12  ;;  %v10359_v42 = vunpack.i.l.bf16 %v16622_v12 }
 0x344   :  { %3875 = vst.msk [vmem:[#allocation2 + $0x2d1] sm:$0xff] %vm2743_vm1, %v3701_v14  ;;  %v3699_v5 = vmax.f32 %v3601_v59, 0.0  ;;  %v3612_v51 = vadd.f32 %v8935_v27, %v16422_v21  ;;  %10647 = vrot.lane.b32.xlu0 %v10621_v43, %s11744_s4  ;;  %v10344_v28 = vunpack.i.l.bf16 %v16628_v16  ;;  %v10345_v33 = vunpack.i.h.bf16 %v16628_v16 }
 0x345   :  { %v3603_v23 = vpop.f32.mrf.mxu0  ;;  %10632 = vrot.lane.b32.xlu1 %v16624_v1, %s11742_s22  ;;  %v6639_v50 = vsel %vm3003_vm6, %v6575_v6, %v10360_v3  ;;  %v16677_v59 = vpack.i.bf16 %v4096_v22, %v4095_v38  ;;  %v6638_v47 = vsel %vm3003_vm6, %v6574_v39, %v10359_v42  ;;  %v4159_v22 = vld [vmem:[#allocation2 + $0xf1] sm:$0xff] }
 0x346   :  { %3873 = vst.msk [vmem:[#allocation2 + $0x2b9] sm:$0xff] %vm2743_vm1, %v3699_v5  ;;  %v3702_v60 = vmax.f32 %v3612_v51, 0.0  ;;  %v3604_v54 = vadd.f32 %v16422_v21, %v3603_v23  ;;  %v16636_v63 = vpop.permute.xlu0 %10367  ;;  %v6512_v27 = vsel %vm2743_vm1, %v16440_v55, %v10344_v28  ;;  %v6513_v58 = vsel %vm2743_vm1, %v16445_v7, %v10345_v33 }
 0x347   :  { %v16643_v48 = vpop.permute.xlu1 %10352  ;;  %v10370_v30 = vunpack.i.h.bf16 %v16636_v63  ;;  %v10369_v41 = vunpack.i.l.bf16 %v16636_v63 }
 0x348   :  { %3876 = vst.msk [vmem:[#allocation2 + $0x2d9] sm:$0xff] %vm2743_vm1, %v3702_v60  ;;  %v3700_v20 = vmax.f32 %v3604_v54, 0.0  ;;  %10657 = vrot.lane.b32.xlu0 %v16638_v52, %s11744_s4  ;;  %v10355_v37 = vunpack.i.h.bf16 %v16643_v48 }
 0x349   :  { %10642 = vrot.lane.b32.xlu1 %v16640_v0, %s11743_s0  ;;  %v6702_v23 = vsel %vm3133_vm8, %v6638_v47, %v10369_v41  ;;  %v6703_v54 = vsel %vm3133_vm8, %v6639_v50, %v10370_v30  ;;  %v4224_v47 = vld [vmem:[#allocation2 + $0xfa] sm:$0xff] }
 0x34a   :  { %3874 = vst.msk [vmem:[#allocation2 + $0x2c1] sm:$0xff] %vm2743_vm1, %v3700_v20  ;;  %v10378_v35 = vpop.permute.xlu0 %10377  ;;  %v6577_v32 = vsel %vm2873_vm4, %v6513_v58, %v10355_v37 }
 0x34b   :  { %v10363_v57 = vpop.permute.xlu1 %10362  ;;  %v10379_v15 = vunpack.i.l.bf16 %v10378_v35 }
 0x34c   :  { %10667 = vrot.lane.b32.xlu0 %v10621_v43, %s11735_s19  ;;  %v10380_v43 = vunpack.i.h.bf16 %v10378_v35  ;;  %v10364_v14 = vunpack.i.l.bf16 %v10363_v57  ;;  %v10365_v5 = vunpack.i.h.bf16 %v10363_v57 }
 0x34d   :  { %v8938_v34 = vpop.f32.mrf.mxu0  ;;  %10652 = vrot.lane.b32.xlu1 %v16609_v4, %s11733_s25  ;;  %v10354_v4 = vunpack.i.l.bf16 %v16643_v48  ;;  %v6767_v55 = vsel %vm6766_vm12, %v6702_v23, %v10379_v15 }
 0x34e   :  { %v3625_v31 = vadd.f32 %v8938_v34, %v16422_v21  ;;  %v10388_v11 = vpop.permute.xlu0 %10387  ;;  %v6768_v53 = vsel %vm6766_vm12, %v6703_v54, %v10380_v43  ;;  %v6641_v20 = vsel %vm3003_vm6, %v6577_v32, %v10365_v5 }
 0x34f   :  { %v3616_v29 = vpop.f32.mrf.mxu0  ;;  %v16670_v46 = vpop.permute.xlu1 %10372  ;;  %v10390_v12 = vunpack.i.h.bf16 %v10388_v11  ;;  %v6576_v16 = vsel %vm2873_vm4, %v6512_v27, %v10354_v4 }
 0x350   :  { %v3705_v8 = vmax.f32 %v3625_v31, 0.0  ;;  %v3617_v13 = vadd.f32 %v16422_v21, %v3616_v29  ;;  %10677 = vrot.lane.b32.xlu0 %v16624_v1, %s11737_s26  ;;  %v10389_v1 = vunpack.i.l.bf16 %v10388_v11  ;;  %v6640_v7 = vsel %vm3003_vm6, %v6576_v16, %v10364_v14  ;;  %v4223_v14 = vld [vmem:[#allocation2 + $0xf2] sm:$0xff] }
 0x351   :  { %v8939_v10 = vpop.f32.mrf.mxu0  ;;  %10662 = vrot.lane.b32.xlu1 %v16640_v0, %s11733_s25  ;;  %v10375_v9 = vunpack.i.h.bf16 %v16670_v46  ;;  %v10374_v62 = vunpack.i.l.bf16 %v16670_v46  ;;  %v6833_v18 = vsel %vm6831_vm13, %v6768_v53, %v10390_v12  ;;  %v10701_v12 = vpack.i.bf16 %v4224_v47, %v4223_v14  ;;  %v4289_v16 = vld [vmem:[#allocation2 + $0x110] sm:$0xff] }
 0x352   :  { %3879 = vst.msk [vmem:[#allocation2 + $0x301] sm:$0xff] %vm2743_vm1, %v3705_v8  ;;  %v3703_v45 = vmax.f32 %v3617_v13, 0.0  ;;  %v3628_v17 = vadd.f32 %v8939_v10, %v16422_v21  ;;  %v10398_v60 = vpop.permute.xlu0 %10397  ;;  %v6832_v34 = vsel %vm6831_vm13, %v6767_v55, %v10389_v1  ;;  %v4160_v8 = vld [vmem:[#allocation2 + $0xf9] sm:$0xff]  ;;  %v4288_v55 = vld [vmem:[#allocation2 + $0x108] sm:$0xff] }
 0x353   :  { %v3619_v25 = vpop.f32.mrf.mxu0  ;;  %v10383_v26 = vpop.permute.xlu1 %10382  ;;  %v10400_v2 = vunpack.i.h.bf16 %v10398_v60  ;;  %v10399_v44 = vunpack.i.l.bf16 %v10398_v60  ;;  %v6704_v33 = vsel %vm3133_vm8, %v6640_v7, %v10374_v62  ;;  %v10711_v53 = vpack.i.bf16 %v4289_v16, %v4288_v55  ;;  %v4416_v7 = vld [vmem:[#allocation2 + $0x10a] sm:$0xff] }
 0x354   :  { %3877 = vst.msk [vmem:[#allocation2 + $0x2e9] sm:$0xff] %vm2743_vm1, %v3703_v45  ;;  %v3706_v24 = vmax.f32 %v3628_v17, 0.0  ;;  %v3620_v19 = vadd.f32 %v16422_v21, %v3619_v25  ;;  %10687 = vrot.lane.b32.xlu0 %v16640_v0, %s11739_s29  ;;  %v10385_v40 = vunpack.i.h.bf16 %v10383_v26  ;;  %v10384_v48 = vunpack.i.l.bf16 %v10383_v26 }
 0x355   :  { %10672 = vrot.lane.b32.xlu1 %v16638_v52, %s11735_s19  ;;  %v6897_v3 = vsel %vm6896_vm14, %v6832_v34, %v10399_v44  ;;  %v6898_v10 = vsel %vm6896_vm14, %v6833_v18, %v10400_v2  ;;  %v10691_v25 = vpack.i.bf16 %v4160_v8, %v4159_v22  ;;  %v4417_v2 = vld [vmem:[#allocation2 + $0x112] sm:$0xff] }
 0x356   :  { %3880 = vst.msk [vmem:[#allocation2 + $0x309] sm:$0xff] %vm2743_vm1, %v3706_v24  ;;  %v3704_v51 = vmax.f32 %v3620_v19, 0.0  ;;  %v10408_v49 = vpop.permute.xlu0 %10407  ;;  %v6769_v46 = vsel %vm6766_vm12, %v6704_v33, %v10384_v48  ;;  %v4353_v44 = vld [vmem:[#allocation2 + $0x111] sm:$0xff] }
 0x357   :  { %v10410_v29 = vunpack.i.h.bf16 %v10408_v49  ;;  %v10409_v35 = vunpack.i.l.bf16 %v10408_v49  ;;  %v10393_v39 = vpop.permute.xlu1 %10392 }
 0x358   :  { %3878 = vst.msk [vmem:[#allocation2 + $0x2f1] sm:$0xff] %vm2743_vm1, %v3704_v51  ;;  %v10395_v13 = vunpack.i.h.bf16 %v10393_v39  ;;  %v10394_v57 = vunpack.i.l.bf16 %v10393_v39  ;;  %10697 = vrot.lane.b32.xlu0 %v16638_v52, %s11741_s18  ;;  %v6705_v52 = vsel %vm3133_vm8, %v6641_v20, %v10375_v9  ;;  %v16737_v20 = vpack.i.bf16 %v4417_v2, %v4416_v7  ;;  %v4352_v9 = vld [vmem:[#allocation2 + $0x109] sm:$0xff] }
 0x359   :  { %10682 = vrot.lane.b32.xlu1 %v16677_v59, %s11737_s26  ;;  %v6962_v45 = vsel %vm6961_vm15, %v6897_v3, %v10409_v35  ;;  %v6963_v17 = vsel %vm6961_vm15, %v6898_v10, %v10410_v29  ;;  %v6770_v38 = vsel %vm6766_vm12, %v6705_v52, %v10385_v40  ;;  %v4100_v29 = vld [vmem:[#allocation2 + $0x128] sm:$0xff] }
 0x35a   :  { %v8942_v36 = vpop.f32.mrf.mxu0  ;;  %v10418_v41 = vpop.permute.xlu0 %10417  ;;  %v7026_v37 = vpack.c.bf16 %v6963_v17, %v6962_v45  ;;  %v6834_v27 = vsel %vm6831_vm13, %v6769_v46, %v10394_v57  ;;  %v4164_v7 = vld [vmem:[#allocation2 + $0x129] sm:$0xff] }
 0x35b   :  { %v3641_v63 = vadd.f32 %v8942_v36, %v16422_v21  ;;  %v10420_v15 = vunpack.i.h.bf16 %v10418_v41  ;;  %v10419_v24 = vunpack.i.l.bf16 %v10418_v41  ;;  %v10403_v19 = vpop.permute.xlu1 %10402 }
 0x35c   :  { %v3632_v56 = vpop.f32.mrf.mxu0  ;;  %v10405_v50 = vunpack.i.h.bf16 %v10403_v19  ;;  %v10404_v43 = vunpack.i.l.bf16 %v10403_v19  ;;  %10707 = vrot.lane.b32.xlu0 %v16677_v59, %s11742_s22  ;;  %8954 = vmatprep.mubr.msk.bf16.mxu1 %vm7101_vm0, %v7026_v37 }
 0x35d   :  { %v3709_v0 = vmax.f32 %v3641_v63, 0.0  ;;  %v3633_v31 = vadd.f32 %v16422_v21, %v3632_v56  ;;  %10692 = vrot.lane.b32.xlu1 %v10691_v25, %s11739_s29  ;;  %v10721_v63 = vpack.i.bf16 %v4353_v44, %v4352_v9 }
 0x35e   :  { %v8943_v6 = vpop.f32.mrf.mxu0  ;;  %v6899_v51 = vsel %vm6896_vm14, %v6834_v27, %v10404_v43  ;;  %v10428_v23 = vpop.permute.xlu0 %10427 }
 0x35f   :  { %3883 = vst.msk [vmem:[#allocation2 + $0x331] sm:$0xff] %vm2743_vm1, %v3709_v0  ;;  %v3707_v42 = vmax.f32 %v3633_v31, 0.0  ;;  %v3644_v28 = vadd.f32 %v8943_v6, %v16422_v21  ;;  %v10413_v59 = vpop.permute.xlu1 %10412  ;;  %v6964_v1 = vsel %vm6961_vm15, %v6899_v51, %v10419_v24  ;;  %v10430_v34 = vunpack.i.h.bf16 %v10428_v23  ;;  %v3889_v0 = vld [vmem:[#allocation2 + $0x30] sm:$0xff]  ;;  %v3890_v31 = vld [vmem:[#allocation2 + $0x38] sm:$0xff] }
 0x360   :  { %v3635_v30 = vpop.f32.mrf.mxu0  ;;  %10717 = vrot.lane.b32.xlu0 %v10691_v25, %s11743_s0  ;;  %v10415_v40 = vunpack.i.h.bf16 %v10413_v59  ;;  %v10414_v48 = vunpack.i.l.bf16 %v10413_v59  ;;  %v10429_v18 = vunpack.i.l.bf16 %v10428_v23 }
 0x361   :  { %3881 = vst.msk [vmem:[#allocation2 + $0x319] sm:$0xff] %vm2743_vm1, %v3707_v42  ;;  %v3710_v11 = vmax.f32 %v3644_v28, 0.0  ;;  %v3636_v4 = vadd.f32 %v16422_v21, %v3635_v30  ;;  %v6835_v21 = vsel %vm6831_vm13, %v6770_v38, %v10395_v13  ;;  %10702 = vrot.lane.b32.xlu1 %v10701_v12, %s11741_s18  ;;  %v4099_v42 = vld [vmem:[#allocation2 + $0x120] sm:$0xff] }
 0x362   :  { %v6900_v58 = vsel %vm6896_vm14, %v6835_v21, %v10405_v50  ;;  %v10438_v32 = vpop.permute.xlu0 %10437  ;;  %v6515_v35 = vsel %vm2743_vm1, %v3890_v31, %v10415_v40  ;;  %v6514_v39 = vsel %vm2743_vm1, %v3889_v0, %v10414_v48  ;;  %v16751_v17 = vpack.i.bf16 %v4100_v29, %v4099_v42  ;;  %v4228_v42 = vld [vmem:[#allocation2 + $0x12a] sm:$0xff] }
 0x363   :  { %3884 = vst.msk [vmem:[#allocation2 + $0x339] sm:$0xff] %vm2743_vm1, %v3710_v11  ;;  %v3708_v5 = vmax.f32 %v3636_v4, 0.0  ;;  %v6965_v60 = vsel %vm6961_vm15, %v6900_v58, %v10420_v15  ;;  %v10423_v26 = vpop.permute.xlu1 %10422  ;;  %v10440_v8 = vunpack.i.h.bf16 %v10438_v32  ;;  %v10439_v13 = vunpack.i.l.bf16 %v10438_v32  ;;  %v3892_v11 = vld [vmem:[#allocation2 + $0x50] sm:$0xff] }
 0x364   :  { %v7027_v54 = vpack.c.bf16 %v6965_v60, %v6964_v1  ;;  %10727 = vrot.lane.b32.xlu0 %v10701_v12, %s11744_s4  ;;  %v10425_v6 = vunpack.i.h.bf16 %v10423_v26  ;;  %v10424_v3 = vunpack.i.l.bf16 %v10423_v26  ;;  %v6578_v22 = vsel %vm2873_vm4, %v6514_v39, %v10429_v18 }
 0x365   :  { %3882 = vst.msk [vmem:[#allocation2 + $0x321] sm:$0xff] %vm2743_vm1, %v3708_v5  ;;  %10712 = vrot.lane.b32.xlu1 %v10711_v53, %s11742_s22  ;;  %v6579_v33 = vsel %vm2873_vm4, %v6515_v35, %v10430_v34  ;;  %v6642_v41 = vsel %vm3003_vm6, %v6578_v22, %v10439_v13 }
 0x366   :  { %8955 = vmatmul.mubr.msk.bf16.vlgmr.msra.gmra.mxu1 %vm7101_vm0, %v7027_v54  ;;  %v10448_v36 = vpop.permute.xlu0 %10447  ;;  %v6643_v37 = vsel %vm3003_vm6, %v6579_v33, %v10440_v8  ;;  %v6517_v19 = vsel %vm2743_vm1, %v3892_v11, %v10425_v6  ;;  %v4293_v11 = vld [vmem:[#allocation2 + $0x140] sm:$0xff] }
 0x367   :  { %v10433_v62 = vpop.permute.xlu1 %10432  ;;  %v10450_v28 = vunpack.i.h.bf16 %v10448_v36  ;;  %v10449_v45 = vunpack.i.l.bf16 %v10448_v36 }
 0x368   :  { %10737 = vrot.lane.b32.xlu0 %v16737_v20, %s11744_s4  ;;  %v10435_v52 = vunpack.i.h.bf16 %v10433_v62  ;;  %v10434_v30 = vunpack.i.l.bf16 %v10433_v62 }
 0x369   :  { %10722 = vrot.lane.b32.xlu1 %v10721_v63, %s11743_s0  ;;  %v6706_v14 = vsel %vm3133_vm8, %v6642_v41, %v10449_v45  ;;  %v6707_v47 = vsel %vm3133_vm8, %v6643_v37, %v10450_v28 }
 0x36a   :  { %v10458_v56 = vpop.permute.xlu0 %10457  ;;  %v6581_v51 = vsel %vm2873_vm4, %v6517_v19, %v10435_v52 }
 0x36b   :  { %v16742_v49 = vpop.permute.xlu1 %10442  ;;  %v10460_v4 = vunpack.i.h.bf16 %v10458_v56  ;;  %v10459_v15 = vunpack.i.l.bf16 %v10458_v56  ;;  %v4163_v56 = vld [vmem:[#allocation2 + $0x121] sm:$0xff] }
 0x36c   :  { %10747 = vrot.lane.b32.xlu0 %v10701_v12, %s11735_s19  ;;  %v10445_v58 = vunpack.i.h.bf16 %v16742_v49  ;;  %v10444_v23 = vunpack.i.l.bf16 %v16742_v49  ;;  %v10771_v0 = vpack.i.bf16 %v4164_v7, %v4163_v56 }
 0x36d   :  { %10732 = vrot.lane.b32.xlu1 %v10691_v25, %s11733_s25  ;;  %v3891_v25 = vld [vmem:[#allocation2 + $0x48] sm:$0xff]  ;;  %v6771_v59 = vsel %vm6766_vm12, %v6706_v14, %v10459_v15  ;;  %v6772_v12 = vsel %vm6766_vm12, %v6707_v47, %v10460_v4  ;;  %v4292_v15 = vld [vmem:[#allocation2 + $0x138] sm:$0xff] }
 0x36e   :  { %v10468_v57 = vpop.permute.xlu0 %10467  ;;  %v6516_v46 = vsel %vm2743_vm1, %v3891_v25, %v10424_v3  ;;  %v6645_v34 = vsel %vm3003_vm6, %v6581_v51, %v10445_v58  ;;  %v10791_v19 = vpack.i.bf16 %v4293_v11, %v4292_v15  ;;  %v4356_v47 = vld [vmem:[#allocation2 + $0x139] sm:$0xff] }
 0x36f   :  { %v16748_v10 = vpop.permute.xlu1 %10452  ;;  %v10470_v38 = vunpack.i.h.bf16 %v10468_v57  ;;  %v10469_v50 = vunpack.i.l.bf16 %v10468_v57  ;;  %v6580_v5 = vsel %vm2873_vm4, %v6516_v46, %v10434_v30  ;;  %v4420_v46 = vld [vmem:[#allocation2 + $0x13a] sm:$0xff] }
 0x370   :  { %10757 = vrot.lane.b32.xlu0 %v10711_v53, %s11737_s26  ;;  %v10455_v1 = vunpack.i.h.bf16 %v16748_v10  ;;  %v10454_v60 = vunpack.i.l.bf16 %v16748_v10  ;;  %v6644_v49 = vsel %vm3003_vm6, %v6580_v5, %v10444_v23  ;;  %v4227_v10 = vld [vmem:[#allocation2 + $0x122] sm:$0xff] }
 0x371   :  { %10742 = vrot.lane.b32.xlu1 %v10721_v63, %s11733_s25  ;;  %v6836_v16 = vsel %vm6831_vm13, %v6771_v59, %v10469_v50  ;;  %v6837_v32 = vsel %vm6831_vm13, %v6772_v12, %v10470_v38  ;;  %v10781_v41 = vpack.i.bf16 %v4228_v42, %v4227_v10  ;;  %v4421_v38 = vld [vmem:[#allocation2 + $0x142] sm:$0xff] }
 0x372   :  { %v10478_v24 = vpop.permute.xlu0 %10477  ;;  %v6708_v29 = vsel %vm3133_vm8, %v6644_v49, %v10454_v60  ;;  %v4357_v50 = vld [vmem:[#allocation2 + $0x141] sm:$0xff]  ;;  %v16804_v14 = vpack.i.bf16 %v4421_v38, %v4420_v46  ;;  %v4168_v46 = vld [vmem:[#allocation2 + $0x159] sm:$0xff] }
 0x373   :  { %v10463_v43 = vpop.permute.xlu1 %10462  ;;  %v10480_v27 = vunpack.i.h.bf16 %v10478_v24  ;;  %v10479_v21 = vunpack.i.l.bf16 %v10478_v24  ;;  %v3894_v60 = vld [vmem:[#allocation2 + $0x68] sm:$0xff] }
 0x374   :  { %10767 = vrot.lane.b32.xlu0 %v10721_v63, %s11739_s29  ;;  %v10465_v36 = vunpack.i.h.bf16 %v10463_v43  ;;  %v10464_v9 = vunpack.i.l.bf16 %v10463_v43 }
 0x375   :  { %10752 = vrot.lane.b32.xlu1 %v16737_v20, %s11735_s19  ;;  %v6901_v2 = vsel %vm6896_vm14, %v6836_v16, %v10479_v21  ;;  %v6902_v44 = vsel %vm6896_vm14, %v6837_v32, %v10480_v27  ;;  %v10801_v21 = vpack.i.bf16 %v4357_v50, %v4356_v47 }
 0x376   :  { %v10488_v54 = vpop.permute.xlu0 %10487  ;;  %v6773_v13 = vsel %vm6766_vm12, %v6708_v29, %v10464_v9 }
 0x377   :  { %v10490_v55 = vunpack.i.h.bf16 %v10488_v54  ;;  %v10489_v26 = vunpack.i.l.bf16 %v10488_v54  ;;  %v10473_v53 = vpop.permute.xlu1 %10472  ;;  %v4104_v54 = vld [vmem:[#allocation2 + $0x158] sm:$0xff] }
 0x378   :  { %10777 = vrot.lane.b32.xlu0 %v16737_v20, %s11741_s18  ;;  %v10475_v40 = vunpack.i.h.bf16 %v10473_v53  ;;  %v10474_v48 = vunpack.i.l.bf16 %v10473_v53  ;;  %v6709_v20 = vsel %vm3133_vm8, %v6645_v34, %v10455_v1  ;;  %v3893_v1 = vld [vmem:[#allocation2 + $0x60] sm:$0xff] }
 0x379   :  { %v6966_v62 = vsel %vm6961_vm15, %v6901_v2, %v10489_v26  ;;  %v6967_v63 = vsel %vm6961_vm15, %v6902_v44, %v10490_v55  ;;  %10762 = vrot.lane.b32.xlu1 %v16751_v17, %s11737_s26  ;;  %v6774_v57 = vsel %vm6766_vm12, %v6709_v20, %v10465_v36  ;;  %v4103_v36 = vld [vmem:[#allocation2 + $0x150] sm:$0xff] }
 0x37a   :  { %v10498_v18 = vpop.permute.xlu0 %10497  ;;  %v7028_v31 = vpack.c.bf16 %v6967_v63, %v6966_v62  ;;  %v6838_v28 = vsel %vm6831_vm13, %v6773_v13, %v10474_v48  ;;  %v6839_v45 = vsel %vm6831_vm13, %v6774_v57, %v10475_v40  ;;  %v16818_v63 = vpack.i.bf16 %v4104_v54, %v4103_v36  ;;  %v4232_v36 = vld [vmem:[#allocation2 + $0x15a] sm:$0xff] }
 0x37b   :  { %v10500_v35 = vunpack.i.h.bf16 %v10498_v18  ;;  %v10499_v39 = vunpack.i.l.bf16 %v10498_v18  ;;  %v10483_v8 = vpop.permute.xlu1 %10482 }
 0x37c   :  { %v10485_v6 = vunpack.i.h.bf16 %v10483_v8  ;;  %v10484_v3 = vunpack.i.l.bf16 %v10483_v8  ;;  %10787 = vrot.lane.b32.xlu0 %v16751_v17, %s11742_s22  ;;  %8958 = vmatprep.mubr.msk.bf16.mxu1 %vm7101_vm0, %v7028_v31  ;;  %v3896_v31 = vld [vmem:[#allocation2 + $0x80] sm:$0xff] }
 0x37d   :  { %10772 = vrot.lane.b32.xlu1 %v10771_v0, %s11739_s29 }
 0x37e   :  { %v6903_v22 = vsel %vm6896_vm14, %v6838_v28, %v10484_v3  ;;  %v6904_v33 = vsel %vm6896_vm14, %v6839_v45, %v10485_v6  ;;  %v10508_v52 = vpop.permute.xlu0 %10507 }
 0x37f   :  { %v10493_v30 = vpop.permute.xlu1 %10492  ;;  %v6968_v37 = vsel %vm6961_vm15, %v6903_v22, %v10499_v39  ;;  %v6969_v17 = vsel %vm6961_vm15, %v6904_v33, %v10500_v35  ;;  %v10510_v59 = vunpack.i.h.bf16 %v10508_v52  ;;  %v10509_v12 = vunpack.i.l.bf16 %v10508_v52 }
 0x380   :  { %10797 = vrot.lane.b32.xlu0 %v10771_v0, %s11743_s0  ;;  %v7029_v25 = vpack.c.bf16 %v6969_v17, %v6968_v37  ;;  %v10495_v5 = vunpack.i.h.bf16 %v10493_v30  ;;  %v10494_v51 = vunpack.i.l.bf16 %v10493_v30 }
 0x381   :  { %10782 = vrot.lane.b32.xlu1 %v10781_v41, %s11741_s18 }
 0x382   :  { %8959 = vmatmul.mubr.msk.bf16.gmra.mxu1 %vm7101_vm0, %v7029_v25  ;;  %v10518_v4 = vpop.permute.xlu0 %10517  ;;  %v6519_v16 = vsel %vm2743_vm1, %v3894_v60, %v10495_v5  ;;  %v6518_v32 = vsel %vm2743_vm1, %v3893_v1, %v10494_v51 }
 0x383   :  { %v10503_v24 = vpop.permute.xlu1 %10502  ;;  %v10520_v55 = vunpack.i.h.bf16 %v10518_v4  ;;  %v10519_v26 = vunpack.i.l.bf16 %v10518_v4  ;;  %v6582_v40 = vsel %vm2873_vm4, %v6518_v32, %v10509_v12  ;;  %v6583_v48 = vsel %vm2873_vm4, %v6519_v16, %v10510_v59 }
 0x384   :  { %10807 = vrot.lane.b32.xlu0 %v10781_v41, %s11744_s4  ;;  %v10505_v7 = vunpack.i.h.bf16 %v10503_v24  ;;  %v10504_v2 = vunpack.i.l.bf16 %v10503_v24 }
 0x385   :  { %10792 = vrot.lane.b32.xlu1 %v10791_v19, %s11742_s22  ;;  %v6646_v34 = vsel %vm3003_vm6, %v6582_v40, %v10519_v26  ;;  %v6647_v18 = vsel %vm3003_vm6, %v6583_v48, %v10520_v55 }
 0x386   :  { %v10528_v43 = vpop.permute.xlu0 %10527  ;;  %v6521_v39 = vsel %vm2743_vm1, %v3896_v31, %v10505_v7  ;;  %v4297_v31 = vld [vmem:[#allocation2 + $0x170] sm:$0xff] }
 0x387   :  { %v10513_v27 = vpop.permute.xlu1 %10512  ;;  %v10530_v9 = vunpack.i.h.bf16 %v10528_v43  ;;  %v10529_v62 = vunpack.i.l.bf16 %v10528_v43 }
 0x388   :  { %10817 = vrot.lane.b32.xlu0 %v16804_v14, %s11744_s4  ;;  %v10515_v56 = vunpack.i.h.bf16 %v10513_v27  ;;  %v10514_v49 = vunpack.i.l.bf16 %v10513_v27 }
 0x389   :  { %10802 = vrot.lane.b32.xlu1 %v10801_v21, %s11743_s0  ;;  %v6710_v3 = vsel %vm3133_vm8, %v6646_v34, %v10529_v62  ;;  %v6711_v10 = vsel %vm3133_vm8, %v6647_v18, %v10530_v9 }
 0x38a   :  { %v10538_v58 = vpop.permute.xlu0 %10537  ;;  %v6585_v22 = vsel %vm2873_vm4, %v6521_v39, %v10515_v56 }
 0x38b   :  { %v16809_v23 = vpop.permute.xlu1 %10522  ;;  %v10540_v29 = vunpack.i.h.bf16 %v10538_v58  ;;  %v10539_v20 = vunpack.i.l.bf16 %v10538_v58  ;;  %v4167_v58 = vld [vmem:[#allocation2 + $0x151] sm:$0xff] }
 0x38c   :  { %10827 = vrot.lane.b32.xlu0 %v10781_v41, %s11735_s19  ;;  %v10525_v33 = vunpack.i.h.bf16 %v16809_v23  ;;  %v10524_v52 = vunpack.i.l.bf16 %v16809_v23  ;;  %v10851_v1 = vpack.i.bf16 %v4168_v46, %v4167_v58 }
 0x38d   :  { %10812 = vrot.lane.b32.xlu1 %v10771_v0, %s11733_s25  ;;  %v3895_v0 = vld [vmem:[#allocation2 + $0x78] sm:$0xff]  ;;  %v6775_v30 = vsel %vm6766_vm12, %v6710_v3, %v10539_v20  ;;  %v6776_v41 = vsel %vm6766_vm12, %v6711_v10, %v10540_v29  ;;  %v4296_v20 = vld [vmem:[#allocation2 + $0x168] sm:$0xff] }
 0x38e   :  { %v10548_v53 = vpop.permute.xlu0 %10547  ;;  %v6520_v8 = vsel %vm2743_vm1, %v3895_v0, %v10504_v2  ;;  %v6649_v59 = vsel %vm3003_vm6, %v6585_v22, %v10525_v33  ;;  %v10871_v39 = vpack.i.bf16 %v4297_v31, %v4296_v20  ;;  %v4360_v10 = vld [vmem:[#allocation2 + $0x169] sm:$0xff] }
 0x38f   :  { %v16815_v44 = vpop.permute.xlu1 %10532  ;;  %v10550_v13 = vunpack.i.h.bf16 %v10548_v53  ;;  %v10549_v57 = vunpack.i.l.bf16 %v10548_v53  ;;  %v6584_v45 = vsel %vm2873_vm4, %v6520_v8, %v10514_v49  ;;  %v4424_v8 = vld [vmem:[#allocation2 + $0x16a] sm:$0xff] }
 0x390   :  { %10837 = vrot.lane.b32.xlu0 %v10791_v19, %s11737_s26  ;;  %v10535_v37 = vunpack.i.h.bf16 %v16815_v44  ;;  %v10534_v17 = vunpack.i.l.bf16 %v16815_v44  ;;  %v6648_v23 = vsel %vm3003_vm6, %v6584_v45, %v10524_v52  ;;  %v4231_v44 = vld [vmem:[#allocation2 + $0x152] sm:$0xff] }
 0x391   :  { %10822 = vrot.lane.b32.xlu1 %v10801_v21, %s11733_s25  ;;  %v6840_v11 = vsel %vm6831_vm13, %v6775_v30, %v10549_v57  ;;  %v6841_v4 = vsel %vm6831_vm13, %v6776_v41, %v10550_v13  ;;  %v10861_v34 = vpack.i.bf16 %v4232_v36, %v4231_v44  ;;  %v4425_v13 = vld [vmem:[#allocation2 + $0x172] sm:$0xff] }
 0x392   :  { %v10558_v35 = vpop.permute.xlu0 %10557  ;;  %v6712_v54 = vsel %vm3133_vm8, %v6648_v23, %v10534_v17  ;;  %v4361_v57 = vld [vmem:[#allocation2 + $0x171] sm:$0xff]  ;;  %v16871_v3 = vpack.i.bf16 %v4425_v13, %v4424_v8  ;;  %v4172_v8 = vld [vmem:[#allocation2 + $0x189] sm:$0xff] }
 0x393   :  { %v10543_v6 = vpop.permute.xlu1 %10542  ;;  %v10560_v42 = vunpack.i.h.bf16 %v10558_v35  ;;  %v10559_v28 = vunpack.i.l.bf16 %v10558_v35  ;;  %v3898_v17 = vld [vmem:[#allocation2 + $0x98] sm:$0xff] }
 0x394   :  { %10847 = vrot.lane.b32.xlu0 %v10801_v21, %s11739_s29  ;;  %v10545_v43 = vunpack.i.h.bf16 %v10543_v6  ;;  %v10544_v47 = vunpack.i.l.bf16 %v10543_v6 }
 0x395   :  { %10832 = vrot.lane.b32.xlu1 %v16804_v14, %s11735_s19  ;;  %v6905_v38 = vsel %vm6896_vm14, %v6840_v11, %v10559_v28  ;;  %v6906_v50 = vsel %vm6896_vm14, %v6841_v4, %v10560_v42  ;;  %v10881_v28 = vpack.i.bf16 %v4361_v57, %v4360_v10 }
 0x396   :  { %v10568_v25 = vpop.permute.xlu0 %10567  ;;  %v6777_v26 = vsel %vm6766_vm12, %v6712_v54, %v10544_v47 }
 0x397   :  { %v10570_v15 = vunpack.i.h.bf16 %v10568_v25  ;;  %v10569_v24 = vunpack.i.l.bf16 %v10568_v25  ;;  %v10553_v19 = vpop.permute.xlu1 %10552  ;;  %v4108_v25 = vld [vmem:[#allocation2 + $0x188] sm:$0xff] }
 0x398   :  { %10857 = vrot.lane.b32.xlu0 %v16804_v14, %s11741_s18  ;;  %v10555_v5 = vunpack.i.h.bf16 %v10553_v19  ;;  %v10554_v51 = vunpack.i.l.bf16 %v10553_v19  ;;  %v6713_v14 = vsel %vm3133_vm8, %v6649_v59, %v10535_v37  ;;  %v3897_v37 = vld [vmem:[#allocation2 + $0x90] sm:$0xff] }
 0x399   :  { %v6970_v27 = vsel %vm6961_vm15, %v6905_v38, %v10569_v24  ;;  %v6971_v21 = vsel %vm6961_vm15, %v6906_v50, %v10570_v15  ;;  %10842 = vrot.lane.b32.xlu1 %v16818_v63, %s11737_s26  ;;  %v6778_v53 = vsel %vm6766_vm12, %v6713_v14, %v10545_v43  ;;  %v4107_v43 = vld [vmem:[#allocation2 + $0x180] sm:$0xff] }
 0x39a   :  { %v10578_v12 = vpop.permute.xlu0 %10577  ;;  %v7030_v60 = vpack.c.bf16 %v6971_v21, %v6970_v27  ;;  %v6842_v9 = vsel %vm6831_vm13, %v6777_v26, %v10554_v51  ;;  %v6843_v62 = vsel %vm6831_vm13, %v6778_v53, %v10555_v5  ;;  %v16885_v21 = vpack.i.bf16 %v4108_v25, %v4107_v43  ;;  %v4236_v43 = vld [vmem:[#allocation2 + $0x18a] sm:$0xff] }
 0x39b   :  { %v10580_v16 = vunpack.i.h.bf16 %v10578_v12  ;;  %v10579_v32 = vunpack.i.l.bf16 %v10578_v12  ;;  %v10563_v55 = vpop.permute.xlu1 %10562 }
 0x39c   :  { %v10565_v7 = vunpack.i.h.bf16 %v10563_v55  ;;  %v10564_v2 = vunpack.i.l.bf16 %v10563_v55  ;;  %10867 = vrot.lane.b32.xlu0 %v16818_v63, %s11742_s22  ;;  %8962 = vmatprep.mubr.msk.bf16.mxu1 %vm7101_vm0, %v7030_v60  ;;  %v3900_v60 = vld [vmem:[#allocation2 + $0xb0] sm:$0xff] }
 0x39d   :  { %10852 = vrot.lane.b32.xlu1 %v10851_v1, %s11739_s29 }
 0x39e   :  { %v6907_v40 = vsel %vm6896_vm14, %v6842_v9, %v10564_v2  ;;  %v6908_v48 = vsel %vm6896_vm14, %v6843_v62, %v10565_v7  ;;  %v10588_v56 = vpop.permute.xlu0 %10587 }
 0x39f   :  { %v10573_v49 = vpop.permute.xlu1 %10572  ;;  %v6972_v18 = vsel %vm6961_vm15, %v6907_v40, %v10579_v32  ;;  %v6973_v63 = vsel %vm6961_vm15, %v6908_v48, %v10580_v16  ;;  %v10590_v30 = vunpack.i.h.bf16 %v10588_v56  ;;  %v10589_v41 = vunpack.i.l.bf16 %v10588_v56 }
 0x3a0   :  { %10877 = vrot.lane.b32.xlu0 %v10851_v1, %s11743_s0  ;;  %v7031_v0 = vpack.c.bf16 %v6973_v63, %v6972_v18  ;;  %v10575_v45 = vunpack.i.h.bf16 %v10573_v49  ;;  %v10574_v22 = vunpack.i.l.bf16 %v10573_v49 }
 0x3a1   :  { %10862 = vrot.lane.b32.xlu1 %v10861_v34, %s11741_s18 }
 0x3a2   :  { %8963 = vmatmul.mubr.msk.bf16.gmra.mxu1 %vm7101_vm0, %v7031_v0  ;;  %v10598_v29 = vpop.permute.xlu0 %10597  ;;  %v6523_v11 = vsel %vm2743_vm1, %v3898_v17, %v10575_v45  ;;  %v6522_v4 = vsel %vm2743_vm1, %v3897_v37, %v10574_v22 }
 0x3a3   :  { %v10583_v35 = vpop.permute.xlu1 %10582  ;;  %v10600_v15 = vunpack.i.h.bf16 %v10598_v29  ;;  %v10599_v24 = vunpack.i.l.bf16 %v10598_v29  ;;  %v6586_v5 = vsel %vm2873_vm4, %v6522_v4, %v10589_v41  ;;  %v6587_v51 = vsel %vm2873_vm4, %v6523_v11, %v10590_v30 }
 0x3a4   :  { %10887 = vrot.lane.b32.xlu0 %v10861_v34, %s11744_s4  ;;  %v10585_v46 = vunpack.i.h.bf16 %v10583_v35  ;;  %v10584_v38 = vunpack.i.l.bf16 %v10583_v35 }
 0x3a5   :  { %10872 = vrot.lane.b32.xlu1 %v10871_v39, %s11742_s22  ;;  %v6650_v59 = vsel %vm3003_vm6, %v6586_v5, %v10599_v24  ;;  %v6651_v12 = vsel %vm3003_vm6, %v6587_v51, %v10600_v15 }
 0x3a6   :  { %v10608_v6 = vpop.permute.xlu0 %10607  ;;  %v6525_v32 = vsel %vm2743_vm1, %v3900_v60, %v10585_v46 }
 0x3a7   :  { %v10593_v42 = vpop.permute.xlu1 %10592  ;;  %v10610_v47 = vunpack.i.h.bf16 %v10608_v6  ;;  %v10609_v27 = vunpack.i.l.bf16 %v10608_v6 }
 0x3a8   :  { %10897 = vrot.lane.b32.xlu0 %v16871_v3, %s11744_s4  ;;  %v10595_v58 = vunpack.i.h.bf16 %v10593_v42  ;;  %v10594_v23 = vunpack.i.l.bf16 %v10593_v42 }
 0x3a9   :  { %10882 = vrot.lane.b32.xlu1 %v10881_v28, %s11743_s0  ;;  %v6714_v2 = vsel %vm3133_vm8, %v6650_v59, %v10609_v27  ;;  %v6715_v44 = vsel %vm3133_vm8, %v6651_v12, %v10610_v47  ;;  %v4301_v59 = vld [vmem:[#allocation2 + $0x1a0] sm:$0xff] }
 0x3aa   :  { %v10618_v33 = vpop.permute.xlu0 %10617  ;;  %v6589_v40 = vsel %vm2873_vm4, %v6525_v32, %v10595_v58  ;;  %v4429_v32 = vld [vmem:[#allocation2 + $0x1a2] sm:$0xff] }
 0x3ab   :  { %v16876_v52 = vpop.permute.xlu1 %10602  ;;  %v10620_v54 = vunpack.i.h.bf16 %v10618_v33  ;;  %v10619_v14 = vunpack.i.l.bf16 %v10618_v33  ;;  %v4171_v33 = vld [vmem:[#allocation2 + $0x181] sm:$0xff] }
 0x3ac   :  { %10907 = vrot.lane.b32.xlu0 %v10861_v34, %s11735_s19  ;;  %v10605_v48 = vunpack.i.h.bf16 %v16876_v52  ;;  %v10604_v56 = vunpack.i.l.bf16 %v16876_v52  ;;  %v10931_v37 = vpack.i.bf16 %v4172_v8, %v4171_v33  ;;  %v3984_v8 = vld [vmem:[#allocation2 + $0x1d1] sm:$0xff] }
 0x3ad   :  { %10892 = vrot.lane.b32.xlu1 %v10851_v1, %s11733_s25  ;;  %v3899_v1 = vld [vmem:[#allocation2 + $0xa8] sm:$0xff]  ;;  %v6779_v49 = vsel %vm6766_vm12, %v6714_v2, %v10619_v14  ;;  %v6780_v34 = vsel %vm6766_vm12, %v6715_v44, %v10620_v54 }
 0x3ae   :  { %v10628_v19 = vpop.permute.xlu0 %10627  ;;  %v6524_v55 = vsel %vm2743_vm1, %v3899_v1, %v10584_v38  ;;  %v6653_v30 = vsel %vm3003_vm6, %v6589_v40, %v10605_v48  ;;  %v3981_v40 = vld [vmem:[#allocation2 + $0x1b1] sm:$0xff]  ;;  %v3982_v48 = vld [vmem:[#allocation2 + $0x1b9] sm:$0xff] }
 0x3af   :  { %v16882_v50 = vpop.permute.xlu1 %10612  ;;  %v10630_v26 = vunpack.i.h.bf16 %v10628_v19  ;;  %v10629_v53 = vunpack.i.l.bf16 %v10628_v19  ;;  %v6588_v62 = vsel %vm2873_vm4, %v6524_v55, %v10594_v23  ;;  %v4300_v23 = vld [vmem:[#allocation2 + $0x198] sm:$0xff] }
 0x3b0   :  { %10917 = vrot.lane.b32.xlu0 %v10871_v39, %s11737_s26  ;;  %v10615_v18 = vunpack.i.h.bf16 %v16882_v50  ;;  %v10614_v63 = vunpack.i.l.bf16 %v16882_v50  ;;  %v6652_v52 = vsel %vm3003_vm6, %v6588_v62, %v10604_v56  ;;  %v4235_v50 = vld [vmem:[#allocation2 + $0x182] sm:$0xff]  ;;  %v10951_v14 = vpack.i.bf16 %v4301_v59, %v4300_v23 }
 0x3b1   :  { %10902 = vrot.lane.b32.xlu1 %v10881_v28, %s11733_s25  ;;  %v6844_v31 = vsel %vm6831_vm13, %v6779_v49, %v10629_v53  ;;  %v6845_v29 = vsel %vm6831_vm13, %v6780_v34, %v10630_v26  ;;  %v4364_v26 = vld [vmem:[#allocation2 + $0x199] sm:$0xff]  ;;  %v4365_v53 = vld [vmem:[#allocation2 + $0x1a1] sm:$0xff]  ;;  %v10971_v34 = vpack.i.bf16 %v3982_v48, %v3981_v40 }
 0x3b2   :  { %v10638_v16 = vpop.permute.xlu0 %10637  ;;  %v6716_v25 = vsel %vm3133_vm8, %v6652_v52, %v10614_v63  ;;  %v10961_v44 = vpack.i.bf16 %v4365_v53, %v4364_v26 }
 0x3b3   :  { %v10623_v7 = vpop.permute.xlu1 %10622  ;;  %v10640_v36 = vunpack.i.h.bf16 %v10638_v16  ;;  %v10639_v9 = vunpack.i.l.bf16 %v10638_v16  ;;  %v4428_v16 = vld [vmem:[#allocation2 + $0x19a] sm:$0xff] }
 0x3b4   :  { %10927 = vrot.lane.b32.xlu0 %v10881_v28, %s11739_s29  ;;  %v10625_v6 = vunpack.i.h.bf16 %v10623_v7  ;;  %v10624_v10 = vunpack.i.l.bf16 %v10623_v7  ;;  %v10976_v2 = vpack.i.bf16 %v4429_v32, %v4428_v16 }
 0x3b5   :  { %10912 = vrot.lane.b32.xlu1 %v16871_v3, %s11735_s19  ;;  %v6909_v13 = vsel %vm6896_vm14, %v6844_v31, %v10639_v9  ;;  %v6910_v57 = vsel %vm6896_vm14, %v6845_v29, %v10640_v36  ;;  %v4045_v36 = vld [vmem:[#allocation2 + $0x1b2] sm:$0xff]  ;;  %v4046_v9 = vld [vmem:[#allocation2 + $0x1ba] sm:$0xff] }
 0x3b6   :  { %v10648_v0 = vpop.permute.xlu0 %10647  ;;  %v6781_v24 = vsel %vm6766_vm12, %v6716_v25, %v10624_v10  ;;  %v10986_v49 = vpack.i.bf16 %v4046_v9, %v4045_v36  ;;  %v4110_v31 = vld [vmem:[#allocation2 + $0x1d0] sm:$0xff]  ;;  %v3901_v29 = vld [vmem:[#allocation2 + $0xc0] sm:$0xff] }
 0x3b7   :  { %v10650_v20 = vunpack.i.h.bf16 %v10648_v0  ;;  %v10649_v35 = vunpack.i.l.bf16 %v10648_v0  ;;  %v10633_v39 = vpop.permute.xlu1 %10632  ;;  %v4047_v10 = vld [vmem:[#allocation2 + $0x1ca] sm:$0xff] }
 0x3b8   :  { %10937 = vrot.lane.b32.xlu0 %v16871_v3, %s11741_s18  ;;  %v10635_v45 = vunpack.i.h.bf16 %v10633_v39  ;;  %v10634_v22 = vunpack.i.l.bf16 %v10633_v39  ;;  %v6717_v3 = vsel %vm3133_vm8, %v6653_v30, %v10615_v18  ;;  %v4109_v39 = vld [vmem:[#allocation2 + $0x1c8] sm:$0xff] }
 0x3b9   :  { %v6974_v42 = vsel %vm6961_vm15, %v6909_v13, %v10649_v35  ;;  %v6975_v28 = vsel %vm6961_vm15, %v6910_v57, %v10650_v20  ;;  %10922 = vrot.lane.b32.xlu1 %v16885_v21, %s11737_s26  ;;  %v6782_v19 = vsel %vm6766_vm12, %v6717_v3, %v10625_v6  ;;  %v3902_v35 = vld [vmem:[#allocation2 + $0xc8] sm:$0xff]  ;;  %v10996_v6 = vpack.i.bf16 %v4110_v31, %v4109_v39 }
 0x3ba   :  { %v10658_v41 = vpop.permute.xlu0 %10657  ;;  %v7032_v17 = vpack.c.bf16 %v6975_v28, %v6974_v42  ;;  %v6846_v47 = vsel %vm6831_vm13, %v6781_v24, %v10634_v22  ;;  %v6847_v27 = vsel %vm6831_vm13, %v6782_v19, %v10635_v45  ;;  %v4048_v42 = vld [vmem:[#allocation2 + $0x1d2] sm:$0xff]  ;;  %v4112_v28 = vld [vmem:[#allocation2 + $0x1e8] sm:$0xff] }
 0x3bb   :  { %v10660_v11 = vunpack.i.h.bf16 %v10658_v41  ;;  %v10659_v4 = vunpack.i.l.bf16 %v10658_v41  ;;  %v10643_v15 = vpop.permute.xlu1 %10642  ;;  %v3983_v41 = vld [vmem:[#allocation2 + $0x1c9] sm:$0xff]  ;;  %v10991_v24 = vpack.i.bf16 %v4048_v42, %v4047_v10 }
 0x3bc   :  { %v10645_v46 = vunpack.i.h.bf16 %v10643_v15  ;;  %v10644_v38 = vunpack.i.l.bf16 %v10643_v15  ;;  %10947 = vrot.lane.b32.xlu0 %v16885_v21, %s11742_s22  ;;  %8966 = vmatprep.mubr.msk.bf16.mxu1 %vm7101_vm0, %v7032_v17  ;;  %v10941_v21 = vpack.i.bf16 %v4236_v43, %v4235_v50  ;;  %v10981_v3 = vpack.i.bf16 %v3984_v8, %v3983_v41 }
 0x3bd   :  { %10932 = vrot.lane.b32.xlu1 %v10931_v37, %s11739_s29 }
 0x3be   :  { %v6911_v5 = vsel %vm6896_vm14, %v6846_v47, %v10644_v38  ;;  %v6912_v51 = vsel %vm6896_vm14, %v6847_v27, %v10645_v46  ;;  %v16931_v58 = vpop.permute.xlu0 %10667 }
 0x3bf   :  { %v10653_v12 = vpop.permute.xlu1 %10652  ;;  %v6976_v1 = vsel %vm6961_vm15, %v6911_v5, %v10659_v4  ;;  %v6977_v60 = vsel %vm6961_vm15, %v6912_v51, %v10660_v11  ;;  %v10670_v13 = vunpack.i.h.bf16 %v16931_v58  ;;  %v10669_v57 = vunpack.i.l.bf16 %v16931_v58  ;;  %v4111_v11 = vld [vmem:[#allocation2 + $0x1e0] sm:$0xff]  ;;  %v3903_v5 = vld [vmem:[#allocation2 + $0xd8] sm:$0xff] }
 0x3c0   :  { %10957 = vrot.lane.b32.xlu0 %v10931_v37, %s11743_s0  ;;  %v7033_v54 = vpack.c.bf16 %v6977_v60, %v6976_v1  ;;  %v10655_v18 = vunpack.i.h.bf16 %v10653_v12  ;;  %v10654_v63 = vunpack.i.l.bf16 %v10653_v12  ;;  %v16959_v19 = vpack.i.bf16 %v4112_v28, %v4111_v11  ;;  %v3904_v51 = vld [vmem:[#allocation2 + $0xe0] sm:$0xff] }
 0x3c1   :  { %10942 = vrot.lane.b32.xlu1 %v10941_v21, %s11741_s18  ;;  %v4239_v11 = vld [vmem:[#allocation2 + $0x1e2] sm:$0xff] }
 0x3c2   :  { %8967 = vmatmul.mubr.msk.bf16.gmra.mxu1 %vm7101_vm0, %v7033_v54  ;;  %v10678_v55 = vpop.permute.xlu0 %10677  ;;  %v6527_v45 = vsel %vm2743_vm1, %v3902_v35, %v10655_v18  ;;  %v6526_v22 = vsel %vm2743_vm1, %v3901_v29, %v10654_v63  ;;  %v4176_v63 = vld [vmem:[#allocation2 + $0x1e9] sm:$0xff] }
 0x3c3   :  { %v16938_v7 = vpop.permute.xlu1 %10662  ;;  %v10680_v33 = vunpack.i.h.bf16 %v10678_v55  ;;  %v10679_v52 = vunpack.i.l.bf16 %v10678_v55  ;;  %v6590_v46 = vsel %vm2873_vm4, %v6526_v22, %v10669_v57  ;;  %v6591_v38 = vsel %vm2873_vm4, %v6527_v45, %v10670_v13  ;;  %v4175_v57 = vld [vmem:[#allocation2 + $0x1e1] sm:$0xff] }
 0x3c4   :  { %10967 = vrot.lane.b32.xlu0 %v10941_v21, %s11744_s4  ;;  %v10665_v37 = vunpack.i.h.bf16 %v16938_v7  ;;  %v10664_v17 = vunpack.i.l.bf16 %v16938_v7  ;;  %v11011_v28 = vpack.i.bf16 %v4176_v63, %v4175_v57 }
 0x3c5   :  { %10952 = vrot.lane.b32.xlu1 %v10951_v14, %s11742_s22  ;;  %v6654_v47 = vsel %vm3003_vm6, %v6590_v46, %v10679_v52  ;;  %v6655_v27 = vsel %vm3003_vm6, %v6591_v38, %v10680_v33 }
 0x3c6   :  { %v10688_v62 = vpop.permute.xlu0 %10687  ;;  %v6529_v12 = vsel %vm2743_vm1, %v3904_v51, %v10665_v37  ;;  %v6528_v21 = vsel %vm2743_vm1, %v3903_v5, %v10664_v17  ;;  %v4305_v51 = vld [vmem:[#allocation2 + $0x200] sm:$0xff] }
 0x3c7   :  { %v16942_v56 = vpop.permute.xlu1 %10672  ;;  %v10690_v4 = vunpack.i.h.bf16 %v10688_v62  ;;  %v10689_v15 = vunpack.i.l.bf16 %v10688_v62 }
 0x3c8   :  { %10977 = vrot.lane.b32.xlu0 %v10976_v2, %s11744_s4  ;;  %v10675_v50 = vunpack.i.h.bf16 %v16942_v56  ;;  %v10674_v43 = vunpack.i.l.bf16 %v16942_v56 }
 0x3c9   :  { %10962 = vrot.lane.b32.xlu1 %v10961_v44, %s11743_s0  ;;  %v6718_v14 = vsel %vm3133_vm8, %v6654_v47, %v10689_v15  ;;  %v6719_v16 = vsel %vm3133_vm8, %v6655_v27, %v10690_v4  ;;  %v4240_v4 = vld [vmem:[#allocation2 + $0x1ea] sm:$0xff] }
 0x3ca   :  { %v10698_v0 = vpop.permute.xlu0 %10697  ;;  %v6592_v26 = vsel %vm2873_vm4, %v6528_v21, %v10674_v43  ;;  %v6593_v53 = vsel %vm2873_vm4, %v6529_v12, %v10675_v50  ;;  %v11021_v47 = vpack.i.bf16 %v4240_v4, %v4239_v11  ;;  %v4432_v21 = vld [vmem:[#allocation2 + $0x1fa] sm:$0xff] }
 0x3cb   :  { %v16946_v20 = vpop.permute.xlu1 %10682  ;;  %v10700_v58 = vunpack.i.h.bf16 %v10698_v0  ;;  %v10699_v23 = vunpack.i.l.bf16 %v10698_v0 }
 0x3cc   :  { %10987 = vrot.lane.b32.xlu0 %v10986_v49, %s11735_s19  ;;  %v10685_v7 = vunpack.i.h.bf16 %v16946_v20  ;;  %v10684_v2 = vunpack.i.l.bf16 %v16946_v20 }
 0x3cd   :  { %10972 = vrot.lane.b32.xlu1 %v10971_v34, %s11733_s25  ;;  %v6783_v44 = vsel %vm6766_vm12, %v6718_v14, %v10699_v23  ;;  %v6784_v36 = vsel %vm6766_vm12, %v6719_v16, %v10700_v58  ;;  %v4304_v23 = vld [vmem:[#allocation2 + $0x1f8] sm:$0xff] }
 0x3ce   :  { %v10708_v30 = vpop.permute.xlu0 %10707  ;;  %v6657_v10 = vsel %vm3003_vm6, %v6593_v53, %v10685_v7  ;;  %v11031_v12 = vpack.i.bf16 %v4305_v51, %v4304_v23  ;;  %v4368_v16 = vld [vmem:[#allocation2 + $0x1f9] sm:$0xff] }
 0x3cf   :  { %v16956_v25 = vpop.permute.xlu1 %10692  ;;  %v10710_v1 = vunpack.i.h.bf16 %v10708_v30  ;;  %v10709_v60 = vunpack.i.l.bf16 %v10708_v30 }
 0x3d0   :  { %10997 = vrot.lane.b32.xlu0 %v10996_v6, %s11737_s26  ;;  %v10695_v9 = vunpack.i.h.bf16 %v16956_v25  ;;  %v10694_v62 = vunpack.i.l.bf16 %v16956_v25  ;;  %v6656_v6 = vsel %vm3003_vm6, %v6592_v26, %v10684_v2 }
 0x3d1   :  { %10982 = vrot.lane.b32.xlu1 %v10981_v3, %s11733_s25  ;;  %v6848_v48 = vsel %vm6831_vm13, %v6783_v44, %v10709_v60  ;;  %v6849_v56 = vsel %vm6831_vm13, %v6784_v36, %v10710_v1  ;;  %v4433_v1 = vld [vmem:[#allocation2 + $0x202] sm:$0xff] }
 0x3d2   :  { %v10718_v59 = vpop.permute.xlu0 %10717  ;;  %v6720_v22 = vsel %vm3133_vm8, %v6656_v6, %v10694_v62  ;;  %v6721_v33 = vsel %vm3133_vm8, %v6657_v10, %v10695_v9  ;;  %v4369_v60 = vld [vmem:[#allocation2 + $0x201] sm:$0xff]  ;;  %v17012_v14 = vpack.i.bf16 %v4433_v1, %v4432_v21  ;;  %v3905_v9 = vld [vmem:[#allocation2 + $0xf0] sm:$0xff]  ;;  %v3906_v62 = vld [vmem:[#allocation2 + $0xf8] sm:$0xff] }
 0x3d3   :  { %v10703_v54 = vpop.permute.xlu1 %10702  ;;  %v10720_v32 = vunpack.i.h.bf16 %v10718_v59  ;;  %v10719_v55 = vunpack.i.l.bf16 %v10718_v59  ;;  %v4180_v21 = vld [vmem:[#allocation2 + $0x219] sm:$0xff] }
 0x3d4   :  { %11007 = vrot.lane.b32.xlu0 %v10981_v3, %s11739_s29  ;;  %v10705_v29 = vunpack.i.h.bf16 %v10703_v54  ;;  %v10704_v20 = vunpack.i.l.bf16 %v10703_v54 }
 0x3d5   :  { %10992 = vrot.lane.b32.xlu1 %v10991_v24, %s11735_s19  ;;  %v6913_v0 = vsel %vm6896_vm14, %v6848_v48, %v10719_v55  ;;  %v6914_v31 = vsel %vm6896_vm14, %v6849_v56, %v10720_v32  ;;  %v11041_v55 = vpack.i.bf16 %v4369_v60, %v4368_v16 }
 0x3d6   :  { %v10728_v40 = vpop.permute.xlu0 %10727  ;;  %v6785_v37 = vsel %vm6766_vm12, %v6720_v22, %v10704_v20  ;;  %v6786_v17 = vsel %vm6766_vm12, %v6721_v33, %v10705_v29  ;;  %v4115_v29 = vld [vmem:[#allocation2 + $0x210] sm:$0xff] }
 0x3d7   :  { %v10730_v49 = vunpack.i.h.bf16 %v10728_v40  ;;  %v10729_v34 = vunpack.i.l.bf16 %v10728_v40  ;;  %v10713_v18 = vpop.permute.xlu1 %10712  ;;  %v4116_v40 = vld [vmem:[#allocation2 + $0x218] sm:$0xff] }
 0x3d8   :  { %11017 = vrot.lane.b32.xlu0 %v10991_v24, %s11741_s18  ;;  %v10715_v8 = vunpack.i.h.bf16 %v10713_v18  ;;  %v10714_v13 = vunpack.i.l.bf16 %v10713_v18 }
 0x3d9   :  { %v6978_v35 = vsel %vm6961_vm15, %v6913_v0, %v10729_v34  ;;  %v6979_v39 = vsel %vm6961_vm15, %v6914_v31, %v10730_v49  ;;  %11002 = vrot.lane.b32.xlu1 %v16959_v19, %s11737_s26 }
 0x3da   :  { %v10738_v42 = vpop.permute.xlu0 %10737  ;;  %v7034_v45 = vpack.c.bf16 %v6979_v39, %v6978_v35  ;;  %v6850_v15 = vsel %vm6831_vm13, %v6785_v37, %v10714_v13  ;;  %v6851_v24 = vsel %vm6831_vm13, %v6786_v17, %v10715_v8  ;;  %v17026_v39 = vpack.i.bf16 %v4116_v40, %v4115_v29  ;;  %v4244_v29 = vld [vmem:[#allocation2 + $0x21a] sm:$0xff] }
 0x3db   :  { %v10740_v52 = vunpack.i.h.bf16 %v10738_v42  ;;  %v10739_v30 = vunpack.i.l.bf16 %v10738_v42  ;;  %v10723_v41 = vpop.permute.xlu1 %10722 }
 0x3dc   :  { %v10725_v25 = vunpack.i.h.bf16 %v10723_v41  ;;  %v10724_v3 = vunpack.i.l.bf16 %v10723_v41  ;;  %11027 = vrot.lane.b32.xlu0 %v16959_v19, %s11742_s22  ;;  %8970 = vmatprep.mubr.msk.bf16.mxu1 %vm7101_vm0, %v7034_v45  ;;  %v3908_v45 = vld [vmem:[#allocation2 + $0x110] sm:$0xff] }
 0x3dd   :  { %11012 = vrot.lane.b32.xlu1 %v11011_v28, %s11739_s29 }
 0x3de   :  { %v6915_v46 = vsel %vm6896_vm14, %v6850_v15, %v10724_v3  ;;  %v6916_v38 = vsel %vm6896_vm14, %v6851_v24, %v10725_v25  ;;  %v10748_v50 = vpop.permute.xlu0 %10747 }
 0x3df   :  { %v10733_v43 = vpop.permute.xlu1 %10732  ;;  %v6980_v27 = vsel %vm6961_vm15, %v6915_v46, %v10739_v30  ;;  %v6981_v19 = vsel %vm6961_vm15, %v6916_v38, %v10740_v52  ;;  %v10750_v44 = vunpack.i.h.bf16 %v10748_v50  ;;  %v10749_v36 = vunpack.i.l.bf16 %v10748_v50 }
 0x3e0   :  { %11037 = vrot.lane.b32.xlu0 %v11011_v28, %s11743_s0  ;;  %v7035_v5 = vpack.c.bf16 %v6981_v19, %v6980_v27  ;;  %v10735_v26 = vunpack.i.h.bf16 %v10733_v43  ;;  %v10734_v53 = vunpack.i.l.bf16 %v10733_v43 }
 0x3e1   :  { %11022 = vrot.lane.b32.xlu1 %v11021_v47, %s11741_s18 }
 0x3e2   :  { %8971 = vmatmul.mubr.msk.bf16.gmra.mxu1 %vm7101_vm0, %v7035_v5  ;;  %v10758_v58 = vpop.permute.xlu0 %10757  ;;  %v6531_v48 = vsel %vm2743_vm1, %v3906_v62, %v10735_v26  ;;  %v6530_v56 = vsel %vm2743_vm1, %v3905_v9, %v10734_v53 }
 0x3e3   :  { %v10743_v59 = vpop.permute.xlu1 %10742  ;;  %v10760_v49 = vunpack.i.h.bf16 %v10758_v58  ;;  %v10759_v34 = vunpack.i.l.bf16 %v10758_v58  ;;  %v6594_v8 = vsel %vm2873_vm4, %v6530_v56, %v10749_v36  ;;  %v6595_v13 = vsel %vm2873_vm4, %v6531_v48, %v10750_v44 }
 0x3e4   :  { %11047 = vrot.lane.b32.xlu0 %v11021_v47, %s11744_s4  ;;  %v10745_v63 = vunpack.i.h.bf16 %v10743_v59  ;;  %v10744_v0 = vunpack.i.l.bf16 %v10743_v59 }
 0x3e5   :  { %11032 = vrot.lane.b32.xlu1 %v11031_v12, %s11742_s22  ;;  %v6658_v10 = vsel %vm3003_vm6, %v6594_v8, %v10759_v34  ;;  %v6659_v42 = vsel %vm3003_vm6, %v6595_v13, %v10760_v49 }
 0x3e6   :  { %v10768_v54 = vpop.permute.xlu0 %10767  ;;  %v6533_v30 = vsel %vm2743_vm1, %v3908_v45, %v10745_v63  ;;  %v4309_v45 = vld [vmem:[#allocation2 + $0x230] sm:$0xff] }
 0x3e7   :  { %v10753_v32 = vpop.permute.xlu1 %10752  ;;  %v10770_v20 = vunpack.i.h.bf16 %v10768_v54  ;;  %v10769_v35 = vunpack.i.l.bf16 %v10768_v54 }
 0x3e8   :  { %11057 = vrot.lane.b32.xlu0 %v17012_v14, %s11744_s4  ;;  %v10755_v57 = vunpack.i.h.bf16 %v10753_v32  ;;  %v10754_v6 = vunpack.i.l.bf16 %v10753_v32 }
 0x3e9   :  { %11042 = vrot.lane.b32.xlu1 %v11041_v55, %s11743_s0  ;;  %v6722_v3 = vsel %vm3133_vm8, %v6658_v10, %v10769_v35  ;;  %v6723_v11 = vsel %vm3133_vm8, %v6659_v42, %v10770_v20 }
 0x3ea   :  { %v10778_v7 = vpop.permute.xlu0 %10777  ;;  %v6597_v46 = vsel %vm2873_vm4, %v6533_v30, %v10755_v57 }
 0x3eb   :  { %v17017_v2 = vpop.permute.xlu1 %10762  ;;  %v10780_v22 = vunpack.i.h.bf16 %v10778_v7  ;;  %v10779_v33 = vunpack.i.l.bf16 %v10778_v7  ;;  %v4179_v7 = vld [vmem:[#allocation2 + $0x211] sm:$0xff] }
 0x3ec   :  { %11067 = vrot.lane.b32.xlu0 %v11021_v47, %s11735_s19  ;;  %v10765_v38 = vunpack.i.h.bf16 %v17017_v2  ;;  %v10764_v50 = vunpack.i.l.bf16 %v17017_v2  ;;  %v11091_v9 = vpack.i.bf16 %v4180_v21, %v4179_v7 }
 0x3ed   :  { %11052 = vrot.lane.b32.xlu1 %v11011_v28, %s11733_s25  ;;  %v3907_v28 = vld [vmem:[#allocation2 + $0x108] sm:$0xff]  ;;  %v6787_v43 = vsel %vm6766_vm12, %v6722_v3, %v10779_v33  ;;  %v6788_v47 = vsel %vm6766_vm12, %v6723_v11, %v10780_v22 }
 0x3ee   :  { %v10788_v18 = vpop.permute.xlu0 %10787  ;;  %v6532_v41 = vsel %vm2743_vm1, %v3907_v28, %v10744_v0  ;;  %v6661_v44 = vsel %vm3003_vm6, %v6597_v46, %v10765_v38  ;;  %v4308_v33 = vld [vmem:[#allocation2 + $0x228] sm:$0xff] }
 0x3ef   :  { %v17023_v31 = vpop.permute.xlu1 %10772  ;;  %v10790_v37 = vunpack.i.h.bf16 %v10788_v18  ;;  %v10789_v17 = vunpack.i.l.bf16 %v10788_v18  ;;  %v6596_v24 = vsel %vm2873_vm4, %v6532_v41, %v10754_v6  ;;  %v11111_v30 = vpack.i.bf16 %v4309_v45, %v4308_v33  ;;  %v4436_v41 = vld [vmem:[#allocation2 + $0x22a] sm:$0xff] }
 0x3f0   :  { %11077 = vrot.lane.b32.xlu0 %v11031_v12, %s11737_s26  ;;  %v10775_v27 = vunpack.i.h.bf16 %v17023_v31  ;;  %v10774_v19 = vunpack.i.l.bf16 %v17023_v31  ;;  %v6660_v2 = vsel %vm3003_vm6, %v6596_v24, %v10764_v50  ;;  %v4243_v31 = vld [vmem:[#allocation2 + $0x212] sm:$0xff]  ;;  %v4372_v11 = vld [vmem:[#allocation2 + $0x229] sm:$0xff] }
 0x3f1   :  { %11062 = vrot.lane.b32.xlu1 %v11041_v55, %s11733_s25  ;;  %v6852_v51 = vsel %vm6831_vm13, %v6787_v43, %v10789_v17  ;;  %v6853_v58 = vsel %vm6831_vm13, %v6788_v47, %v10790_v37  ;;  %v11101_v10 = vpack.i.bf16 %v4244_v29, %v4243_v31  ;;  %v4437_v37 = vld [vmem:[#allocation2 + $0x232] sm:$0xff] }
 0x3f2   :  { %v10798_v52 = vpop.permute.xlu0 %10797  ;;  %v6724_v40 = vsel %vm3133_vm8, %v6660_v2, %v10774_v19  ;;  %v4373_v17 = vld [vmem:[#allocation2 + $0x231] sm:$0xff]  ;;  %v17079_v3 = vpack.i.bf16 %v4437_v37, %v4436_v41  ;;  %v3910_v19 = vld [vmem:[#allocation2 + $0x128] sm:$0xff] }
 0x3f3   :  { %v10783_v25 = vpop.permute.xlu1 %10782  ;;  %v10800_v4 = vunpack.i.h.bf16 %v10798_v52  ;;  %v10799_v15 = vunpack.i.l.bf16 %v10798_v52  ;;  %v4184_v41 = vld [vmem:[#allocation2 + $0x249] sm:$0xff] }
 0x3f4   :  { %11087 = vrot.lane.b32.xlu0 %v11041_v55, %s11739_s29  ;;  %v10785_v54 = vunpack.i.h.bf16 %v10783_v25  ;;  %v10784_v16 = vunpack.i.l.bf16 %v10783_v25 }
 0x3f5   :  { %11072 = vrot.lane.b32.xlu1 %v17012_v14, %s11735_s19  ;;  %v6917_v1 = vsel %vm6896_vm14, %v6852_v51, %v10799_v15  ;;  %v6918_v60 = vsel %vm6896_vm14, %v6853_v58, %v10800_v4  ;;  %v11121_v15 = vpack.i.bf16 %v4373_v17, %v4372_v11 }
 0x3f6   :  { %v10808_v5 = vpop.permute.xlu0 %10807  ;;  %v6789_v34 = vsel %vm6766_vm12, %v6724_v40, %v10784_v16 }
 0x3f7   :  { %v10810_v23 = vunpack.i.h.bf16 %v10808_v5  ;;  %v10809_v59 = vunpack.i.l.bf16 %v10808_v5  ;;  %v10793_v12 = vpop.permute.xlu1 %10792  ;;  %v4120_v5 = vld [vmem:[#allocation2 + $0x248] sm:$0xff] }
 0x3f8   :  { %11097 = vrot.lane.b32.xlu0 %v17012_v14, %s11741_s18  ;;  %v10795_v26 = vunpack.i.h.bf16 %v10793_v12  ;;  %v10794_v53 = vunpack.i.l.bf16 %v10793_v12  ;;  %v6725_v14 = vsel %vm3133_vm8, %v6661_v44, %v10775_v27  ;;  %v3909_v27 = vld [vmem:[#allocation2 + $0x120] sm:$0xff] }
 0x3f9   :  { %v6982_v32 = vsel %vm6961_vm15, %v6917_v1, %v10809_v59  ;;  %v6983_v55 = vsel %vm6961_vm15, %v6918_v60, %v10810_v23  ;;  %11082 = vrot.lane.b32.xlu1 %v17026_v39, %s11737_s26  ;;  %v6790_v18 = vsel %vm6766_vm12, %v6725_v14, %v10785_v54  ;;  %v4119_v54 = vld [vmem:[#allocation2 + $0x240] sm:$0xff] }
 0x3fa   :  { %v10818_v36 = vpop.permute.xlu0 %10817  ;;  %v7036_v62 = vpack.c.bf16 %v6983_v55, %v6982_v32  ;;  %v6854_v20 = vsel %vm6831_vm13, %v6789_v34, %v10794_v53  ;;  %v6855_v35 = vsel %vm6831_vm13, %v6790_v18, %v10795_v26  ;;  %v17093_v55 = vpack.i.bf16 %v4120_v5, %v4119_v54  ;;  %v4248_v54 = vld [vmem:[#allocation2 + $0x24a] sm:$0xff] }
 0x3fb   :  { %v10820_v48 = vunpack.i.h.bf16 %v10818_v36  ;;  %v10819_v56 = vunpack.i.l.bf16 %v10818_v36  ;;  %v10803_v49 = vpop.permute.xlu1 %10802 }
 0x3fc   :  { %v10805_v63 = vunpack.i.h.bf16 %v10803_v49  ;;  %v10804_v0 = vunpack.i.l.bf16 %v10803_v49  ;;  %11107 = vrot.lane.b32.xlu0 %v17026_v39, %s11742_s22  ;;  %8974 = vmatprep.mubr.msk.bf16.mxu1 %vm7101_vm0, %v7036_v62  ;;  %v3912_v62 = vld [vmem:[#allocation2 + $0x140] sm:$0xff] }
 0x3fd   :  { %11092 = vrot.lane.b32.xlu1 %v11091_v9, %s11739_s29 }
 0x3fe   :  { %v6919_v8 = vsel %vm6896_vm14, %v6854_v20, %v10804_v0  ;;  %v6920_v13 = vsel %vm6896_vm14, %v6855_v35, %v10805_v63  ;;  %v10828_v57 = vpop.permute.xlu0 %10827 }
 0x3ff   :  { %v10813_v6 = vpop.permute.xlu1 %10812  ;;  %v6984_v42 = vsel %vm6961_vm15, %v6919_v8, %v10819_v56  ;;  %v6985_v39 = vsel %vm6961_vm15, %v6920_v13, %v10820_v48  ;;  %v10830_v43 = vunpack.i.h.bf16 %v10828_v57  ;;  %v10829_v47 = vunpack.i.l.bf16 %v10828_v57 }
 0x400   :  { %11117 = vrot.lane.b32.xlu0 %v11091_v9, %s11743_s0  ;;  %v7037_v28 = vpack.c.bf16 %v6985_v39, %v6984_v42  ;;  %v10815_v24 = vunpack.i.h.bf16 %v10813_v6  ;;  %v10814_v46 = vunpack.i.l.bf16 %v10813_v6 }
 0x401   :  { %11102 = vrot.lane.b32.xlu1 %v11101_v10, %s11741_s18 }
 0x402   :  { %8975 = vmatmul.mubr.msk.bf16.gmra.mxu1 %vm7101_vm0, %v7037_v28  ;;  %v10838_v22 = vpop.permute.xlu0 %10837  ;;  %v6535_v51 = vsel %vm2743_vm1, %v3910_v19, %v10815_v24  ;;  %v6534_v58 = vsel %vm2743_vm1, %v3909_v27, %v10814_v46 }
 0x403   :  { %v10823_v52 = vpop.permute.xlu1 %10822  ;;  %v10840_v23 = vunpack.i.h.bf16 %v10838_v22  ;;  %v10839_v59 = vunpack.i.l.bf16 %v10838_v22  ;;  %v6598_v26 = vsel %vm2873_vm4, %v6534_v58, %v10829_v47  ;;  %v6599_v53 = vsel %vm2873_vm4, %v6535_v51, %v10830_v43 }
 0x404   :  { %11127 = vrot.lane.b32.xlu0 %v11101_v10, %s11744_s4  ;;  %v10825_v21 = vunpack.i.h.bf16 %v10823_v52  ;;  %v10824_v1 = vunpack.i.l.bf16 %v10823_v52 }
 0x405   :  { %11112 = vrot.lane.b32.xlu1 %v11111_v30, %s11742_s22  ;;  %v6662_v44 = vsel %vm3003_vm6, %v6598_v26, %v10839_v59  ;;  %v6663_v36 = vsel %vm3003_vm6, %v6599_v53, %v10840_v23 }
 0x406   :  { %v10848_v25 = vpop.permute.xlu0 %10847  ;;  %v6537_v56 = vsel %vm2743_vm1, %v3912_v62, %v10825_v21  ;;  %v4313_v62 = vld [vmem:[#allocation2 + $0x260] sm:$0xff] }
 0x407   :  { %v10833_v4 = vpop.permute.xlu1 %10832  ;;  %v10850_v16 = vunpack.i.h.bf16 %v10848_v25  ;;  %v10849_v32 = vunpack.i.l.bf16 %v10848_v25 }
 0x408   :  { %11137 = vrot.lane.b32.xlu0 %v17079_v3, %s11744_s4  ;;  %v10835_v7 = vunpack.i.h.bf16 %v10833_v4  ;;  %v10834_v2 = vunpack.i.l.bf16 %v10833_v4 }
 0x409   :  { %11122 = vrot.lane.b32.xlu1 %v11121_v15, %s11743_s0  ;;  %v6726_v0 = vsel %vm3133_vm8, %v6662_v44, %v10849_v32  ;;  %v6727_v31 = vsel %vm3133_vm8, %v6663_v36, %v10850_v16 }
 0x40a   :  { %v10858_v38 = vpop.permute.xlu0 %10857  ;;  %v6601_v8 = vsel %vm2873_vm4, %v6537_v56, %v10835_v7 }
 0x40b   :  { %v17084_v50 = vpop.permute.xlu1 %10842  ;;  %v10860_v40 = vunpack.i.h.bf16 %v10858_v38  ;;  %v10859_v14 = vunpack.i.l.bf16 %v10858_v38  ;;  %v4183_v38 = vld [vmem:[#allocation2 + $0x241] sm:$0xff] }
 0x40c   :  { %11147 = vrot.lane.b32.xlu0 %v11101_v10, %s11735_s19  ;;  %v10845_v13 = vunpack.i.h.bf16 %v17084_v50  ;;  %v10844_v57 = vunpack.i.l.bf16 %v17084_v50  ;;  %v17127_v27 = vpack.i.bf16 %v4184_v41, %v4183_v38  ;;  %v3913_v41 = vld [vmem:[#allocation2 + $0x150] sm:$0xff] }
 0x40d   :  { %11132 = vrot.lane.b32.xlu1 %v11091_v9, %s11733_s25  ;;  %v3911_v9 = vld [vmem:[#allocation2 + $0x138] sm:$0xff]  ;;  %v6791_v6 = vsel %vm6766_vm12, %v6726_v0, %v10859_v14  ;;  %v6792_v10 = vsel %vm6766_vm12, %v6727_v31, %v10860_v40  ;;  %v4377_v31 = vld [vmem:[#allocation2 + $0x261] sm:$0xff] }
 0x40e   :  { %v10868_v12 = vpop.permute.xlu0 %10867  ;;  %v6536_v49 = vsel %vm2743_vm1, %v3911_v9, %v10824_v1  ;;  %v6665_v43 = vsel %vm3003_vm6, %v6601_v8, %v10845_v13  ;;  %v4376_v13 = vld [vmem:[#allocation2 + $0x259] sm:$0xff] }
 0x40f   :  { %v17090_v60 = vpop.permute.xlu1 %10852  ;;  %v10870_v34 = vunpack.i.h.bf16 %v10868_v12  ;;  %v10869_v18 = vunpack.i.l.bf16 %v10868_v12  ;;  %v6600_v35 = vsel %vm2873_vm4, %v6536_v49, %v10834_v2 }
 0x410   :  { %11157 = vrot.lane.b32.xlu0 %v11111_v30, %s11737_s26  ;;  %v10855_v42 = vunpack.i.h.bf16 %v17090_v60  ;;  %v10854_v39 = vunpack.i.l.bf16 %v17090_v60  ;;  %v6664_v50 = vsel %vm3003_vm6, %v6600_v35, %v10844_v57  ;;  %v4247_v60 = vld [vmem:[#allocation2 + $0x242] sm:$0xff] }
 0x411   :  { %11142 = vrot.lane.b32.xlu1 %v11121_v15, %s11733_s25  ;;  %v6856_v45 = vsel %vm6831_vm13, %v6791_v6, %v10869_v18  ;;  %v6857_v22 = vsel %vm6831_vm13, %v6792_v10, %v10870_v34  ;;  %v11181_v44 = vpack.i.bf16 %v4248_v54, %v4247_v60  ;;  %v4440_v34 = vld [vmem:[#allocation2 + $0x25a] sm:$0xff]  ;;  %v4441_v18 = vld [vmem:[#allocation2 + $0x262] sm:$0xff]  ;;  %v11201_v10 = vpack.i.bf16 %v4377_v31, %v4376_v13 }
 0x412   :  { %v10878_v48 = vpop.permute.xlu0 %10877  ;;  %v6729_v5 = vsel %vm3133_vm8, %v6665_v43, %v10855_v42  ;;  %v17164_v8 = vpack.i.bf16 %v4441_v18, %v4440_v34 }
 0x413   :  { %v10863_v63 = vpop.permute.xlu1 %10862  ;;  %v10880_v29 = vunpack.i.h.bf16 %v10878_v48  ;;  %v10879_v20 = vunpack.i.l.bf16 %v10878_v48  ;;  %v4312_v48 = vld [vmem:[#allocation2 + $0x258] sm:$0xff] }
 0x414   :  { %11167 = vrot.lane.b32.xlu0 %v11121_v15, %s11739_s29  ;;  %v10865_v25 = vunpack.i.h.bf16 %v10863_v63  ;;  %v10864_v11 = vunpack.i.l.bf16 %v10863_v63  ;;  %v11191_v49 = vpack.i.bf16 %v4313_v62, %v4312_v48  ;;  %v17157_v63 = vld [vmem:[%s18103_s5] ss:$0 sm:$0xff] }
 0x415   :  { %11152 = vrot.lane.b32.xlu1 %v17079_v3, %s11735_s19  ;;  %v6921_v37 = vsel %vm6896_vm14, %v6856_v45, %v10879_v20  ;;  %v6922_v17 = vsel %vm6896_vm14, %v6857_v22, %v10880_v29 }
 0x416   :  { %v10888_v28 = vpop.permute.xlu0 %10887  ;;  %v6794_v12 = vsel %vm6766_vm12, %v6729_v5, %v10865_v25 }
 0x417   :  { %v10890_v33 = vunpack.i.h.bf16 %v10888_v28  ;;  %v10889_v52 = vunpack.i.l.bf16 %v10888_v28  ;;  %v10873_v30 = vpop.permute.xlu1 %10872 }
 0x418   :  { %11177 = vrot.lane.b32.xlu0 %v17079_v3, %s11741_s18  ;;  %v10875_v24 = vunpack.i.h.bf16 %v10873_v30  ;;  %v10874_v46 = vunpack.i.l.bf16 %v10873_v30  ;;  %v6728_v3 = vsel %vm3133_vm8, %v6664_v50, %v10854_v39 }
 0x419   :  { %v6986_v4 = vsel %vm6961_vm15, %v6921_v37, %v10889_v52  ;;  %v6987_v15 = vsel %vm6961_vm15, %v6922_v17, %v10890_v33  ;;  %11162 = vrot.lane.b32.xlu1 %v17093_v55, %s11737_s26  ;;  %v6793_v59 = vsel %vm6766_vm12, %v6728_v3, %v10864_v11  ;;  %v3914_v37 = vld [vmem:[#allocation2 + $0x158] sm:$0xff] }
 0x41a   :  { %v10898_v47 = vpop.permute.xlu0 %10897  ;;  %v7038_v19 = vpack.c.bf16 %v6987_v15, %v6986_v4  ;;  %v6858_v16 = vsel %vm6831_vm13, %v6793_v59, %v10874_v46  ;;  %v6859_v32 = vsel %vm6831_vm13, %v6794_v12, %v10875_v24  ;;  %v4124_v4 = vld [vmem:[#allocation2 + $0x278] sm:$0xff] }
 0x41b   :  { %v10900_v51 = vunpack.i.h.bf16 %v10898_v47  ;;  %v10899_v58 = vunpack.i.l.bf16 %v10898_v47  ;;  %v10883_v23 = vpop.permute.xlu1 %10882 }
 0x41c   :  { %v10885_v21 = vunpack.i.h.bf16 %v10883_v23  ;;  %v10884_v1 = vunpack.i.l.bf16 %v10883_v23  ;;  %11187 = vrot.lane.b32.xlu0 %v17093_v55, %s11742_s22  ;;  %8978 = vmatprep.mubr.msk.bf16.mxu1 %vm7101_vm0, %v7038_v19  ;;  %v4123_v19 = vld [vmem:[#allocation2 + $0x270] sm:$0xff] }
 0x41d   :  { %11172 = vrot.lane.b32.xlu1 %v17127_v27, %s11739_s29 }
 0x41e   :  { %v6923_v26 = vsel %vm6896_vm14, %v6858_v16, %v10884_v1  ;;  %v6924_v53 = vsel %vm6896_vm14, %v6859_v32, %v10885_v21  ;;  %v17142_v7 = vpop.permute.xlu0 %10907 }
 0x41f   :  { %v10893_v2 = vpop.permute.xlu1 %10892  ;;  %v6988_v55 = vsel %vm6961_vm15, %v6923_v26, %v10899_v58  ;;  %v6989_v36 = vsel %vm6961_vm15, %v6924_v53, %v10900_v51  ;;  %v10909_v30 = vunpack.i.l.bf16 %v17142_v7  ;;  %v10910_v15 = vunpack.i.h.bf16 %v17142_v7 }
 0x420   :  { %11197 = vrot.lane.b32.xlu0 %v17127_v27, %s11743_s0  ;;  %v7039_v9 = vpack.c.bf16 %v6989_v36, %v6988_v55  ;;  %v10895_v42 = vunpack.i.h.bf16 %v10893_v2  ;;  %v10894_v39 = vunpack.i.l.bf16 %v10893_v2  ;;  %v17187_v58 = vpack.i.bf16 %v4124_v4, %v4123_v19  ;;  %v3916_v55 = vld [vmem:[#allocation2 + $0x170] sm:$0xff] }
 0x421   :  { %11182 = vrot.lane.b32.xlu1 %v11181_v44, %s11741_s18 }
 0x422   :  { %8979 = vmatmul.mubr.msk.bf16.gmra.mxu1 %vm7101_vm0, %v7039_v9  ;;  %v17150_v14 = vpop.permute.xlu0 %10917  ;;  %v6539_v24 = vsel %vm2743_vm1, %v3914_v37, %v10895_v42  ;;  %v6538_v46 = vsel %vm2743_vm1, %v3913_v41, %v10894_v39  ;;  %v4188_v41 = vld [vmem:[#allocation2 + $0x279] sm:$0xff] }
 0x423   :  { %v17152_v56 = vpop.permute.xlu1 %10902  ;;  %v10919_v38 = vunpack.i.l.bf16 %v17150_v14  ;;  %v10920_v3 = vunpack.i.h.bf16 %v17150_v14  ;;  %v6602_v59 = vsel %vm2873_vm4, %v6538_v46, %v10909_v30  ;;  %v6603_v60 = vsel %vm2873_vm4, %v6539_v24, %v10910_v15 }
 0x424   :  { %11207 = vrot.lane.b32.xlu0 %v11181_v44, %s11744_s4  ;;  %v10905_v12 = vunpack.i.h.bf16 %v17152_v56  ;;  %v10904_v21 = vunpack.i.l.bf16 %v17152_v56 }
 0x425   :  { %11192 = vrot.lane.b32.xlu1 %v11191_v49, %s11742_s22  ;;  %v6666_v32 = vsel %vm3003_vm6, %v6602_v59, %v10919_v38  ;;  %v6667_v2 = vsel %vm3003_vm6, %v6603_v60, %v10920_v3  ;;  %v4187_v38 = vld [vmem:[#allocation2 + $0x271] sm:$0xff] }
 0x426   :  { %v8956_v40 = vpop.f32.mrf.mxu1  ;;  %v17162_v35 = vpop.permute.xlu0 %10927  ;;  %v6541_v14 = vsel %vm2743_vm1, %v3916_v55, %v10905_v12  ;;  %v17234_v19 = vpack.i.bf16 %v4188_v41, %v4187_v38 }
 0x427   :  { %v7245_v57 = vadd.f32 %v8956_v40, %v17157_v63  ;;  %v17167_v6 = vpop.permute.xlu1 %10912  ;;  %v10929_v54 = vunpack.i.l.bf16 %v17162_v35 }
 0x428   :  { %v7236_v0 = vpop.f32.mrf.mxu1  ;;  %11217 = vrot.lane.b32.xlu0 %v17164_v8, %s11744_s4  ;;  %v10915_v53 = vunpack.i.h.bf16 %v17167_v6  ;;  %v10914_v7 = vunpack.i.l.bf16 %v17167_v6 }
 0x429   :  { %v7237_v29 = vadd.f32 %v17157_v63, %v7236_v0  ;;  %11202 = vrot.lane.b32.xlu1 %v11201_v10, %s11743_s0  ;;  %v7493_v17 = vmax.f32 %v7245_v57, 0.0  ;;  %v6730_v18 = vsel %vm3133_vm8, %v6666_v32, %v10929_v54  ;;  %v4252_v54 = vld [vmem:[#allocation2 + $0x27a] sm:$0xff] }
 0x42a   :  { %v8957_v20 = vpop.f32.mrf.mxu1  ;;  %v10938_v52 = vpop.permute.xlu0 %10937 }
 0x42b   :  { %v7491_v45 = vmax.f32 %v7237_v29, 0.0  ;;  %v7248_v22 = vadd.f32 %v8957_v20, %v17157_v63  ;;  %v17175_v11 = vpop.permute.xlu1 %10922  ;;  %v7558_v23 = vsel %vm3133_vm8, %v7493_v17, 0.0  ;;  %v10940_v36 = vunpack.i.h.bf16 %v10938_v52 }
 0x42c   :  { %v7239_v28 = vpop.f32.mrf.mxu1  ;;  %11227 = vrot.lane.b32.xlu0 %v11181_v44, %s11735_s19  ;;  %v3915_v44 = vld [vmem:[#allocation2 + $0x168] sm:$0xff]  ;;  %v10939_v9 = vunpack.i.l.bf16 %v10938_v52  ;;  %v10925_v13 = vunpack.i.h.bf16 %v17175_v11  ;;  %v10924_v57 = vunpack.i.l.bf16 %v17175_v11 }
 0x42d   :  { %v7240_v33 = vadd.f32 %v17157_v63, %v7239_v28  ;;  %v7555_v50 = vsel %vm3133_vm8, %v7491_v45, 0.0  ;;  %v7494_v43 = vmax.f32 %v7248_v22, 0.0  ;;  %11212 = vrot.lane.b32.xlu1 %v17127_v27, %s11733_s25  ;;  %v10930_v27 = vunpack.i.h.bf16 %v17162_v35 }
 0x42e   :  { %v10948_v51 = vpop.permute.xlu0 %10947  ;;  %v6540_v48 = vsel %vm2743_vm1, %v3915_v44, %v10904_v21  ;;  %v6605_v35 = vsel %vm2873_vm4, %v6541_v14, %v10915_v53  ;;  %v6795_v6 = vsel %vm6766_vm12, %v6730_v18, %v10939_v9  ;;  %v4317_v9 = vld [vmem:[#allocation2 + $0x290] sm:$0xff] }
 0x42f   :  { %v7492_v25 = vmax.f32 %v7240_v33, 0.0  ;;  %v17193_v1 = vpop.permute.xlu1 %10932  ;;  %v7560_v26 = vsel %vm3133_vm8, %v7494_v43, 0.0  ;;  %v10950_v56 = vunpack.i.h.bf16 %v10948_v51  ;;  %v6731_v0 = vsel %vm3133_vm8, %v6667_v2, %v10930_v27  ;;  %v4251_v27 = vld [vmem:[#allocation2 + $0x272] sm:$0xff] }
 0x430   :  { %11237 = vrot.lane.b32.xlu0 %v11191_v49, %s11737_s26  ;;  %v10949_v49 = vunpack.i.l.bf16 %v10948_v51  ;;  %v6604_v20 = vsel %vm2873_vm4, %v6540_v48, %v10914_v7  ;;  %v6796_v42 = vsel %vm6766_vm12, %v6731_v0, %v10940_v36  ;;  %v10935_v39 = vunpack.i.h.bf16 %v17193_v1  ;;  %v4316_v48 = vld [vmem:[#allocation2 + $0x288] sm:$0xff]  ;;  %v4445_v18 = vld [vmem:[#allocation2 + $0x292] sm:$0xff] }
 0x431   :  { %v7556_v47 = vsel %vm3133_vm8, %v7492_v25, 0.0  ;;  %11222 = vrot.lane.b32.xlu1 %v11201_v10, %s11733_s25  ;;  %v10934_v28 = vunpack.i.l.bf16 %v17193_v1  ;;  %v6861_v22 = vsel %vm6831_vm13, %v6796_v42, %v10950_v56  ;;  %v6669_v43 = vsel %vm3003_vm6, %v6605_v35, %v10925_v13 }
 0x432   :  { %v7557_v5 = vadd.f32 %v7556_v47, %v7555_v50  ;;  %v10958_v62 = vpop.permute.xlu0 %10957  ;;  %v6860_v45 = vsel %vm6831_vm13, %v6795_v6, %v10949_v49  ;;  %v6668_v50 = vsel %vm3003_vm6, %v6604_v20, %v10924_v57  ;;  %v11261_v44 = vpack.i.bf16 %v4252_v54, %v4251_v27  ;;  %v4380_v57 = vld [vmem:[#allocation2 + $0x289] sm:$0xff] }
 0x433   :  { %v10943_v34 = vpop.permute.xlu1 %10942  ;;  %v10960_v31 = vunpack.i.h.bf16 %v10958_v62  ;;  %v10959_v29 = vunpack.i.l.bf16 %v10958_v62  ;;  %v11271_v49 = vpack.i.bf16 %v4317_v9, %v4316_v48 }
 0x434   :  { %v7559_v16 = vadd.f32 %v7558_v23, %v7557_v5  ;;  %11247 = vrot.lane.b32.xlu0 %v11201_v10, %s11739_s29  ;;  %v10945_v25 = vunpack.i.h.bf16 %v10943_v34  ;;  %v10944_v11 = vunpack.i.l.bf16 %v10943_v34  ;;  %v6733_v5 = vsel %vm3133_vm8, %v6669_v43, %v10935_v39  ;;  %v4444_v34 = vld [vmem:[#allocation2 + $0x28a] sm:$0xff] }
 0x435   :  { %11232 = vrot.lane.b32.xlu1 %v17164_v8, %s11735_s19  ;;  %v6925_v37 = vsel %vm6896_vm14, %v6860_v45, %v10959_v29  ;;  %v6926_v17 = vsel %vm6896_vm14, %v6861_v22, %v10960_v31  ;;  %v4381_v31 = vld [vmem:[#allocation2 + $0x291] sm:$0xff]  ;;  %v17266_v13 = vpack.i.bf16 %v4445_v18, %v4444_v34 }
 0x436   :  { %v17205_v40 = vadd.f32 %v7560_v26, %v7559_v16  ;;  %v10968_v10 = vpop.permute.xlu0 %10967  ;;  %v6798_v21 = vsel %vm6766_vm12, %v6733_v5, %v10945_v25  ;;  %v3917_v22 = vld [vmem:[#allocation2 + $0x1b0] sm:$0xff] }
 0x437   :  { %v10970_v33 = vunpack.i.h.bf16 %v10968_v10  ;;  %v10969_v52 = vunpack.i.l.bf16 %v10968_v10  ;;  %v10953_v30 = vpop.permute.xlu1 %10952 }
 0x438   :  { %11257 = vrot.lane.b32.xlu0 %v17164_v8, %s11741_s18  ;;  %v10955_v24 = vunpack.i.h.bf16 %v10953_v30  ;;  %v10954_v46 = vunpack.i.l.bf16 %v10953_v30  ;;  %v6732_v8 = vsel %vm3133_vm8, %v6668_v50, %v10934_v28  ;;  %v11281_v28 = vpack.i.bf16 %v4381_v31, %v4380_v57 }
 0x439   :  { %v6990_v4 = vsel %vm6961_vm15, %v6925_v37, %v10969_v52  ;;  %v6991_v15 = vsel %vm6961_vm15, %v6926_v17, %v10970_v33  ;;  %11242 = vrot.lane.b32.xlu1 %v17187_v58, %s11737_s26  ;;  %v6797_v12 = vsel %vm6766_vm12, %v6732_v8, %v10944_v11  ;;  %v3918_v37 = vld [vmem:[#allocation2 + $0x1b8] sm:$0xff]  ;;  %v4127_v8 = vld [vmem:[#allocation2 + $0x2a0] sm:$0xff] }
 0x43a   :  { %v10978_v47 = vpop.permute.xlu0 %10977  ;;  %v7040_v3 = vpack.c.bf16 %v6991_v15, %v6990_v4  ;;  %v6862_v16 = vsel %vm6831_vm13, %v6797_v12, %v10954_v46  ;;  %v6863_v32 = vsel %vm6831_vm13, %v6798_v21, %v10955_v24  ;;  %v4128_v46 = vld [vmem:[#allocation2 + $0x2a8] sm:$0xff] }
 0x43b   :  { %v10980_v51 = vunpack.i.h.bf16 %v10978_v47  ;;  %v10979_v23 = vunpack.i.l.bf16 %v10978_v47  ;;  %v10963_v59 = vpop.permute.xlu1 %10962 }
 0x43c   :  { %v10965_v1 = vunpack.i.h.bf16 %v10963_v59  ;;  %v10964_v60 = vunpack.i.l.bf16 %v10963_v59  ;;  %11267 = vrot.lane.b32.xlu0 %v17187_v58, %s11742_s22  ;;  %8982 = vmatprep.mubr.msk.bf16.mxu1 %vm7101_vm0, %v7040_v3  ;;  %v17290_v59 = vpack.i.bf16 %v4128_v46, %v4127_v8 }
 0x43d   :  { %11252 = vrot.lane.b32.xlu1 %v17234_v19, %s11739_s29 }
 0x43e   :  { %v6927_v26 = vsel %vm6896_vm14, %v6862_v16, %v10964_v60  ;;  %v6928_v53 = vsel %vm6896_vm14, %v6863_v32, %v10965_v1  ;;  %v17249_v7 = vpop.permute.xlu0 %10987 }
 0x43f   :  { %v10973_v2 = vpop.permute.xlu1 %10972  ;;  %v6992_v58 = vsel %vm6961_vm15, %v6927_v26, %v10979_v23  ;;  %v6993_v55 = vsel %vm6961_vm15, %v6928_v53, %v10980_v51  ;;  %v10989_v11 = vunpack.i.l.bf16 %v17249_v7  ;;  %v10990_v38 = vunpack.i.h.bf16 %v17249_v7 }
 0x440   :  { %11277 = vrot.lane.b32.xlu0 %v17234_v19, %s11743_s0  ;;  %v7041_v36 = vpack.c.bf16 %v6993_v55, %v6992_v58  ;;  %v10974_v10 = vunpack.i.l.bf16 %v10973_v2  ;;  %v10975_v33 = vunpack.i.h.bf16 %v10973_v2  ;;  %v3919_v58 = vld [vmem:[#allocation2 + $0x1c8] sm:$0xff]  ;;  %v3920_v55 = vld [vmem:[#allocation2 + $0x1d0] sm:$0xff] }
 0x441   :  { %11262 = vrot.lane.b32.xlu1 %v11261_v44, %s11741_s18 }
 0x442   :  { %v8960_v62 = vpop.f32.mrf.mxu1  ;;  %8983 = vmatmul.mubr.msk.bf16.gmra.mxu1 %vm7101_vm0, %v7041_v36  ;;  %v17257_v14 = vpop.permute.xlu0 %10997  ;;  %v6542_v50 = vsel %vm2743_vm1, %v3917_v22, %v10974_v10  ;;  %v6543_v43 = vsel %vm2743_vm1, %v3918_v37, %v10975_v33 }
 0x443   :  { %v17259_v56 = vpop.permute.xlu1 %10982  ;;  %v7261_v6 = vadd.f32 %v8960_v62, %v17157_v63  ;;  %v10999_v47 = vunpack.i.l.bf16 %v17257_v14  ;;  %v11000_v5 = vunpack.i.h.bf16 %v17257_v14  ;;  %v6606_v21 = vsel %vm2873_vm4, %v6542_v50, %v10989_v11 }
 0x444   :  { %v7252_v0 = vpop.f32.mrf.mxu1  ;;  %11287 = vrot.lane.b32.xlu0 %v11261_v44, %s11744_s4  ;;  %v10985_v1 = vunpack.i.h.bf16 %v17259_v56  ;;  %v10984_v60 = vunpack.i.l.bf16 %v17259_v56  ;;  %v6607_v54 = vsel %vm2873_vm4, %v6543_v43, %v10990_v38  ;;  %v4191_v43 = vld [vmem:[#allocation2 + $0x2a1] sm:$0xff] }
 0x445   :  { %v7253_v29 = vadd.f32 %v17157_v63, %v7252_v0  ;;  %11272 = vrot.lane.b32.xlu1 %v11271_v49, %s11742_s22  ;;  %v7497_v4 = vmax.f32 %v7261_v6, 0.0  ;;  %v6670_v26 = vsel %vm3003_vm6, %v6606_v21, %v10999_v47 }
 0x446   :  { %v8961_v20 = vpop.f32.mrf.mxu1  ;;  %v17264_v35 = vpop.permute.xlu0 %11007  ;;  %v6545_v48 = vsel %vm2743_vm1, %v3920_v55, %v10985_v1  ;;  %v6544_v56 = vsel %vm2743_vm1, %v3919_v58, %v10984_v60 }
 0x447   :  { %v7495_v42 = vmax.f32 %v7253_v29, 0.0  ;;  %v17269_v39 = vpop.permute.xlu1 %10992  ;;  %v7264_v30 = vadd.f32 %v8961_v20, %v17157_v63  ;;  %v7566_v12 = vsel %vm3133_vm8, %v7497_v4, 0.0  ;;  %v11009_v16 = vunpack.i.l.bf16 %v17264_v35 }
 0x448   :  { %v7255_v45 = vpop.f32.mrf.mxu1  ;;  %11297 = vrot.lane.b32.xlu0 %v17266_v13, %s11744_s4  ;;  %v10995_v7 = vunpack.i.h.bf16 %v17269_v39  ;;  %v10994_v2 = vunpack.i.l.bf16 %v17269_v39 }
 0x449   :  { %v7562_v52 = vsel %vm3133_vm8, %v7495_v42, 0.0  ;;  %v7256_v41 = vadd.f32 %v17157_v63, %v7255_v45  ;;  %11282 = vrot.lane.b32.xlu1 %v11281_v28, %s11743_s0  ;;  %v7498_v3 = vmax.f32 %v7264_v30, 0.0  ;;  %v6734_v0 = vsel %vm3133_vm8, %v6670_v26, %v11009_v16  ;;  %v4256_v16 = vld [vmem:[#allocation2 + $0x2aa] sm:$0xff] }
 0x44a   :  { %v7563_v17 = vadd.f32 %v7562_v52, %v17205_v40  ;;  %v11018_v25 = vpop.permute.xlu0 %11017  ;;  %v6609_v57 = vsel %vm2873_vm4, %v6545_v48, %v10995_v7 }
 0x44b   :  { %v7496_v15 = vmax.f32 %v7256_v41, 0.0  ;;  %v17279_v24 = vpop.permute.xlu1 %11002  ;;  %v7568_v53 = vsel %vm3133_vm8, %v7498_v3, 0.0  ;;  %v11020_v36 = vunpack.i.h.bf16 %v11018_v25  ;;  %v11019_v9 = vunpack.i.l.bf16 %v11018_v25 }
 0x44c   :  { %11307 = vrot.lane.b32.xlu0 %v11261_v44, %s11735_s19  ;;  %v6671_v44 = vsel %vm3003_vm6, %v6607_v54, %v11000_v5  ;;  %v11005_v6 = vunpack.i.h.bf16 %v17279_v24  ;;  %v11004_v42 = vunpack.i.l.bf16 %v17279_v24 }
 0x44d   :  { %v7564_v40 = vsel %vm3133_vm8, %v7496_v15, 0.0  ;;  %11292 = vrot.lane.b32.xlu1 %v17234_v19, %s11733_s25  ;;  %v11010_v19 = vunpack.i.h.bf16 %v17264_v35  ;;  %v6608_v35 = vsel %vm2873_vm4, %v6544_v56, %v10994_v2  ;;  %v6799_v39 = vsel %vm6766_vm12, %v6734_v0, %v11019_v9  ;;  %v4321_v9 = vld [vmem:[#allocation2 + $0x2c0] sm:$0xff]  ;;  %v4320_v56 = vld [vmem:[#allocation2 + $0x2b8] sm:$0xff] }
 0x44e   :  { %v7565_v51 = vadd.f32 %v7564_v40, %v7563_v17  ;;  %v11028_v23 = vpop.permute.xlu0 %11027  ;;  %v4192_v17 = vld [vmem:[#allocation2 + $0x2a9] sm:$0xff]  ;;  %v6672_v47 = vsel %vm3003_vm6, %v6608_v35, %v11004_v42  ;;  %v6673_v3 = vsel %vm3003_vm6, %v6609_v57, %v11005_v6  ;;  %v4384_v42 = vld [vmem:[#allocation2 + $0x2b9] sm:$0xff] }
 0x44f   :  { %v17296_v27 = vpop.permute.xlu1 %11012  ;;  %v11029_v34 = vunpack.i.l.bf16 %v11028_v23  ;;  %v6735_v31 = vsel %vm3133_vm8, %v6671_v44, %v11010_v19  ;;  %v17337_v8 = vpack.i.bf16 %v4192_v17, %v4191_v43  ;;  %v4255_v19 = vld [vmem:[#allocation2 + $0x2a2] sm:$0xff] }
 0x450   :  { %v7567_v32 = vadd.f32 %v7566_v12, %v7565_v51  ;;  %11317 = vrot.lane.b32.xlu0 %v11271_v49, %s11737_s26  ;;  %v11030_v49 = vunpack.i.h.bf16 %v11028_v23  ;;  %v6800_v10 = vsel %vm6766_vm12, %v6735_v31, %v11020_v36  ;;  %v11015_v45 = vunpack.i.h.bf16 %v17296_v27  ;;  %v4449_v0 = vld [vmem:[#allocation2 + $0x2c2] sm:$0xff] }
 0x451   :  { %11302 = vrot.lane.b32.xlu1 %v11281_v28, %s11733_s25  ;;  %v11014_v22 = vunpack.i.l.bf16 %v17296_v27  ;;  %v6864_v33 = vsel %vm6831_vm13, %v6799_v39, %v11029_v34  ;;  %v11341_v58 = vpack.i.bf16 %v4256_v16, %v4255_v19  ;;  %v11351_v34 = vpack.i.bf16 %v4321_v9, %v4320_v56  ;;  %v3922_v43 = vld [vmem:[#allocation2 + $0x1e8] sm:$0xff] }
 0x452   :  { %v11038_v62 = vpop.permute.xlu0 %11037  ;;  %v17308_v14 = vadd.f32 %v7568_v53, %v7567_v32  ;;  %v6865_v52 = vsel %vm6831_vm13, %v6800_v10, %v11030_v49  ;;  %v6737_v51 = vsel %vm3133_vm8, %v6673_v3, %v11015_v45 }
 0x453   :  { %v11023_v18 = vpop.permute.xlu1 %11022  ;;  %v11040_v29 = vunpack.i.h.bf16 %v11038_v62  ;;  %v11039_v20 = vunpack.i.l.bf16 %v11038_v62 }
 0x454   :  { %11327 = vrot.lane.b32.xlu0 %v11281_v28, %s11739_s29  ;;  %v11025_v4 = vunpack.i.h.bf16 %v11023_v18  ;;  %v11024_v15 = vunpack.i.l.bf16 %v11023_v18  ;;  %v4448_v18 = vld [vmem:[#allocation2 + $0x2ba] sm:$0xff] }
 0x455   :  { %11312 = vrot.lane.b32.xlu1 %v17266_v13, %s11735_s19  ;;  %v6929_v25 = vsel %vm6896_vm14, %v6864_v33, %v11039_v20  ;;  %v6930_v11 = vsel %vm6896_vm14, %v6865_v52, %v11040_v29  ;;  %v4385_v29 = vld [vmem:[#allocation2 + $0x2c1] sm:$0xff]  ;;  %v17369_v6 = vpack.i.bf16 %v4449_v0, %v4448_v18 }
 0x456   :  { %v11048_v28 = vpop.permute.xlu0 %11047  ;;  %v6802_v60 = vsel %vm6766_vm12, %v6737_v51, %v11025_v4  ;;  %v3921_v4 = vld [vmem:[#allocation2 + $0x1e0] sm:$0xff] }
 0x457   :  { %v11050_v30 = vunpack.i.h.bf16 %v11048_v28  ;;  %v11049_v41 = vunpack.i.l.bf16 %v11048_v28  ;;  %v11033_v37 = vpop.permute.xlu1 %11032 }
 0x458   :  { %11337 = vrot.lane.b32.xlu0 %v17266_v13, %s11741_s18  ;;  %v11035_v38 = vunpack.i.h.bf16 %v11033_v37  ;;  %v11034_v50 = vunpack.i.l.bf16 %v11033_v37  ;;  %v6736_v13 = vsel %vm3133_vm8, %v6672_v47, %v11014_v22  ;;  %v11361_v22 = vpack.i.bf16 %v4385_v29, %v4384_v42 }
 0x459   :  { %v6994_v24 = vsel %vm6961_vm15, %v6929_v25, %v11049_v41  ;;  %v6995_v46 = vsel %vm6961_vm15, %v6930_v11, %v11050_v30  ;;  %11322 = vrot.lane.b32.xlu1 %v17290_v59, %s11737_s26  ;;  %v6801_v1 = vsel %vm6766_vm12, %v6736_v13, %v11024_v15  ;;  %v4131_v13 = vld [vmem:[#allocation2 + $0x2d0] sm:$0xff] }
 0x45a   :  { %v11058_v40 = vpop.permute.xlu0 %11057  ;;  %v7042_v5 = vpack.c.bf16 %v6995_v46, %v6994_v24  ;;  %v6866_v32 = vsel %vm6831_vm13, %v6801_v1, %v11034_v50  ;;  %v6867_v26 = vsel %vm6831_vm13, %v6802_v60, %v11035_v38  ;;  %v4132_v38 = vld [vmem:[#allocation2 + $0x2d8] sm:$0xff] }
 0x45b   :  { %v11060_v23 = vunpack.i.h.bf16 %v11058_v40  ;;  %v11059_v12 = vunpack.i.l.bf16 %v11058_v40  ;;  %v11043_v21 = vpop.permute.xlu1 %11042 }
 0x45c   :  { %v11045_v27 = vunpack.i.h.bf16 %v11043_v21  ;;  %v11044_v54 = vunpack.i.l.bf16 %v11043_v21  ;;  %11347 = vrot.lane.b32.xlu0 %v17290_v59, %s11742_s22  ;;  %8986 = vmatprep.mubr.msk.bf16.mxu1 %vm7101_vm0, %v7042_v5  ;;  %v17393_v21 = vpack.i.bf16 %v4132_v38, %v4131_v13 }
 0x45d   :  { %11332 = vrot.lane.b32.xlu1 %v17337_v8, %s11739_s29 }
 0x45e   :  { %v6931_v53 = vsel %vm6896_vm14, %v6866_v32, %v11044_v54  ;;  %v6932_v7 = vsel %vm6896_vm14, %v6867_v26, %v11045_v27  ;;  %v17352_v2 = vpop.permute.xlu0 %11067 }
 0x45f   :  { %v11053_v44 = vpop.permute.xlu1 %11052  ;;  %v6996_v59 = vsel %vm6961_vm15, %v6931_v53, %v11059_v12  ;;  %v6997_v55 = vsel %vm6961_vm15, %v6932_v7, %v11060_v23  ;;  %v11069_v11 = vunpack.i.l.bf16 %v17352_v2  ;;  %v11070_v50 = vunpack.i.h.bf16 %v17352_v2 }
 0x460   :  { %11357 = vrot.lane.b32.xlu0 %v17337_v8, %s11743_s0  ;;  %v7043_v36 = vpack.c.bf16 %v6997_v55, %v6996_v59  ;;  %v11054_v28 = vunpack.i.l.bf16 %v11053_v44  ;;  %v11055_v52 = vunpack.i.h.bf16 %v11053_v44  ;;  %v3923_v59 = vld [vmem:[#allocation2 + $0x1f8] sm:$0xff]  ;;  %v3924_v55 = vld [vmem:[#allocation2 + $0x200] sm:$0xff] }
 0x461   :  { %11342 = vrot.lane.b32.xlu1 %v11341_v58, %s11741_s18 }
 0x462   :  { %v8964_v62 = vpop.f32.mrf.mxu1  ;;  %8987 = vmatmul.mubr.msk.bf16.gmra.mxu1 %vm7101_vm0, %v7043_v36  ;;  %v17360_v48 = vpop.permute.xlu0 %11077  ;;  %v6546_v47 = vsel %vm2743_vm1, %v3921_v4, %v11054_v28  ;;  %v6547_v3 = vsel %vm2743_vm1, %v3922_v43, %v11055_v52 }
 0x463   :  { %v17362_v49 = vpop.permute.xlu1 %11062  ;;  %v7277_v39 = vadd.f32 %v8964_v62, %v17157_v63  ;;  %v11080_v51 = vunpack.i.h.bf16 %v17360_v48  ;;  %v6610_v60 = vsel %vm2873_vm4, %v6546_v47, %v11069_v11  ;;  %v6611_v16 = vsel %vm2873_vm4, %v6547_v3, %v11070_v50  ;;  %v4196_v11 = vld [vmem:[#allocation2 + $0x2d9] sm:$0xff]  ;;  %v4195_v3 = vld [vmem:[#allocation2 + $0x2d1] sm:$0xff] }
 0x464   :  { %v7268_v31 = vpop.f32.mrf.mxu1  ;;  %11367 = vrot.lane.b32.xlu0 %v11341_v58, %s11744_s4  ;;  %v11065_v27 = vunpack.i.h.bf16 %v17362_v49  ;;  %v11064_v54 = vunpack.i.l.bf16 %v17362_v49 }
 0x465   :  { %v7269_v20 = vadd.f32 %v17157_v63, %v7268_v31  ;;  %11352 = vrot.lane.b32.xlu1 %v11351_v34, %s11742_s22  ;;  %v7501_v15 = vmax.f32 %v7277_v39, 0.0 }
 0x466   :  { %v8965_v35 = vpop.f32.mrf.mxu1  ;;  %v17367_v57 = vpop.permute.xlu0 %11087  ;;  %v6549_v56 = vsel %vm2743_vm1, %v3924_v55, %v11065_v27  ;;  %v6548_v49 = vsel %vm2743_vm1, %v3923_v59, %v11064_v54 }
 0x467   :  { %v7499_v10 = vmax.f32 %v7269_v20, 0.0  ;;  %v17372_v45 = vpop.permute.xlu1 %11072  ;;  %v7280_v41 = vadd.f32 %v8965_v35, %v17157_v63  ;;  %v7574_v1 = vsel %vm3133_vm8, %v7501_v15, 0.0  ;;  %v11089_v32 = vunpack.i.l.bf16 %v17367_v57 }
 0x468   :  { %v7271_v33 = vpop.f32.mrf.mxu1  ;;  %11377 = vrot.lane.b32.xlu0 %v17369_v6, %s11744_s4  ;;  %v11075_v2 = vunpack.i.h.bf16 %v17372_v45  ;;  %v11074_v44 = vunpack.i.l.bf16 %v17372_v45 }
 0x469   :  { %v7570_v30 = vsel %vm3133_vm8, %v7499_v10, 0.0  ;;  %v7272_v37 = vadd.f32 %v17157_v63, %v7271_v33  ;;  %11362 = vrot.lane.b32.xlu1 %v11361_v22, %s11743_s0  ;;  %v7502_v40 = vmax.f32 %v7280_v41, 0.0 }
 0x46a   :  { %v7571_v17 = vadd.f32 %v7570_v30, %v17308_v14  ;;  %v11098_v25 = vpop.permute.xlu0 %11097  ;;  %v11079_v14 = vunpack.i.l.bf16 %v17360_v48  ;;  %v6613_v42 = vsel %vm2873_vm4, %v6549_v56, %v11075_v2 }
 0x46b   :  { %v7500_v24 = vmax.f32 %v7272_v37, 0.0  ;;  %v17382_v46 = vpop.permute.xlu1 %11082  ;;  %v7576_v7 = vsel %vm3133_vm8, %v7502_v40, 0.0  ;;  %v11100_v36 = vunpack.i.h.bf16 %v11098_v25  ;;  %v11099_v9 = vunpack.i.l.bf16 %v11098_v25 }
 0x46c   :  { %11387 = vrot.lane.b32.xlu0 %v11341_v58, %s11735_s19  ;;  %v6674_v53 = vsel %vm3003_vm6, %v6610_v60, %v11079_v14  ;;  %v6675_v58 = vsel %vm3003_vm6, %v6611_v16, %v11080_v51  ;;  %v11085_v39 = vunpack.i.h.bf16 %v17382_v46  ;;  %v11084_v10 = vunpack.i.l.bf16 %v17382_v46 }
 0x46d   :  { %v7572_v5 = vsel %vm3133_vm8, %v7500_v24, 0.0  ;;  %11372 = vrot.lane.b32.xlu1 %v17337_v8, %s11733_s25  ;;  %v11090_v8 = vunpack.i.h.bf16 %v17367_v57  ;;  %v6738_v31 = vsel %vm3133_vm8, %v6674_v53, %v11089_v32  ;;  %v6612_v57 = vsel %vm2873_vm4, %v6548_v49, %v11074_v44  ;;  %v4260_v32 = vld [vmem:[#allocation2 + $0x2da] sm:$0xff]  ;;  %v4324_v49 = vld [vmem:[#allocation2 + $0x2e8] sm:$0xff] }
 0x46e   :  { %v7573_v23 = vadd.f32 %v7572_v5, %v7571_v17  ;;  %v11108_v12 = vpop.permute.xlu0 %11107  ;;  %v6803_v45 = vsel %vm6766_vm12, %v6738_v31, %v11099_v9  ;;  %v6676_v14 = vsel %vm3003_vm6, %v6612_v57, %v11084_v10  ;;  %v6677_v40 = vsel %vm3003_vm6, %v6613_v42, %v11085_v39  ;;  %v4325_v9 = vld [vmem:[#allocation2 + $0x2f0] sm:$0xff] }
 0x46f   :  { %v17399_v19 = vpop.permute.xlu1 %11092  ;;  %v11109_v18 = vunpack.i.l.bf16 %v11108_v12  ;;  %v6739_v29 = vsel %vm3133_vm8, %v6675_v58, %v11090_v8  ;;  %v17440_v51 = vpack.i.bf16 %v4196_v11, %v4195_v3  ;;  %v4259_v8 = vld [vmem:[#allocation2 + $0x2d2] sm:$0xff]  ;;  %v4388_v10 = vld [vmem:[#allocation2 + $0x2e9] sm:$0xff] }
 0x470   :  { %v7575_v26 = vadd.f32 %v7574_v1, %v7573_v23  ;;  %11397 = vrot.lane.b32.xlu0 %v11351_v34, %s11737_s26  ;;  %v11110_v34 = vunpack.i.h.bf16 %v11108_v12  ;;  %v6804_v28 = vsel %vm6766_vm12, %v6739_v29, %v11100_v36  ;;  %v11095_v33 = vunpack.i.h.bf16 %v17399_v19  ;;  %v4453_v31 = vld [vmem:[#allocation2 + $0x2f2] sm:$0xff] }
 0x471   :  { %11382 = vrot.lane.b32.xlu1 %v11361_v22, %s11733_s25  ;;  %v11094_v52 = vunpack.i.l.bf16 %v17399_v19  ;;  %v6868_v30 = vsel %vm6831_vm13, %v6803_v45, %v11109_v18  ;;  %v11421_v59 = vpack.i.bf16 %v4260_v32, %v4259_v8  ;;  %v11431_v18 = vpack.i.bf16 %v4325_v9, %v4324_v49  ;;  %v3926_v3 = vld [vmem:[#allocation2 + $0x218] sm:$0xff] }
 0x472   :  { %v11118_v62 = vpop.permute.xlu0 %11117  ;;  %v17411_v48 = vadd.f32 %v7576_v7, %v7575_v26  ;;  %v6869_v41 = vsel %vm6831_vm13, %v6804_v28, %v11110_v34  ;;  %v6741_v23 = vsel %vm3133_vm8, %v6677_v40, %v11095_v33 }
 0x473   :  { %v11103_v0 = vpop.permute.xlu1 %11102  ;;  %v11120_v20 = vunpack.i.h.bf16 %v11118_v62  ;;  %v11119_v35 = vunpack.i.l.bf16 %v11118_v62 }
 0x474   :  { %11407 = vrot.lane.b32.xlu0 %v11361_v22, %s11739_s29  ;;  %v11105_v24 = vunpack.i.h.bf16 %v11103_v0  ;;  %v11104_v46 = vunpack.i.l.bf16 %v11103_v0  ;;  %v4452_v0 = vld [vmem:[#allocation2 + $0x2ea] sm:$0xff] }
 0x475   :  { %11392 = vrot.lane.b32.xlu1 %v17369_v6, %s11735_s19  ;;  %v6933_v4 = vsel %vm6896_vm14, %v6868_v30, %v11119_v35  ;;  %v6934_v15 = vsel %vm6896_vm14, %v6869_v41, %v11120_v20  ;;  %v4389_v20 = vld [vmem:[#allocation2 + $0x2f1] sm:$0xff]  ;;  %v17472_v39 = vpack.i.bf16 %v4453_v31, %v4452_v0 }
 0x476   :  { %v11128_v22 = vpop.permute.xlu0 %11127  ;;  %v6806_v54 = vsel %vm6766_vm12, %v6741_v23, %v11105_v24  ;;  %v3925_v24 = vld [vmem:[#allocation2 + $0x210] sm:$0xff] }
 0x477   :  { %v11130_v37 = vunpack.i.h.bf16 %v11128_v22  ;;  %v11129_v17 = vunpack.i.l.bf16 %v11128_v22  ;;  %v11113_v25 = vpop.permute.xlu1 %11112 }
 0x478   :  { %11417 = vrot.lane.b32.xlu0 %v17369_v6, %s11741_s18  ;;  %v11115_v43 = vunpack.i.h.bf16 %v11113_v25  ;;  %v11114_v47 = vunpack.i.l.bf16 %v11113_v25  ;;  %v6740_v6 = vsel %vm3133_vm8, %v6676_v14, %v11094_v52  ;;  %v11441_v52 = vpack.i.bf16 %v4389_v20, %v4388_v10 }
 0x479   :  { %v6998_v38 = vsel %vm6961_vm15, %v6933_v4, %v11129_v17  ;;  %v6999_v50 = vsel %vm6961_vm15, %v6934_v15, %v11130_v37  ;;  %11402 = vrot.lane.b32.xlu1 %v17393_v21, %s11737_s26  ;;  %v6805_v27 = vsel %vm6766_vm12, %v6740_v6, %v11104_v46 }
 0x47a   :  { %v7044_v5 = vpack.c.bf16 %v6999_v50, %v6998_v38  ;;  %v11138_v13 = vpop.permute.xlu0 %11137  ;;  %v6870_v26 = vsel %vm6831_vm13, %v6805_v27, %v11114_v47  ;;  %v6871_v53 = vsel %vm6831_vm13, %v6806_v54, %v11115_v43  ;;  %v4136_v43 = vld [vmem:[#allocation2 + $0x308] sm:$0xff] }
 0x47b   :  { %v11140_v12 = vunpack.i.h.bf16 %v11138_v13  ;;  %v11139_v1 = vunpack.i.l.bf16 %v11138_v13  ;;  %v11123_v60 = vpop.permute.xlu1 %11122  ;;  %v4135_v13 = vld [vmem:[#allocation2 + $0x300] sm:$0xff] }
 0x47c   :  { %v11125_v19 = vunpack.i.h.bf16 %v11123_v60  ;;  %v11124_v16 = vunpack.i.l.bf16 %v11123_v60  ;;  %11427 = vrot.lane.b32.xlu0 %v17393_v21, %s11742_s22  ;;  %8990 = vmatprep.mubr.msk.bf16.mxu1 %vm7101_vm0, %v7044_v5 }
 0x47d   :  { %11412 = vrot.lane.b32.xlu1 %v17440_v51, %s11739_s29 }
 0x47e   :  { %v6935_v7 = vsel %vm6896_vm14, %v6870_v26, %v11124_v16  ;;  %v6936_v2 = vsel %vm6896_vm14, %v6871_v53, %v11125_v19  ;;  %v17455_v44 = vpop.permute.xlu0 %11147 }
 0x47f   :  { %v11133_v58 = vpop.permute.xlu1 %11132  ;;  %v7000_v21 = vsel %vm6961_vm15, %v6935_v7, %v11139_v1  ;;  %v7001_v55 = vsel %vm6961_vm15, %v6936_v2, %v11140_v12  ;;  %v11149_v15 = vunpack.i.l.bf16 %v17455_v44  ;;  %v11150_v47 = vunpack.i.h.bf16 %v17455_v44 }
 0x480   :  { %11437 = vrot.lane.b32.xlu0 %v17440_v51, %s11743_s0  ;;  %v7045_v36 = vpack.c.bf16 %v7001_v55, %v7000_v21  ;;  %v11134_v22 = vunpack.i.l.bf16 %v11133_v58  ;;  %v11135_v41 = vunpack.i.h.bf16 %v11133_v58  ;;  %v17496_v1 = vpack.i.bf16 %v4136_v43, %v4135_v13  ;;  %v3928_v21 = vld [vmem:[#allocation2 + $0x230] sm:$0xff] }
 0x481   :  { %11422 = vrot.lane.b32.xlu1 %v11421_v59, %s11741_s18 }
 0x482   :  { %v8968_v62 = vpop.f32.mrf.mxu1  ;;  %8991 = vmatmul.mubr.msk.bf16.gmra.mxu1 %vm7101_vm0, %v7045_v36  ;;  %v17463_v56 = vpop.permute.xlu0 %11157  ;;  %v6550_v14 = vsel %vm2743_vm1, %v3925_v24, %v11134_v22 }
 0x483   :  { %v17465_v34 = vpop.permute.xlu1 %11142  ;;  %v7293_v45 = vadd.f32 %v8968_v62, %v17157_v63  ;;  %v11160_v6 = vunpack.i.h.bf16 %v17463_v56  ;;  %v6614_v27 = vsel %vm2873_vm4, %v6550_v14, %v11149_v15  ;;  %v4199_v14 = vld [vmem:[#allocation2 + $0x301] sm:$0xff] }
 0x484   :  { %v7284_v29 = vpop.f32.mrf.mxu1  ;;  %11447 = vrot.lane.b32.xlu0 %v11421_v59, %s11744_s4  ;;  %v11145_v54 = vunpack.i.h.bf16 %v17465_v34  ;;  %v11144_v19 = vunpack.i.l.bf16 %v17465_v34 }
 0x485   :  { %v7285_v35 = vadd.f32 %v17157_v63, %v7284_v29  ;;  %11432 = vrot.lane.b32.xlu1 %v11431_v18, %s11742_s22  ;;  %v7505_v46 = vmax.f32 %v7293_v45, 0.0 }
 0x486   :  { %v8969_v57 = vpop.f32.mrf.mxu1  ;;  %v17470_v42 = vpop.permute.xlu0 %11167 }
 0x487   :  { %v7503_v28 = vmax.f32 %v7285_v35, 0.0  ;;  %v17475_v33 = vpop.permute.xlu1 %11152  ;;  %v7296_v17 = vadd.f32 %v8969_v57, %v17157_v63  ;;  %v7582_v60 = vsel %vm3133_vm8, %v7505_v46, 0.0  ;;  %v11169_v32 = vunpack.i.l.bf16 %v17470_v42 }
 0x488   :  { %v7287_v30 = vpop.f32.mrf.mxu1  ;;  %11457 = vrot.lane.b32.xlu0 %v17472_v39, %s11744_s4  ;;  %v11155_v2 = vunpack.i.h.bf16 %v17475_v33  ;;  %v11154_v44 = vunpack.i.l.bf16 %v17475_v33 }
 0x489   :  { %v7578_v37 = vsel %vm3133_vm8, %v7503_v28, 0.0  ;;  %v7288_v25 = vadd.f32 %v17157_v63, %v7287_v30  ;;  %11442 = vrot.lane.b32.xlu1 %v11441_v52, %s11743_s0  ;;  %v6551_v63 = vsel %vm2743_vm1, %v3926_v3, %v11135_v41  ;;  %v7506_v40 = vmax.f32 %v7296_v17, 0.0 }
 0x48a   :  { %v7579_v11 = vadd.f32 %v7578_v37, %v17411_v48  ;;  %v11178_v4 = vpop.permute.xlu0 %11177  ;;  %v11159_v48 = vunpack.i.l.bf16 %v17463_v56  ;;  %v6615_v8 = vsel %vm2873_vm4, %v6551_v63, %v11150_v47  ;;  %v6553_v56 = vsel %vm2743_vm1, %v3928_v21, %v11145_v54 }
 0x48b   :  { %v7504_v38 = vmax.f32 %v7288_v25, 0.0  ;;  %v17485_v50 = vpop.permute.xlu1 %11162  ;;  %v7584_v7 = vsel %vm3133_vm8, %v7506_v40, 0.0  ;;  %v6679_v58 = vsel %vm3003_vm6, %v6615_v8, %v11160_v6  ;;  %v11180_v55 = vunpack.i.h.bf16 %v11178_v4  ;;  %v4263_v8 = vld [vmem:[#allocation2 + $0x302] sm:$0xff] }
 0x48c   :  { %11467 = vrot.lane.b32.xlu0 %v11421_v59, %s11735_s19  ;;  %v6678_v53 = vsel %vm3003_vm6, %v6614_v27, %v11159_v48  ;;  %v3927_v59 = vld [vmem:[#allocation2 + $0x228] sm:$0xff]  ;;  %v11179_v36 = vunpack.i.l.bf16 %v11178_v4  ;;  %v11165_v10 = vunpack.i.h.bf16 %v17485_v50  ;;  %v11164_v45 = vunpack.i.l.bf16 %v17485_v50 }
 0x48d   :  { %v7580_v5 = vsel %vm3133_vm8, %v7504_v38, 0.0  ;;  %11452 = vrot.lane.b32.xlu1 %v17440_v51, %s11733_s25  ;;  %v11170_v51 = vunpack.i.h.bf16 %v17470_v42  ;;  %v6552_v49 = vsel %vm2743_vm1, %v3927_v59, %v11144_v19  ;;  %v6742_v31 = vsel %vm3133_vm8, %v6678_v53, %v11169_v32  ;;  %v4200_v4 = vld [vmem:[#allocation2 + $0x309] sm:$0xff] }
 0x48e   :  { %v7581_v23 = vadd.f32 %v7580_v5, %v7579_v11  ;;  %v11188_v12 = vpop.permute.xlu0 %11187  ;;  %v6616_v57 = vsel %vm2873_vm4, %v6552_v49, %v11154_v44  ;;  %v6617_v42 = vsel %vm2873_vm4, %v6553_v56, %v11155_v2  ;;  %v6807_v28 = vsel %vm6766_vm12, %v6742_v31, %v11179_v36  ;;  %v4328_v56 = vld [vmem:[#allocation2 + $0x318] sm:$0xff] }
 0x48f   :  { %v17502_v16 = vpop.permute.xlu1 %11172  ;;  %v11190_v34 = vunpack.i.h.bf16 %v11188_v12  ;;  %v6743_v29 = vsel %vm3133_vm8, %v6679_v58, %v11170_v51  ;;  %v6680_v63 = vsel %vm3003_vm6, %v6616_v57, %v11164_v45  ;;  %v6681_v48 = vsel %vm3003_vm6, %v6617_v42, %v11165_v10  ;;  %v4264_v51 = vld [vmem:[#allocation2 + $0x30a] sm:$0xff]  ;;  %v4392_v45 = vld [vmem:[#allocation2 + $0x319] sm:$0xff] }
 0x490   :  { %v7583_v26 = vadd.f32 %v7582_v60, %v7581_v23  ;;  %11477 = vrot.lane.b32.xlu0 %v11431_v18, %s11737_s26  ;;  %v11189_v18 = vunpack.i.l.bf16 %v11188_v12  ;;  %v6808_v33 = vsel %vm6766_vm12, %v6743_v29, %v11180_v55  ;;  %v11175_v22 = vunpack.i.h.bf16 %v17502_v16  ;;  %v4329_v55 = vld [vmem:[#allocation2 + $0x320] sm:$0xff] }
 0x491   :  { %11462 = vrot.lane.b32.xlu1 %v11441_v52, %s11733_s25  ;;  %v11174_v30 = vunpack.i.l.bf16 %v17502_v16  ;;  %v6873_v37 = vsel %vm6831_vm13, %v6808_v33, %v11190_v34  ;;  %v17543_v13 = vpack.i.bf16 %v4200_v4, %v4199_v14  ;;  %v11501_v58 = vpack.i.bf16 %v4264_v51, %v4263_v8  ;;  %v4393_v29 = vld [vmem:[#allocation2 + $0x321] sm:$0xff] }
 0x492   :  { %v11198_v9 = vpop.permute.xlu0 %11197  ;;  %v17514_v62 = vadd.f32 %v7584_v7, %v7583_v26  ;;  %v6872_v41 = vsel %vm6831_vm13, %v6807_v28, %v11189_v18  ;;  %v6745_v6 = vsel %vm3133_vm8, %v6681_v48, %v11175_v22  ;;  %v11511_v34 = vpack.i.bf16 %v4329_v55, %v4328_v56  ;;  %v4456_v18 = vld [vmem:[#allocation2 + $0x31a] sm:$0xff]  ;;  %v3930_v14 = vld [vmem:[#allocation2 + $0x248] sm:$0xff] }
 0x493   :  { %v11183_v0 = vpop.permute.xlu1 %11182  ;;  %v11200_v20 = vunpack.i.h.bf16 %v11198_v9  ;;  %v11199_v35 = vunpack.i.l.bf16 %v11198_v9 }
 0x494   :  { %11487 = vrot.lane.b32.xlu0 %v11441_v52, %s11739_s29  ;;  %v11185_v46 = vunpack.i.h.bf16 %v11183_v0  ;;  %v11184_v38 = vunpack.i.l.bf16 %v11183_v0  ;;  %v4457_v0 = vld [vmem:[#allocation2 + $0x322] sm:$0xff] }
 0x495   :  { %11472 = vrot.lane.b32.xlu1 %v17472_v39, %s11735_s19  ;;  %v6937_v15 = vsel %vm6896_vm14, %v6872_v41, %v11199_v35  ;;  %v6938_v24 = vsel %vm6896_vm14, %v6873_v37, %v11200_v20  ;;  %v17574_v20 = vld [vmem:[%s18103_s5] ss:$0 sm:$0xff]  ;;  %v17580_v10 = vpack.i.bf16 %v4457_v0, %v4456_v18 }
 0x496   :  { %v11208_v52 = vpop.permute.xlu0 %11207  ;;  %v6810_v54 = vsel %vm6766_vm12, %v6745_v6, %v11185_v46  ;;  %v3929_v46 = vld [vmem:[#allocation2 + $0x240] sm:$0xff] }
 0x497   :  { %v11210_v17 = vunpack.i.h.bf16 %v11208_v52  ;;  %v11209_v25 = vunpack.i.l.bf16 %v11208_v52  ;;  %v11193_v11 = vpop.permute.xlu1 %11192 }
 0x498   :  { %11497 = vrot.lane.b32.xlu0 %v17472_v39, %s11741_s18  ;;  %v11195_v47 = vunpack.i.h.bf16 %v11193_v11  ;;  %v11194_v3 = vunpack.i.l.bf16 %v11193_v11  ;;  %v6744_v39 = vsel %vm3133_vm8, %v6680_v63, %v11174_v30  ;;  %v11521_v30 = vpack.i.bf16 %v4393_v29, %v4392_v45 }
 0x499   :  { %v7002_v50 = vsel %vm6961_vm15, %v6937_v15, %v11209_v25  ;;  %v7003_v43 = vsel %vm6961_vm15, %v6938_v24, %v11210_v17  ;;  %11482 = vrot.lane.b32.xlu1 %v17496_v1, %s11737_s26  ;;  %v6809_v27 = vsel %vm6766_vm12, %v6744_v39, %v11184_v38  ;;  %v4139_v39 = vld [vmem:[#allocation2 + $0x330] sm:$0xff] }
 0x49a   :  { %v7046_v40 = vpack.c.bf16 %v7003_v43, %v7002_v50  ;;  %v11218_v5 = vpop.permute.xlu0 %11217  ;;  %v6874_v32 = vsel %vm6831_vm13, %v6809_v27, %v11194_v3  ;;  %v6875_v26 = vsel %vm6831_vm13, %v6810_v54, %v11195_v47  ;;  %v4140_v47 = vld [vmem:[#allocation2 + $0x338] sm:$0xff] }
 0x49b   :  { %v11220_v23 = vunpack.i.h.bf16 %v11218_v5  ;;  %v11219_v12 = vunpack.i.l.bf16 %v11218_v5  ;;  %v11203_v60 = vpop.permute.xlu1 %11202 }
 0x49c   :  { %v11205_v19 = vunpack.i.h.bf16 %v11203_v60  ;;  %v11204_v16 = vunpack.i.l.bf16 %v11203_v60  ;;  %11507 = vrot.lane.b32.xlu0 %v17496_v1, %s11742_s22  ;;  %8994 = vmatprep.mubr.msk.bf16.mxu1 %vm7101_vm0, %v7046_v40  ;;  %v17604_v60 = vpack.i.bf16 %v4140_v47, %v4139_v39 }
 0x49d   :  { %11492 = vrot.lane.b32.xlu1 %v17543_v13, %s11739_s29 }
 0x49e   :  { %v6939_v53 = vsel %vm6896_vm14, %v6874_v32, %v11204_v16  ;;  %v6940_v7 = vsel %vm6896_vm14, %v6875_v26, %v11205_v19  ;;  %v17558_v2 = vpop.permute.xlu0 %11227 }
 0x49f   :  { %v11213_v44 = vpop.permute.xlu1 %11212  ;;  %v7004_v1 = vsel %vm6961_vm15, %v6939_v53, %v11219_v12  ;;  %v7005_v59 = vsel %vm6961_vm15, %v6940_v7, %v11220_v23  ;;  %v11229_v24 = vunpack.i.l.bf16 %v17558_v2  ;;  %v11230_v3 = vunpack.i.h.bf16 %v17558_v2 }
 0x4a0   :  { %11517 = vrot.lane.b32.xlu0 %v17543_v13, %s11743_s0  ;;  %v7047_v21 = vpack.c.bf16 %v7005_v59, %v7004_v1  ;;  %v11214_v52 = vunpack.i.l.bf16 %v11213_v44  ;;  %v11215_v37 = vunpack.i.h.bf16 %v11213_v44  ;;  %v3931_v1 = vld [vmem:[#allocation2 + $0x258] sm:$0xff]  ;;  %v3932_v59 = vld [vmem:[#allocation2 + $0x260] sm:$0xff] }
 0x4a1   :  { %11502 = vrot.lane.b32.xlu1 %v11501_v58, %s11741_s18 }
 0x4a2   :  { %v8972_v36 = vpop.f32.mrf.mxu1  ;;  %8995 = vmatmul.mubr.msk.bf16.gmra.mxu1 %vm7101_vm0, %v7047_v21  ;;  %v17566_v9 = vpop.permute.xlu0 %11237  ;;  %v6554_v63 = vsel %vm2743_vm1, %v3929_v46, %v11214_v52  ;;  %v6555_v48 = vsel %vm2743_vm1, %v3930_v14, %v11215_v37 }
 0x4a3   :  { %v17568_v49 = vpop.permute.xlu1 %11222  ;;  %v7309_v28 = vadd.f32 %v17574_v20, %v8972_v36  ;;  %v11240_v6 = vunpack.i.h.bf16 %v17566_v9  ;;  %v6618_v54 = vsel %vm2873_vm4, %v6554_v63, %v11229_v24  ;;  %v6619_v51 = vsel %vm2873_vm4, %v6555_v48, %v11230_v3  ;;  %v4204_v24 = vld [vmem:[#allocation2 + $0x339] sm:$0xff]  ;;  %v4203_v48 = vld [vmem:[#allocation2 + $0x331] sm:$0xff] }
 0x4a4   :  { %v7300_v31 = vpop.f32.mrf.mxu1  ;;  %11527 = vrot.lane.b32.xlu0 %v11501_v58, %s11744_s4  ;;  %v11225_v19 = vunpack.i.h.bf16 %v17568_v49  ;;  %v11224_v16 = vunpack.i.l.bf16 %v17568_v49 }
 0x4a5   :  { %v7301_v35 = vadd.f32 %v17574_v20, %v7300_v31  ;;  %11512 = vrot.lane.b32.xlu1 %v11511_v34, %s11742_s22  ;;  %v7509_v38 = vmax.f32 %v7309_v28, 0.0 }
 0x4a6   :  { %v8973_v57 = vpop.f32.mrf.mxu1  ;;  %v17578_v42 = vpop.permute.xlu0 %11247  ;;  %v6557_v56 = vsel %vm2743_vm1, %v3932_v59, %v11225_v19  ;;  %v6556_v49 = vsel %vm2743_vm1, %v3931_v1, %v11224_v16  ;;  %v4333_v1 = vld [vmem:[#allocation2 + $0x350] sm:$0xff] }
 0x4a7   :  { %v7507_v33 = vmax.f32 %v7301_v35, 0.0  ;;  %v17583_v22 = vpop.permute.xlu1 %11232  ;;  %v7312_v25 = vadd.f32 %v17574_v20, %v8973_v57  ;;  %v7590_v27 = vsel %vm3133_vm8, %v7509_v38, 0.0  ;;  %v11249_v32 = vunpack.i.l.bf16 %v17578_v42 }
 0x4a8   :  { %v7303_v41 = vpop.f32.mrf.mxu1  ;;  %11537 = vrot.lane.b32.xlu0 %v17580_v10, %s11744_s4  ;;  %v11235_v2 = vunpack.i.h.bf16 %v17583_v22  ;;  %v11234_v44 = vunpack.i.l.bf16 %v17583_v22 }
 0x4a9   :  { %v7586_v17 = vsel %vm3133_vm8, %v7507_v33, 0.0  ;;  %v7304_v11 = vadd.f32 %v17574_v20, %v7303_v41  ;;  %11522 = vrot.lane.b32.xlu1 %v11521_v30, %s11743_s0  ;;  %v7510_v40 = vmax.f32 %v7312_v25, 0.0 }
 0x4aa   :  { %v7587_v4 = vadd.f32 %v7586_v17, %v17514_v62  ;;  %v11258_v15 = vpop.permute.xlu0 %11257  ;;  %v11239_v62 = vunpack.i.l.bf16 %v17566_v9  ;;  %v6621_v45 = vsel %vm2873_vm4, %v6557_v56, %v11235_v2 }
 0x4ab   :  { %v7508_v50 = vmax.f32 %v7304_v11, 0.0  ;;  %v17593_v43 = vpop.permute.xlu1 %11242  ;;  %v7592_v7 = vsel %vm3133_vm8, %v7510_v40, 0.0  ;;  %v11260_v21 = vunpack.i.h.bf16 %v11258_v15  ;;  %v11259_v55 = vunpack.i.l.bf16 %v11258_v15 }
 0x4ac   :  { %11547 = vrot.lane.b32.xlu0 %v11501_v58, %s11735_s19  ;;  %v6682_v53 = vsel %vm3003_vm6, %v6618_v54, %v11239_v62  ;;  %v6683_v58 = vsel %vm3003_vm6, %v6619_v51, %v11240_v6  ;;  %v11245_v28 = vunpack.i.h.bf16 %v17593_v43  ;;  %v11244_v33 = vunpack.i.l.bf16 %v17593_v43 }
 0x4ad   :  { %v7588_v5 = vsel %vm3133_vm8, %v7508_v50, 0.0  ;;  %11532 = vrot.lane.b32.xlu1 %v17543_v13, %s11733_s25  ;;  %v11250_v13 = vunpack.i.h.bf16 %v17578_v42  ;;  %v6746_v31 = vsel %vm3133_vm8, %v6682_v53, %v11249_v32  ;;  %v6620_v42 = vsel %vm2873_vm4, %v6556_v49, %v11234_v44  ;;  %v4268_v32 = vld [vmem:[#allocation2 + $0x33a] sm:$0xff] }
 0x4ae   :  { %v7589_v23 = vadd.f32 %v7588_v5, %v7587_v4  ;;  %v11268_v12 = vpop.permute.xlu0 %11267  ;;  %v6811_v22 = vsel %vm6766_vm12, %v6746_v31, %v11259_v55  ;;  %v6684_v62 = vsel %vm3003_vm6, %v6620_v42, %v11244_v33  ;;  %v6685_v40 = vsel %vm3003_vm6, %v6621_v45, %v11245_v28  ;;  %v4460_v42 = vld [vmem:[#allocation2 + $0x34a] sm:$0xff]  ;;  %v4461_v45 = vld [vmem:[#allocation2 + $0x352] sm:$0xff] }
 0x4af   :  { %v17610_v8 = vpop.permute.xlu1 %11252  ;;  %v11269_v18 = vunpack.i.l.bf16 %v11268_v12  ;;  %v6747_v29 = vsel %vm3133_vm8, %v6683_v58, %v11250_v13  ;;  %v11571_v6 = vpack.i.bf16 %v4204_v24, %v4203_v48  ;;  %v4267_v13 = vld [vmem:[#allocation2 + $0x332] sm:$0xff]  ;;  %v4332_v58 = vld [vmem:[#allocation2 + $0x348] sm:$0xff] }
 0x4b0   :  { %v7591_v26 = vadd.f32 %v7590_v27, %v7589_v23  ;;  %11557 = vrot.lane.b32.xlu0 %v11511_v34, %s11737_s26  ;;  %v11270_v34 = vunpack.i.h.bf16 %v11268_v12  ;;  %v6812_v52 = vsel %vm6766_vm12, %v6747_v29, %v11260_v21  ;;  %v11255_v41 = vunpack.i.h.bf16 %v17610_v8 }
 0x4b1   :  { %11542 = vrot.lane.b32.xlu1 %v11521_v30, %s11733_s25  ;;  %v11254_v37 = vunpack.i.l.bf16 %v17610_v8  ;;  %v6876_v17 = vsel %vm6831_vm13, %v6811_v22, %v11269_v18  ;;  %v11581_v21 = vpack.i.bf16 %v4268_v32, %v4267_v13  ;;  %v11591_v56 = vpack.i.bf16 %v4333_v1, %v4332_v58  ;;  %v4396_v18 = vld [vmem:[#allocation2 + $0x349] sm:$0xff] }
 0x4b2   :  { %v11278_v36 = vpop.permute.xlu0 %11277  ;;  %v17622_v9 = vadd.f32 %v7592_v7, %v7591_v26  ;;  %v6877_v25 = vsel %vm6831_vm13, %v6812_v52, %v11270_v34  ;;  %v3936_v58 = vld [vmem:[#allocation2 + $0x290] sm:$0xff] }
 0x4b3   :  { %v11263_v0 = vpop.permute.xlu1 %11262  ;;  %v11280_v35 = vunpack.i.h.bf16 %v11278_v36  ;;  %v11279_v57 = vunpack.i.l.bf16 %v11278_v36  ;;  %v6748_v23 = vsel %vm3133_vm8, %v6684_v62, %v11254_v37 }
 0x4b4   :  { %11567 = vrot.lane.b32.xlu0 %v11521_v30, %s11739_s29  ;;  %v11265_v50 = vunpack.i.h.bf16 %v11263_v0  ;;  %v11264_v43 = vunpack.i.l.bf16 %v11263_v0  ;;  %v4397_v0 = vld [vmem:[#allocation2 + $0x351] sm:$0xff] }
 0x4b5   :  { %11552 = vrot.lane.b32.xlu1 %v17580_v10, %s11735_s19  ;;  %v6941_v46 = vsel %vm6896_vm14, %v6876_v17, %v11279_v57  ;;  %v6942_v38 = vsel %vm6896_vm14, %v6877_v25, %v11280_v35  ;;  %v11601_v57 = vpack.i.bf16 %v4397_v0, %v4396_v18  ;;  %v11611_v17 = vpack.i.bf16 %v4461_v45, %v4460_v42 }
 0x4b6   :  { %v11288_v30 = vpop.permute.xlu0 %11287  ;;  %v6813_v19 = vsel %vm6766_vm12, %v6748_v23, %v11264_v43 }
 0x4b7   :  { %v11290_v11 = vunpack.i.h.bf16 %v11288_v30  ;;  %v11289_v4 = vunpack.i.l.bf16 %v11288_v30  ;;  %v11273_v15 = vpop.permute.xlu1 %11272 }
 0x4b8   :  { %11577 = vrot.lane.b32.xlu0 %v17580_v10, %s11741_s18  ;;  %v11275_v14 = vunpack.i.h.bf16 %v11273_v15  ;;  %v11274_v63 = vunpack.i.l.bf16 %v11273_v15  ;;  %v6749_v10 = vsel %vm3133_vm8, %v6685_v40, %v11255_v41 }
 0x4b9   :  { %v7006_v47 = vsel %vm6961_vm15, %v6941_v46, %v11289_v4  ;;  %v7007_v3 = vsel %vm6961_vm15, %v6942_v38, %v11290_v11  ;;  %11562 = vrot.lane.b32.xlu1 %v17604_v60, %s11737_s26  ;;  %v6814_v16 = vsel %vm6766_vm12, %v6749_v10, %v11265_v50  ;;  %v3933_v50 = vld [vmem:[#allocation2 + $0x270] sm:$0xff] }
 0x4ba   :  { %v7048_v5 = vpack.c.bf16 %v7007_v3, %v7006_v47  ;;  %v11298_v39 = vpop.permute.xlu0 %11297  ;;  %v6878_v26 = vsel %vm6831_vm13, %v6813_v19, %v11274_v63  ;;  %v6879_v53 = vsel %vm6831_vm13, %v6814_v16, %v11275_v14  ;;  %v3934_v63 = vld [vmem:[#allocation2 + $0x278] sm:$0xff] }
 0x4bb   :  { %v11300_v12 = vunpack.i.h.bf16 %v11298_v39  ;;  %v11299_v27 = vunpack.i.l.bf16 %v11298_v39  ;;  %v11283_v54 = vpop.permute.xlu1 %11282 }
 0x4bc   :  { %v11285_v8 = vunpack.i.h.bf16 %v11283_v54  ;;  %v11284_v51 = vunpack.i.l.bf16 %v11283_v54  ;;  %11587 = vrot.lane.b32.xlu0 %v17604_v60, %s11742_s22  ;;  %8998 = vmatprep.mubr.msk.bf16.mxu1 %vm7101_vm0, %v7048_v5 }
 0x4bd   :  { %11572 = vrot.lane.b32.xlu1 %v11571_v6, %s11739_s29 }
 0x4be   :  { %v6943_v7 = vsel %vm6896_vm14, %v6878_v26, %v11284_v51  ;;  %v6944_v2 = vsel %vm6896_vm14, %v6879_v53, %v11285_v8  ;;  %v11308_v44 = vpop.permute.xlu0 %11307 }
 0x4bf   :  { %v11293_v59 = vpop.permute.xlu1 %11292  ;;  %v7008_v60 = vsel %vm6961_vm15, %v6943_v7, %v11299_v27  ;;  %v7009_v55 = vsel %vm6961_vm15, %v6944_v2, %v11300_v12  ;;  %v11309_v38 = vunpack.i.l.bf16 %v11308_v44  ;;  %v11310_v14 = vunpack.i.h.bf16 %v11308_v44  ;;  %v3935_v44 = vld [vmem:[#allocation2 + $0x288] sm:$0xff] }
 0x4c0   :  { %11597 = vrot.lane.b32.xlu0 %v11571_v6, %s11743_s0  ;;  %v7049_v36 = vpack.c.bf16 %v7009_v55, %v7008_v60  ;;  %v11294_v37 = vunpack.i.l.bf16 %v11293_v59  ;;  %v11295_v25 = vunpack.i.h.bf16 %v11293_v59 }
 0x4c1   :  { %11582 = vrot.lane.b32.xlu1 %v11581_v21, %s11741_s18 }
 0x4c2   :  { %v8976_v49 = vpop.f32.mrf.mxu1  ;;  %8999 = vmatmul.mubr.msk.bf16.gmra.mxu1 %vm7101_vm0, %v7049_v36  ;;  %v11318_v34 = vpop.permute.xlu0 %11317  ;;  %v6558_v48 = vsel %vm2743_vm1, %v3933_v50, %v11294_v37  ;;  %v6559_v62 = vsel %vm2743_vm1, %v3934_v63, %v11295_v25 }
 0x4c3   :  { %v11303_v31 = vpop.permute.xlu1 %11302  ;;  %v7325_v22 = vadd.f32 %v17574_v20, %v8976_v49  ;;  %v11319_v40 = vunpack.i.l.bf16 %v11318_v34  ;;  %v6622_v12 = vsel %vm2873_vm4, %v6558_v48, %v11309_v38  ;;  %v6623_v16 = vsel %vm2873_vm4, %v6559_v62, %v11310_v14 }
 0x4c4   :  { %v7316_v29 = vpop.f32.mrf.mxu1  ;;  %11607 = vrot.lane.b32.xlu0 %v11581_v21, %s11744_s4  ;;  %v11305_v27 = vunpack.i.h.bf16 %v11303_v31  ;;  %v11304_v54 = vunpack.i.l.bf16 %v11303_v31 }
 0x4c5   :  { %v7317_v35 = vadd.f32 %v17574_v20, %v7316_v29  ;;  %11592 = vrot.lane.b32.xlu1 %v11591_v56, %s11742_s22  ;;  %v7513_v43 = vmax.f32 %v7325_v22, 0.0  ;;  %v6686_v32 = vsel %vm3003_vm6, %v6622_v12, %v11319_v40 }
 0x4c6   :  { %v8977_v28 = vpop.f32.mrf.mxu1  ;;  %v11328_v33 = vpop.permute.xlu0 %11327  ;;  %v6561_v55 = vsel %vm2743_vm1, %v3936_v58, %v11305_v27  ;;  %v6560_v36 = vsel %vm2743_vm1, %v3935_v44, %v11304_v54 }
 0x4c7   :  { %v7511_v52 = vmax.f32 %v7317_v35, 0.0  ;;  %v11313_v41 = vpop.permute.xlu1 %11312  ;;  %v7328_v4 = vadd.f32 %v17574_v20, %v8977_v28  ;;  %v7598_v10 = vsel %vm3133_vm8, %v7513_v43, 0.0  ;;  %v11330_v8 = vunpack.i.h.bf16 %v11328_v33 }
 0x4c8   :  { %v7319_v30 = vpop.f32.mrf.mxu1  ;;  %v11329_v51 = vunpack.i.l.bf16 %v11328_v33  ;;  %v11315_v53 = vunpack.i.h.bf16 %v11313_v41  ;;  %v11314_v7 = vunpack.i.l.bf16 %v11313_v41 }
 0x4c9   :  { %v7594_v11 = vsel %vm3133_vm8, %v7511_v52, 0.0  ;;  %v7320_v15 = vadd.f32 %v17574_v20, %v7319_v30  ;;  %11602 = vrot.lane.b32.xlu1 %v11601_v57, %s11743_s0  ;;  %v7514_v5 = vmax.f32 %v7328_v4, 0.0 }
 0x4ca   :  { %v7595_v24 = vadd.f32 %v7594_v11, %v17622_v9  ;;  %v11338_v46 = vpop.permute.xlu0 %11337  ;;  %v11320_v9 = vunpack.i.h.bf16 %v11318_v34  ;;  %v6750_v18 = vsel %vm3133_vm8, %v6686_v32, %v11329_v51  ;;  %v6624_v35 = vsel %vm2873_vm4, %v6560_v36, %v11314_v7 }
 0x4cb   :  { %v7512_v47 = vmax.f32 %v7320_v15, 0.0  ;;  %v17677_v3 = vpop.permute.xlu1 %11322  ;;  %v7600_v26 = vsel %vm3133_vm8, %v7514_v5, 0.0  ;;  %v11340_v1 = vunpack.i.h.bf16 %v11338_v46  ;;  %v11339_v59 = vunpack.i.l.bf16 %v11338_v46 }
 0x4cc   :  { %v6687_v2 = vsel %vm3003_vm6, %v6623_v16, %v11320_v9  ;;  %v6625_v57 = vsel %vm2873_vm4, %v6561_v55, %v11315_v53  ;;  %v11325_v42 = vunpack.i.h.bf16 %v17677_v3  ;;  %v11324_v45 = vunpack.i.l.bf16 %v17677_v3 }
 0x4cd   :  { %v7596_v39 = vsel %vm3133_vm8, %v7512_v47, 0.0  ;;  %11612 = vrot.lane.b32.xlu1 %v11611_v17, %s11744_s4  ;;  %v6751_v0 = vsel %vm3133_vm8, %v6687_v2, %v11330_v8  ;;  %v6815_v28 = vsel %vm6766_vm12, %v6750_v18, %v11339_v59 }
 0x4ce   :  { %v7597_v6 = vadd.f32 %v7596_v39, %v7595_v24  ;;  %v11348_v23 = vpop.permute.xlu0 %11347  ;;  %v6816_v33 = vsel %vm6766_vm12, %v6751_v0, %v11340_v1  ;;  %v6688_v3 = vsel %vm3003_vm6, %v6624_v35, %v11324_v45  ;;  %v6689_v14 = vsel %vm3003_vm6, %v6625_v57, %v11325_v42  ;;  %v3937_v42 = vld [vmem:[#allocation2 + $0x2a0] sm:$0xff] }
 0x4cf   :  { %v11333_v19 = vpop.permute.xlu1 %11332  ;;  %v11350_v56 = vunpack.i.h.bf16 %v11348_v23  ;;  %v11349_v49 = vunpack.i.l.bf16 %v11348_v23 }
 0x4d0   :  { %v7599_v13 = vadd.f32 %v7598_v10, %v7597_v6  ;;  %v11335_v22 = vunpack.i.h.bf16 %v11333_v19  ;;  %v11334_v52 = vunpack.i.l.bf16 %v11333_v19 }
 0x4d1   :  { %v6880_v37 = vsel %vm6831_vm13, %v6815_v28, %v11349_v49  ;;  %v6881_v30 = vsel %vm6831_vm13, %v6816_v33, %v11350_v56 }
 0x4d2   :  { %v11358_v21 = vpop.permute.xlu0 %11357  ;;  %v17689_v60 = vadd.f32 %v7600_v26, %v7599_v13  ;;  %v6752_v62 = vsel %vm3133_vm8, %v6688_v3, %v11334_v52  ;;  %v6753_v40 = vsel %vm3133_vm8, %v6689_v14, %v11335_v22  ;;  %v3938_v52 = vld [vmem:[#allocation2 + $0x2a8] sm:$0xff] }
 0x4d3   :  { %v11343_v34 = vpop.permute.xlu1 %11342  ;;  %v11360_v31 = vunpack.i.h.bf16 %v11358_v21  ;;  %v11359_v29 = vunpack.i.l.bf16 %v11358_v21 }
 0x4d4   :  { %v11345_v24 = vunpack.i.h.bf16 %v11343_v34  ;;  %v11344_v46 = vunpack.i.l.bf16 %v11343_v34 }
 0x4d5   :  { %v6945_v4 = vsel %vm6896_vm14, %v6880_v37, %v11359_v29  ;;  %v6946_v15 = vsel %vm6896_vm14, %v6881_v30, %v11360_v31 }
 0x4d6   :  { %v11368_v41 = vpop.permute.xlu0 %11367  ;;  %v6817_v6 = vsel %vm6766_vm12, %v6752_v62, %v11344_v46  ;;  %v6818_v23 = vsel %vm6766_vm12, %v6753_v40, %v11345_v24 }
 0x4d7   :  { %v11370_v17 = vunpack.i.h.bf16 %v11368_v41  ;;  %v11369_v25 = vunpack.i.l.bf16 %v11368_v41  ;;  %v11353_v11 = vpop.permute.xlu1 %11352 }
 0x4d8   :  { %v11355_v43 = vunpack.i.h.bf16 %v11353_v11  ;;  %v11354_v47 = vunpack.i.l.bf16 %v11353_v11 }
 0x4d9   :  { %v7010_v38 = vsel %vm6961_vm15, %v6945_v4, %v11369_v25  ;;  %v7011_v50 = vsel %vm6961_vm15, %v6946_v15, %v11370_v17 }
 0x4da   :  { %v7050_v63 = vpack.c.bf16 %v7011_v50, %v7010_v38  ;;  %v11378_v48 = vpop.permute.xlu0 %11377  ;;  %v6882_v27 = vsel %vm6831_vm13, %v6817_v6, %v11354_v47  ;;  %v6883_v54 = vsel %vm6831_vm13, %v6818_v23, %v11355_v43 }
 0x4db   :  { %v11380_v5 = vunpack.i.h.bf16 %v11378_v48  ;;  %v11379_v39 = vunpack.i.l.bf16 %v11378_v48  ;;  %v11363_v9 = vpop.permute.xlu1 %11362 }
 0x4dc   :  { %v11365_v10 = vunpack.i.h.bf16 %v11363_v9  ;;  %v11364_v12 = vunpack.i.l.bf16 %v11363_v9  ;;  %9002 = vmatprep.mubr.msk.bf16.mxu1 %vm7101_vm0, %v7050_v63  ;;  %v3940_v9 = vld [vmem:[#allocation2 + $0x2c0] sm:$0xff] }
 0x4de   :  { %v6947_v19 = vsel %vm6896_vm14, %v6882_v27, %v11364_v12  ;;  %v6948_v16 = vsel %vm6896_vm14, %v6883_v54, %v11365_v10  ;;  %v11388_v8 = vpop.permute.xlu0 %11387 }
 0x4df   :  { %v11373_v51 = vpop.permute.xlu1 %11372  ;;  %v7012_v13 = vsel %vm6961_vm15, %v6947_v19, %v11379_v39  ;;  %v7013_v32 = vsel %vm6961_vm15, %v6948_v16, %v11380_v5  ;;  %v11389_v57 = vunpack.i.l.bf16 %v11388_v8  ;;  %v11390_v22 = vunpack.i.h.bf16 %v11388_v8  ;;  %v3939_v39 = vld [vmem:[#allocation2 + $0x2b8] sm:$0xff] }
 0x4e0   :  { %v7051_v26 = vpack.c.bf16 %v7013_v32, %v7012_v13  ;;  %v11374_v56 = vunpack.i.l.bf16 %v11373_v51  ;;  %v11375_v34 = vunpack.i.h.bf16 %v11373_v51 }
 0x4e2   :  { %v8980_v53 = vpop.f32.mrf.mxu1  ;;  %9003 = vmatmul.mubr.msk.bf16.gmra.mxu1 %vm7101_vm0, %v7051_v26  ;;  %v11398_v7 = vpop.permute.xlu0 %11397  ;;  %v6562_v41 = vsel %vm2743_vm1, %v3937_v42, %v11374_v56  ;;  %v6563_v37 = vsel %vm2743_vm1, %v3938_v52, %v11375_v34 }
 0x4e3   :  { %v11383_v2 = vpop.permute.xlu1 %11382  ;;  %v7341_v21 = vadd.f32 %v17574_v20, %v8980_v53  ;;  %v11399_v30 = vunpack.i.l.bf16 %v11398_v7  ;;  %v11400_v11 = vunpack.i.h.bf16 %v11398_v7  ;;  %v6626_v24 = vsel %vm2873_vm4, %v6562_v41, %v11389_v57 }
 0x4e4   :  { %v7332_v44 = vpop.f32.mrf.mxu1  ;;  %v11385_v46 = vunpack.i.h.bf16 %v11383_v2  ;;  %v11384_v38 = vunpack.i.l.bf16 %v11383_v2  ;;  %v6627_v43 = vsel %vm2873_vm4, %v6563_v37, %v11390_v22 }
 0x4e5   :  { %v7333_v58 = vadd.f32 %v17574_v20, %v7332_v44  ;;  %v7517_v45 = vmax.f32 %v7341_v21, 0.0  ;;  %v6690_v63 = vsel %vm3003_vm6, %v6626_v24, %v11399_v30  ;;  %v6691_v5 = vsel %vm3003_vm6, %v6627_v43, %v11400_v11 }
 0x4e6   :  { %v8981_v1 = vpop.f32.mrf.mxu1  ;;  %v11408_v59 = vpop.permute.xlu0 %11407  ;;  %v6565_v27 = vsel %vm2743_vm1, %v3940_v9, %v11385_v46  ;;  %v6564_v54 = vsel %vm2743_vm1, %v3939_v39, %v11384_v38 }
 0x4e7   :  { %v7515_v55 = vmax.f32 %v7333_v58, 0.0  ;;  %v11393_v36 = vpop.permute.xlu1 %11392  ;;  %v7344_v0 = vadd.f32 %v17574_v20, %v8981_v1  ;;  %v7606_v15 = vsel %vm3133_vm8, %v7517_v45, 0.0  ;;  %v11410_v47 = vunpack.i.h.bf16 %v11408_v59 }
 0x4e8   :  { %v7335_v49 = vpop.f32.mrf.mxu1  ;;  %v11409_v3 = vunpack.i.l.bf16 %v11408_v59  ;;  %v11395_v62 = vunpack.i.h.bf16 %v11393_v36  ;;  %v11394_v40 = vunpack.i.l.bf16 %v11393_v36 }
 0x4e9   :  { %v7602_v18 = vsel %vm3133_vm8, %v7515_v55, 0.0  ;;  %v7336_v31 = vadd.f32 %v17574_v20, %v7335_v49  ;;  %v7518_v17 = vmax.f32 %v7344_v0, 0.0  ;;  %v6755_v13 = vsel %vm3133_vm8, %v6691_v5, %v11410_v47 }
 0x4ea   :  { %v7603_v29 = vadd.f32 %v7602_v18, %v17689_v60  ;;  %v11418_v35 = vpop.permute.xlu0 %11417  ;;  %v6754_v51 = vsel %vm3133_vm8, %v6690_v63, %v11409_v3  ;;  %v6628_v53 = vsel %vm2873_vm4, %v6564_v54, %v11394_v40  ;;  %v6629_v7 = vsel %vm2873_vm4, %v6565_v27, %v11395_v62 }
 0x4eb   :  { %v7516_v28 = vmax.f32 %v7336_v31, 0.0  ;;  %v17727_v33 = vpop.permute.xlu1 %11402  ;;  %v7608_v48 = vsel %vm3133_vm8, %v7518_v17, 0.0  ;;  %v11420_v6 = vunpack.i.h.bf16 %v11418_v35  ;;  %v11419_v23 = vunpack.i.l.bf16 %v11418_v35 }
 0x4ec   :  { %v11405_v2 = vunpack.i.h.bf16 %v17727_v33  ;;  %v11404_v44 = vunpack.i.l.bf16 %v17727_v33 }
 0x4ed   :  { %v7604_v25 = vsel %vm3133_vm8, %v7516_v28, 0.0  ;;  %v6819_v58 = vsel %vm6766_vm12, %v6754_v51, %v11419_v23  ;;  %v6820_v1 = vsel %vm6766_vm12, %v6755_v13, %v11420_v6 }
 0x4ee   :  { %v7605_v4 = vadd.f32 %v7604_v25, %v7603_v29  ;;  %v11428_v60 = vpop.permute.xlu0 %11427  ;;  %v6692_v33 = vsel %vm3003_vm6, %v6628_v53, %v11404_v44  ;;  %v6693_v22 = vsel %vm3003_vm6, %v6629_v7, %v11405_v2  ;;  %v3941_v2 = vld [vmem:[#allocation2 + $0x2d0] sm:$0xff] }
 0x4ef   :  { %v11413_v50 = vpop.permute.xlu1 %11412  ;;  %v11430_v19 = vunpack.i.h.bf16 %v11428_v60  ;;  %v11429_v16 = vunpack.i.l.bf16 %v11428_v60 }
 0x4f0   :  { %v7607_v14 = vadd.f32 %v7606_v15, %v7605_v4  ;;  %v11415_v59 = vunpack.i.h.bf16 %v11413_v50  ;;  %v11414_v21 = vunpack.i.l.bf16 %v11413_v50 }
 0x4f1   :  { %v6884_v36 = vsel %vm6831_vm13, %v6819_v58, %v11429_v16  ;;  %v6885_v56 = vsel %vm6831_vm13, %v6820_v1, %v11430_v19 }
 0x4f2   :  { %v11438_v10 = vpop.permute.xlu0 %11437  ;;  %v17738_v12 = vadd.f32 %v7608_v48, %v7607_v14  ;;  %v6756_v37 = vsel %vm3133_vm8, %v6692_v33, %v11414_v21  ;;  %v6757_v30 = vsel %vm3133_vm8, %v6693_v22, %v11415_v59  ;;  %v3942_v21 = vld [vmem:[#allocation2 + $0x2d8] sm:$0xff] }
 0x4f3   :  { %v11423_v8 = vpop.permute.xlu1 %11422  ;;  %v11440_v32 = vunpack.i.h.bf16 %v11438_v10  ;;  %v11439_v26 = vunpack.i.l.bf16 %v11438_v10 }
 0x4f4   :  { %v11425_v29 = vunpack.i.h.bf16 %v11423_v8  ;;  %v11424_v35 = vunpack.i.l.bf16 %v11423_v8 }
 0x4f5   :  { %v6949_v0 = vsel %vm6896_vm14, %v6884_v36, %v11439_v26  ;;  %v6950_v31 = vsel %vm6896_vm14, %v6885_v56, %v11440_v32 }
 0x4f6   :  { %v11448_v55 = vpop.permute.xlu0 %11447  ;;  %v6821_v4 = vsel %vm6766_vm12, %v6756_v37, %v11424_v35  ;;  %v6822_v60 = vsel %vm6766_vm12, %v6757_v30, %v11425_v29 }
 0x4f7   :  { %v11450_v49 = vunpack.i.h.bf16 %v11448_v55  ;;  %v11449_v34 = vunpack.i.l.bf16 %v11448_v55  ;;  %v11433_v18 = vpop.permute.xlu1 %11432 }
 0x4f8   :  { %v11435_v45 = vunpack.i.h.bf16 %v11433_v18  ;;  %v11434_v28 = vunpack.i.l.bf16 %v11433_v18 }
 0x4f9   :  { %v7014_v57 = vsel %vm6961_vm15, %v6949_v0, %v11449_v34  ;;  %v7015_v42 = vsel %vm6961_vm15, %v6950_v31, %v11450_v49 }
 0x4fa   :  { %v7052_v52 = vpack.c.bf16 %v7015_v42, %v7014_v57  ;;  %v11458_v41 = vpop.permute.xlu0 %11457  ;;  %v6886_v46 = vsel %vm6831_vm13, %v6821_v4, %v11434_v28  ;;  %v6887_v38 = vsel %vm6831_vm13, %v6822_v60, %v11435_v45 }
 0x4fb   :  { %v11460_v17 = vunpack.i.h.bf16 %v11458_v41  ;;  %v11459_v25 = vunpack.i.l.bf16 %v11458_v41  ;;  %v11443_v11 = vpop.permute.xlu1 %11442 }
 0x4fc   :  { %v11445_v15 = vunpack.i.h.bf16 %v11443_v11  ;;  %v11444_v24 = vunpack.i.l.bf16 %v11443_v11  ;;  %9006 = vmatprep.mubr.msk.bf16.mxu1 %vm7101_vm0, %v7052_v52 }
 0x4fe   :  { %v6951_v50 = vsel %vm6896_vm14, %v6886_v46, %v11444_v24  ;;  %v6952_v43 = vsel %vm6896_vm14, %v6887_v38, %v11445_v15  ;;  %v11468_v47 = vpop.permute.xlu0 %11467 }
 0x4ff   :  { %v11453_v3 = vpop.permute.xlu1 %11452  ;;  %v7016_v14 = vsel %vm6961_vm15, %v6951_v50, %v11459_v25  ;;  %v7017_v63 = vsel %vm6961_vm15, %v6952_v43, %v11460_v17  ;;  %v11469_v7 = vunpack.i.l.bf16 %v11468_v47  ;;  %v11470_v59 = vunpack.i.h.bf16 %v11468_v47  ;;  %v3943_v17 = vld [vmem:[#allocation2 + $0x2e8] sm:$0xff]  ;;  %v3944_v25 = vld [vmem:[#allocation2 + $0x2f0] sm:$0xff] }
 0x500   :  { %v7053_v48 = vpack.c.bf16 %v7017_v63, %v7016_v14  ;;  %v11454_v19 = vunpack.i.l.bf16 %v11453_v3  ;;  %v11455_v8 = vunpack.i.h.bf16 %v11453_v3 }
 0x502   :  { %v8984_v62 = vpop.f32.mrf.mxu1  ;;  %9007 = vmatmul.mubr.msk.bf16.gmra.mxu1 %vm7101_vm0, %v7053_v48  ;;  %v11478_v40 = vpop.permute.xlu0 %11477  ;;  %v6566_v55 = vsel %vm2743_vm1, %v3941_v2, %v11454_v19  ;;  %v6567_v36 = vsel %vm2743_vm1, %v3942_v21, %v11455_v8 }
 0x503   :  { %v11463_v5 = vpop.permute.xlu1 %11462  ;;  %v7357_v10 = vadd.f32 %v17574_v20, %v8984_v62  ;;  %v11479_v56 = vunpack.i.l.bf16 %v11478_v40  ;;  %v6630_v31 = vsel %vm2873_vm4, %v6566_v55, %v11469_v7  ;;  %v6631_v42 = vsel %vm2873_vm4, %v6567_v36, %v11470_v59 }
 0x504   :  { %v7348_v39 = vpop.f32.mrf.mxu1  ;;  %v11465_v29 = vunpack.i.h.bf16 %v11463_v5  ;;  %v11464_v35 = vunpack.i.l.bf16 %v11463_v5 }
 0x505   :  { %v7349_v9 = vadd.f32 %v17574_v20, %v7348_v39  ;;  %v7521_v44 = vmax.f32 %v7357_v10, 0.0  ;;  %v6694_v22 = vsel %vm3003_vm6, %v6630_v31, %v11479_v56 }
 0x506   :  { %v8985_v6 = vpop.f32.mrf.mxu1  ;;  %v11488_v23 = vpop.permute.xlu0 %11487  ;;  %v6569_v24 = vsel %vm2743_vm1, %v3944_v25, %v11465_v29  ;;  %v6568_v46 = vsel %vm2743_vm1, %v3943_v17, %v11464_v35 }
 0x507   :  { %v7519_v27 = vmax.f32 %v7349_v9, 0.0  ;;  %v11473_v54 = vpop.permute.xlu1 %11472  ;;  %v7360_v13 = vadd.f32 %v17574_v20, %v8985_v6  ;;  %v7614_v0 = vsel %vm3133_vm8, %v7521_v44, 0.0  ;;  %v11490_v45 = vunpack.i.h.bf16 %v11488_v23 }
 0x508   :  { %v7351_v16 = vpop.f32.mrf.mxu1  ;;  %v11489_v28 = vunpack.i.l.bf16 %v11488_v23  ;;  %v11475_v41 = vunpack.i.h.bf16 %v11473_v54  ;;  %v11474_v37 = vunpack.i.l.bf16 %v11473_v54 }
 0x509   :  { %v7610_v51 = vsel %vm3133_vm8, %v7519_v27, 0.0  ;;  %v7352_v32 = vadd.f32 %v17574_v20, %v7351_v16  ;;  %v7522_v49 = vmax.f32 %v7360_v13, 0.0  ;;  %v11480_v20 = vunpack.i.h.bf16 %v11478_v40 }
 0x50a   :  { %v7611_v26 = vadd.f32 %v7610_v51, %v17738_v12  ;;  %v11498_v53 = vpop.permute.xlu0 %11497  ;;  %v6758_v47 = vsel %vm3133_vm8, %v6694_v22, %v11489_v28  ;;  %v6632_v48 = vsel %vm2873_vm4, %v6568_v46, %v11474_v37  ;;  %v6633_v62 = vsel %vm2873_vm4, %v6569_v24, %v11475_v41  ;;  %v7793_v46 = vld [vmem:[%s18106_s8 + $0x60] sm:$0x33] }
 0x50b   :  { %v7520_v58 = vmax.f32 %v7352_v32, 0.0  ;;  %v17776_v1 = vpop.permute.xlu1 %11482  ;;  %v7616_v52 = vsel %vm3133_vm8, %v7522_v49, 0.0  ;;  %v6695_v30 = vsel %vm3003_vm6, %v6631_v42, %v11480_v20  ;;  %v11500_v4 = vunpack.i.h.bf16 %v11498_v53 }
 0x50c   :  { %v11499_v60 = vunpack.i.l.bf16 %v11498_v53  ;;  %v6759_v3 = vsel %vm3133_vm8, %v6695_v30, %v11490_v45  ;;  %v11485_v40 = vunpack.i.h.bf16 %v17776_v1  ;;  %v11484_v5 = vunpack.i.l.bf16 %v17776_v1 }
 0x50d   :  { %v7612_v34 = vsel %vm3133_vm8, %v7520_v58, 0.0  ;;  %v6824_v9 = vsel %vm6766_vm12, %v6759_v3, %v11500_v4 }
 0x50e   :  { %v7613_v18 = vadd.f32 %v7612_v34, %v7611_v26  ;;  %v11508_v12 = vpop.permute.xlu0 %11507  ;;  %v6823_v39 = vsel %vm6766_vm12, %v6758_v47, %v11499_v60  ;;  %v6696_v58 = vsel %vm3003_vm6, %v6632_v48, %v11484_v5  ;;  %v6697_v1 = vsel %vm3003_vm6, %v6633_v62, %v11485_v40  ;;  %v11624_v60 = vld [vmem:[%s18104_s6 + $0x10] ss:$8 sps:$4 sm:$0xff]  }
 0x50f   :  { %v11493_v57 = vpop.permute.xlu1 %11492  ;;  %v11510_v38 = vunpack.i.h.bf16 %v11508_v12  ;;  %v11509_v50 = vunpack.i.l.bf16 %v11508_v12 }
 0x510   :  { %v7615_v33 = vadd.f32 %v7614_v0, %v7613_v18  ;;  %v11495_v6 = vunpack.i.h.bf16 %v11493_v57  ;;  %v11494_v23 = vunpack.i.l.bf16 %v11493_v57 }
 0x511   :  { %v6888_v27 = vsel %vm6831_vm13, %v6823_v39, %v11509_v50  ;;  %v6889_v54 = vsel %vm6831_vm13, %v6824_v9, %v11510_v38  ;;  %v8741_v38 = vcombine.high %v7793_v46, %v7793_v46  ;;  %v3946_v50 = vld [vmem:[#allocation2 + $0x308] sm:$0xff]  ;;  %v8740_v39 = vcombine.low %v7793_v46, %v7793_v46  ;;  %v11631_v9 = vld [vmem:[%s18106_s8 + $0x54] ss:$8 sps:$4 sm:$0xff]  }
 0x512   :  { %v17787_v11 = vadd.f32 %v7616_v52, %v7615_v33  ;;  %v11518_v15 = vpop.permute.xlu0 %11517  ;;  %v6760_v55 = vsel %vm3133_vm8, %v6696_v58, %v11494_v23  ;;  %v6761_v36 = vsel %vm3133_vm8, %v6697_v1, %v11495_v6 }
 0x513   :  { %v11503_v43 = vpop.permute.xlu1 %11502  ;;  %v11520_v14 = vunpack.i.h.bf16 %v11518_v15  ;;  %v11519_v63 = vunpack.i.l.bf16 %v11518_v15  ;;  %v11626_v15 = vld [vmem:[%s18104_s6 + $0x14] ss:$8 sps:$4 sm:$0xff]   ;;  %8742 = vmatprep.subr.msk.bf16.mxu1 %vm3354_vm3, %v8741_v38 }
 0x514   :  { %v11505_v32 = vunpack.i.h.bf16 %v11503_v43  ;;  %v11504_v26 = vunpack.i.l.bf16 %v11503_v43  ;;  %7750 = vmatprep.subr.bf16.mxu0 %v11626_v15 }
 0x515   :  { %v6953_v51 = vsel %vm6896_vm14, %v6888_v27, %v11519_v63  ;;  %v6954_v13 = vsel %vm6896_vm14, %v6889_v54, %v11520_v14  ;;  %7751 = vmatpush1.bf16.msra.mxu0 %v11624_v60  ;;  %v3945_v14 = vld [vmem:[#allocation2 + $0x300] sm:$0xff] }
 0x516   :  { %v11528_v10 = vpop.permute.xlu0 %11527  ;;  %v6825_v20 = vsel %vm6766_vm12, %v6760_v55, %v11504_v26  ;;  %v6826_v18 = vsel %vm6766_vm12, %v6761_v36, %v11505_v32  ;;  %v11629_v26 = vld [vmem:[%s18106_s8 + $0x50] ss:$8 sps:$4 sm:$0xff]  }
 0x517   :  { %v11530_v19 = vunpack.i.h.bf16 %v11528_v10  ;;  %v11529_v16 = vunpack.i.l.bf16 %v11528_v10  ;;  %v11513_v8 = vpop.permute.xlu1 %11512 }
 0x518   :  { %v11515_v2 = vunpack.i.h.bf16 %v11513_v8  ;;  %v11514_v44 = vunpack.i.l.bf16 %v11513_v8 }
 0x519   :  { %v7018_v53 = vsel %vm6961_vm15, %v6953_v51, %v11529_v16  ;;  %v7019_v7 = vsel %vm6961_vm15, %v6954_v13, %v11530_v19  ;;  %v7876_v19 = vsel %vm3354_vm3, %v8740_v39, 0 }
 0x51a   :  { %v7054_v59 = vpack.c.bf16 %v7019_v7, %v7018_v53  ;;  %v11538_v21 = vpop.permute.xlu0 %11537  ;;  %v6890_v31 = vsel %vm6831_vm13, %v6825_v20, %v11514_v44  ;;  %v6891_v29 = vsel %vm6831_vm13, %v6826_v18, %v11515_v2  ;;  %7884 = vmatpush1.bf16.msra.mxu1 %v7876_v19 }
 0x51b   :  { %v11540_v56 = vunpack.i.h.bf16 %v11538_v21  ;;  %v11539_v49 = vunpack.i.l.bf16 %v11538_v21  ;;  %v11523_v34 = vpop.permute.xlu1 %11522  ;;  %7885 = vmatprep.subr.bf16.mxu1 %v11631_v9 }
 0x51c   :  { %v11525_v12 = vunpack.i.h.bf16 %v11523_v34  ;;  %v11524_v0 = vunpack.i.l.bf16 %v11523_v34  ;;  %9010 = vmatprep.mubr.msk.bf16.mxu1 %vm7101_vm0, %v7054_v59 }
 0x51e   :  { %v6955_v35 = vsel %vm6896_vm14, %v6890_v31, %v11524_v0  ;;  %v6956_v57 = vsel %vm6896_vm14, %v6891_v29, %v11525_v12  ;;  %v11548_v42 = vpop.permute.xlu0 %11547  ;;  %7886 = vmatpush1.bf16.msra.mxu1 %v11629_v26  ;;  %v11640_v26 = vld [vmem:[%s18104_s6 + $0x4] ss:$8 sps:$4 sm:$0xff]  }
 0x51f   :  { %v11533_v45 = vpop.permute.xlu1 %11532  ;;  %v7020_v28 = vsel %vm6961_vm15, %v6955_v35, %v11539_v49  ;;  %v7021_v33 = vsel %vm6961_vm15, %v6956_v57, %v11540_v56  ;;  %v11550_v47 = vunpack.i.h.bf16 %v11548_v42  ;;  %v11549_v3 = vunpack.i.l.bf16 %v11548_v42  ;;  %7752 = vmatprep.subr.bf16.mxu0 %v11640_v26 }
 0x520   :  { %v7055_v22 = vpack.c.bf16 %v7021_v33, %v7020_v28  ;;  %v11535_v25 = vunpack.i.h.bf16 %v11533_v45  ;;  %v11534_v24 = vunpack.i.l.bf16 %v11533_v45 }
 0x522   :  { %9011 = vmatmul.mubr.msk.bf16.gmra.mxu1 %vm7101_vm0, %v7055_v22  ;;  %v11558_v52 = vpop.permute.xlu0 %11557  ;;  %v6571_v63 = vsel %vm2743_vm1, %v3946_v50, %v11535_v25  ;;  %v6570_v62 = vsel %vm2743_vm1, %v3945_v14, %v11534_v24 }
 0x523   :  { %v17819_v41 = vpop.permute.xlu1 %11542  ;;  %v11560_v40 = vunpack.i.h.bf16 %v11558_v52  ;;  %v11559_v5 = vunpack.i.l.bf16 %v11558_v52  ;;  %v6634_v16 = vsel %vm2873_vm4, %v6570_v62, %v11549_v3  ;;  %v6635_v8 = vsel %vm2873_vm4, %v6571_v63, %v11550_v47 }
 0x524   :  { %v11545_v59 = vunpack.i.h.bf16 %v17819_v41  ;;  %v11544_v21 = vunpack.i.l.bf16 %v17819_v41  ;;  %v11707_v41 = vld [vmem:[#allocation2 + $0x320] sm:$0xff] }
 0x525   :  { %v6698_v53 = vsel %vm3003_vm6, %v6634_v16, %v11559_v5  ;;  %v6699_v7 = vsel %vm3003_vm6, %v6635_v8, %v11560_v40  ;;  %v11632_v16 = vld [vmem:[%s18106_s8 + $0x40] ss:$8 sps:$4 sm:$0xff]   ;;  %v11634_v8 = vld [vmem:[%s18106_s8 + $0x44] ss:$8 sps:$4 sm:$0xff]  }
 0x526   :  { %v11568_v37 = vpop.permute.xlu0 %11567  ;;  %7887 = vmatprep.subr.bf16.mxu1 %v11634_v8 }
 0x527   :  { %v17821_v30 = vpop.permute.xlu1 %11552  ;;  %v11570_v6 = vunpack.i.h.bf16 %v11568_v37  ;;  %v11569_v23 = vunpack.i.l.bf16 %v11568_v37  ;;  %v6573_v37 = vsel %vm2743_vm1, %v11707_v41, %v11545_v59  ;;  %7888 = vmatpush1.bf16.msra.mxu1 %v11632_v16 }
 0x528   :  { %v11555_v0 = vunpack.i.h.bf16 %v17821_v30  ;;  %v11554_v31 = vunpack.i.l.bf16 %v17821_v30  ;;  %v11708_v30 = vld [vmem:[#allocation2 + $0x318] sm:$0xff] }
 0x529   :  { %v6762_v58 = vsel %vm3133_vm8, %v6698_v53, %v11569_v23  ;;  %v6763_v1 = vsel %vm3133_vm8, %v6699_v7, %v11570_v6  ;;  %v11641_v53 = vld [vmem:[%s18106_s8 + $0x20] ss:$8 sps:$4 sm:$0xff]   ;;  %v11643_v7 = vld [vmem:[%s18106_s8 + $0x24] ss:$8 sps:$4 sm:$0xff]  }
 0x52a   :  { %v11578_v17 = vpop.permute.xlu0 %11577  ;;  %v6637_v24 = vsel %vm2873_vm4, %v6573_v37, %v11555_v0 }
 0x52b   :  { %v17823_v4 = vpop.permute.xlu1 %11562  ;;  %v11580_v10 = vunpack.i.h.bf16 %v11578_v17  ;;  %v11579_v27 = vunpack.i.l.bf16 %v11578_v17  ;;  %v6572_v17 = vsel %vm2743_vm1, %v11708_v30, %v11544_v21  ;;  %v11649_v21 = vld [vmem:[%s18106_s8 + $0x4] ss:$8 sps:$4 sm:$0xff]   ;;  %vm7871_vm1 = vcmask 818176  }
 0x52c   :  { %v11565_v57 = vunpack.i.h.bf16 %v17823_v4  ;;  %v11564_v42 = vunpack.i.l.bf16 %v17823_v4  ;;  %v6636_v4 = vsel %vm2873_vm4, %v6572_v17, %v11554_v31  ;;  %vm11746_vm4 = vmmov 0  }
 0x52d   :  { %v6827_v55 = vsel %vm6766_vm12, %v6762_v58, %v11579_v27  ;;  %v6828_v36 = vsel %vm6766_vm12, %v6763_v1, %v11580_v10  ;;  %v8988_v58 = vpop.f32.mrf.mxu1 }
 0x52e   :  { %v11588_v43 = vpop.permute.xlu0 %11587  ;;  %v6700_v50 = vsel %vm3003_vm6, %v6636_v4, %v11564_v42 }
 0x52f   :  { %v17835_v48 = vpop.permute.xlu1 %11572  ;;  %v11590_v51 = vunpack.i.h.bf16 %v11588_v43  ;;  %v11589_v13 = vunpack.i.l.bf16 %v11588_v43  ;;  %v6701_v43 = vsel %vm3003_vm6, %v6637_v24, %v11565_v57  ;;  %v7364_v1 = vpop.f32.mrf.mxu1 }
 0x530   :  { %v11575_v33 = vunpack.i.h.bf16 %v17835_v48  ;;  %v11574_v22 = vunpack.i.l.bf16 %v17835_v48 }
 0x531   :  { %v6892_v49 = vsel %vm6831_vm13, %v6827_v55, %v11589_v13  ;;  %v6893_v34 = vsel %vm6831_vm13, %v6828_v36, %v11590_v51  ;;  %v11637_v51 = vld [vmem:[%s18106_s8 + $0x34] ss:$8 sps:$4 sm:$0xff]   ;;  %v11635_v13 = vld [vmem:[%s18106_s8 + $0x30] ss:$8 sps:$4 sm:$0xff]   ;;  %v8989_v59 = vpop.f32.mrf.mxu1  ;;  %v11647_v55 = vld [vmem:[%s18106_s8] ss:$8 sps:$4 sm:$0xff]  }
 0x532   :  { %v11598_v54 = vpop.permute.xlu0 %11597  ;;  %v6764_v14 = vsel %vm3133_vm8, %v6700_v50, %v11574_v22  ;;  %v6765_v63 = vsel %vm3133_vm8, %v6701_v43, %v11575_v33  ;;  %7889 = vmatprep.subr.bf16.mxu1 %v11637_v51 }
 0x533   :  { %v11583_v32 = vpop.permute.xlu1 %11582  ;;  %v11600_v2 = vunpack.i.h.bf16 %v11598_v54  ;;  %v11599_v44 = vunpack.i.l.bf16 %v11598_v54  ;;  %7890 = vmatpush1.bf16.msra.mxu1 %v11635_v13  ;;  %v7367_v36 = vpop.f32.mrf.mxu1 }
 0x534   :  { %v11585_v25 = vunpack.i.h.bf16 %v11583_v32  ;;  %v11584_v60 = vunpack.i.l.bf16 %v11583_v32  ;;  %v11638_v32 = vld [vmem:[%s18104_s6] ss:$8 sps:$4 sm:$0xff]   ;;  %7891 = vmatprep.subr.bf16.mxu1 %v11643_v7 }
 0x535   :  { %v6957_v29 = vsel %vm6896_vm14, %v6892_v49, %v11599_v44  ;;  %v6958_v35 = vsel %vm6896_vm14, %v6893_v34, %v11600_v2  ;;  %7753 = vmatpush1.bf16.msra.mxu0 %v11638_v32  ;;  %v11646_v2 = vld [vmem:[%s18106_s8 + $0x14] ss:$8 sps:$4 sm:$0xff]   ;;  %v11644_v44 = vld [vmem:[%s18106_s8 + $0x10] ss:$8 sps:$4 sm:$0xff]   ;;  %v11745_v49 = vmov 0  }
 0x536   :  { %v11608_v56 = vpop.permute.xlu0 %11607  ;;  %v6829_v48 = vsel %vm6766_vm12, %v6764_v14, %v11584_v60  ;;  %v6830_v62 = vsel %vm6766_vm12, %v6765_v63, %v11585_v25  ;;  %7770 = vmatprep.mubr.bf16.mxu0 %v11745_v49 }
 0x537   :  { %v11610_v20 = vunpack.i.h.bf16 %v11608_v56  ;;  %v11609_v18 = vunpack.i.l.bf16 %v11608_v56  ;;  %v11593_v12 = vpop.permute.xlu1 %11592  ;;  %7892 = vmatpush1.bf16.msra.mxu1 %v11641_v53  ;;  %v7779_v56 = vld [vmem:[%s18099_s1] sm:$0x3] }
 0x538   :  { %v11595_v46 = vunpack.i.h.bf16 %v11593_v12  ;;  %v11594_v38 = vunpack.i.l.bf16 %v11593_v12  ;;  %7893 = vmatprep.subr.bf16.mxu1 %v11646_v2  ;;  %v7780_v34 = vpack.c.bf16 %v7779_v56, %v7779_v56 }
 0x539   :  { %v7022_v45 = vsel %vm6961_vm15, %v6957_v29, %v11609_v18  ;;  %v7023_v28 = vsel %vm6961_vm15, %v6958_v35, %v11610_v20  ;;  %v11650_v18 = vld [vmem:[%s18108_s10 + $0x78] sm:$0xff]   ;;  %v17932_v29 = vld [vmem:[%s18103_s5] ss:$0 sm:$0xff] }
 0x53a   :  { %v7056_v52 = vpack.c.bf16 %v7023_v28, %v7022_v45  ;;  %v6894_v5 = vsel %vm6831_vm13, %v6829_v48, %v11594_v38  ;;  %v6895_v39 = vsel %vm6831_vm13, %v6830_v62, %v11595_v46  ;;  %8843 = vmatprep.subr.bf16.mxu0 %v11650_v18  ;;  %v7368_v35 = vadd.f32 %v17932_v29, %v7367_v36 }
 0x53b   :  { %v11603_v15 = vpop.permute.xlu1 %11602  ;;  %7894 = vmatpush1.bf16.msra.mxu1 %v11644_v44  ;;  %v7365_v42 = vadd.f32 %v17932_v29, %v7364_v1  ;;  %v7373_v33 = vadd.f32 %v17932_v29, %v8988_v58  ;;  %v7376_v17 = vadd.f32 %v17932_v29, %v8989_v59 }
 0x53c   :  { %9014 = vmatprep.mubr.msk.bf16.mxu1 %vm7101_vm0, %v7056_v52  ;;  %v11605_v47 = vunpack.i.h.bf16 %v11603_v15  ;;  %v11604_v3 = vunpack.i.l.bf16 %v11603_v15  ;;  %7895 = vmatprep.subr.bf16.mxu1 %v11649_v21  ;;  %v7524_v45 = vmax.f32 %v7368_v35, 0.0 }
 0x53d   :  { %v7523_v22 = vmax.f32 %v7365_v42, 0.0  ;;  %v7525_v37 = vmax.f32 %v7373_v33, 0.0  ;;  %v7526_v46 = vmax.f32 %v7376_v17, 0.0 }
 0x53e   :  { %v6959_v23 = vsel %vm6896_vm14, %v6894_v5, %v11604_v3  ;;  %v6960_v10 = vsel %vm6896_vm14, %v6895_v39, %v11605_v47  ;;  %v7627_v52 = vsel %vm3133_vm8, %v7524_v45, 0.0 }
 0x53f   :  { %v11613_v40 = vpop.permute.xlu1 %11612  ;;  %7896 = vmatpush1.bf16.msra.mxu1 %v11647_v55  ;;  %v7626_v30 = vsel %vm3133_vm8, %v7523_v22, 0.0  ;;  %v7629_v24 = vsel %vm3133_vm8, %v7525_v37, 0.0  ;;  %v7631_v3 = vsel %vm3133_vm8, %v7526_v46, 0.0 }
 0x540   :  { %v11615_v9 = vunpack.i.h.bf16 %v11613_v40  ;;  %v11614_v6 = vunpack.i.l.bf16 %v11613_v40  ;;  %9018 = vmatprep.subr.bf16.mxu1 %v11740_v61  ;;  %v7628_v60 = vadd.f32 %v7627_v52, %v7626_v30 }
 0x542   :  { %v7024_v27 = vsel %vm6961_vm15, %v6959_v23, %v11614_v6  ;;  %v7025_v54 = vsel %vm6961_vm15, %v6960_v10, %v11615_v9  ;;  %v8992_v20 = vpop.f32.mrf.mxu1  ;;  %v7630_v50 = vadd.f32 %v7629_v24, %v7628_v60 }
 0x543   :  { %v7057_v19 = vpack.c.bf16 %v7025_v54, %v7024_v27  ;;  %v7389_v14 = vadd.f32 %v17932_v29, %v8992_v20 }
 0x544   :  { %v7380_v12 = vpop.f32.mrf.mxu1  ;;  %v7632_v48 = vadd.f32 %v7631_v3, %v7630_v50 }
 0x545   :  { %9015 = vmatmul.mubr.msk.bf16.gmra.mxu1 %vm7101_vm0, %v7057_v19  ;;  %v7381_v25 = vadd.f32 %v17932_v29, %v7380_v12  ;;  %v7529_v39 = vmax.f32 %v7389_v14, 0.0 }
 0x546   :  { %7913 = vmatprep.mubr.bf16.mxu1 %v11745_v49  ;;  %v8993_v0 = vpop.f32.mrf.mxu1 }
 0x547   :  { %v7527_v38 = vmax.f32 %v7381_v25, 0.0  ;;  %v7392_v9 = vadd.f32 %v17932_v29, %v8993_v0  ;;  %v7637_v54 = vsel %vm3133_vm8, %v7529_v39, 0.0 }
 0x548   :  { %v7383_v31 = vpop.f32.mrf.mxu1 }
 0x549   :  { %v7384_v15 = vadd.f32 %v17932_v29, %v7383_v31  ;;  %v7633_v63 = vsel %vm3133_vm8, %v7527_v38, 0.0  ;;  %v7530_v19 = vmax.f32 %v7392_v9, 0.0 }
 0x54a   :  { %v7634_v5 = vadd.f32 %v7633_v63, %v7632_v48 }
 0x54b   :  { %v7528_v47 = vmax.f32 %v7384_v15, 0.0  ;;  %v7639_v26 = vsel %vm3133_vm8, %v7530_v19, 0.0 }
 0x54d   :  { %8743 = vmatmul.mubr.msk.bf16.vlgmr.msra.gmra.mxu1 %vm7871_vm1, %v7780_v34  ;;  %v7635_v40 = vsel %vm3133_vm8, %v7528_v47, 0.0 }
 0x54e   :  { %v7636_v23 = vadd.f32 %v7635_v40, %v7634_v5  ;;  %9034 = vmatprep.mubr.msk.bf16.mxu1 %vm11746_vm4, %v11740_v61 }
 0x550   :  { %v7638_v8 = vadd.f32 %v7637_v54, %v7636_v23 }
 0x552   :  { %v7640_v2 = vadd.f32 %v7639_v26, %v7638_v8 }
 0x562   :  { %v8996_v57 = vpop.f32.mrf.mxu1 }
 0x563   :  { %v7405_v53 = vadd.f32 %v17932_v29, %v8996_v57 }
 0x564   :  { %v7396_v28 = vpop.f32.mrf.mxu1 }
 0x565   :  { %v7397_v6 = vadd.f32 %v17932_v29, %v7396_v28  ;;  %v7533_v59 = vmax.f32 %v7405_v53, 0.0 }
 0x566   :  { %v8997_v41 = vpop.f32.mrf.mxu1 }
 0x567   :  { %v7531_v16 = vmax.f32 %v7397_v6, 0.0  ;;  %v7408_v21 = vadd.f32 %v17932_v29, %v8997_v41  ;;  %v7645_v34 = vsel %vm3133_vm8, %v7533_v59, 0.0 }
 0x568   :  { %v7399_v4 = vpop.f32.mrf.mxu1 }
 0x569   :  { %v7400_v27 = vadd.f32 %v17932_v29, %v7399_v4  ;;  %v7641_v7 = vsel %vm3133_vm8, %v7531_v16, 0.0  ;;  %v7534_v20 = vmax.f32 %v7408_v21, 0.0 }
 0x56a   :  { %v7642_v58 = vadd.f32 %v7641_v7, %v7640_v2 }
 0x56b   :  { %v7532_v13 = vmax.f32 %v7400_v27, 0.0  ;;  %v7647_v35 = vsel %vm3133_vm8, %v7534_v20, 0.0 }
 0x56d   :  { %v7643_v44 = vsel %vm3133_vm8, %v7532_v13, 0.0 }
 0x56e   :  { %v7644_v36 = vadd.f32 %v7643_v44, %v7642_v58 }
 0x570   :  { %v7646_v12 = vadd.f32 %v7645_v34, %v7644_v36 }
 0x572   :  { %v7648_v45 = vadd.f32 %v7647_v35, %v7646_v12 }
 0x582   :  { %v9000_v43 = vpop.f32.mrf.mxu1 }
 0x583   :  { %v7421_v57 = vadd.f32 %v17932_v29, %v9000_v43 }
 0x584   :  { %v7412_v62 = vpop.f32.mrf.mxu1 }
 0x585   :  { %v7413_v55 = vadd.f32 %v17932_v29, %v7412_v62  ;;  %v7537_v52 = vmax.f32 %v7421_v57, 0.0 }
 0x586   :  { %v9001_v10 = vpop.f32.mrf.mxu1 }
 0x587   :  { %v7535_v18 = vmax.f32 %v7413_v55, 0.0  ;;  %v7424_v41 = vadd.f32 %v17932_v29, %v9001_v10  ;;  %v7653_v60 = vsel %vm3133_vm8, %v7537_v52, 0.0 }
 0x588   :  { %v7415_v51 = vpop.f32.mrf.mxu1 }
 0x589   :  { %v7416_v56 = vadd.f32 %v17932_v29, %v7415_v51  ;;  %v7649_v42 = vsel %vm3133_vm8, %v7535_v18, 0.0  ;;  %v7538_v15 = vmax.f32 %v7424_v41, 0.0 }
 0x58a   :  { %v7650_v22 = vadd.f32 %v7649_v42, %v7648_v45 }
 0x58b   :  { %v7536_v0 = vmax.f32 %v7416_v56, 0.0  ;;  %v7655_v50 = vsel %vm3133_vm8, %v7538_v15, 0.0 }
 0x58d   :  { %v7651_v33 = vsel %vm3133_vm8, %v7536_v0, 0.0 }
 0x58e   :  { %v7652_v30 = vadd.f32 %v7651_v33, %v7650_v22 }
 0x590   :  { %v7654_v24 = vadd.f32 %v7653_v60, %v7652_v30  ;;  %v7618_v60 = vrot.slane %v17787_v11, 4 }
 0x592   :  { %v7656_v3 = vadd.f32 %v7655_v50, %v7654_v24 }
 0x5a2   :  { %v9004_v32 = vpop.f32.mrf.mxu1 }
 0x5a3   :  { %v7437_v43 = vadd.f32 %v17932_v29, %v9004_v32 }
 0x5a4   :  { %v7428_v1 = vpop.f32.mrf.mxu1 }
 0x5a5   :  { %v7429_v37 = vadd.f32 %v17932_v29, %v7428_v1  ;;  %v7541_v40 = vmax.f32 %v7437_v43, 0.0 }
 0x5a6   :  { %v9005_v49 = vpop.f32.mrf.mxu1 }
 0x5a7   :  { %v7539_v4 = vmax.f32 %v7429_v37, 0.0  ;;  %v7440_v5 = vadd.f32 %v17932_v29, %v9005_v49  ;;  %v7661_v10 = vsel %vm3133_vm8, %v7541_v40, 0.0 }
 0x5a8   :  { %v7431_v31 = vpop.f32.mrf.mxu1 }
 0x5a9   :  { %v7432_v25 = vadd.f32 %v17932_v29, %v7431_v31  ;;  %v7657_v47 = vsel %vm3133_vm8, %v7539_v4, 0.0  ;;  %v7542_v27 = vmax.f32 %v7440_v5, 0.0 }
 0x5aa   :  { %v7658_v48 = vadd.f32 %v7657_v47, %v7656_v3  ;;  %v7619_v3 = vadd.f32 %v7618_v60, %v17787_v11 }
 0x5ab   :  { %v7540_v38 = vmax.f32 %v7432_v25, 0.0  ;;  %v7663_v51 = vsel %vm3133_vm8, %v7542_v27, 0.0 }
 0x5ac   :  { %v7620_v5 = vrot.slane %v7619_v3, 2 }
 0x5ad   :  { %v7659_v63 = vsel %vm3133_vm8, %v7540_v38, 0.0 }
 0x5ae   :  { %v7660_v9 = vadd.f32 %v7659_v63, %v7658_v48 }
 0x5b0   :  { %v7662_v19 = vadd.f32 %v7661_v10, %v7660_v9 }
 0x5b2   :  { %v7664_v26 = vadd.f32 %v7663_v51, %v7662_v19 }
 0x5c2   :  { %v9008_v28 = vpop.f32.mrf.mxu1 }
 0x5c3   :  { %v7453_v13 = vadd.f32 %v17932_v29, %v9008_v28 }
 0x5c4   :  { %v7444_v17 = vpop.f32.mrf.mxu1 }
 0x5c5   :  { %v7445_v39 = vadd.f32 %v17932_v29, %v7444_v17  ;;  %v7545_v44 = vmax.f32 %v7453_v13, 0.0 }
 0x5c6   :  { %v9009_v46 = vpop.f32.mrf.mxu1 }
 0x5c7   :  { %v7543_v54 = vmax.f32 %v7445_v39, 0.0  ;;  %v7456_v58 = vadd.f32 %v17932_v29, %v9009_v46  ;;  %v7669_v55 = vsel %vm3133_vm8, %v7545_v44, 0.0  ;;  %v11654_v44 = vld [vmem:[%s18108_s10 + $0x68] sm:$0xff]  }
 0x5c8   :  { %v7447_v14 = vpop.f32.mrf.mxu1 }
 0x5c9   :  { %v7448_v6 = vadd.f32 %v17932_v29, %v7447_v14  ;;  %v7665_v32 = vsel %vm3133_vm8, %v7543_v54, 0.0  ;;  %v7546_v36 = vmax.f32 %v7456_v58, 0.0  ;;  %v11655_v58 = vld [vmem:[%s18108_s10 + $0x28] sm:$0xff]  }
 0x5ca   :  { %v7666_v7 = vadd.f32 %v7665_v32, %v7664_v26  ;;  %v11651_v26 = vld [vmem:[%s18108_s10 + $0x38] sm:$0xff]  }
 0x5cb   :  { %v7544_v16 = vmax.f32 %v7448_v6, 0.0  ;;  %v7671_v20 = vsel %vm3133_vm8, %v7546_v36, 0.0 }
 0x5cd   :  { %v7667_v53 = vsel %vm3133_vm8, %v7544_v16, 0.0 }
 0x5ce   :  { %v7668_v59 = vadd.f32 %v7667_v53, %v7666_v7  ;;  %v11652_v7 = vld [vmem:[%s18108_s10 + $0x70] sm:$0xff]  }
 0x5d0   :  { %v7670_v49 = vadd.f32 %v7669_v55, %v7668_v59  ;;  %v11657_v59 = vld [vmem:[%s18108_s10 + $0x20] sm:$0xff]   ;;  %v11659_v55 = vld [vmem:[%s18108_s10 + $0x18] sm:$0xff]  }
 0x5d2   :  { %v7672_v0 = vadd.f32 %v7671_v20, %v7670_v49  ;;  %v11661_v20 = vld [vmem:[%s18108_s10 + $0x10] sm:$0xff]  }
 0x5e2   :  { %v9012_v62 = vpop.f32.mrf.mxu1 }
 0x5e3   :  { %v7469_v18 = vadd.f32 %v17932_v29, %v9012_v62 }
 0x5e4   :  { %v7460_v23 = vpop.f32.mrf.mxu1 }
 0x5e5   :  { %v7461_v1 = vadd.f32 %v17932_v29, %v7460_v23  ;;  %v7549_v57 = vmax.f32 %v7469_v18, 0.0  ;;  %v7621_v23 = vadd.f32 %v7620_v5, %v7619_v3  ;;  %v11667_v5 = vld [vmem:[%s18111_s13 + $0x30] sm:$0xff]  }
 0x5e6   :  { %v9013_v8 = vpop.f32.mrf.mxu1 }
 0x5e7   :  { %v7547_v56 = vmax.f32 %v7461_v1, 0.0  ;;  %v7472_v42 = vadd.f32 %v17932_v29, %v9013_v8  ;;  %v7677_v22 = vsel %vm3133_vm8, %v7549_v57, 0.0  ;;  %v7622_v27 = vrot.slane %v7621_v23, 1  ;;  %v11656_v1 = vld [vmem:[%s18108_s10 + $0x60] sm:$0xff]  }
 0x5e8   :  { %v7463_v2 = vpop.f32.mrf.mxu1  ;;  %v7705_v57 = vlaneseq }
 0x5e9   :  { %v7464_v21 = vadd.f32 %v17932_v29, %v7463_v2  ;;  %v7673_v12 = vsel %vm3133_vm8, %v7547_v56, 0.0  ;;  %v7550_v52 = vmax.f32 %v7472_v42, 0.0  ;;  %v7623_v16 = vadd.f32 %v7622_v27, %v7621_v23  ;;  %v11653_v2 = vld [vmem:[%s18108_s10 + $0x30] sm:$0xff]  }
 0x5ea   :  { %v7674_v35 = vadd.f32 %v7673_v12, %v7672_v0  ;;  %v11662_v12 = vld [vmem:[%s18108_s10 + $0x48] sm:$0xff]   ;;  %v7706_v42 = vshrl.u32 %v7705_v57, 7  ;;  %v11671_v23 = vld [vmem:[%s18111_s13 + $0x10] sm:$0xff]  }
 0x5eb   :  { %v7548_v34 = vmax.f32 %v7464_v21, 0.0  ;;  %v7679_v4 = vsel %vm3133_vm8, %v7550_v52, 0.0  ;;  %v7625_v51 = vmul.f32 0.00390625, %v7623_v16  ;;  %v11658_v21 = vld [vmem:[%s18108_s10 + $0x58] sm:$0xff]   ;;  %v11663_v0 = vld [vmem:[%s18108_s10 + $0x8] sm:$0xff]  }
 0x5ed   :  { %v7675_v31 = vsel %vm3133_vm8, %v7548_v34, 0.0  ;;  %v11660_v34 = vld [vmem:[%s18108_s10 + $0x50] sm:$0xff]  }
 0x5ee   :  { %v7676_v45 = vadd.f32 %v7675_v31, %v7674_v35  ;;  %v11664_v31 = vld [vmem:[%s18108_s10 + $0x40] sm:$0xff]  }
 0x5ef   :  { %v11665_v35 = vld [vmem:[%s18108_s10] sm:$0xff]  }
 0x5f0   :  { %v7678_v37 = vadd.f32 %v7677_v22, %v7676_v45  ;;  %v7707_v45 = vsub.s32 0, %v7706_v42  ;;  %v7703_v22 = vld [vmem:[%s18105_s7] sm:$0x3] }
 0x5f2   :  { %v7680_v50 = vadd.f32 %v7679_v4, %v7678_v37  ;;  %v7708_v37 = vrot.slane %v7703_v22, %v7707_v45 }
 0x605   :  { %v9016_v28 = vpop.f32.mrf.mxu1 }
 0x606   :  { %v7485_v17 = vadd.f32 %v17932_v29, %v9016_v28  ;;  %v7711_v28 = vsub.s32 1, %v7706_v42 }
 0x607   :  { %v7476_v33 = vpop.f32.mrf.mxu1 }
 0x608   :  { %v7477_v41 = vadd.f32 %v17932_v29, %v7476_v33  ;;  %v7553_v43 = vmax.f32 %v7485_v17, 0.0  ;;  %v7794_v33 = vld [vmem:[%s18107_s9] sm:$0x3] }
 0x609   :  { %v9017_v30 = vpop.f32.mrf.mxu1  ;;  %v7799_v52 = vrot.slane %v7794_v33, %v7707_v45  ;;  %v8762_v45 = vld [vmem:[%s18112_s14] ss:$0 sm:$0xff] }
 0x60a   :  { %v7551_v25 = vmax.f32 %v7477_v41, 0.0  ;;  %v7488_v46 = vadd.f32 %v17932_v29, %v9017_v30  ;;  %v7685_v40 = vsel %vm3133_vm8, %v7553_v43, 0.0  ;;  %v7803_v41 = vrot.slane %v7794_v33, %v7711_v28 }
 0x60b   :  { %v7479_v15 = vpop.f32.mrf.mxu1  ;;  %v7712_v30 = vrot.slane %v7703_v22, %v7711_v28 }
 0x60c   :  { %v7681_v24 = vsel %vm3133_vm8, %v7551_v25, 0.0  ;;  %v7480_v38 = vadd.f32 %v17932_v29, %v7479_v15  ;;  %v7554_v63 = vmax.f32 %v7488_v46, 0.0 }
 0x60d   :  { %v7682_v14 = vadd.f32 %v7681_v24, %v7680_v50  ;;  %v7915_v36 = vpop.f32.mrf.mxu1 }
 0x60e   :  { %v7552_v47 = vmax.f32 %v7480_v38, 0.0  ;;  %v7687_v9 = vsel %vm3133_vm8, %v7554_v63, 0.0  ;;  %v7916_v25 = vadd.f32 %v7915_v36, %v7799_v52 }
 0x60f   :  { %v7917_v56 = vpop.f32.mrf.mxu1 }
 0x610   :  { %v7683_v48 = vsel %vm3133_vm8, %v7552_v47, 0.0  ;;  %v7918_v60 = vadd.f32 %v7917_v56, %v7803_v41 }
 0x611   :  { %v7684_v62 = vadd.f32 %v7683_v48, %v7682_v14  ;;  %v7919_v49 = vpop.f32.mrf.mxu1 }
 0x613   :  { %v7686_v39 = vadd.f32 %v7685_v40, %v7684_v62  ;;  %v7920_v18 = vpop.f32.mrf.mxu1  ;;  %v11666_v40 = vld [vmem:[%s18111_s13 + $0x38] sm:$0xff]  }
 0x614   :  { %9019 = vmatpush3.bf16.msra.mxu1 %v11666_v40  ;;  %v8760_v18 = vld [vmem:[%s18109_s11] ss:$0 sm:$0xff]  ;;  %s11710_s11 = scalar_lea.vmem %s8258_s16, 32 }
 0x615   :  { %v7688_v6 = vadd.f32 %v7687_v9, %v7686_v39  ;;  %9020 = vmatprep.subr.bf16.mxu1 %v11740_v61  ;;  %v11668_v39 = vld [vmem:[%s18111_s13 + $0x28] sm:$0xff]   ;;  %v11669_v9 = vld [vmem:[%s18111_s13 + $0x20] sm:$0xff]   ;;  %p11711_p0 = scmp.ne.s32.totalorder %s8258_s16, %s11710_s11  ;;  %p11716_p2 = scmp.lt.s32.totalorder %s11710_s11, %s11710_s11 }
 0x617   :  { %v7689_v10 = vrot.slane %v7688_v6, 4  ;;  %p11717_p3 = por %p11716_p2, %p11715_p1 }
 0x618   :  { %9021 = vmatpush3.bf16.msra.mxu1 %v11667_v5 }
 0x619   :  { %v7690_v29 = vadd.f32 %v7689_v10, %v7688_v6  ;;  %9022 = vmatprep.subr.bf16.mxu1 %v11740_v61  ;;  %v11670_v6 = vld [vmem:[%s18111_s13 + $0x18] sm:$0xff]   ;;  %v11672_v10 = vld [vmem:[%s18111_s13 + $0x8] sm:$0xff]   ;;  %p11718_p4 = pnand %p11717_p3, %p11711_p0 }
 0x61b   :  { %v7691_v54 = vrot.slane %v7690_v29, 2 }
 0x61c   :  { %9023 = vmatpush3.bf16.msra.mxu1 %v11668_v39 }
 0x61d   :  { %v7692_v19 = vadd.f32 %v7691_v54, %v7690_v29  ;;  %9024 = vmatprep.subr.bf16.mxu1 %v11740_v61  ;;  %v11673_v29 = vld [vmem:[%s18111_s13] sm:$0xff]  }
 0x61f   :  { %v7693_v11 = vrot.slane %v7692_v19, 1 }
 0x620   :  { %9025 = vmatpush3.bf16.msra.mxu1 %v11669_v9 }
 0x621   :  { %v7694_v8 = vadd.f32 %v7693_v11, %v7692_v19  ;;  %9026 = vmatprep.subr.bf16.mxu1 %v11740_v61 }
 0x623   :  { %v7695_v13 = vmul.f32 0.00390625, %v7694_v8 }
 0x624   :  { %9027 = vmatpush3.bf16.msra.mxu1 %v11670_v6 }
 0x625   :  { %v7697_v32 = vsel %vm7696_vm2, %v7625_v51, %v7695_v13  ;;  %9028 = vmatprep.subr.bf16.mxu1 %v11740_v61 }
 0x626   :  { %v7698_v53 = vpack.c.bf16 %v7697_v32, %v7697_v32 }
 0x628   :  { %8727 = vmatmul.mubr.msk.bf16.vlgmr.msra.gmra.mxu0 %vm3133_vm8, %v7698_v53  ;;  %9029 = vmatpush3.bf16.msra.mxu1 %v11671_v23 }
 0x629   :  { %8844 = vmatpush3.bf16.msra.mxu0 %v11651_v26  ;;  %9030 = vmatprep.subr.bf16.mxu1 %v11740_v61 }
 0x62a   :  { %8845 = vmatprep.subr.bf16.mxu0 %v11652_v7 }
 0x62c   :  { %9031 = vmatpush3.bf16.msra.mxu1 %v11672_v10 }
 0x62d   :  { %8846 = vmatpush3.bf16.msra.mxu0 %v11653_v2  ;;  %9032 = vmatprep.subr.bf16.mxu1 %v11740_v61 }
 0x62e   :  { %8847 = vmatprep.subr.bf16.mxu0 %v11654_v44 }
 0x630   :  { %9033 = vmatpush3.bf16.msra.mxu1 %v11673_v29 }
 0x631   :  { %8848 = vmatpush3.bf16.msra.mxu0 %v11655_v58 }
 0x632   :  { %8849 = vmatprep.subr.bf16.mxu0 %v11656_v1 }
 0x635   :  { %8850 = vmatpush3.bf16.msra.mxu0 %v11657_v59 }
 0x636   :  { %8851 = vmatprep.subr.bf16.mxu0 %v11658_v21 }
 0x639   :  { %8852 = vmatpush3.bf16.msra.mxu0 %v11659_v55 }
 0x63a   :  { %8853 = vmatprep.subr.bf16.mxu0 %v11660_v34 }
 0x63d   :  { %8854 = vmatpush3.bf16.msra.mxu0 %v11661_v20 }
 0x63e   :  { %8855 = vmatprep.subr.bf16.mxu0 %v11662_v12 }
 0x641   :  { %8856 = vmatpush3.bf16.msra.mxu0 %v11663_v0  ;;  %v8761_v0 = vld [vmem:[%s18110_s12] ss:$0 sm:$0xff] }
 0x642   :  { %8857 = vmatprep.subr.bf16.mxu0 %v11664_v31 }
 0x645   :  { %8858 = vmatpush3.bf16.msra.mxu0 %v11665_v35 }
 0x6e8   :  { %v7772_v17 = vpop.f32.mrf.mxu0 }
 0x6e9   :  { %v7773_v15 = vadd.f32 %v7772_v17, %v7708_v37 }
 0x6ea   :  { %v7774_v4 = vpop.f32.mrf.mxu0 }
 0x6eb   :  { %v7775_v24 = vadd.f32 %v7774_v4, %v7712_v30  ;;  %v7922_v38 = vmul.f32 %v7916_v25, %v7773_v15  ;;  %v7925_v50 = vmul.f32 %v7918_v60, %v7773_v15 }
 0x6ec   :  { %v7776_v46 = vpop.f32.mrf.mxu0 }
 0x6ed   :  { %v7923_v43 = vmul.f32 %v7918_v60, %v7775_v24  ;;  %v7926_v47 = vmul.f32 %v7916_v25, %v7775_v24 }
 0x6ee   :  { %v7777_v3 = vpop.f32.mrf.mxu0 }
 0x6ef   :  { %v7924_v14 = vsub.f32 %v7922_v38, %v7923_v43  ;;  %v7927_v63 = vadd.f32 %v7926_v47, %v7925_v50 }
 0x6f1   :  { %v7928_v48 = vpack.c.bf16 %v7924_v14, %v7924_v14  ;;  %v7929_v62 = vpack.c.bf16 %v7927_v63, %v7927_v63 }
 0x6f3   :  { %8090 = vmatprep.mubr.bf16.mxu0 %v7929_v62 }
 0x6f4   :  { %8091 = vmatmul.mubr.bf16.vlgmr.msra.gmra.mxu0 %v7928_v48 }
 0x7b4   :  { %v8859_v27 = vpop.f32.mrf.mxu0 }
 0x7b6   :  { %v8860_v54 = vpop.f32.mrf.mxu0 }
 0x7b7   :  { %v8861_v19 = vadd.f32 %v8860_v54, %v8859_v27 }
 0x7b8   :  { %v8862_v16 = vpop.f32.mrf.mxu0 }
 0x7b9   :  { %v8098_v11 = vsel %vm3354_vm3, %v8861_v19, 0.0 }
 0x7ba   :  { %v8099_v8 = vrot.slane %v8098_v11, 4  ;;  %v8863_v51 = vpop.f32.mrf.mxu0 }
 0x7bc   :  { %v8100_v13 = vadd.f32 %v8099_v8, %v8098_v11 }
 0x7be   :  { %v8101_v32 = vrot.slane %v8100_v13, 2 }
 0x7c0   :  { %v8102_v26 = vadd.f32 %v8101_v32, %v8100_v13 }
 0x7c2   :  { %v8103_v53 = vrot.slane %v8102_v26, 1 }
 0x7c4   :  { %v8104_v7 = vadd.f32 %v8103_v53, %v8102_v26 }
 0x7c6   :  { %v8106_v2 = vmul.f32 0.5, %v8104_v7 }
 0x7c8   :  { %v8107_v44 = vsub.f32 %v8861_v19, %v8106_v2 }
 0x7ca   :  { %v8108_v58 = vmul.f32 %v8107_v44, %v8107_v44 }
 0x7cc   :  { %v8109_v1 = vsel %vm3354_vm3, %v8108_v58, 0.0  ;;  %vm8249_vm3 = vcmask 9216  }
 0x7cd   :  { %v8110_v61 = vrot.slane %v8109_v1, 4 }
 0x7cf   :  { %v8111_v59 = vadd.f32 %v8110_v61, %v8109_v1 }
 0x7d1   :  { %v8112_v21 = vrot.slane %v8111_v59, 2 }
 0x7d3   :  { %v8113_v55 = vadd.f32 %v8112_v21, %v8111_v59 }
 0x7d5   :  { %v8114_v36 = vrot.slane %v8113_v55, 1 }
 0x7d7   :  { %v8115_v56 = vadd.f32 %v8114_v36, %v8113_v55 }
 0x7d9   :  { %v8116_v49 = vmul.f32 0.5, %v8115_v56 }
 0x7db   :  { %v8117_v34 = vadd.f32 1e-05, %v8116_v49 }
 0x7dd   :  { %11674 = vrsqrt.f32 %v8117_v34 }
 0x7ea   :  { %v11675_v20 = vpop.eup %11674 }
 0x7eb   :  { %v8119_v12 = vmul.f32 %v11675_v20, %v8107_v44 }
 0x7ed   :  { %v8127_v31 = vmul.f32 %v8760_v18, %v8119_v12 }
 0x7ef   :  { %v8135_v35 = vadd.f32 %v8761_v0, %v8127_v31 }
 0x7f1   :  { %v8136_v57 = vmax.f32 %v8135_v35, 0.0 }
 0x7f3   :  { %v8137_v42 = vpack.c.bf16 %v8136_v57, %v8136_v57 }
 0x7f5   :  { %9035 = vmatmul.mubr.bf16.vlgmr.msra.gmra.mxu1 %v8137_v42 }
 0x8b5   :  { %v8243_v28 = vpop.f32.mrf.mxu1 }
 0x8b6   :  { %v8244_v33 = vadd.f32 %v8762_v45, %v8243_v28 }
 0x8b7   :  { %v9036_v22 = vpop.f32.mrf.mxu1 }
 0x8b8   :  { %8250 = vst.msk [vmem:[#allocation3] sm:$0x3] %vm8249_vm3, %v8244_v33 }
 0x8b9   :  { %v8246_v52 = vpop.f32.mrf.mxu1 }
 0x8ba   :  { %11721 = shalt.err (!%p11718_p4)
}
 0x8bb   :  { %8260 = dma.vmem_to_hbm [thread:$0]  %s8258_s16, 32, %s18113_s15, [#allocation4]   ;;  %v9037_v41 = vpop.f32.mrf.mxu1 }
 0x8bc   :  { %11730 = dma.done.wait [#allocation4], 32  }
 0x8bd   :  { %11731 = vsyncadd [#allocation4], 4294967264 }
 0x8be   :  { %8264 = vsyncpa [#allocation4], 1 }

</bundles_post_ra>
